<compile_context>
chip_gen: v7x
topology: tpu7x:2x2x1
jax: 0.10.0
libtpu: 0.0.40
codegen_flags: <defaults>
</compile_context>

<pallas_src>
import functools

import jax
import jax.numpy as jnp
from jax import lax
from jax.experimental import pallas as pl
from jax.experimental.pallas import tpu as pltpu

# ----------------------------- problem sizes --------------------------------
B, N, E, H = 2, 64, 64, 2          # batch, seq, embed_dim, num_heads
D = E // H                         # head_dim
BH = B * H                         # batch*heads
BASE = 10000.0                     # lrpe base
SCALE = D ** -0.5                  # scale_type == 0
CHUNK = 16                         # forward-substitution block (multiple of 8)
PROJ_W = 3 * E + H                 # q,k,v,beta logits packed on the lane axis
PROJ_PAD = 256                     # lane-dense padded projection width


# ------------------------ kernel 1: fused projections ------------------------

def _qkvb_proj_kernel(x_ref, w_ref, o_ref):
    o_ref[...] = jnp.dot(x_ref[...], w_ref[...],
                         preferred_element_type=jnp.float32).astype(o_ref.dtype)


def fused_qkvb_proj(x2d, w_cat):
    """x2d: (M, E); w_cat: (E, PROJ_PAD) = [wq.T | wk.T | wv.T | wb.T | 0-pad]."""
    M, K = x2d.shape
    P = w_cat.shape[1]
    return pl.pallas_call(
        _qkvb_proj_kernel,
        out_shape=jax.ShapeDtypeStruct((M, P), jnp.float32),
        grid=(1,),
        in_specs=[pl.BlockSpec((M, K), lambda i: (0, 0)),
                  pl.BlockSpec((K, P), lambda i: (0, 0))],
        out_specs=pl.BlockSpec((M, P), lambda i: (0, 0)),
        compiler_params=pltpu.CompilerParams(dimension_semantics=("arbitrary",)),
    )(x2d, w_cat)


# ------------- kernel 2: norm + rope + delta-rule + attention + o_proj -------

def _kr_attn_kernel(q_ref, k_ref, v_ref, blog_ref, cos_ref, sin_ref, wot_ref,
                    o_ref, u_ref, *, scale, chunk, num_batch, num_heads):
    bh, n, d = q_ref.shape
    e = wot_ref.shape[1]
    nc = n // chunk
    f32 = jnp.float32

    # ---- beta = 2 * sigmoid(beta_logits) (per-token column vector) ---------
    beta = 2.0 / (1.0 + jnp.exp(-blog_ref[...]))                  # (bh, n, 1)

    # ---- l2-normalize keys --------------------------------------------------
    k = k_ref[...]
    knorm = jnp.sqrt(jnp.sum(k * k, axis=-1, keepdims=True))
    k = k / jnp.maximum(knorm, 1e-12)

    # ---- rotary embedding: rotate-half expressed as a (d,d) +/-1 matmul -----
    # TODO(synk): xmixers Lrpe(rotate) pair ordering (interleaved vs half-split)
    # may differ; this is the standard norm-preserving half-split rotary.
    half = d // 2
    rr = lax.broadcasted_iota(jnp.int32, (d, d), 0)
    rc = lax.broadcasted_iota(jnp.int32, (d, d), 1)
    rot = (jnp.where(rr == rc + half, -1.0, 0.0)
           + jnp.where(rr + half == rc, 1.0, 0.0)).astype(f32)    # (d, d)
    cosf = cos_ref[...][None]                                     # (1, n, d)
    sinf = sin_ref[...][None]

    def rope(x):
        xr = jnp.dot(x.reshape(bh * n, d), rot,
                     preferred_element_type=f32).reshape(bh, n, d)
        return x * cosf + xr * sinf

    q = rope(q_ref[...])
    k = rope(k)

    # keys pre-scaled by their own beta (== "k = k * beta.unsqueeze(-1)")
    kb = k * beta                                                 # (bh, n, d)
    v = v_ref[...]

    # ---- delta-rule / kernel-regression recurrence --------------------------
    #   u_t = v_t - sum_{s<t} (k_t . k_s) * beta_s * u_s
    # i.e. (I + A) u = v with A strictly lower triangular; solved by blocked
    # forward substitution over `chunk`-row blocks.
    row = lax.broadcasted_iota(jnp.int32, (n, n), 0)
    col = lax.broadcasted_iota(jnp.int32, (n, n), 1)
    a_full = jnp.where((row > col)[None],
                       jnp.einsum('btd,bsd->bts', k, kb,
                                  preferred_element_type=f32),
                       0.0)                                       # (bh, n, n)

    # Diagonal-block inverses (I + L_c)^{-1}, all bh*nc blocks batched.
    # L_c is strictly lower (chunk x chunk), nilpotent with L_c^chunk = 0, so
    # 3 Newton-Schulz iterations are exact (residual L^2 -> L^4 -> L^8 -> L^16).
    k_cs = k.reshape(bh * nc, chunk, d)
    kb_cs = kb.reshape(bh * nc, chunk, d)
    crow = lax.broadcasted_iota(jnp.int32, (chunk, chunk), 0)
    ccol = lax.broadcasted_iota(jnp.int32, (chunk, chunk), 1)
    eye_c = (crow == ccol).astype(f32)[None]                      # (1, C, C)
    l_blk = jnp.where((crow > ccol)[None],
                      jnp.einsum('xtd,xsd->xts', k_cs, kb_cs,
                                 preferred_element_type=f32),
                      0.0)                                        # (bh*nc, C, C)
    m_blk = eye_c + l_blk
    t_blk = eye_c - l_blk
    for _ in range(3):
        mt = jnp.einsum('xij,xjk->xik', m_blk, t_blk,
                        preferred_element_type=f32)
        t_blk = jnp.einsum('xij,xjk->xik', t_blk, 2.0 * eye_c - mt,
                           preferred_element_type=f32)
    t_blk = t_blk.reshape(bh, nc, chunk, chunk)

    # Blocked forward substitution (4 serial block steps instead of n=64
    # serial single-row steps).
    u_ref[...] = jnp.zeros_like(u_ref)
    for c in range(nc):
        lo, hi = c * chunk, (c + 1) * chunk
        rhs = v[:, lo:hi, :]
        if c > 0:
            # rows >= lo of u_ref are still zero -> only prior blocks contribute
            cross = jnp.einsum('bts,bsd->btd', a_full[:, lo:hi, :], u_ref[...],
                               preferred_element_type=f32)
            rhs = rhs - cross
        u_ref[:, lo:hi, :] = jnp.einsum('btk,bkd->btd', t_blk[:, c], rhs,
                                        preferred_element_type=f32)

    # ---- causal softmax attention: softmax(q (k*beta)^T * scale) @ u --------
    s = jnp.einsum('bqd,bkd->bqk', q, kb, preferred_element_type=f32) * scale
    s = jnp.where((row >= col)[None], s, -1e30)
    m = jnp.max(s, axis=-1, keepdims=True)
    p = jnp.exp(s - m)
    l = jnp.sum(p, axis=-1, keepdims=True)
    o = jnp.einsum('bqk,bkd->bqd', p, u_ref[...], preferred_element_type=f32)
    o = o * pl.reciprocal(l, approx=True)                         # (bh, n, d)

    # ---- fused output projection, lane-dense (n, B*E) store -----------------
    wot = wot_ref[...]                                            # (E, E) = wo.T
    outs = []
    for b_i in range(num_batch):
        acc = jnp.zeros((n, e), dtype=f32)
        for h_i in range(num_heads):
            acc = acc + jnp.dot(o[b_i * num_heads + h_i],
                                wot[h_i * d:(h_i + 1) * d, :],
                                preferred_element_type=f32)
        outs.append(acc)
    o_ref[...] = jnp.concatenate(outs, axis=-1).astype(o_ref.dtype)


def kr_attention(q, k, v, blog, cosf, sinf, wot):
    """q,k,v: (BH, n, D); blog: (BH, n, 1); cosf/sinf: (n, D); wot: (E, E)."""
    bh, n, d = q.shape
    e = wot.shape[1]
    kern = functools.partial(_kr_attn_kernel, scale=SCALE, chunk=CHUNK,
                             num_batch=B, num_heads=H)
    full3 = lambda shape: pl.BlockSpec(shape, lambda i: (0, 0, 0))
    full2 = lambda shape: pl.BlockSpec(shape, lambda i: (0, 0))
    return pl.pallas_call(
        kern,
        out_shape=jax.ShapeDtypeStruct((n, B * e), jnp.float32),
        grid=(1,),
        in_specs=[full3((bh, n, d)), full3((bh, n, d)), full3((bh, n, d)),
                  full3((bh, n, 1)), full2((n, d)), full2((n, d)),
                  full2((e, e))],
        out_specs=pl.BlockSpec((n, B * e), lambda i: (0, 0)),
        scratch_shapes=[pltpu.VMEM((bh, n, d), jnp.float32)],
        compiler_params=pltpu.CompilerParams(dimension_semantics=("arbitrary",)),
    )(q, k, v, blog, cosf, sinf, wot)


# ----------------------------- plain-JAX glue --------------------------------

def l2_norm(x, eps=1e-12):
    return x / jnp.maximum(jnp.linalg.norm(x, axis=-1, keepdims=True), eps)


def rope_tables(n, d, base):
    half = d // 2
    inv_freq = base ** (-(2.0 * jnp.arange(half, dtype=jnp.float32)) / d)
    ang = jnp.arange(n, dtype=jnp.float32)[:, None] * inv_freq[None, :]
    return jnp.cos(ang), jnp.sin(ang)


def apply_rope(x, cos, sin):
    # x: (b, n, h, d); cos/sin: (n, d//2).  Half-split (rotate-half) convention.
    half = x.shape[-1] // 2
    x1, x2 = x[..., :half], x[..., half:]
    c = cos[None, :, None, :]
    s = sin[None, :, None, :]
    return jnp.concatenate([x1 * c - x2 * s, x1 * s + x2 * c], axis=-1)


def prepare_params(params):
    """One-time weight packing: pre-transposed, concatenated, lane-padded."""
    w_cat = jnp.concatenate([params["wq"].T, params["wk"].T,
                             params["wv"].T, params["wb"].T], axis=1)  # (E, 3E+H)
    w_cat = jnp.pad(w_cat, ((0, 0), (0, PROJ_PAD - w_cat.shape[1])))
    cos, sin = rope_tables(N, D, BASE)
    return {
        "w_qkvb": w_cat,                                    # (E, PROJ_PAD)
        "wo_t": params["wo"].T,                             # (E, E)
        "rope_cos": jnp.concatenate([cos, cos], axis=-1),   # (N, D)
        "rope_sin": jnp.concatenate([sin, sin], axis=-1),   # (N, D)
    }


def forward(prep, x):
    b, n, e = x.shape
    x2d = x.reshape(b * n, e)

    y = fused_qkvb_proj(x2d, prep["w_qkvb"])                # (b*n, PROJ_PAD)

    def to_heads(t):
        return t.reshape(b, n, H, D).transpose(0, 2, 1, 3).reshape(b * H, n, D)

    q = to_heads(y[:, 0:E])
    k = to_heads(y[:, E:2 * E])
    v = to_heads(y[:, 2 * E:3 * E])
    blog = (y[:, 3 * E:3 * E + H].reshape(b, n, H)
            .transpose(0, 2, 1).reshape(b * H, n)[:, :, None])          # (bh,n,1)

    o = kr_attention(q, k, v, blog, prep["rope_cos"], prep["rope_sin"],
                     prep["wo_t"])                          # (n, b*e) lane-dense
    return o.reshape(n, b, e).transpose(1, 0, 2)            # (b, n, e)


# ----------------------------- pure-JAX reference ----------------------------

def _delta_rule_ref(k, v, beta):
    d = k.shape[-1]

    def step(S, inp):
        kt, vt, bt = inp
        ut = vt - jnp.dot(kt, S, precision=lax.Precision.HIGHEST)
        S = S + bt * jnp.outer(kt, ut)
        return S, ut

    _, u = lax.scan(step, jnp.zeros((d, d), jnp.float32), (k, v, beta))
    return u


def reference_forward(params, x):
    hp = lax.Precision.HIGHEST
    b, n, e = x.shape
    x2d = x.reshape(b * n, e)
    q = jnp.dot(x2d, params["wq"].T, precision=hp).reshape(b, n, H, D)
    k = jnp.dot(x2d, params["wk"].T, precision=hp).reshape(b, n, H, D)
    v = jnp.dot(x2d, params["wv"].T, precision=hp).reshape(b, n, H, D)
    beta = 2.0 * jax.nn.sigmoid(
        jnp.dot(x2d, params["wb"].T, precision=hp).reshape(b, n, H))

    k = l2_norm(k)
    cos, sin = rope_tables(n, D, BASE)
    q = apply_rope(q, cos, sin)
    k = apply_rope(k, cos, sin)

    to_heads = lambda t: t.transpose(0, 2, 1, 3).reshape(b * H, n, D)
    qh, kh, vh = to_heads(q), to_heads(k), to_heads(v)
    beta_bh = beta.transpose(0, 2, 1).reshape(b * H, n)

    u = jax.vmap(_delta_rule_ref)(kh, vh, beta_bh)
    kb = kh * beta_bh[..., None]

    s = jnp.einsum("bqd,bkd->bqk", qh, kb, precision=hp) * SCALE
    row = jnp.arange(n)[:, None]
    col = jnp.arange(n)[None, :]
    s = jnp.where(row >= col, s, -1e30)
    p = jax.nn.softmax(s, axis=-1)
    o = jnp.einsum("bqk,bkd->bqd", p, u, precision=hp)
    o = o.reshape(b, H, n, D).transpose(0, 2, 1, 3).reshape(b * n, e)
    return jnp.dot(o, params["wo"].T, precision=hp).reshape(b, n, e)


# ----------------------------------- main ------------------------------------

if __name__ == "__main__":
    assert N % CHUNK == 0 and CHUNK % 8 == 0

    key = jax.random.PRNGKey(0)
    kq, kk_, kv, ko, kb_, kx = jax.random.split(key, 6)
    std = 0.02
    params = {
        "wq": std * jax.random.normal(kq, (E, E), jnp.float32),
        "wk": std * jax.random.normal(kk_, (E, E), jnp.float32),
        "wv": std * jax.random.normal(kv, (E, E), jnp.float32),
        "wo": std * jax.random.normal(ko, (E, E), jnp.float32),
        "wb": std * jax.random.normal(kb_, (H, E), jnp.float32),  # bet_proj
    }
    x = jax.random.normal(kx, (B, N, E), jnp.float32)

    prep = prepare_params(params)
    out = jax.jit(forward)(prep, x)
    jax.block_until_ready(out)

    ref = reference_forward(params, x)
    assert out.shape == (B, N, E)
    assert bool(jnp.all(jnp.isfinite(out)))
    assert bool(jnp.allclose(out, ref, atol=5e-3, rtol=5e-2)), (
        f"max abs err = {float(jnp.max(jnp.abs(out - ref)))}")

    print("KERNEL_OK")
</pallas_src>

<mosaic_0001>
module attributes {stable_mosaic.version = 11 : i64} {
  func.func @_qkvb_proj_kernel(%arg0: i32, %arg1: memref<128x64xf32, #tpu.memory_space<vmem>>, %arg2: memref<64x256xf32, #tpu.memory_space<vmem>>, %arg3: memref<128x256xf32, #tpu.memory_space<vmem>>) attributes {dimension_semantics = [#tpu.dimension_semantics<arbitrary>], iteration_bounds = array<i64: 1>, scalar_prefetch = 0 : i64, scratch_operands = 0 : i64, tpu.core_type = #tpu.core_type<tc>, window_params = [{pipeline_mode = #tpu.pipeline_mode<synchronous>, transform_indices = @transform_0, window_bounds = array<i64: 128, 64>}, {pipeline_mode = #tpu.pipeline_mode<synchronous>, transform_indices = @transform_1, window_bounds = array<i64: 64, 256>}, {pipeline_mode = #tpu.pipeline_mode<synchronous>, transform_indices = @transform_2, window_bounds = array<i64: 128, 256>}]} {
    %c0 = arith.constant 0 : index
    %c0_0 = arith.constant 0 : index
    %0 = vector.load %arg1[%c0, %c0_0] : memref<128x64xf32, #tpu.memory_space<vmem>>, vector<128x64xf32>
    %c0_1 = arith.constant 0 : index
    %c0_2 = arith.constant 0 : index
    %1 = vector.load %arg2[%c0_1, %c0_2] : memref<64x256xf32, #tpu.memory_space<vmem>>, vector<64x256xf32>
    %cst = arith.constant dense<0.000000e+00> : vector<128x256xf32>
    %2 = tpu.matmul %0, %1, %cst {dimension_numbers = #tpu.dot_dimension_numbers<[1], [0], [0], [1], [0, 0, 1, 1], [], []>} : vector<128x64xf32>, vector<64x256xf32>, vector<128x256xf32> -> vector<128x256xf32>
    %c0_3 = arith.constant 0 : index
    %c0_4 = arith.constant 0 : index
    %3 = vector.load %arg3[%c0_3, %c0_4] : memref<128x256xf32, #tpu.memory_space<vmem>>, vector<128x256xf32>
    tpu.vector_store %arg3[%c0_3, %c0_4], %2 {strides = array<i32>} : memref<128x256xf32, #tpu.memory_space<vmem>>, vector<128x256xf32>,
    return
  }
  func.func @transform_0(%arg0: i32) -> (i32, i32) {
    %c0_i32 = arith.constant 0 : i32
    %c0_i32_0 = arith.constant 0 : i32
    %c0_i32_1 = arith.constant 0 : i32
    return %c0_i32, %c0_i32_0 : i32, i32
  }
  func.func @transform_1(%arg0: i32) -> (i32, i32) {
    %c0_i32 = arith.constant 0 : i32
    %c0_i32_0 = arith.constant 0 : i32
    %c0_i32_1 = arith.constant 0 : i32
    return %c0_i32, %c0_i32_0 : i32, i32
  }
  func.func @transform_2(%arg0: i32) -> (i32, i32) {
    %c0_i32 = arith.constant 0 : i32
    %c0_i32_0 = arith.constant 0 : i32
    %c0_i32_1 = arith.constant 0 : i32
    return %c0_i32, %c0_i32_0 : i32, i32
  }
}

module attributes {stable_mosaic.version = 11 : i64} {
  func.func @_kr_attn_kernel(%arg0: i32, %arg1: memref<4x64x32xf32, #tpu.memory_space<vmem>>, %arg2: memref<4x64x32xf32, #tpu.memory_space<vmem>>, %arg3: memref<4x64x32xf32, #tpu.memory_space<vmem>>, %arg4: memref<4x64x1xf32, #tpu.memory_space<vmem>>, %arg5: memref<64x32xf32, #tpu.memory_space<vmem>>, %arg6: memref<64x32xf32, #tpu.memory_space<vmem>>, %arg7: memref<64x64xf32, #tpu.memory_space<vmem>>, %arg8: memref<64x128xf32, #tpu.memory_space<vmem>>, %arg9: memref<4x64x32xf32, #tpu.memory_space<vmem>>) attributes {dimension_semantics = [#tpu.dimension_semantics<arbitrary>], iteration_bounds = array<i64: 1>, scalar_prefetch = 0 : i64, scratch_operands = 1 : i64, tpu.core_type = #tpu.core_type<tc>, window_params = [{pipeline_mode = #tpu.pipeline_mode<synchronous>, transform_indices = @transform_0, window_bounds = array<i64: 4, 64, 32>}, {pipeline_mode = #tpu.pipeline_mode<synchronous>, transform_indices = @transform_1, window_bounds = array<i64: 4, 64, 32>}, {pipeline_mode = #tpu.pipeline_mode<synchronous>, transform_indices = @transform_2, window_bounds = array<i64: 4, 64, 32>}, {pipeline_mode = #tpu.pipeline_mode<synchronous>, transform_indices = @transform_3, window_bounds = array<i64: 4, 64, 1>}, {pipeline_mode = #tpu.pipeline_mode<synchronous>, transform_indices = @transform_4, window_bounds = array<i64: 64, 32>}, {pipeline_mode = #tpu.pipeline_mode<synchronous>, transform_indices = @transform_5, window_bounds = array<i64: 64, 32>}, {pipeline_mode = #tpu.pipeline_mode<synchronous>, transform_indices = @transform_6, window_bounds = array<i64: 64, 64>}, {pipeline_mode = #tpu.pipeline_mode<synchronous>, transform_indices = @transform_7, window_bounds = array<i64: 64, 128>}]} {
    %c0 = arith.constant 0 : index
    %c0_0 = arith.constant 0 : index
    %c0_1 = arith.constant 0 : index
    %0 = vector.load %arg4[%c0, %c0_0, %c0_1] : memref<4x64x1xf32, #tpu.memory_space<vmem>>, vector<4x64x1xf32>
    %cst = arith.constant 0.000000e+00 : f32
    %1 = vector.broadcast %cst : f32 to vector<4x64x1xf32>
    %2 = arith.subf %1, %0 : vector<4x64x1xf32>
    %3 = math.exp %2 : vector<4x64x1xf32>
    %cst_2 = arith.constant 1.000000e+00 : f32
    %4 = vector.broadcast %cst_2 : f32 to vector<4x64x1xf32>
    %5 = arith.addf %4, %3 : vector<4x64x1xf32>
    %cst_3 = arith.constant 2.000000e+00 : f32
    %6 = vector.broadcast %cst_3 : f32 to vector<4x64x1xf32>
    %7 = arith.divf %6, %5 : vector<4x64x1xf32>
    %c0_4 = arith.constant 0 : index
    %c0_5 = arith.constant 0 : index
    %c0_6 = arith.constant 0 : index
    %8 = vector.load %arg2[%c0_4, %c0_5, %c0_6] : memref<4x64x32xf32, #tpu.memory_space<vmem>>, vector<4x64x32xf32>
    %9 = arith.mulf %8, %8 : vector<4x64x32xf32>
    %cst_7 = arith.constant dense<0.000000e+00> : vector<4x64xf32>
    %10 = vector.multi_reduction <add>, %9, %cst_7 [2] : vector<4x64x32xf32> to vector<4x64xf32>
    %11 = vector.shape_cast %10 : vector<4x64xf32> to vector<4x64x1xf32>
    %12 = math.sqrt %11 : vector<4x64x1xf32>
    %cst_8 = arith.constant 9.99999996E-13 : f32
    %13 = vector.broadcast %cst_8 : f32 to vector<4x64x1xf32>
    %14 = arith.maximumf %12, %13 : vector<4x64x1xf32>
    %15 = vector.broadcast %14 : vector<4x64x1xf32> to vector<4x64x32xf32>
    %16 = arith.divf %8, %15 : vector<4x64x32xf32>
    %17 = tpu.iota {dimensions = array<i32: 0>} : vector<32x32xi32>
    %18 = tpu.iota {dimensions = array<i32: 1>} : vector<32x32xi32>
    %c16_i32 = arith.constant 16 : i32
    %19 = vector.broadcast %c16_i32 : i32 to vector<32x32xi32>
    %20 = arith.addi %18, %19 : vector<32x32xi32>
    %21 = arith.cmpi eq, %17, %20 : vector<32x32xi32>
    %cst_9 = arith.constant -1.000000e+00 : f32
    %cst_10 = arith.constant 0.000000e+00 : f32
    %22 = vector.broadcast %cst_9 : f32 to vector<32x32xf32>
    %23 = vector.broadcast %cst_10 : f32 to vector<32x32xf32>
    %24 = arith.select %21, %22, %23 : vector<32x32xi1>, vector<32x32xf32>
    %c16_i32_11 = arith.constant 16 : i32
    %25 = vector.broadcast %c16_i32_11 : i32 to vector<32x32xi32>
    %26 = arith.addi %17, %25 : vector<32x32xi32>
    %27 = arith.cmpi eq, %26, %18 : vector<32x32xi32>
    %cst_12 = arith.constant 1.000000e+00 : f32
    %cst_13 = arith.constant 0.000000e+00 : f32
    %28 = vector.broadcast %cst_12 : f32 to vector<32x32xf32>
    %29 = vector.broadcast %cst_13 : f32 to vector<32x32xf32>
    %30 = arith.select %27, %28, %29 : vector<32x32xi1>, vector<32x32xf32>
    %31 = arith.addf %24, %30 : vector<32x32xf32>
    %c0_14 = arith.constant 0 : index
    %c0_15 = arith.constant 0 : index
    %32 = vector.load %arg5[%c0_14, %c0_15] : memref<64x32xf32, #tpu.memory_space<vmem>>, vector<64x32xf32>
    %33 = vector.shape_cast %32 : vector<64x32xf32> to vector<1x64x32xf32>
    %c0_16 = arith.constant 0 : index
    %c0_17 = arith.constant 0 : index
    %34 = vector.load %arg6[%c0_16, %c0_17] : memref<64x32xf32, #tpu.memory_space<vmem>>, vector<64x32xf32>
    %35 = vector.shape_cast %34 : vector<64x32xf32> to vector<1x64x32xf32>
    %c0_18 = arith.constant 0 : index
    %c0_19 = arith.constant 0 : index
    %c0_20 = arith.constant 0 : index
    %36 = vector.load %arg1[%c0_18, %c0_19, %c0_20] : memref<4x64x32xf32, #tpu.memory_space<vmem>>, vector<4x64x32xf32>
    %37 = vector.shape_cast %36 : vector<4x64x32xf32> to vector<256x32xf32>
    %cst_21 = arith.constant dense<0.000000e+00> : vector<256x32xf32>
    %38 = tpu.matmul %37, %31, %cst_21 {dimension_numbers = #tpu.dot_dimension_numbers<[1], [0], [0], [1], [0, 0, 1, 1], [], []>} : vector<256x32xf32>, vector<32x32xf32>, vector<256x32xf32> -> vector<256x32xf32>
    %39 = vector.shape_cast %38 : vector<256x32xf32> to vector<4x64x32xf32>
    %40 = vector.broadcast %33 : vector<1x64x32xf32> to vector<4x64x32xf32>
    %41 = arith.mulf %36, %40 : vector<4x64x32xf32>
    %42 = vector.broadcast %35 : vector<1x64x32xf32> to vector<4x64x32xf32>
    %43 = arith.mulf %39, %42 : vector<4x64x32xf32>
    %44 = arith.addf %41, %43 : vector<4x64x32xf32>
    %45 = vector.shape_cast %16 : vector<4x64x32xf32> to vector<256x32xf32>
    %cst_22 = arith.constant dense<0.000000e+00> : vector<256x32xf32>
    %46 = tpu.matmul %45, %31, %cst_22 {dimension_numbers = #tpu.dot_dimension_numbers<[1], [0], [0], [1], [0, 0, 1, 1], [], []>} : vector<256x32xf32>, vector<32x32xf32>, vector<256x32xf32> -> vector<256x32xf32>
    %47 = vector.shape_cast %46 : vector<256x32xf32> to vector<4x64x32xf32>
    %48 = vector.broadcast %33 : vector<1x64x32xf32> to vector<4x64x32xf32>
    %49 = arith.mulf %16, %48 : vector<4x64x32xf32>
    %50 = vector.broadcast %35 : vector<1x64x32xf32> to vector<4x64x32xf32>
    %51 = arith.mulf %47, %50 : vector<4x64x32xf32>
    %52 = arith.addf %49, %51 : vector<4x64x32xf32>
    %53 = vector.broadcast %7 : vector<4x64x1xf32> to vector<4x64x32xf32>
    %54 = arith.mulf %52, %53 : vector<4x64x32xf32>
    %c0_23 = arith.constant 0 : index
    %c0_24 = arith.constant 0 : index
    %c0_25 = arith.constant 0 : index
    %55 = vector.load %arg3[%c0_23, %c0_24, %c0_25] : memref<4x64x32xf32, #tpu.memory_space<vmem>>, vector<4x64x32xf32>
    %56 = tpu.iota {dimensions = array<i32: 0>} : vector<64x64xi32>
    %57 = tpu.iota {dimensions = array<i32: 1>} : vector<64x64xi32>
    %58 = arith.cmpi sgt, %56, %57 : vector<64x64xi32>
    %59 = vector.shape_cast %58 : vector<64x64xi1> to vector<1x64x64xi1>
    "tpu.trace_start"() <{level = 10 : i32, message = "btd,bsd->bts"}> : () -> ()
    %cst_26 = arith.constant dense<0.000000e+00> : vector<4x64x64xf32>
    %60 = tpu.matmul %52, %54, %cst_26 {dimension_numbers = #tpu.dot_dimension_numbers<[2], [2], [1], [1], [0, 0, 0, 1, 1, 1], [0], [0]>} : vector<4x64x32xf32>, vector<4x64x32xf32>, vector<4x64x64xf32> -> vector<4x64x64xf32>
    %cst_27 = arith.constant 0.000000e+00 : f32
    "tpu.trace_stop"() : () -> ()
    %61 = vector.shape_cast %59 : vector<1x64x64xi1> to vector<1x64x64xi1>
    %62 = vector.broadcast %61 : vector<1x64x64xi1> to vector<4x64x64xi1>
    %63 = vector.broadcast %cst_27 : f32 to vector<4x64x64xf32>
    %64 = arith.select %62, %60, %63 : vector<4x64x64xi1>, vector<4x64x64xf32>
    %65 = vector.shape_cast %52 : vector<4x64x32xf32> to vector<16x16x32xf32>
    %66 = vector.shape_cast %54 : vector<4x64x32xf32> to vector<16x16x32xf32>
    %67 = tpu.iota {dimensions = array<i32: 0>} : vector<16x16xi32>
    %68 = tpu.iota {dimensions = array<i32: 1>} : vector<16x16xi32>
    %69 = arith.cmpi eq, %67, %68 : vector<16x16xi32>
    %70 = arith.extui %69 : vector<16x16xi1> to vector<16x16xi32>
    %71 = arith.sitofp %70 : vector<16x16xi32> to vector<16x16xf32>
    %72 = vector.shape_cast %71 : vector<16x16xf32> to vector<1x16x16xf32>
    %73 = arith.cmpi sgt, %67, %68 : vector<16x16xi32>
    %74 = vector.shape_cast %73 : vector<16x16xi1> to vector<1x16x16xi1>
    "tpu.trace_start"() <{level = 10 : i32, message = "xtd,xsd->xts"}> : () -> ()
    %cst_28 = arith.constant dense<0.000000e+00> : vector<16x16x16xf32>
    %75 = tpu.matmul %65, %66, %cst_28 {dimension_numbers = #tpu.dot_dimension_numbers<[2], [2], [1], [1], [0, 0, 0, 1, 1, 1], [0], [0]>} : vector<16x16x32xf32>, vector<16x16x32xf32>, vector<16x16x16xf32> -> vector<16x16x16xf32>
    %cst_29 = arith.constant 0.000000e+00 : f32
    "tpu.trace_stop"() : () -> ()
    %76 = vector.shape_cast %74 : vector<1x16x16xi1> to vector<1x16x16xi1>
    %77 = vector.broadcast %76 : vector<1x16x16xi1> to vector<16x16x16xi1>
    %78 = vector.broadcast %cst_29 : f32 to vector<16x16x16xf32>
    %79 = arith.select %77, %75, %78 : vector<16x16x16xi1>, vector<16x16x16xf32>
    %80 = vector.broadcast %72 : vector<1x16x16xf32> to vector<16x16x16xf32>
    %81 = arith.addf %80, %79 : vector<16x16x16xf32>
    %82 = vector.broadcast %72 : vector<1x16x16xf32> to vector<16x16x16xf32>
    %83 = arith.subf %82, %79 : vector<16x16x16xf32>
    "tpu.trace_start"() <{level = 10 : i32, message = "xij,xjk->xik"}> : () -> ()
    %cst_30 = arith.constant dense<0.000000e+00> : vector<16x16x16xf32>
    %84 = tpu.matmul %81, %83, %cst_30 {dimension_numbers = #tpu.dot_dimension_numbers<[2], [1], [1], [2], [0, 0, 0, 1, 1, 2], [0], [0]>} : vector<16x16x16xf32>, vector<16x16x16xf32>, vector<16x16x16xf32> -> vector<16x16x16xf32>
    "tpu.trace_stop"() : () -> ()
    %cst_31 = arith.constant 2.000000e+00 : f32
    %85 = vector.broadcast %cst_31 : f32 to vector<1x16x16xf32>
    %86 = arith.mulf %85, %72 : vector<1x16x16xf32>
    %87 = vector.broadcast %86 : vector<1x16x16xf32> to vector<16x16x16xf32>
    %88 = arith.subf %87, %84 : vector<16x16x16xf32>
    "tpu.trace_start"() <{level = 10 : i32, message = "xij,xjk->xik"}> : () -> ()
    %cst_32 = arith.constant dense<0.000000e+00> : vector<16x16x16xf32>
    %89 = tpu.matmul %83, %88, %cst_32 {dimension_numbers = #tpu.dot_dimension_numbers<[2], [1], [1], [2], [0, 0, 0, 1, 1, 2], [0], [0]>} : vector<16x16x16xf32>, vector<16x16x16xf32>, vector<16x16x16xf32> -> vector<16x16x16xf32>
    %cst_33 = arith.constant dense<0.000000e+00> : vector<16x16x16xf32>
    %90 = tpu.matmul %81, %89, %cst_33 {dimension_numbers = #tpu.dot_dimension_numbers<[2], [1], [1], [2], [0, 0, 0, 1, 1, 2], [0], [0]>} : vector<16x16x16xf32>, vector<16x16x16xf32>, vector<16x16x16xf32> -> vector<16x16x16xf32>
    "tpu.trace_stop"() : () -> ()
    %cst_34 = arith.constant 2.000000e+00 : f32
    %91 = vector.broadcast %cst_34 : f32 to vector<1x16x16xf32>
    %92 = arith.mulf %91, %72 : vector<1x16x16xf32>
    %93 = vector.broadcast %92 : vector<1x16x16xf32> to vector<16x16x16xf32>
    %94 = arith.subf %93, %90 : vector<16x16x16xf32>
    "tpu.trace_start"() <{level = 10 : i32, message = "xij,xjk->xik"}> : () -> ()
    %cst_35 = arith.constant dense<0.000000e+00> : vector<16x16x16xf32>
    %95 = tpu.matmul %89, %94, %cst_35 {dimension_numbers = #tpu.dot_dimension_numbers<[2], [1], [1], [2], [0, 0, 0, 1, 1, 2], [0], [0]>} : vector<16x16x16xf32>, vector<16x16x16xf32>, vector<16x16x16xf32> -> vector<16x16x16xf32>
    %cst_36 = arith.constant dense<0.000000e+00> : vector<16x16x16xf32>
    %96 = tpu.matmul %81, %95, %cst_36 {dimension_numbers = #tpu.dot_dimension_numbers<[2], [1], [1], [2], [0, 0, 0, 1, 1, 2], [0], [0]>} : vector<16x16x16xf32>, vector<16x16x16xf32>, vector<16x16x16xf32> -> vector<16x16x16xf32>
    "tpu.trace_stop"() : () -> ()
    %cst_37 = arith.constant 2.000000e+00 : f32
    %97 = vector.broadcast %cst_37 : f32 to vector<1x16x16xf32>
    %98 = arith.mulf %97, %72 : vector<1x16x16xf32>
    %99 = vector.broadcast %98 : vector<1x16x16xf32> to vector<16x16x16xf32>
    %100 = arith.subf %99, %96 : vector<16x16x16xf32>
    "tpu.trace_start"() <{level = 10 : i32, message = "xij,xjk->xik"}> : () -> ()
    %cst_38 = arith.constant dense<0.000000e+00> : vector<16x16x16xf32>
    %101 = tpu.matmul %95, %100, %cst_38 {dimension_numbers = #tpu.dot_dimension_numbers<[2], [1], [1], [2], [0, 0, 0, 1, 1, 2], [0], [0]>} : vector<16x16x16xf32>, vector<16x16x16xf32>, vector<16x16x16xf32> -> vector<16x16x16xf32>
    "tpu.trace_stop"() : () -> ()
    %102 = vector.shape_cast %101 : vector<16x16x16xf32> to vector<4x4x16x16xf32>
    %cst_39 = arith.constant 0.000000e+00 : f32
    %103 = vector.broadcast %cst_39 : f32 to vector<4x64x32xf32>
    %c0_40 = arith.constant 0 : index
    %c0_41 = arith.constant 0 : index
    %c0_42 = arith.constant 0 : index
    %104 = vector.load %arg9[%c0_40, %c0_41, %c0_42] : memref<4x64x32xf32, #tpu.memory_space<vmem>>, vector<4x64x32xf32>
    tpu.vector_store %arg9[%c0_40, %c0_41, %c0_42], %103 {strides = array<i32>} : memref<4x64x32xf32, #tpu.memory_space<vmem>>, vector<4x64x32xf32>,
    %105 = vector.extract_strided_slice %55 {offsets = [0, 0, 0], sizes = [4, 16, 32], strides = [1, 1, 1]} : vector<4x64x32xf32> to vector<4x16x32xf32>
    %106 = vector.extract_strided_slice %102 {offsets = [0, 0, 0, 0], sizes = [4, 1, 16, 16], strides = [1, 1, 1, 1]} : vector<4x4x16x16xf32> to vector<4x1x16x16xf32>
    %107 = vector.shape_cast %106 : vector<4x1x16x16xf32> to vector<4x16x16xf32>
    "tpu.trace_start"() <{level = 10 : i32, message = "btk,bkd->btd"}> : () -> ()
    %cst_43 = arith.constant dense<0.000000e+00> : vector<4x16x32xf32>
    %108 = tpu.matmul %107, %105, %cst_43 {dimension_numbers = #tpu.dot_dimension_numbers<[2], [1], [1], [2], [0, 0, 0, 1, 1, 2], [0], [0]>} : vector<4x16x16xf32>, vector<4x16x32xf32>, vector<4x16x32xf32> -> vector<4x16x32xf32>
    "tpu.trace_stop"() : () -> ()
    %c0_44 = arith.constant 0 : index
    %c0_45 = arith.constant 0 : index
    %c0_46 = arith.constant 0 : index
    %109 = vector.load %arg9[%c0_44, %c0_45, %c0_46] : memref<4x64x32xf32, #tpu.memory_space<vmem>>, vector<4x16x32xf32>
    tpu.vector_store %arg9[%c0_44, %c0_45, %c0_46], %108 {strides = array<i32>} : memref<4x64x32xf32, #tpu.memory_space<vmem>>, vector<4x16x32xf32>,
    %110 = vector.extract_strided_slice %55 {offsets = [0, 16, 0], sizes = [4, 16, 32], strides = [1, 1, 1]} : vector<4x64x32xf32> to vector<4x16x32xf32>
    %111 = vector.extract_strided_slice %64 {offsets = [0, 16, 0], sizes = [4, 16, 64], strides = [1, 1, 1]} : vector<4x64x64xf32> to vector<4x16x64xf32>
    %c0_47 = arith.constant 0 : index
    %c0_48 = arith.constant 0 : index
    %c0_49 = arith.constant 0 : index
    %112 = vector.load %arg9[%c0_47, %c0_48, %c0_49] : memref<4x64x32xf32, #tpu.memory_space<vmem>>, vector<4x64x32xf32>
    "tpu.trace_start"() <{level = 10 : i32, message = "bts,bsd->btd"}> : () -> ()
    %cst_50 = arith.constant dense<0.000000e+00> : vector<4x16x32xf32>
    %113 = tpu.matmul %111, %112, %cst_50 {dimension_numbers = #tpu.dot_dimension_numbers<[2], [1], [1], [2], [0, 0, 0, 1, 1, 2], [0], [0]>} : vector<4x16x64xf32>, vector<4x64x32xf32>, vector<4x16x32xf32> -> vector<4x16x32xf32>
    "tpu.trace_stop"() : () -> ()
    %114 = arith.subf %110, %113 : vector<4x16x32xf32>
    %115 = vector.extract_strided_slice %102 {offsets = [0, 1, 0, 0], sizes = [4, 1, 16, 16], strides = [1, 1, 1, 1]} : vector<4x4x16x16xf32> to vector<4x1x16x16xf32>
    %116 = vector.shape_cast %115 : vector<4x1x16x16xf32> to vector<4x16x16xf32>
    "tpu.trace_start"() <{level = 10 : i32, message = "btk,bkd->btd"}> : () -> ()
    %cst_51 = arith.constant dense<0.000000e+00> : vector<4x16x32xf32>
    %117 = tpu.matmul %116, %114, %cst_51 {dimension_numbers = #tpu.dot_dimension_numbers<[2], [1], [1], [2], [0, 0, 0, 1, 1, 2], [0], [0]>} : vector<4x16x16xf32>, vector<4x16x32xf32>, vector<4x16x32xf32> -> vector<4x16x32xf32>
    "tpu.trace_stop"() : () -> ()
    %c0_52 = arith.constant 0 : index
    %c16 = arith.constant 16 : index
    %c0_53 = arith.constant 0 : index
    %118 = vector.load %arg9[%c0_52, %c16, %c0_53] : memref<4x64x32xf32, #tpu.memory_space<vmem>>, vector<4x16x32xf32>
    tpu.vector_store %arg9[%c0_52, %c16, %c0_53], %117 {strides = array<i32>} : memref<4x64x32xf32, #tpu.memory_space<vmem>>, vector<4x16x32xf32>,
    %119 = vector.extract_strided_slice %55 {offsets = [0, 32, 0], sizes = [4, 16, 32], strides = [1, 1, 1]} : vector<4x64x32xf32> to vector<4x16x32xf32>
    %120 = vector.extract_strided_slice %64 {offsets = [0, 32, 0], sizes = [4, 16, 64], strides = [1, 1, 1]} : vector<4x64x64xf32> to vector<4x16x64xf32>
    %c0_54 = arith.constant 0 : index
    %c0_55 = arith.constant 0 : index
    %c0_56 = arith.constant 0 : index
    %121 = vector.load %arg9[%c0_54, %c0_55, %c0_56] : memref<4x64x32xf32, #tpu.memory_space<vmem>>, vector<4x64x32xf32>
    "tpu.trace_start"() <{level = 10 : i32, message = "bts,bsd->btd"}> : () -> ()
    %cst_57 = arith.constant dense<0.000000e+00> : vector<4x16x32xf32>
    %122 = tpu.matmul %120, %121, %cst_57 {dimension_numbers = #tpu.dot_dimension_numbers<[2], [1], [1], [2], [0, 0, 0, 1, 1, 2], [0], [0]>} : vector<4x16x64xf32>, vector<4x64x32xf32>, vector<4x16x32xf32> -> vector<4x16x32xf32>
    "tpu.trace_stop"() : () -> ()
    %123 = arith.subf %119, %122 : vector<4x16x32xf32>
    %124 = vector.extract_strided_slice %102 {offsets = [0, 2, 0, 0], sizes = [4, 1, 16, 16], strides = [1, 1, 1, 1]} : vector<4x4x16x16xf32> to vector<4x1x16x16xf32>
    %125 = vector.shape_cast %124 : vector<4x1x16x16xf32> to vector<4x16x16xf32>
    "tpu.trace_start"() <{level = 10 : i32, message = "btk,bkd->btd"}> : () -> ()
    %cst_58 = arith.constant dense<0.000000e+00> : vector<4x16x32xf32>
    %126 = tpu.matmul %125, %123, %cst_58 {dimension_numbers = #tpu.dot_dimension_numbers<[2], [1], [1], [2], [0, 0, 0, 1, 1, 2], [0], [0]>} : vector<4x16x16xf32>, vector<4x16x32xf32>, vector<4x16x32xf32> -> vector<4x16x32xf32>
    "tpu.trace_stop"() : () -> ()
    %c0_59 = arith.constant 0 : index
    %c32 = arith.constant 32 : index
    %c0_60 = arith.constant 0 : index
    %127 = vector.load %arg9[%c0_59, %c32, %c0_60] : memref<4x64x32xf32, #tpu.memory_space<vmem>>, vector<4x16x32xf32>
    tpu.vector_store %arg9[%c0_59, %c32, %c0_60], %126 {strides = array<i32>} : memref<4x64x32xf32, #tpu.memory_space<vmem>>, vector<4x16x32xf32>,
    %128 = vector.extract_strided_slice %55 {offsets = [0, 48, 0], sizes = [4, 16, 32], strides = [1, 1, 1]} : vector<4x64x32xf32> to vector<4x16x32xf32>
    %129 = vector.extract_strided_slice %64 {offsets = [0, 48, 0], sizes = [4, 16, 64], strides = [1, 1, 1]} : vector<4x64x64xf32> to vector<4x16x64xf32>
    %c0_61 = arith.constant 0 : index
    %c0_62 = arith.constant 0 : index
    %c0_63 = arith.constant 0 : index
    %130 = vector.load %arg9[%c0_61, %c0_62, %c0_63] : memref<4x64x32xf32, #tpu.memory_space<vmem>>, vector<4x64x32xf32>
    "tpu.trace_start"() <{level = 10 : i32, message = "bts,bsd->btd"}> : () -> ()
    %cst_64 = arith.constant dense<0.000000e+00> : vector<4x16x32xf32>
    %131 = tpu.matmul %129, %130, %cst_64 {dimension_numbers = #tpu.dot_dimension_numbers<[2], [1], [1], [2], [0, 0, 0, 1, 1, 2], [0], [0]>} : vector<4x16x64xf32>, vector<4x64x32xf32>, vector<4x16x32xf32> -> vector<4x16x32xf32>
    "tpu.trace_stop"() : () -> ()
    %132 = arith.subf %128, %131 : vector<4x16x32xf32>
    %133 = vector.extract_strided_slice %102 {offsets = [0, 3, 0, 0], sizes = [4, 1, 16, 16], strides = [1, 1, 1, 1]} : vector<4x4x16x16xf32> to vector<4x1x16x16xf32>
    %134 = vector.shape_cast %133 : vector<4x1x16x16xf32> to vector<4x16x16xf32>
    "tpu.trace_start"() <{level = 10 : i32, message = "btk,bkd->btd"}> : () -> ()
    %cst_65 = arith.constant dense<0.000000e+00> : vector<4x16x32xf32>
    %135 = tpu.matmul %134, %132, %cst_65 {dimension_numbers = #tpu.dot_dimension_numbers<[2], [1], [1], [2], [0, 0, 0, 1, 1, 2], [0], [0]>} : vector<4x16x16xf32>, vector<4x16x32xf32>, vector<4x16x32xf32> -> vector<4x16x32xf32>
    "tpu.trace_stop"() : () -> ()
    %c0_66 = arith.constant 0 : index
    %c48 = arith.constant 48 : index
    %c0_67 = arith.constant 0 : index
    %136 = vector.load %arg9[%c0_66, %c48, %c0_67] : memref<4x64x32xf32, #tpu.memory_space<vmem>>, vector<4x16x32xf32>
    tpu.vector_store %arg9[%c0_66, %c48, %c0_67], %135 {strides = array<i32>} : memref<4x64x32xf32, #tpu.memory_space<vmem>>, vector<4x16x32xf32>,
    "tpu.trace_start"() <{level = 10 : i32, message = "bqd,bkd->bqk"}> : () -> ()
    %cst_68 = arith.constant dense<0.000000e+00> : vector<4x64x64xf32>
    %137 = tpu.matmul %44, %54, %cst_68 {dimension_numbers = #tpu.dot_dimension_numbers<[2], [2], [1], [1], [0, 0, 0, 1, 1, 1], [0], [0]>} : vector<4x64x32xf32>, vector<4x64x32xf32>, vector<4x64x64xf32> -> vector<4x64x64xf32>
    "tpu.trace_stop"() : () -> ()
    %cst_69 = arith.constant 0.176776692 : f32
    %138 = vector.broadcast %cst_69 : f32 to vector<4x64x64xf32>
    %139 = arith.mulf %137, %138 : vector<4x64x64xf32>
    %140 = arith.cmpi sge, %56, %57 : vector<64x64xi32>
    %141 = vector.shape_cast %140 : vector<64x64xi1> to vector<1x64x64xi1>
    %cst_70 = arith.constant -1.000000e+30 : f32
    %142 = vector.shape_cast %141 : vector<1x64x64xi1> to vector<1x64x64xi1>
    %143 = vector.broadcast %142 : vector<1x64x64xi1> to vector<4x64x64xi1>
    %144 = vector.broadcast %cst_70 : f32 to vector<4x64x64xf32>
    %145 = arith.select %143, %139, %144 : vector<4x64x64xi1>, vector<4x64x64xf32>
    %cst_71 = arith.constant dense<0xFF800000> : vector<4x64xf32>
    %146 = vector.multi_reduction <maximumf>, %145, %cst_71 [2] : vector<4x64x64xf32> to vector<4x64xf32>
    %147 = vector.shape_cast %146 : vector<4x64xf32> to vector<4x64x1xf32>
    %148 = vector.broadcast %147 : vector<4x64x1xf32> to vector<4x64x64xf32>
    %149 = arith.subf %145, %148 : vector<4x64x64xf32>
    %150 = math.exp %149 : vector<4x64x64xf32>
    %cst_72 = arith.constant dense<0.000000e+00> : vector<4x64xf32>
    %151 = vector.multi_reduction <add>, %150, %cst_72 [2] : vector<4x64x64xf32> to vector<4x64xf32>
    %152 = vector.shape_cast %151 : vector<4x64xf32> to vector<4x64x1xf32>
    %c0_73 = arith.constant 0 : index
    %c0_74 = arith.constant 0 : index
    %c0_75 = arith.constant 0 : index
    %153 = vector.load %arg9[%c0_73, %c0_74, %c0_75] : memref<4x64x32xf32, #tpu.memory_space<vmem>>, vector<4x64x32xf32>
    "tpu.trace_start"() <{level = 10 : i32, message = "bqk,bkd->bqd"}> : () -> ()
    %cst_76 = arith.constant dense<0.000000e+00> : vector<4x64x32xf32>
    %154 = tpu.matmul %150, %153, %cst_76 {dimension_numbers = #tpu.dot_dimension_numbers<[2], [1], [1], [2], [0, 0, 0, 1, 1, 2], [0], [0]>} : vector<4x64x64xf32>, vector<4x64x32xf32>, vector<4x64x32xf32> -> vector<4x64x32xf32>
    "tpu.trace_stop"() : () -> ()
    %155 = tpu.reciprocal %152 {approx = true} : vector<4x64x1xf32> -> vector<4x64x1xf32>
    %156 = vector.broadcast %155 : vector<4x64x1xf32> to vector<4x64x32xf32>
    %157 = arith.mulf %154, %156 : vector<4x64x32xf32>
    %c0_77 = arith.constant 0 : index
    %c0_78 = arith.constant 0 : index
    %158 = vector.load %arg7[%c0_77, %c0_78] : memref<64x64xf32, #tpu.memory_space<vmem>>, vector<64x64xf32>
    %cst_79 = arith.constant 0.000000e+00 : f32
    %159 = vector.broadcast %cst_79 : f32 to vector<64x64xf32>
    %160 = vector.extract_strided_slice %157 {offsets = [0, 0, 0], sizes = [1, 64, 32], strides = [1, 1, 1]} : vector<4x64x32xf32> to vector<1x64x32xf32>
    %161 = vector.shape_cast %160 : vector<1x64x32xf32> to vector<64x32xf32>
    %162 = vector.extract_strided_slice %158 {offsets = [0, 0], sizes = [32, 64], strides = [1, 1]} : vector<64x64xf32> to vector<32x64xf32>
    %cst_80 = arith.constant dense<0.000000e+00> : vector<64x64xf32>
    %163 = tpu.matmul %161, %162, %cst_80 {dimension_numbers = #tpu.dot_dimension_numbers<[1], [0], [0], [1], [0, 0, 1, 1], [], []>} : vector<64x32xf32>, vector<32x64xf32>, vector<64x64xf32> -> vector<64x64xf32>
    %164 = arith.addf %159, %163 : vector<64x64xf32>
    %165 = vector.extract_strided_slice %157 {offsets = [1, 0, 0], sizes = [1, 64, 32], strides = [1, 1, 1]} : vector<4x64x32xf32> to vector<1x64x32xf32>
    %166 = vector.shape_cast %165 : vector<1x64x32xf32> to vector<64x32xf32>
    %167 = vector.extract_strided_slice %158 {offsets = [32, 0], sizes = [32, 64], strides = [1, 1]} : vector<64x64xf32> to vector<32x64xf32>
    %cst_81 = arith.constant dense<0.000000e+00> : vector<64x64xf32>
    %168 = tpu.matmul %166, %167, %cst_81 {dimension_numbers = #tpu.dot_dimension_numbers<[1], [0], [0], [1], [0, 0, 1, 1], [], []>} : vector<64x32xf32>, vector<32x64xf32>, vector<64x64xf32> -> vector<64x64xf32>
    %169 = arith.addf %164, %168 : vector<64x64xf32>
    %cst_82 = arith.constant 0.000000e+00 : f32
    %170 = vector.broadcast %cst_82 : f32 to vector<64x64xf32>
    %171 = vector.extract_strided_slice %157 {offsets = [2, 0, 0], sizes = [1, 64, 32], strides = [1, 1, 1]} : vector<4x64x32xf32> to vector<1x64x32xf32>
    %172 = vector.shape_cast %171 : vector<1x64x32xf32> to vector<64x32xf32>
    %173 = vector.extract_strided_slice %158 {offsets = [0, 0], sizes = [32, 64], strides = [1, 1]} : vector<64x64xf32> to vector<32x64xf32>
    %cst_83 = arith.constant dense<0.000000e+00> : vector<64x64xf32>
    %174 = tpu.matmul %172, %173, %cst_83 {dimension_numbers = #tpu.dot_dimension_numbers<[1], [0], [0], [1], [0, 0, 1, 1], [], []>} : vector<64x32xf32>, vector<32x64xf32>, vector<64x64xf32> -> vector<64x64xf32>
    %175 = arith.addf %170, %174 : vector<64x64xf32>
    %176 = vector.extract_strided_slice %157 {offsets = [3, 0, 0], sizes = [1, 64, 32], strides = [1, 1, 1]} : vector<4x64x32xf32> to vector<1x64x32xf32>
    %177 = vector.shape_cast %176 : vector<1x64x32xf32> to vector<64x32xf32>
    %178 = vector.extract_strided_slice %158 {offsets = [32, 0], sizes = [32, 64], strides = [1, 1]} : vector<64x64xf32> to vector<32x64xf32>
    %cst_84 = arith.constant dense<0.000000e+00> : vector<64x64xf32>
    %179 = tpu.matmul %177, %178, %cst_84 {dimension_numbers = #tpu.dot_dimension_numbers<[1], [0], [0], [1], [0, 0, 1, 1], [], []>} : vector<64x32xf32>, vector<32x64xf32>, vector<64x64xf32> -> vector<64x64xf32>
    %180 = arith.addf %175, %179 : vector<64x64xf32>
    %181 = tpu.concatenate %169, %180 in 1 : vector<64x64xf32>, vector<64x64xf32> -> vector<64x128xf32>
    %c0_85 = arith.constant 0 : index
    %c0_86 = arith.constant 0 : index
    %182 = vector.load %arg8[%c0_85, %c0_86] : memref<64x128xf32, #tpu.memory_space<vmem>>, vector<64x128xf32>
    tpu.vector_store %arg8[%c0_85, %c0_86], %181 {strides = array<i32>} : memref<64x128xf32, #tpu.memory_space<vmem>>, vector<64x128xf32>,
    return
  }
  func.func @transform_0(%arg0: i32) -> (i32, i32, i32) {
    %c0_i32 = arith.constant 0 : i32
    %c0_i32_0 = arith.constant 0 : i32
    %c0_i32_1 = arith.constant 0 : i32
    %c0_i32_2 = arith.constant 0 : i32
    return %c0_i32, %c0_i32_0, %c0_i32_1 : i32, i32, i32
  }
  func.func @transform_1(%arg0: i32) -> (i32, i32, i32) {
    %c0_i32 = arith.constant 0 : i32
    %c0_i32_0 = arith.constant 0 : i32
    %c0_i32_1 = arith.constant 0 : i32
    %c0_i32_2 = arith.constant 0 : i32
    return %c0_i32, %c0_i32_0, %c0_i32_1 : i32, i32, i32
  }
  func.func @transform_2(%arg0: i32) -> (i32, i32, i32) {
    %c0_i32 = arith.constant 0 : i32
    %c0_i32_0 = arith.constant 0 : i32
    %c0_i32_1 = arith.constant 0 : i32
    %c0_i32_2 = arith.constant 0 : i32
    return %c0_i32, %c0_i32_0, %c0_i32_1 : i32, i32, i32
  }
  func.func @transform_3(%arg0: i32) -> (i32, i32, i32) {
    %c0_i32 = arith.constant 0 : i32
    %c0_i32_0 = arith.constant 0 : i32
    %c0_i32_1 = arith.constant 0 : i32
    %c0_i32_2 = arith.constant 0 : i32
    return %c0_i32, %c0_i32_0, %c0_i32_1 : i32, i32, i32
  }
  func.func @transform_4(%arg0: i32) -> (i32, i32) {
    %c0_i32 = arith.constant 0 : i32
    %c0_i32_0 = arith.constant 0 : i32
    %c0_i32_1 = arith.constant 0 : i32
    return %c0_i32, %c0_i32_0 : i32, i32
  }
  func.func @transform_5(%arg0: i32) -> (i32, i32) {
    %c0_i32 = arith.constant 0 : i32
    %c0_i32_0 = arith.constant 0 : i32
    %c0_i32_1 = arith.constant 0 : i32
    return %c0_i32, %c0_i32_0 : i32, i32
  }
  func.func @transform_6(%arg0: i32) -> (i32, i32) {
    %c0_i32 = arith.constant 0 : i32
    %c0_i32_0 = arith.constant 0 : i32
    %c0_i32_1 = arith.constant 0 : i32
    return %c0_i32, %c0_i32_0 : i32, i32
  }
  func.func @transform_7(%arg0: i32) -> (i32, i32) {
    %c0_i32 = arith.constant 0 : i32
    %c0_i32_0 = arith.constant 0 : i32
    %c0_i32_1 = arith.constant 0 : i32
    return %c0_i32, %c0_i32_0 : i32, i32
  }
}

</mosaic_0001>

<bundles_post_ra>
// kernel: forward.2
= control target key start
LH: loop header
LB: loop body
LE: loop exit
PB: predicated region body
PF: predicated region fallthrough
CT: control target
= control target key end

     0   :  { %7 = vsyncpa [#allocation3], 0  ;;  %s372_s9 = smov [#allocation2]   ;;  %s579_s0 = inlined_call_operand.vmem [shape: f32[128,64], index: 0, kind: input, shape index: {}]   ;;  %s580_s1 = inlined_call_operand.hbm [shape: f32[64,256], index: 1, kind: input, shape index: {}]   ;;  %s581_s2 = inlined_call_operand.vmem [shape: f32[128,256], index: 2, kind: output, shape index: {}]  }
   0x1   :  { %s15_s10 = sshll.u32 %s372_s9, 4  ;;  %s348_s13 = scalar_lea.hbm %s580_s1, 2048  ;;  %s16_s10 = int_to_ptr.vmem [resolvable:$true] %s15_s10 }
   0x2   :  { %p349_p0 = scmp.ne.s32.totalorder %s580_s1, %s348_s13  ;;  %p352_p1 = scmp.lt.u32.totalorder %s348_s13, %s580_s1 }
   0x4   :  { %p354_p2 = pnand %p352_p1, %p349_p0 }
   0x6   :  { %357 = shalt.err (!%p354_p2)
}
   0x7   :  { %s358_s18 = scalar_lea.vmem %s16_s10, 2048  ;;  %p363_p4 = scmp.lt.s32.totalorder %s16_s10, %s16_s10 }
   0x8   :  { %p359_p3 = scmp.ne.s32.totalorder %s16_s10, %s358_s18  ;;  %p364_p5 = scmp.lt.s32.totalorder %s358_s18, %s358_s18 }
   0xa   :  { %p365_p6 = por %p364_p5, %p363_p4 }
   0xc   :  { %p366_p7 = pnand %p365_p6, %p359_p3 }
   0xe   :  { %369 = shalt.err (!%p366_p7)
}
   0xf   :  { %s373_s19 = smov 256   ;;  %s374_s20 = smov 16  }
  0x10   :  { %21 = dma.hbm_to_vmem [thread:$0]  %s580_s1, 2048, %s16_s10, [#allocation3], %s373_s19, %s373_s19, %s374_s20  }
  0x11   :  { %370 = dma.done.wait [#allocation3], 2048  }
  0x12   :  { %371 = vsyncadd [#allocation3], 4294965248  ;;  %v375_v0 = vmov 0.0   ;;  %v42_v1 = vld [vmem:[#allocation2 + $0x8] sm:$0xff]  ;;  %v44_v2 = vld [vmem:[#allocation2 + $0x18] sm:$0xff]  ;;  %vm57_vm0 = vcmask 523264  }
  0x13   :  { %170 = vmatprep.mubr.f32.mxu0 %v375_v0  ;;  %218 = vmatprep.mubr.f32.mxu1 %v375_v0  ;;  %v41_v3 = vld [vmem:[#allocation2] sm:$0xff]  ;;  %v320_v4 = vpack.c.bf16 %v44_v2, %v42_v1  ;;  %v43_v5 = vld [vmem:[#allocation2 + $0x10] sm:$0xff]  ;;  %v46_v6 = vld [vmem:[#allocation2 + $0x28] sm:$0xff] }
  0x14   :  { %v48_v7 = vld [vmem:[#allocation2 + $0x38] sm:$0xff]  ;;  %v322_v8 = vpack.c.bf16 %v43_v5, %v41_v3  ;;  %v45_v10 = vld [vmem:[#allocation2 + $0x20] sm:$0xff]  ;;  %v47_v11 = vld [vmem:[#allocation2 + $0x30] sm:$0xff] }
  0x15   :  { %v324_v9 = vpack.c.bf16 %v48_v7, %v46_v6  ;;  %v50_v12 = vld [vmem:[#allocation2 + $0x48] sm:$0xff]  ;;  %321 = vmatprep.subr.bf16.mxu0 %v320_v4  ;;  %336 = vmatprep.subr.bf16.mxu1 %v320_v4  ;;  %v52_v13 = vld [vmem:[#allocation2 + $0x58] sm:$0xff]  ;;  %v326_v14 = vpack.c.bf16 %v47_v11, %v45_v10  ;;  %v49_v16 = vld [vmem:[#allocation2 + $0x40] sm:$0xff] }
  0x16   :  { %323 = vmatpush1.bf16.msra.mxu0 %v322_v8  ;;  %340 = vmatpush1.bf16.msra.mxu1 %v322_v8  ;;  %v328_v15 = vpack.c.bf16 %v52_v13, %v50_v12  ;;  %v51_v17 = vld [vmem:[#allocation2 + $0x50] sm:$0xff]  ;;  %v54_v18 = vld [vmem:[#allocation2 + $0x68] sm:$0xff]  ;;  %v56_v19 = vld [vmem:[#allocation2 + $0x78] sm:$0xff] }
  0x17   :  { %325 = vmatprep.subr.bf16.mxu0 %v324_v9  ;;  %337 = vmatprep.subr.bf16.mxu1 %v324_v9  ;;  %v330_v20 = vpack.c.bf16 %v51_v17, %v49_v16  ;;  %v332_v21 = vpack.c.bf16 %v56_v19, %v54_v18  ;;  %v53_v22 = vld [vmem:[#allocation2 + $0x60] sm:$0xff]  ;;  %v55_v23 = vld [vmem:[#allocation2 + $0x70] sm:$0xff]  ;;  %v26_v27 = vld [vmem:[%s579_s0 + $0x8] sm:$0xff] }
  0x18   :  { %v334_v24 = vpack.c.bf16 %v55_v23, %v53_v22  ;;  %v25_v25 = vld [vmem:[%s579_s0] sm:$0xff]  ;;  %v34_v28 = vld [vmem:[%s579_s0 + $0x48] sm:$0xff]  ;;  %v27_v29 = vld [vmem:[%s579_s0 + $0x10] sm:$0xff] }
  0x19   :  { %v33_v26 = vld [vmem:[%s579_s0 + $0x40] sm:$0xff]  ;;  %v35_v30 = vld [vmem:[%s579_s0 + $0x50] sm:$0xff]  ;;  %v28_v31 = vld [vmem:[%s579_s0 + $0x18] sm:$0xff] }
  0x1a   :  { %327 = vmatpush1.bf16.msra.mxu0 %v326_v14  ;;  %341 = vmatpush1.bf16.msra.mxu1 %v326_v14  ;;  %v36_v32 = vld [vmem:[%s579_s0 + $0x58] sm:$0xff]  ;;  %v29_v33 = vld [vmem:[%s579_s0 + $0x20] sm:$0xff]  ;;  %v30_v35 = vld [vmem:[%s579_s0 + $0x28] sm:$0xff] }
  0x1b   :  { %329 = vmatprep.subr.bf16.mxu0 %v328_v15  ;;  %338 = vmatprep.subr.bf16.mxu1 %v328_v15  ;;  %v37_v34 = vld [vmem:[%s579_s0 + $0x60] sm:$0xff]  ;;  %v38_v36 = vld [vmem:[%s579_s0 + $0x68] sm:$0xff]  ;;  %v31_v37 = vld [vmem:[%s579_s0 + $0x30] sm:$0xff] }
  0x1c   :  { %v39_v38 = vld [vmem:[%s579_s0 + $0x70] sm:$0xff]  ;;  %v32_v39 = vld [vmem:[%s579_s0 + $0x38] sm:$0xff] }
  0x1d   :  { %v40_v40 = vld [vmem:[%s579_s0 + $0x78] sm:$0xff] }
  0x1e   :  { %331 = vmatpush1.bf16.msra.mxu0 %v330_v20  ;;  %342 = vmatpush1.bf16.msra.mxu1 %v330_v20 }
  0x1f   :  { %333 = vmatprep.subr.bf16.mxu0 %v332_v21  ;;  %339 = vmatprep.subr.bf16.mxu1 %v332_v21 }
  0x22   :  { %335 = vmatpush1.bf16.msra.mxu0 %v334_v24  ;;  %343 = vmatpush1.bf16.msra.mxu1 %v334_v24 }
  0x25   :  { %304 = vmatmul.mubr.msk.f32.vlgmr.msra.gmra.mrb[0].mxu0 %vm57_vm0, %v25_v25  ;;  %312 = vmatmul.mubr.msk.f32.vlgmr.msra.gmra.mrb[0].mxu1 %vm57_vm0, %v33_v26 }
  0x26   :  { %176 = vmatprep.mubr.f32.mxu0 %v375_v0  ;;  %224 = vmatprep.mubr.f32.mxu1 %v375_v0 }
  0x29   :  { %305 = vmatmul.mubr.msk.f32.gmra.mrb[2].mxu0 %vm57_vm0, %v26_v27  ;;  %313 = vmatmul.mubr.msk.f32.gmra.mrb[2].mxu1 %vm57_vm0, %v34_v28 }
  0x2a   :  { %182 = vmatprep.mubr.f32.mxu0 %v375_v0  ;;  %230 = vmatprep.mubr.f32.mxu1 %v375_v0 }
  0x2d   :  { %306 = vmatmul.mubr.msk.f32.gmra.mrb[4].mxu0 %vm57_vm0, %v27_v29  ;;  %314 = vmatmul.mubr.msk.f32.gmra.mrb[4].mxu1 %vm57_vm0, %v35_v30 }
  0x2e   :  { %188 = vmatprep.mubr.f32.mxu0 %v375_v0  ;;  %236 = vmatprep.mubr.f32.mxu1 %v375_v0 }
  0x31   :  { %307 = vmatmul.mubr.msk.f32.gmra.mrb[6].mxu0 %vm57_vm0, %v28_v31  ;;  %315 = vmatmul.mubr.msk.f32.gmra.mrb[6].mxu1 %vm57_vm0, %v36_v32 }
  0x32   :  { %194 = vmatprep.mubr.f32.mxu0 %v375_v0  ;;  %242 = vmatprep.mubr.f32.mxu1 %v375_v0 }
  0x35   :  { %308 = vmatmul.mubr.msk.f32.gmra.mrb[8].mxu0 %vm57_vm0, %v29_v33  ;;  %316 = vmatmul.mubr.msk.f32.gmra.mrb[8].mxu1 %vm57_vm0, %v37_v34 }
  0x36   :  { %200 = vmatprep.mubr.f32.mxu0 %v375_v0  ;;  %248 = vmatprep.mubr.f32.mxu1 %v375_v0 }
  0x39   :  { %309 = vmatmul.mubr.msk.f32.gmra.mrb[10].mxu0 %vm57_vm0, %v30_v35  ;;  %317 = vmatmul.mubr.msk.f32.gmra.mrb[10].mxu1 %vm57_vm0, %v38_v36 }
  0x3a   :  { %206 = vmatprep.mubr.f32.mxu0 %v375_v0  ;;  %254 = vmatprep.mubr.f32.mxu1 %v375_v0 }
  0x3d   :  { %310 = vmatmul.mubr.msk.f32.gmra.mrb[12].mxu0 %vm57_vm0, %v31_v37  ;;  %318 = vmatmul.mubr.msk.f32.gmra.mrb[12].mxu1 %vm57_vm0, %v39_v38 }
  0x3e   :  { %212 = vmatprep.mubr.f32.mxu0 %v375_v0  ;;  %260 = vmatprep.mubr.f32.mxu1 %v375_v0 }
  0x41   :  { %311 = vmatmul.mubr.msk.f32.gmra.mrb[14].mxu0 %vm57_vm0, %v32_v39  ;;  %319 = vmatmul.mubr.msk.f32.gmra.mrb[14].mxu1 %vm57_vm0, %v40_v40 }
  0xf8   :  { %v172_v41 = vpop.f32.mrb[0].mxu0  ;;  %v220_v42 = vpop.f32.mrb[0].mxu1 }
  0xf9   :  { %267 = vst [vmem:[%s581_s2] sm:$0xff] %v172_v41  ;;  %283 = vst [vmem:[%s581_s2 + $0x80] sm:$0xff] %v220_v42  ;;  %v174_v43 = vpop.f32.mrb[1].mxu0  ;;  %v222_v44 = vpop.f32.mrb[1].mxu1 }
  0xfa   :  { %268 = vst [vmem:[%s581_s2 + $0x8] sm:$0xff] %v174_v43  ;;  %284 = vst [vmem:[%s581_s2 + $0x88] sm:$0xff] %v222_v44 }
  0xfc   :  { %v178_v45 = vpop.f32.mrb[2].mxu0  ;;  %v226_v46 = vpop.f32.mrb[2].mxu1 }
  0xfd   :  { %269 = vst [vmem:[%s581_s2 + $0x10] sm:$0xff] %v178_v45  ;;  %285 = vst [vmem:[%s581_s2 + $0x90] sm:$0xff] %v226_v46  ;;  %v180_v47 = vpop.f32.mrb[3].mxu0  ;;  %v228_v48 = vpop.f32.mrb[3].mxu1 }
  0xfe   :  { %270 = vst [vmem:[%s581_s2 + $0x18] sm:$0xff] %v180_v47  ;;  %286 = vst [vmem:[%s581_s2 + $0x98] sm:$0xff] %v228_v48 }
 0x100   :  { %v184_v49 = vpop.f32.mrb[4].mxu0  ;;  %v232_v50 = vpop.f32.mrb[4].mxu1 }
 0x101   :  { %271 = vst [vmem:[%s581_s2 + $0x20] sm:$0xff] %v184_v49  ;;  %287 = vst [vmem:[%s581_s2 + $0xa0] sm:$0xff] %v232_v50  ;;  %v186_v51 = vpop.f32.mrb[5].mxu0  ;;  %v234_v52 = vpop.f32.mrb[5].mxu1 }
 0x102   :  { %272 = vst [vmem:[%s581_s2 + $0x28] sm:$0xff] %v186_v51  ;;  %288 = vst [vmem:[%s581_s2 + $0xa8] sm:$0xff] %v234_v52 }
 0x104   :  { %v190_v53 = vpop.f32.mrb[6].mxu0  ;;  %v238_v54 = vpop.f32.mrb[6].mxu1 }
 0x105   :  { %273 = vst [vmem:[%s581_s2 + $0x30] sm:$0xff] %v190_v53  ;;  %289 = vst [vmem:[%s581_s2 + $0xb0] sm:$0xff] %v238_v54  ;;  %v192_v55 = vpop.f32.mrb[7].mxu0  ;;  %v240_v56 = vpop.f32.mrb[7].mxu1 }
 0x106   :  { %274 = vst [vmem:[%s581_s2 + $0x38] sm:$0xff] %v192_v55  ;;  %290 = vst [vmem:[%s581_s2 + $0xb8] sm:$0xff] %v240_v56 }
 0x108   :  { %v196_v57 = vpop.f32.mrb[8].mxu0  ;;  %v244_v58 = vpop.f32.mrb[8].mxu1 }
 0x109   :  { %275 = vst [vmem:[%s581_s2 + $0x40] sm:$0xff] %v196_v57  ;;  %291 = vst [vmem:[%s581_s2 + $0xc0] sm:$0xff] %v244_v58  ;;  %v198_v59 = vpop.f32.mrb[9].mxu0  ;;  %v246_v60 = vpop.f32.mrb[9].mxu1 }
 0x10a   :  { %276 = vst [vmem:[%s581_s2 + $0x48] sm:$0xff] %v198_v59  ;;  %292 = vst [vmem:[%s581_s2 + $0xc8] sm:$0xff] %v246_v60 }
 0x10c   :  { %v202_v61 = vpop.f32.mrb[10].mxu0  ;;  %v250_v62 = vpop.f32.mrb[10].mxu1 }
 0x10d   :  { %277 = vst [vmem:[%s581_s2 + $0x50] sm:$0xff] %v202_v61  ;;  %293 = vst [vmem:[%s581_s2 + $0xd0] sm:$0xff] %v250_v62  ;;  %v204_v63 = vpop.f32.mrb[11].mxu0  ;;  %v252_v0 = vpop.f32.mrb[11].mxu1 }
 0x10e   :  { %278 = vst [vmem:[%s581_s2 + $0x58] sm:$0xff] %v204_v63  ;;  %294 = vst [vmem:[%s581_s2 + $0xd8] sm:$0xff] %v252_v0 }
 0x110   :  { %v208_v1 = vpop.f32.mrb[12].mxu0  ;;  %v256_v2 = vpop.f32.mrb[12].mxu1 }
 0x111   :  { %279 = vst [vmem:[%s581_s2 + $0x60] sm:$0xff] %v208_v1  ;;  %295 = vst [vmem:[%s581_s2 + $0xe0] sm:$0xff] %v256_v2  ;;  %v210_v3 = vpop.f32.mrb[13].mxu0  ;;  %v258_v4 = vpop.f32.mrb[13].mxu1 }
 0x112   :  { %280 = vst [vmem:[%s581_s2 + $0x68] sm:$0xff] %v210_v3  ;;  %296 = vst [vmem:[%s581_s2 + $0xe8] sm:$0xff] %v258_v4 }
 0x114   :  { %v214_v5 = vpop.f32.mrb[14].mxu0  ;;  %v262_v6 = vpop.f32.mrb[14].mxu1 }
 0x115   :  { %281 = vst [vmem:[%s581_s2 + $0x70] sm:$0xff] %v214_v5  ;;  %297 = vst [vmem:[%s581_s2 + $0xf0] sm:$0xff] %v262_v6  ;;  %v216_v7 = vpop.f32.mrb[15].mxu0  ;;  %v264_v8 = vpop.f32.mrb[15].mxu1 }
 0x116   :  { %282 = vst [vmem:[%s581_s2 + $0x78] sm:$0xff] %v216_v7  ;;  %298 = vst [vmem:[%s581_s2 + $0xf8] sm:$0xff] %v264_v8 }
 0x117   :  { %303 = vsyncpa [#allocation3], 1 }

// kernel: forward.3
= control target key start
LH: loop header
LB: loop body
LE: loop exit
PB: predicated region body
PF: predicated region fallthrough
CT: control target
= control target key end

     0   :  { %vm314_vm0 = vcmask 261120   ;;  %v731_v61 = vlaneseq  ;;  %s25236_s1 = inlined_call_operand.vmem [shape: f32[4,64,32], index: 1, kind: input, shape index: {}]   ;;  %s25237_s3 = inlined_call_operand.vmem [shape: f32[4,64,1], index: 3, kind: input, shape index: {}]   ;;  %s25238_s0 = inlined_call_operand.vmem [shape: f32[4,64,32], index: 0, kind: input, shape index: {}]   ;;  %s25239_s5 = inlined_call_operand.vmem [shape: f32[64,32], index: 5, kind: input, shape index: {}]   ;;  %s25240_s4 = inlined_call_operand.vmem [shape: f32[64,32], index: 4, kind: input, shape index: {}]   ;;  %s25241_s2 = inlined_call_operand.vmem [shape: f32[4,64,32], index: 2, kind: input, shape index: {}]   ;;  %s25242_s6 = inlined_call_operand.vmem [shape: f32[64,64], index: 6, kind: input, shape index: {}]   ;;  %s25243_s7 = inlined_call_operand.vmem [shape: f32[64,128], index: 7, kind: output, shape index: {}]  }
   0x1   :  { %v250_v0 = vld [vmem:[%s25236_s1] sm:$0xff]  ;;  %v252_v1 = vld [vmem:[%s25236_s1 + $0x10] sm:$0xff]  ;;  %v251_v2 = vld [vmem:[%s25236_s1 + $0x8] sm:$0xff] }
   0x2   :  { %v282_v3 = vmul.f32 %v250_v0, %v250_v0  ;;  %v284_v4 = vmul.f32 %v252_v1, %v252_v1  ;;  %v283_v5 = vmul.f32 %v251_v2, %v251_v2  ;;  %v253_v6 = vld [vmem:[%s25236_s1 + $0x18] sm:$0xff]  ;;  %v254_v8 = vld [vmem:[%s25236_s1 + $0x20] sm:$0xff]  ;;  %v255_v9 = vld [vmem:[%s25236_s1 + $0x28] sm:$0xff] }
   0x3   :  { %v285_v7 = vmul.f32 %v253_v6, %v253_v6  ;;  %v286_v14 = vmul.f32 %v254_v8, %v254_v8  ;;  %v287_v15 = vmul.f32 %v255_v9, %v255_v9  ;;  %v256_v16 = vld [vmem:[%s25236_s1 + $0x30] sm:$0xff]  ;;  %v257_v17 = vld [vmem:[%s25236_s1 + $0x38] sm:$0xff]  ;;  %v258_v22 = vld [vmem:[%s25236_s1 + $0x40] sm:$0xff]  ;;  %v20888_v9 = vand.u32 127, %v731_v61 }
   0x4   :  { %v315_v10 = vsel %vm314_vm0, %v282_v3, 0.0  ;;  %v321_v11 = vsel %vm314_vm0, %v284_v4, 0.0  ;;  %v318_v12 = vsel %vm314_vm0, %v283_v5, 0.0  ;;  %v288_v20 = vmul.f32 %v256_v16, %v256_v16  ;;  %v259_v23 = vld [vmem:[%s25236_s1 + $0x48] sm:$0xff]  ;;  %v260_v28 = vld [vmem:[%s25236_s1 + $0x50] sm:$0xff]  ;;  %v261_v29 = vld [vmem:[%s25236_s1 + $0x58] sm:$0xff] }
   0x5   :  { %316 = vadd.xlane.f32.xlu0 %v315_v10  ;;  %322 = vadd.xlane.f32.xlu1 %v321_v11  ;;  %v324_v13 = vsel %vm314_vm0, %v285_v7, 0.0  ;;  %v327_v18 = vsel %vm314_vm0, %v286_v14, 0.0  ;;  %v330_v19 = vsel %vm314_vm0, %v287_v15, 0.0  ;;  %v289_v21 = vmul.f32 %v257_v17, %v257_v17  ;;  %v262_v34 = vld [vmem:[%s25236_s1 + $0x60] sm:$0xff]  ;;  %v263_v35 = vld [vmem:[%s25236_s1 + $0x68] sm:$0xff]  ;;  %v264_v40 = vld [vmem:[%s25236_s1 + $0x70] sm:$0xff] }
   0x6   :  { %v333_v24 = vsel %vm314_vm0, %v288_v20, 0.0  ;;  %v290_v26 = vmul.f32 %v258_v22, %v258_v22  ;;  %v291_v27 = vmul.f32 %v259_v23, %v259_v23  ;;  %v292_v32 = vmul.f32 %v260_v28, %v260_v28  ;;  %v265_v41 = vld [vmem:[%s25236_s1 + $0x78] sm:$0xff]  ;;  %v266_v46 = vld [vmem:[%s25236_s1 + $0x80] sm:$0xff]  ;;  %v267_v47 = vld [vmem:[%s25236_s1 + $0x88] sm:$0xff]  ;;  %25338 = vst [vmem:[#allocation6_spill] sm:$0xff] %v20888_v9 }
   0x7   :  { %v336_v25 = vsel %vm314_vm0, %v289_v21, 0.0  ;;  %v293_v33 = vmul.f32 %v261_v29, %v261_v29  ;;  %v294_v38 = vmul.f32 %v262_v34, %v262_v34  ;;  %v295_v39 = vmul.f32 %v263_v35, %v263_v35  ;;  %v268_v52 = vld [vmem:[%s25236_s1 + $0x90] sm:$0xff]  ;;  %v269_v53 = vld [vmem:[%s25236_s1 + $0x98] sm:$0xff]  ;;  %v270_v58 = vld [vmem:[%s25236_s1 + $0xa0] sm:$0xff] }
   0x8   :  { %v339_v30 = vsel %vm314_vm0, %v290_v26, 0.0  ;;  %v342_v31 = vsel %vm314_vm0, %v291_v27, 0.0  ;;  %v345_v36 = vsel %vm314_vm0, %v292_v32, 0.0  ;;  %v296_v44 = vmul.f32 %v264_v40, %v264_v40  ;;  %v271_v59 = vld [vmem:[%s25236_s1 + $0xa8] sm:$0xff]  ;;  %v272_v60 = vld [vmem:[%s25236_s1 + $0xb0] sm:$0xff]  ;;  %v273_v2 = vld [vmem:[%s25236_s1 + $0xb8] sm:$0xff] }
   0x9   :  { %319 = vadd.xlane.f32.xlu0 %v318_v12  ;;  %325 = vadd.xlane.f32.xlu1 %v324_v13  ;;  %v348_v37 = vsel %vm314_vm0, %v293_v33, 0.0  ;;  %v351_v42 = vsel %vm314_vm0, %v294_v38, 0.0  ;;  %v354_v43 = vsel %vm314_vm0, %v295_v39, 0.0  ;;  %v297_v45 = vmul.f32 %v265_v41, %v265_v41  ;;  %v274_v5 = vld [vmem:[%s25236_s1 + $0xc0] sm:$0xff]  ;;  %v275_v6 = vld [vmem:[%s25236_s1 + $0xc8] sm:$0xff]  ;;  %v277_v29 = vld [vmem:[%s25236_s1 + $0xd8] sm:$0xff] }
   0xa   :  { %v357_v48 = vsel %vm314_vm0, %v296_v44, 0.0  ;;  %v298_v50 = vmul.f32 %v266_v46, %v266_v46  ;;  %v299_v51 = vmul.f32 %v267_v47, %v267_v47  ;;  %v300_v56 = vmul.f32 %v268_v52, %v268_v52  ;;  %v278_v38 = vld [vmem:[%s25236_s1 + $0xe0] sm:$0xff]  ;;  %v279_v39 = vld [vmem:[%s25236_s1 + $0xe8] sm:$0xff]  ;;  %v280_v44 = vld [vmem:[%s25236_s1 + $0xf0] sm:$0xff] }
   0xb   :  { %v360_v49 = vsel %vm314_vm0, %v297_v45, 0.0  ;;  %v301_v57 = vmul.f32 %v269_v53, %v269_v53  ;;  %v302_v62 = vmul.f32 %v270_v58, %v270_v58  ;;  %v303_v63 = vmul.f32 %v271_v59, %v271_v59  ;;  %v281_v45 = vld [vmem:[%s25236_s1 + $0xf8] sm:$0xff] }
   0xc   :  { %v363_v54 = vsel %vm314_vm0, %v298_v50, 0.0  ;;  %v366_v55 = vsel %vm314_vm0, %v299_v51, 0.0  ;;  %v369_v0 = vsel %vm314_vm0, %v300_v56, 0.0  ;;  %v20874_v3 = vshrl.u32 %v731_v61, 7  ;;  %v27_v50 = vld [vmem:[%s25237_s3 + $0x8] sm:$0xff]  ;;  %v29_v58 = vld [vmem:[%s25237_s3 + $0x18] sm:$0xff] }
   0xd   :  { %328 = vadd.xlane.f32.xlu0 %v327_v18  ;;  %331 = vadd.xlane.f32.xlu1 %v330_v19  ;;  %v372_v1 = vsel %vm314_vm0, %v301_v57, 0.0  ;;  %v304_v4 = vmul.f32 %v272_v60, %v272_v60  ;;  %v375_v11 = vsel %vm314_vm0, %v302_v62, 0.0  ;;  %v378_v12 = vsel %vm314_vm0, %v303_v63, 0.0  ;;  %v30_v62 = vld [vmem:[%s25237_s3 + $0x20] sm:$0xff] }
   0xe   :  { %25335 = vst [vmem:[#allocation3_spill] sm:$0xff] %v20874_v3  ;;  %v20883_v7 = vadd.s32 8, %v20874_v3  ;;  %v20886_v8 = vadd.s32 16, %v20874_v3  ;;  %v20891_v10 = vadd.s32 24, %v20874_v3  ;;  %v305_v13 = vmul.f32 %v273_v2, %v273_v2 }
   0xf   :  { %v738_v15 = vadd.s32 16, %v20888_v9  ;;  %v381_v18 = vsel %vm314_vm0, %v304_v4, 0.0  ;;  %v306_v19 = vmul.f32 %v274_v5, %v274_v5  ;;  %v307_v20 = vmul.f32 %v275_v6, %v275_v6  ;;  %v31_v4 = vld [vmem:[%s25237_s3 + $0x28] sm:$0xff] }
  0x10   :  { %25336 = vst [vmem:[#allocation4_spill] sm:$0xff] %v20883_v7  ;;  %25337 = vst [vmem:[#allocation5_spill] sm:$0xff] %v20886_v8  ;;  %v747_v14 = vadd.s32 16, %v20883_v7  ;;  %v748_v16 = vadd.s32 16, %v20886_v8  ;;  %v749_v17 = vadd.s32 16, %v20891_v10  ;;  %vm750_vm1 = vcmp.eq.s32.totalorder %v20886_v8, %v20888_v9 }
  0x11   :  { %334 = vadd.xlane.f32.xlu0 %v333_v24  ;;  %337 = vadd.xlane.f32.xlu1 %v336_v25  ;;  %25339 = vst [vmem:[#allocation7_spill] sm:$0xff] %v20891_v10  ;;  %vm741_vm3 = vcmp.eq.s32.totalorder %v20886_v8, %v738_v15  ;;  %v25244_v22 = vmov 0.0   ;;  %vm742_vm5 = vcmp.eq.s32.totalorder %v20891_v10, %v738_v15  ;;  %v384_v24 = vsel %vm314_vm0, %v305_v13, 0.0  ;;  %v276_v25 = vld [vmem:[%s25236_s1 + $0xd0] sm:$0xff] }
  0x12   :  { %vm751_vm2 = vcmp.eq.s32.totalorder %v747_v14, %v20888_v9  ;;  %11509 = vst.msk [vmem:[#allocation2] sm:$0xff] %vm314_vm0, %v25244_v22  ;;  %11510 = vst.msk [vmem:[#allocation2 + $0x8] sm:$0xff] %vm314_vm0, %v25244_v22  ;;  %v745_v23 = vsel %vm741_vm3, -1.0, %v25244_v22  ;;  %vm752_vm6 = vcmp.eq.s32.totalorder %v748_v16, %v20888_v9  ;;  %v20739_v26 = vmov 1.0|1.0  }
  0x13   :  { %vm20904_vm4 = vmpackc.low %vm751_vm2, %vm750_vm1  ;;  %11511 = vst.msk [vmem:[#allocation2 + $0x10] sm:$0xff] %vm314_vm0, %v25244_v22  ;;  %v746_v27 = vsel %vm742_vm5, -1.0, %v25244_v22  ;;  %vm753_vm7 = vcmp.eq.s32.totalorder %v749_v17, %v20888_v9  ;;  %v756_v28 = vsel %vm752_vm6, 1.0, %v25244_v22  ;;  %v308_v33 = vmul.f32 %v276_v25, %v276_v25 }
  0x14   :  { %11512 = vst.msk [vmem:[#allocation2 + $0x18] sm:$0xff] %vm314_vm0, %v25244_v22  ;;  %11513 = vst.msk [vmem:[#allocation2 + $0x20] sm:$0xff] %vm314_vm0, %v25244_v22  ;;  %19221 = vmatprep.subr.msk.bf16.mxu1 %vm20904_vm4, %v20739_v26  ;;  %19213 = vmatprep.subr.msk.bf16.mxu0 %vm20904_vm4, %v20739_v26  ;;  %v387_v34 = vsel %vm314_vm0, %v306_v19, 0.0  ;;  %v390_v35 = vsel %vm314_vm0, %v307_v20, 0.0  ;;  %v59_v51 = vsub.f32 0.0, %v27_v50  ;;  %v61_v59 = vsub.f32 0.0, %v29_v58 }
  0x15   :  { %340 = vadd.xlane.f32.xlu0 %v339_v30  ;;  %343 = vadd.xlane.f32.xlu1 %v342_v31  ;;  %11514 = vst.msk [vmem:[#allocation2 + $0x28] sm:$0xff] %vm314_vm0, %v25244_v22  ;;  %11515 = vst.msk [vmem:[#allocation2 + $0x30] sm:$0xff] %vm314_vm0, %v25244_v22  ;;  %v757_v30 = vsel %vm753_vm7, 1.0, %v25244_v22  ;;  %v760_v31 = vadd.f32 %v756_v28, %v745_v23  ;;  %v393_v40 = vsel %vm314_vm0, %v308_v33, 0.0  ;;  %v63_v6 = vsub.f32 0.0, %v31_v4  ;;  %v33_v19 = vld [vmem:[%s25237_s3 + $0x38] sm:$0xff] }
  0x16   :  { %11516 = vst.msk [vmem:[#allocation2 + $0x38] sm:$0xff] %vm314_vm0, %v25244_v22  ;;  %11517 = vst.msk [vmem:[#allocation2 + $0x40] sm:$0xff] %vm314_vm0, %v25244_v22  ;;  %19223 = vmatpush3.bf16.msk.msra.mxu1 %vm20904_vm4, %v20739_v26  ;;  %19215 = vmatpush3.bf16.msk.msra.mxu0 %vm20904_vm4, %v20739_v26  ;;  %v761_v32 = vadd.f32 %v757_v30, %v746_v27  ;;  %v96_v60 = vmul.f32 1.442695, %v61_v59  ;;  %v20740_v15 = vmov 0   ;;  %v26_v20 = vld [vmem:[%s25237_s3] sm:$0xff] }
  0x17   :  { %11518 = vst.msk [vmem:[#allocation2 + $0x48] sm:$0xff] %vm314_vm0, %v25244_v22  ;;  %11519 = vst.msk [vmem:[#allocation2 + $0x50] sm:$0xff] %vm314_vm0, %v25244_v22  ;;  %20273 = vset.pattern.permute.xlu1 %v20740_v15  ;;  %20272 = vset.pattern.permute.xlu0 %v20740_v15  ;;  %v65_v23 = vsub.f32 0.0, %v33_v19  ;;  %v43_v30 = vld [vmem:[%s25237_s3 + $0x88] sm:$0xff]  ;;  %v48_v58 = vld [vmem:[%s25237_s3 + $0xb0] sm:$0xff] }
  0x18   :  { %11520 = vst.msk [vmem:[#allocation2 + $0x58] sm:$0xff] %vm314_vm0, %v25244_v22  ;;  %11521 = vst.msk [vmem:[#allocation2 + $0x60] sm:$0xff] %vm314_vm0, %v25244_v22  ;;  %v75_v33 = vsub.f32 0.0, %v43_v30  ;;  %v47_v50 = vld [vmem:[%s25237_s3 + $0xa8] sm:$0xff]  ;;  %v49_v59 = vld [vmem:[%s25237_s3 + $0xb8] sm:$0xff] }
  0x19   :  { %346 = vadd.xlane.f32.xlu0 %v345_v36  ;;  %349 = vadd.xlane.f32.xlu1 %v348_v37  ;;  %11522 = vst.msk [vmem:[#allocation2 + $0x68] sm:$0xff] %vm314_vm0, %v25244_v22  ;;  %11523 = vst.msk [vmem:[#allocation2 + $0x70] sm:$0xff] %vm314_vm0, %v25244_v22  ;;  %v309_v36 = vmul.f32 %v277_v29, %v277_v29  ;;  %v19216_v37 = vpack.c.bf16 %v761_v32, %v760_v31  ;;  %v104_v27 = vmul.f32 1.442695, %v65_v23  ;;  %v42_v29 = vld [vmem:[%s25237_s3 + $0x80] sm:$0xff] }
  0x1a   :  { %11524 = vst.msk [vmem:[#allocation2 + $0x78] sm:$0xff] %vm314_vm0, %v25244_v22  ;;  %11525 = vst.msk [vmem:[#allocation2 + $0x80] sm:$0xff] %vm314_vm0, %v25244_v22  ;;  %v74_v32 = vsub.f32 0.0, %v42_v29 }
  0x1b   :  { %11526 = vst.msk [vmem:[#allocation2 + $0x88] sm:$0xff] %vm314_vm0, %v25244_v22  ;;  %11527 = vst.msk [vmem:[#allocation2 + $0x90] sm:$0xff] %vm314_vm0, %v25244_v22  ;;  %19225 = vmatprep.subr.bf16.mxu1 %v19216_v37  ;;  %19217 = vmatprep.subr.bf16.mxu0 %v19216_v37  ;;  %v396_v41 = vsel %vm314_vm0, %v309_v36, 0.0 }
  0x1c   :  { %11528 = vst.msk [vmem:[#allocation2 + $0x98] sm:$0xff] %vm314_vm0, %v25244_v22  ;;  %11529 = vst.msk [vmem:[#allocation2 + $0xa0] sm:$0xff] %vm314_vm0, %v25244_v22  ;;  %19227 = vmatpush3.bf16.msra.mxu1 %v19216_v37  ;;  %19219 = vmatpush3.bf16.msra.mxu0 %v19216_v37  ;;  %v122_v36 = vmul.f32 1.442695, %v74_v32  ;;  %v124_v37 = vmul.f32 1.442695, %v75_v33 }
  0x1d   :  { %352 = vadd.xlane.f32.xlu0 %v351_v42  ;;  %355 = vadd.xlane.f32.xlu1 %v354_v43  ;;  %11530 = vst.msk [vmem:[#allocation2 + $0xa8] sm:$0xff] %vm314_vm0, %v25244_v22  ;;  %11531 = vst.msk [vmem:[#allocation2 + $0xb0] sm:$0xff] %vm314_vm0, %v25244_v22  ;;  %v310_v42 = vmul.f32 %v278_v38, %v278_v38  ;;  %v311_v43 = vmul.f32 %v279_v39, %v279_v39  ;;  %v44_v39 = vld [vmem:[%s25237_s3 + $0x90] sm:$0xff] }
  0x1e   :  { %11532 = vst.msk [vmem:[#allocation2 + $0xb8] sm:$0xff] %vm314_vm0, %v25244_v22  ;;  %11533 = vst.msk [vmem:[#allocation2 + $0xc0] sm:$0xff] %vm314_vm0, %v25244_v22 }
  0x1f   :  { %11534 = vst.msk [vmem:[#allocation2 + $0xc8] sm:$0xff] %vm314_vm0, %v25244_v22  ;;  %11535 = vst.msk [vmem:[#allocation2 + $0xd0] sm:$0xff] %vm314_vm0, %v25244_v22  ;;  %v399_v46 = vsel %vm314_vm0, %v310_v42, 0.0  ;;  %v402_v47 = vsel %vm314_vm0, %v311_v43, 0.0 }
  0x20   :  { %11536 = vst.msk [vmem:[#allocation2 + $0xd8] sm:$0xff] %vm314_vm0, %v25244_v22  ;;  %11537 = vst.msk [vmem:[#allocation2 + $0xe0] sm:$0xff] %vm314_vm0, %v25244_v22 }
  0x21   :  { %358 = vadd.xlane.f32.xlu0 %v357_v48  ;;  %361 = vadd.xlane.f32.xlu1 %v360_v49  ;;  %11538 = vst.msk [vmem:[#allocation2 + $0xe8] sm:$0xff] %vm314_vm0, %v25244_v22  ;;  %11539 = vst.msk [vmem:[#allocation2 + $0xf0] sm:$0xff] %vm314_vm0, %v25244_v22  ;;  %v312_v48 = vmul.f32 %v280_v44, %v280_v44  ;;  %v313_v49 = vmul.f32 %v281_v45, %v281_v45 }
  0x22   :  { %11540 = vst.msk [vmem:[#allocation2 + $0xf8] sm:$0xff] %vm314_vm0, %v25244_v22  ;;  %v22017_v22 = vld [vmem:[%s25239_s5 + $0x18] sm:$0xff] }
  0x23   :  { %v405_v52 = vsel %vm314_vm0, %v312_v48, 0.0  ;;  %v408_v53 = vsel %vm314_vm0, %v313_v49, 0.0  ;;  %v46_v49 = vld [vmem:[%s25237_s3 + $0xa0] sm:$0xff] }
  0x25   :  { %364 = vadd.xlane.f32.xlu0 %v363_v54  ;;  %367 = vadd.xlane.f32.xlu1 %v366_v55  ;;  %v92_v54 = vmul.f32 1.442695, %v59_v51  ;;  %v28_v55 = vld [vmem:[%s25237_s3 + $0x10] sm:$0xff]  ;;  %v78_v51 = vsub.f32 0.0, %v46_v49 }
  0x26   :  { %v60_v56 = vsub.f32 0.0, %v28_v55 }
  0x27   :  { %20274 = vpow2.f32 %v92_v54  ;;  %v130_v54 = vmul.f32 1.442695, %v78_v51  ;;  %v37_v51 = vld [vmem:[%s25237_s3 + $0x58] sm:$0xff] }
  0x28   :  { %v94_v57 = vmul.f32 1.442695, %v60_v56 }
  0x29   :  { %370 = vadd.xlane.f32.xlu0 %v369_v0  ;;  %373 = vadd.xlane.f32.xlu1 %v372_v1  ;;  %v62_v0 = vsub.f32 0.0, %v30_v62  ;;  %v80_v62 = vsub.f32 0.0, %v48_v58 }
  0x2a   :  { %20276 = vpow2.f32 %v94_v57 }
  0x2b   :  { %20278 = vpow2.f32 %v96_v60  ;;  %v98_v1 = vmul.f32 1.442695, %v62_v0 }
  0x2d   :  { %376 = vadd.xlane.f32.xlu0 %v375_v11  ;;  %379 = vadd.xlane.f32.xlu1 %v378_v12  ;;  %v100_v11 = vmul.f32 1.442695, %v63_v6  ;;  %v32_v12 = vld [vmem:[%s25237_s3 + $0x30] sm:$0xff] }
  0x2e   :  { %v64_v14 = vsub.f32 0.0, %v32_v12  ;;  %v35_v12 = vld [vmem:[%s25237_s3 + $0x48] sm:$0xff] }
  0x30   :  { %v102_v17 = vmul.f32 1.442695, %v64_v14 }
  0x31   :  { %382 = vadd.xlane.f32.xlu0 %v381_v18  ;;  %385 = vadd.xlane.f32.xlu1 %v384_v24  ;;  %v20275_v61 = vpop.eup %20274  ;;  %v58_v24 = vsub.f32 0.0, %v26_v20 }
  0x32   :  { %v155_v63 = vadd.f32 1.0, %v20275_v61 }
  0x33   :  { %v90_v28 = vmul.f32 1.442695, %v58_v24  ;;  %v38_v24 = vld [vmem:[%s25237_s3 + $0x60] sm:$0xff] }
  0x34   :  { %20280 = vrcp.f32 %v155_v63  ;;  %v20277_v2 = vpop.eup %20276  ;;  %v81_v63 = vsub.f32 0.0, %v49_v59 }
  0x35   :  { %388 = vadd.xlane.f32.xlu0 %v387_v34  ;;  %391 = vadd.xlane.f32.xlu1 %v390_v35  ;;  %20282 = vpow2.f32 %v98_v1  ;;  %v156_v5 = vadd.f32 1.0, %v20277_v2  ;;  %v20279_v13 = vpop.eup %20278  ;;  %v134_v2 = vmul.f32 1.442695, %v80_v62 }
  0x36   :  { %v157_v16 = vadd.f32 1.0, %v20279_v13  ;;  %v136_v4 = vmul.f32 1.442695, %v81_v63 }
  0x37   :  { %20284 = vrcp.f32 %v156_v5 }
  0x38   :  { %20286 = vpow2.f32 %v100_v11  ;;  %v34_v11 = vld [vmem:[%s25237_s3 + $0x40] sm:$0xff] }
  0x39   :  { %394 = vadd.xlane.f32.xlu0 %v393_v40  ;;  %397 = vadd.xlane.f32.xlu1 %v396_v41  ;;  %20288 = vrcp.f32 %v157_v16  ;;  %v45_v40 = vld [vmem:[%s25237_s3 + $0x98] sm:$0xff]  ;;  %v76_v41 = vsub.f32 0.0, %v44_v39  ;;  %v66_v15 = vsub.f32 0.0, %v34_v11  ;;  %v67_v16 = vsub.f32 0.0, %v35_v12 }
  0x3a   :  { %20290 = vpow2.f32 %v102_v17  ;;  %v77_v42 = vsub.f32 0.0, %v45_v40 }
  0x3b   :  { %v106_v19 = vmul.f32 1.442695, %v66_v15  ;;  %v108_v20 = vmul.f32 1.442695, %v67_v16 }
  0x3d   :  { %400 = vadd.xlane.f32.xlu0 %v399_v46  ;;  %403 = vadd.xlane.f32.xlu1 %v402_v47  ;;  %v126_v46 = vmul.f32 1.442695, %v76_v41  ;;  %v128_v47 = vmul.f32 1.442695, %v77_v42 }
  0x3e   :  { %v20281_v18 = vpop.eup %20280 }
  0x3f   :  { %v189_v21 = vmul.f32 2.0, %v20281_v18  ;;  %v20283_v25 = vpop.eup %20282 }
  0x40   :  { %v158_v26 = vadd.f32 1.0, %v20283_v25  ;;  %v39_v25 = vld [vmem:[%s25237_s3 + $0x68] sm:$0xff] }
  0x41   :  { %406 = vadd.xlane.f32.xlu0 %v405_v52  ;;  %409 = vadd.xlane.f32.xlu1 %v408_v53  ;;  %v20285_v31 = vpop.eup %20284  ;;  %v79_v52 = vsub.f32 0.0, %v47_v50  ;;  %v71_v29 = vsub.f32 0.0, %v39_v25  ;;  %v36_v50 = vld [vmem:[%s25237_s3 + $0x50] sm:$0xff] }
  0x42   :  { %20292 = vrcp.f32 %v158_v26  ;;  %v191_v34 = vmul.f32 2.0, %v20285_v31  ;;  %v20287_v35 = vpop.eup %20286 }
  0x43   :  { %20294 = vpow2.f32 %v104_v27  ;;  %v159_v38 = vadd.f32 1.0, %v20287_v35  ;;  %v20289_v43 = vpop.eup %20288  ;;  %v132_v55 = vmul.f32 1.442695, %v79_v52  ;;  %v116_v35 = vmul.f32 1.442695, %v71_v29 }
  0x44   :  { %20296 = vpow2.f32 %v90_v28  ;;  %v20291_v44 = vpop.eup %20290  ;;  %v193_v45 = vmul.f32 2.0, %v20289_v43  ;;  %v70_v28 = vsub.f32 0.0, %v38_v24 }
  0x45   :  { %20298 = vpow2.f32 %v122_v36  ;;  %v160_v48 = vadd.f32 1.0, %v20291_v44  ;;  %v50_v36 = vld [vmem:[%s25237_s3 + $0xc0] sm:$0xff] }
  0x46   :  { %20300 = vrcp.f32 %v159_v38  ;;  %v114_v32 = vmul.f32 1.442695, %v70_v28  ;;  %v82_v40 = vsub.f32 0.0, %v50_v36 }
  0x47   :  { %20302 = vpow2.f32 %v124_v37  ;;  %v51_v37 = vld [vmem:[%s25237_s3 + $0xc8] sm:$0xff] }
  0x48   :  { %20304 = vpow2.f32 %v126_v46  ;;  %v83_v41 = vsub.f32 0.0, %v51_v37  ;;  %v138_v46 = vmul.f32 1.442695, %v82_v40 }
  0x49   :  { %20306 = vrcp.f32 %v160_v48 }
  0x4a   :  { %20308 = vpow2.f32 %v128_v47  ;;  %v140_v47 = vmul.f32 1.442695, %v83_v41  ;;  %v54_v41 = vld [vmem:[%s25237_s3 + $0xe0] sm:$0xff] }
  0x4b   :  { %20310 = vpow2.f32 %v130_v54  ;;  %v68_v54 = vsub.f32 0.0, %v36_v50  ;;  %v781_v50 = vld [vmem:[%s25238_s0 + $0x18] sm:$0xff] }
  0x4c   :  { %v20293_v53 = vpop.eup %20292  ;;  %20312 = vpow2.f32 %v132_v55  ;;  %v69_v55 = vsub.f32 0.0, %v37_v51 }
  0x4d   :  { %v20295_v56 = vpop.eup %20294  ;;  %v195_v57 = vmul.f32 2.0, %v20293_v53 }
  0x4e   :  { %v20297_v60 = vpop.eup %20296  ;;  %v161_v61 = vadd.f32 1.0, %v20295_v56 }
  0x4f   :  { %v154_v0 = vadd.f32 1.0, %v20297_v60  ;;  %v20299_v1 = vpop.eup %20298  ;;  %v110_v60 = vmul.f32 1.442695, %v68_v54  ;;  %v782_v54 = vld [vmem:[%s25238_s0 + $0x20] sm:$0xff] }
  0x50   :  { %20314 = vrcp.f32 %v161_v61  ;;  %v20301_v5 = vpop.eup %20300  ;;  %v170_v6 = vadd.f32 1.0, %v20299_v1  ;;  %v112_v61 = vmul.f32 1.442695, %v69_v55  ;;  %v41_v1 = vld [vmem:[%s25237_s3 + $0x78] sm:$0xff] }
  0x51   :  { %20316 = vrcp.f32 %v154_v0  ;;  %v20303_v13 = vpop.eup %20302  ;;  %v197_v14 = vmul.f32 2.0, %v20301_v5  ;;  %v40_v0 = vld [vmem:[%s25237_s3 + $0x70] sm:$0xff] }
  0x52   :  { %1651 = vperm.xlu1 %20273, %v189_v21   ;;  %20318 = vpow2.f32 %v134_v2  ;;  %v171_v17 = vadd.f32 1.0, %v20303_v13  ;;  %v20305_v18 = vpop.eup %20304  ;;  %v72_v5 = vsub.f32 0.0, %v40_v0 }
  0x53   :  { %20320 = vrcp.f32 %v170_v6  ;;  %v20307_v21 = vpop.eup %20306  ;;  %v172_v23 = vadd.f32 1.0, %v20305_v18  ;;  %v73_v6 = vsub.f32 0.0, %v41_v1 }
  0x54   :  { %20322 = vpow2.f32 %v136_v4  ;;  %v20309_v26 = vpop.eup %20308  ;;  %v199_v27 = vmul.f32 2.0, %v20307_v21  ;;  %v118_v15 = vmul.f32 1.442695, %v72_v5 }
  0x55   :  { %20324 = vrcp.f32 %v171_v17  ;;  %v173_v30 = vadd.f32 1.0, %v20309_v26  ;;  %v20311_v31 = vpop.eup %20310  ;;  %v120_v16 = vmul.f32 1.442695, %v73_v6 }
  0x56   :  { %1656 = vperm.xlu1 %20273, %v191_v34   ;;  %20326 = vpow2.f32 %v106_v19  ;;  %v20313_v33 = vpop.eup %20312  ;;  %v174_v34 = vadd.f32 1.0, %v20311_v31  ;;  %v52_v19 = vld [vmem:[%s25237_s3 + $0xd0] sm:$0xff] }
  0x57   :  { %20328 = vrcp.f32 %v172_v23  ;;  %v175_v39 = vadd.f32 1.0, %v20313_v33  ;;  %v84_v23 = vsub.f32 0.0, %v52_v19 }
  0x58   :  { %20330 = vpow2.f32 %v108_v20 }
  0x59   :  { %20332 = vrcp.f32 %v173_v30  ;;  %v142_v28 = vmul.f32 1.442695, %v84_v23  ;;  %v786_v23 = vld [vmem:[%s25238_s0 + $0x40] sm:$0xff] }
  0x5a   :  { %1661 = vperm.xlu1 %20273, %v193_v45   ;;  %v20315_v38 = vpop.eup %20314  ;;  %20334 = vpow2.f32 %v114_v32 }
  0x5b   :  { %v20317_v42 = vpop.eup %20316  ;;  %v201_v43 = vmul.f32 2.0, %v20315_v38  ;;  %20336 = vrcp.f32 %v174_v34  ;;  %v778_v38 = vld [vmem:[%s25238_s0] sm:$0xff] }
  0x5c   :  { %v20319_v44 = vpop.eup %20318  ;;  %v187_v45 = vmul.f32 2.0, %v20317_v42  ;;  %20338 = vrcp.f32 %v175_v39  ;;  %17568 = vmatprep.mubr.msk.f32.mxu0 %vm314_vm0, %v778_v38  ;;  %v779_v42 = vld [vmem:[%s25238_s0 + $0x8] sm:$0xff] }
  0x5d   :  { %v20321_v48 = vpop.eup %20320  ;;  %v176_v49 = vadd.f32 1.0, %v20319_v44  ;;  %20340 = vpow2.f32 %v116_v35  ;;  %v53_v35 = vld [vmem:[%s25237_s3 + $0xd8] sm:$0xff]  ;;  %17569 = vmatmul.mubr.msk.f32.vlgmr.msra.gmra.mrb[0].mxu0 %vm314_vm0, %v779_v42  ;;  %v790_v42 = vld [vmem:[%s25238_s0 + $0x60] sm:$0xff] }
  0x5e   :  { %1666 = vperm.xlu1 %20273, %v195_v57   ;;  %v20323_v52 = vpop.eup %20322  ;;  %1646 = vperm.xlu0 %20272, %v187_v45   ;;  %v219_v53 = vmul.f32 2.0, %v20321_v48  ;;  %20342 = vpow2.f32 %v138_v46  ;;  %v85_v46 = vsub.f32 0.0, %v53_v35 }
  0x5f   :  { %v20325_v56 = vpop.eup %20324  ;;  %20344 = vrcp.f32 %v176_v49  ;;  %v177_v57 = vadd.f32 1.0, %v20323_v52  ;;  %v55_v49 = vld [vmem:[%s25237_s3 + $0xe8] sm:$0xff] }
  0x60   :  { %v20327_v58 = vpop.eup %20326  ;;  %v221_v59 = vmul.f32 2.0, %v20325_v56  ;;  %20346 = vpow2.f32 %v140_v47 }
  0x61   :  { %v20329_v62 = vpop.eup %20328  ;;  %20348 = vrcp.f32 %v177_v57  ;;  %v162_v63 = vadd.f32 1.0, %v20327_v58  ;;  %v56_v57 = vld [vmem:[%s25237_s3 + $0xf0] sm:$0xff] }
  0x62   :  { %1671 = vperm.xlu1 %20273, %v197_v14   ;;  %v20331_v2 = vpop.eup %20330  ;;  %1731 = vperm.xlu0 %20272, %v221_v59   ;;  %v223_v4 = vmul.f32 2.0, %v20329_v62  ;;  %20350 = vpow2.f32 %v110_v60  ;;  %v144_v60 = vmul.f32 1.442695, %v85_v46 }
  0x63   :  { %v20333_v11 = vpop.eup %20332  ;;  %20352 = vrcp.f32 %v162_v63  ;;  %v163_v12 = vadd.f32 1.0, %v20331_v2  ;;  %v783_v63 = vld [vmem:[%s25238_s0 + $0x28] sm:$0xff]  ;;  %v88_v2 = vsub.f32 0.0, %v56_v57 }
  0x64   :  { %v20335_v13 = vpop.eup %20334  ;;  %v225_v14 = vmul.f32 2.0, %v20333_v11  ;;  %20354 = vpow2.f32 %v112_v61  ;;  %v87_v61 = vsub.f32 0.0, %v55_v49  ;;  %v792_v49 = vld [vmem:[%s25238_s0 + $0x70] sm:$0xff] }
  0x65   :  { %v20337_v17 = vpop.eup %20336  ;;  %20356 = vrcp.f32 %v163_v12  ;;  %v166_v18 = vadd.f32 1.0, %v20335_v13 }
  0x66   :  { %1676 = vperm.xlu1 %20273, %v199_v27   ;;  %v20339_v20 = vpop.eup %20338  ;;  %1741 = vperm.xlu0 %20272, %v225_v14   ;;  %v227_v21 = vmul.f32 2.0, %v20337_v17  ;;  %20358 = vpow2.f32 %v118_v15  ;;  %v148_v13 = vmul.f32 1.442695, %v87_v61  ;;  %v57_v14 = vld [vmem:[%s25237_s3 + $0xf8] sm:$0xff] }
  0x67   :  { %v20341_v24 = vpop.eup %20340  ;;  %v229_v25 = vmul.f32 2.0, %v20339_v20  ;;  %20360 = vrcp.f32 %v166_v18  ;;  %v785_v17 = vld [vmem:[%s25238_s0 + $0x38] sm:$0xff] }
  0x68   :  { %v20343_v26 = vpop.eup %20342  ;;  %v167_v27 = vadd.f32 1.0, %v20341_v24  ;;  %20362 = vpow2.f32 %v120_v16 }
  0x69   :  { %v20345_v29 = vpop.eup %20344  ;;  %v178_v30 = vadd.f32 1.0, %v20343_v26 }
  0x6a   :  { %1681 = vperm.xlu1 %20273, %v201_v43   ;;  %v20347_v31 = vpop.eup %20346  ;;  %1751 = vperm.xlu0 %20272, %v229_v25   ;;  %v231_v32 = vmul.f32 2.0, %v20345_v29  ;;  %20364 = vrcp.f32 %v167_v27  ;;  %v780_v43 = vld [vmem:[%s25238_s0 + $0x10] sm:$0xff]  ;;  %v89_v25 = vsub.f32 0.0, %v57_v14 }
  0x6b   :  { %v20349_v33 = vpop.eup %20348  ;;  %20366 = vrcp.f32 %v178_v30  ;;  %v179_v34 = vadd.f32 1.0, %v20347_v31  ;;  %17571 = vmatprep.mubr.msk.f32.mxu0 %vm314_vm0, %v780_v43 }
  0x6c   :  { %v20351_v36 = vpop.eup %20350  ;;  %v233_v37 = vmul.f32 2.0, %v20349_v33  ;;  %20368 = vpow2.f32 %v142_v28  ;;  %17572 = vmatmul.mubr.msk.f32.gmra.mrb[2].mxu0 %vm314_vm0, %v781_v50  ;;  %v787_v28 = vld [vmem:[%s25238_s0 + $0x48] sm:$0xff] }
  0x6d   :  { %v20353_v39 = vpop.eup %20352  ;;  %20370 = vrcp.f32 %v179_v34  ;;  %v164_v40 = vadd.f32 1.0, %v20351_v36  ;;  %17574 = vmatprep.mubr.msk.f32.mxu0 %vm314_vm0, %v782_v54  ;;  %v152_v34 = vmul.f32 1.442695, %v89_v25 }
  0x6e   :  { %1726 = vperm.xlu1 %20273, %v219_v53   ;;  %v20355_v44 = vpop.eup %20354  ;;  %1761 = vperm.xlu0 %20272, %v233_v37   ;;  %v203_v45 = vmul.f32 2.0, %v20353_v39  ;;  %v86_v53 = vsub.f32 0.0, %v54_v41  ;;  %v789_v37 = vld [vmem:[%s25238_s0 + $0x58] sm:$0xff] }
  0x6f   :  { %v20357_v47 = vpop.eup %20356  ;;  %20372 = vrcp.f32 %v164_v40  ;;  %v165_v48 = vadd.f32 1.0, %v20355_v44 }
  0x70   :  { %v20359_v51 = vpop.eup %20358  ;;  %v205_v52 = vmul.f32 2.0, %v20357_v47  ;;  %v146_v1 = vmul.f32 1.442695, %v86_v53  ;;  %17575 = vmatmul.mubr.msk.f32.gmra.mrb[4].mxu0 %vm314_vm0, %v783_v63 }
  0x71   :  { %v20361_v55 = vpop.eup %20360  ;;  %20374 = vrcp.f32 %v165_v48  ;;  %v168_v56 = vadd.f32 1.0, %v20359_v51 }
  0x72   :  { %1736 = vperm.xlu1 %20273, %v223_v4   ;;  %v20363_v58 = vpop.eup %20362  ;;  %1691 = vperm.xlu0 %20272, %v205_v52   ;;  %v211_v59 = vmul.f32 2.0, %v20361_v55  ;;  %v784_v4 = vld [vmem:[%s25238_s0 + $0x30] sm:$0xff]  ;;  %v793_v55 = vld [vmem:[%s25238_s0 + $0x78] sm:$0xff] }
  0x73   :  { %20376 = vrcp.f32 %v168_v56  ;;  %v169_v62 = vadd.f32 1.0, %v20363_v58  ;;  %17577 = vmatprep.mubr.msk.f32.mxu0 %vm314_vm0, %v784_v4 }
  0x74   :  { %v20365_v0 = vpop.eup %20364  ;;  %17578 = vmatmul.mubr.msk.f32.gmra.mrb[6].mxu0 %vm314_vm0, %v785_v17 }
  0x75   :  { %v20367_v5 = vpop.eup %20366  ;;  %v213_v6 = vmul.f32 2.0, %v20365_v0  ;;  %20378 = vrcp.f32 %v169_v62  ;;  %17580 = vmatprep.mubr.msk.f32.mxu0 %vm314_vm0, %v786_v23 }
  0x76   :  { %1746 = vperm.xlu1 %20273, %v227_v21   ;;  %v20369_v11 = vpop.eup %20368  ;;  %v235_v12 = vmul.f32 2.0, %v20367_v5  ;;  %20380 = vpow2.f32 %v144_v60  ;;  %v150_v21 = vmul.f32 1.442695, %v88_v2  ;;  %v794_v60 = vld [vmem:[%s25238_s0 + $0x80] sm:$0xff] }
  0x77   :  { %v20371_v15 = vpop.eup %20370  ;;  %1711 = vperm.xlu0 %20272, %v213_v6   ;;  %v180_v16 = vadd.f32 1.0, %v20369_v11  ;;  %20382 = vpow2.f32 %v146_v1  ;;  %v795_v6 = vld [vmem:[%s25238_s0 + $0x88] sm:$0xff] }
  0x78   :  { %v237_v20 = vmul.f32 2.0, %v20371_v15  ;;  %20384 = vpow2.f32 %v148_v13  ;;  %17581 = vmatmul.mubr.msk.f32.gmra.mrb[8].mxu0 %vm314_vm0, %v787_v28  ;;  %v796_v15 = vld [vmem:[%s25238_s0 + $0x90] sm:$0xff] }
  0x79   :  { %v20373_v24 = vpop.eup %20372  ;;  %20386 = vrcp.f32 %v180_v16 }
  0x7a   :  { %1756 = vperm.xlu1 %20273, %v231_v32   ;;  %v207_v27 = vmul.f32 2.0, %v20373_v24  ;;  %20388 = vpow2.f32 %v150_v21  ;;  %v788_v32 = vld [vmem:[%s25238_s0 + $0x50] sm:$0xff] }
  0x7b   :  { %v20375_v26 = vpop.eup %20374  ;;  %1771 = vperm.xlu0 %20272, %v237_v20   ;;  %17583 = vmatprep.mubr.msk.f32.mxu0 %vm314_vm0, %v788_v32 }
  0x7c   :  { %v209_v31 = vmul.f32 2.0, %v20375_v26  ;;  %17584 = vmatmul.mubr.msk.f32.gmra.mrb[10].mxu0 %vm314_vm0, %v789_v37 }
  0x7d   :  { %v20377_v33 = vpop.eup %20376  ;;  %17586 = vmatprep.mubr.msk.f32.mxu0 %vm314_vm0, %v790_v42 }
  0x7e   :  { %1686 = vperm.xlu1 %20273, %v203_v45   ;;  %v215_v36 = vmul.f32 2.0, %v20377_v33  ;;  %v791_v45 = vld [vmem:[%s25238_s0 + $0x68] sm:$0xff]  ;;  %v798_v33 = vld [vmem:[%s25238_s0 + $0xa0] sm:$0xff] }
  0x7f   :  { %v20379_v35 = vpop.eup %20378  ;;  %1701 = vperm.xlu0 %20272, %v209_v31  }
  0x80   :  { %v20381_v38 = vpop.eup %20380  ;;  %v217_v41 = vmul.f32 2.0, %v20379_v35  ;;  %17587 = vmatmul.mubr.msk.f32.gmra.mrb[12].mxu0 %vm314_vm0, %v791_v45 }
  0x81   :  { %v20383_v43 = vpop.eup %20382  ;;  %v181_v44 = vadd.f32 1.0, %v20381_v38  ;;  %17589 = vmatprep.mubr.msk.f32.mxu0 %vm314_vm0, %v792_v49 }
  0x82   :  { %1706 = vperm.xlu1 %20273, %v211_v59   ;;  %v20385_v46 = vpop.eup %20384  ;;  %v182_v51 = vadd.f32 1.0, %v20383_v43 }
  0x83   :  { %1721 = vperm.xlu0 %20272, %v217_v41   ;;  %v20387_v50 = vpop.eup %20386  ;;  %v183_v63 = vadd.f32 1.0, %v20385_v46 }
  0x84   :  { %v20389_v52 = vpop.eup %20388  ;;  %v239_v54 = vmul.f32 2.0, %v20387_v50  ;;  %17590 = vmatmul.mubr.msk.f32.gmra.mrb[14].mxu0 %vm314_vm0, %v793_v55 }
  0x85   :  { %v184_v2 = vadd.f32 1.0, %v20389_v52  ;;  %17592 = vmatprep.mubr.msk.f32.mxu0 %vm314_vm0, %v794_v60 }
  0x86   :  { %1766 = vperm.xlu1 %20273, %v235_v12  }
  0x88   :  { %17593 = vmatmul.mubr.msk.f32.gmra.mrb[16].mxu0 %vm314_vm0, %v795_v6 }
  0x89   :  { %17595 = vmatprep.mubr.msk.f32.mxu0 %vm314_vm0, %v796_v15 }
  0x8a   :  { %1696 = vperm.xlu1 %20273, %v207_v27   ;;  %v797_v27 = vld [vmem:[%s25238_s0 + $0x98] sm:$0xff] }
  0x8c   :  { %17596 = vmatmul.mubr.msk.f32.gmra.mrb[18].mxu0 %vm314_vm0, %v797_v27 }
  0x8d   :  { %17598 = vmatprep.mubr.msk.f32.mxu0 %vm314_vm0, %v798_v33 }
  0x8e   :  { %1716 = vperm.xlu1 %20273, %v215_v36  }
  0x92   :  { %v21143_v18 = vpop.xlane.xlu0 %316  ;;  %v21145_v19 = vpop.xlane.xlu1 %322  ;;  %1776 = vperm.xlu1 %20273, %v239_v54  }
  0x93   :  { %20390 = vrsqrt.f32 %v21145_v19  ;;  %vm413_vm8 = vcmp.eq.f32.partialorder %v21143_v18, inf  ;;  %v416_v57 = vand.u32 2147483648, %v21143_v18  ;;  %vm427_vm9 = vcmp.eq.f32.partialorder %v21145_v19, inf }
  0x94   :  { %20392 = vrsqrt.f32 %v21143_v18  ;;  %vm429_vm10 = vcmp.eq.f32.partialorder %v21145_v19, 0.0  ;;  %v430_v62 = vand.u32 2147483648, %v21145_v19  ;;  %vm415_vm11 = vcmp.eq.f32.partialorder %v21143_v18, 0.0 }
  0x96   :  { %v21155_v29 = vpop.xlane.xlu0 %319  ;;  %v21157_v30 = vpop.xlane.xlu1 %325 }
  0x97   :  { %20394 = vrsqrt.f32 %v21155_v29  ;;  %vm420_vm12 = vcmp.eq.f32.partialorder %v21155_v29, inf  ;;  %vm422_vm13 = vcmp.eq.f32.partialorder %v21155_v29, 0.0  ;;  %v423_v12 = vand.u32 2147483648, %v21155_v29 }
  0x98   :  { %20396 = vrsqrt.f32 %v21157_v30  ;;  %vm434_vm14 = vcmp.eq.f32.partialorder %v21157_v30, inf  ;;  %vm436_vm15 = vcmp.eq.f32.partialorder %v21157_v30, 0.0  ;;  %v437_v20 = vand.u32 2147483648, %v21157_v30 }
  0x99   :  { %20398 = vpow2.f32 %v152_v34 }
  0x9a   :  { %v21171_v39 = vpop.xlane.xlu0 %328  ;;  %v21173_v40 = vpop.xlane.xlu1 %331 }
  0x9b   :  { %20400 = vrsqrt.f32 %v21171_v39  ;;  %vm441_vm1 = vcmp.eq.f32.partialorder %v21171_v39, inf  ;;  %vm443_vm2 = vcmp.eq.f32.partialorder %v21171_v39, 0.0  ;;  %v444_v25 = vand.u32 2147483648, %v21171_v39 }
  0x9c   :  { %20402 = vrsqrt.f32 %v21173_v40  ;;  %vm448_vm3 = vcmp.eq.f32.partialorder %v21173_v40, inf  ;;  %vm450_vm4 = vcmp.eq.f32.partialorder %v21173_v40, 0.0  ;;  %v451_v42 = vand.u32 2147483648, %v21173_v40 }
  0x9d   :  { %v20391_v53 = vpop.eup %20390  ;;  %20404 = vrcp.f32 %v181_v44 }
  0x9e   :  { %v21185_v47 = vpop.xlane.xlu0 %334  ;;  %v21187_v48 = vpop.xlane.xlu1 %337  ;;  %v426_v1 = vmul.f32 %v20391_v53, %v21145_v19  ;;  %v800_v53 = vld [vmem:[%s25238_s0 + $0xb0] sm:$0xff] }
  0x9f   :  { %v20393_v56 = vpop.eup %20392  ;;  %20406 = vrsqrt.f32 %v21185_v47  ;;  %vm455_vm5 = vcmp.eq.f32.partialorder %v21185_v47, inf  ;;  %vm457_vm6 = vcmp.eq.f32.partialorder %v21185_v47, 0.0  ;;  %v458_v45 = vand.u32 2147483648, %v21185_v47 }
  0xa0   :  { %20408 = vrcp.f32 %v182_v51  ;;  %v412_v5 = vmul.f32 %v20393_v56, %v21143_v18  ;;  %v428_v23 = vsel %vm427_vm9, %v21145_v19, %v426_v1  ;;  %vm462_vm7 = vcmp.eq.f32.partialorder %v21187_v48, inf }
  0xa1   :  { %v20395_v61 = vpop.eup %20394  ;;  %20410 = vrsqrt.f32 %v21187_v48  ;;  %v21268_v35 = vsel %vm429_vm10, %v430_v62, %v428_v23  ;;  %v465_v50 = vand.u32 2147483648, %v21187_v48 }
  0xa2   :  { %v21201_v58 = vpop.xlane.xlu0 %340  ;;  %v21203_v59 = vpop.xlane.xlu1 %343  ;;  %v419_v11 = vmul.f32 %v20395_v61, %v21155_v29  ;;  %v414_v26 = vsel %vm413_vm8, %v21143_v18, %v412_v5  ;;  %v799_v18 = vld [vmem:[%s25238_s0 + $0xa8] sm:$0xff]  ;;  %v637_v49 = vmax.f32 %v21268_v35, 1e-12  ;;  %vm464_vm8 = vcmp.eq.f32.partialorder %v21187_v48, 0.0 }
  0xa3   :  { %v20397_v0 = vpop.eup %20396  ;;  %20412 = vrsqrt.f32 %v21201_v58  ;;  %v417_v19 = vsel %vm415_vm11, %v416_v57, %v414_v26  ;;  %vm469_vm9 = vcmp.eq.f32.partialorder %v21201_v58, inf  ;;  %v472_v62 = vand.u32 2147483648, %v21201_v58  ;;  %17599 = vmatmul.mubr.msk.f32.gmra.mrb[20].mxu0 %vm314_vm0, %v799_v18 }
  0xa4   :  { %v20399_v4 = vpop.eup %20398  ;;  %20414 = vrsqrt.f32 %v21203_v59  ;;  %v433_v17 = vmul.f32 %v20397_v0, %v21157_v30  ;;  %v421_v28 = vsel %vm420_vm12, %v21155_v29, %v419_v11  ;;  %v635_v57 = vmax.f32 %v417_v19, 1e-12  ;;  %17601 = vmatprep.mubr.msk.f32.mxu0 %vm314_vm0, %v800_v53 }
  0xa5   :  { %v20401_v16 = vpop.eup %20400  ;;  %20416 = vrcp.f32 %v183_v63  ;;  %v185_v24 = vadd.f32 1.0, %v20399_v4  ;;  %v424_v44 = vsel %vm422_vm13, %v423_v12, %v421_v28  ;;  %vm476_vm10 = vcmp.eq.f32.partialorder %v21203_v59, inf }
  0xa6   :  { %v21226_v13 = vpop.xlane.xlu0 %346  ;;  %v21228_v14 = vpop.xlane.xlu1 %349  ;;  %20418 = vrcp.f32 %v184_v2  ;;  %v435_v36 = vsel %vm434_vm14, %v21157_v30, %v433_v17  ;;  %v440_v37 = vmul.f32 %v20401_v16, %v21171_v39  ;;  %v636_v61 = vmax.f32 %v424_v44, 1e-12  ;;  %v801_v2 = vld [vmem:[%s25238_s0 + $0xb8] sm:$0xff]  ;;  %v802_v16 = vld [vmem:[%s25238_s0 + $0xc0] sm:$0xff] }
  0xa7   :  { %v20403_v21 = vpop.eup %20402  ;;  %20420 = vrsqrt.f32 %v21226_v13  ;;  %v21297_v29 = vsel %vm436_vm15, %v437_v20, %v435_v36  ;;  %vm471_vm11 = vcmp.eq.f32.partialorder %v21201_v58, 0.0  ;;  %vm478_vm12 = vcmp.eq.f32.partialorder %v21203_v59, 0.0  ;;  %17602 = vmatmul.mubr.msk.f32.gmra.mrb[22].mxu0 %vm314_vm0, %v801_v2 }
  0xa8   :  { %20422 = vrsqrt.f32 %v21228_v14  ;;  %v21264_v34 = vpop.eup %20404  ;;  %v447_v38 = vmul.f32 %v20403_v21, %v21173_v40  ;;  %v442_v55 = vsel %vm441_vm1, %v21171_v39, %v440_v37  ;;  %v638_v0 = vmax.f32 %v21297_v29, 1e-12  ;;  %17604 = vmatprep.mubr.msk.f32.mxu0 %vm314_vm0, %v802_v16 }
  0xa9   :  { %v20407_v41 = vpop.eup %20406  ;;  %20424 = vrcp.f32 %v185_v24  ;;  %v479_v1 = vand.u32 2147483648, %v21203_v59  ;;  %v21334_v5 = vsel %vm443_vm2, %v444_v25, %v442_v55  ;;  %vm483_vm13 = vcmp.eq.f32.partialorder %v21226_v13, inf  ;;  %v803_v24 = vld [vmem:[%s25238_s0 + $0xc8] sm:$0xff] }
  0xaa   :  { %v21257_v31 = vpop.xlane.xlu0 %352  ;;  %v21259_v32 = vpop.xlane.xlu1 %355  ;;  %v449_v30 = vsel %vm448_vm3, %v21173_v40, %v447_v38  ;;  %v454_v56 = vmul.f32 %v20407_v41, %v21185_v47  ;;  %v486_v23 = vand.u32 2147483648, %v21226_v13  ;;  %vm490_vm14 = vcmp.eq.f32.partialorder %v21228_v14, inf }
  0xab   :  { %v21282_v43 = vpop.eup %20408  ;;  %20426 = vrsqrt.f32 %v21257_v31  ;;  %v21338_v6 = vsel %vm450_vm4, %v451_v42, %v449_v30  ;;  %v639_v25 = vmax.f32 %v21334_v5, 1e-12  ;;  %vm485_vm15 = vcmp.eq.f32.partialorder %v21226_v13, 0.0  ;;  %v804_v42 = vld [vmem:[%s25238_s0 + $0xd0] sm:$0xff]  ;;  %17605 = vmatmul.mubr.msk.f32.gmra.mrb[24].mxu0 %vm314_vm0, %v803_v24 }
  0xac   :  { %v20411_v46 = vpop.eup %20410  ;;  %20428 = vrsqrt.f32 %v21259_v32  ;;  %v456_v39 = vsel %vm455_vm5, %v21185_v47, %v454_v56  ;;  %v640_v26 = vmax.f32 %v21338_v6, 1e-12  ;;  %vm492_vm1 = vcmp.eq.f32.partialorder %v21228_v14, 0.0  ;;  %17607 = vmatprep.mubr.msk.f32.mxu0 %vm314_vm0, %v804_v42 }
  0xad   :  { %v20413_v54 = vpop.eup %20412  ;;  %20430 = vrcp.f32 %v635_v57  ;;  %v461_v11 = vmul.f32 %v20411_v46, %v21187_v48  ;;  %v493_v27 = vand.u32 2147483648, %v21228_v14  ;;  %v21372_v33 = vsel %vm457_vm6, %v458_v45, %v456_v39 }
  0xae   :  { %v21301_v51 = vpop.xlane.xlu0 %358  ;;  %v21303_v52 = vpop.xlane.xlu1 %361  ;;  %v468_v40 = vmul.f32 %v20413_v54, %v21201_v58  ;;  %vm497_vm2 = vcmp.eq.f32.partialorder %v21257_v31, inf  ;;  %v500_v46 = vand.u32 2147483648, %v21257_v31  ;;  %vm504_vm3 = vcmp.eq.f32.partialorder %v21259_v32, inf }
  0xaf   :  { %v20415_v60 = vpop.eup %20414  ;;  %20432 = vrsqrt.f32 %v21301_v51  ;;  %v463_v36 = vsel %vm462_vm7, %v21187_v48, %v461_v11  ;;  %v641_v29 = vmax.f32 %v21372_v33, 1e-12  ;;  %vm499_vm4 = vcmp.eq.f32.partialorder %v21257_v31, 0.0 }
  0xb0   :  { %v21320_v63 = vpop.eup %20416  ;;  %v475_v20 = vmul.f32 %v20415_v60, %v21203_v59  ;;  %20434 = vrsqrt.f32 %v21303_v52  ;;  %v470_v47 = vsel %vm469_vm9, %v21201_v58, %v468_v40  ;;  %v21405_v53 = vsel %vm464_vm8, %v465_v50, %v463_v36  ;;  %v20659_v40 = vld [vmem:[%s25236_s1 + $0x8] sm:$0xff] }
  0xb1   :  { %v21330_v4 = vpop.eup %20418  ;;  %20436 = vrcp.f32 %v636_v61  ;;  %vm506_vm5 = vcmp.eq.f32.partialorder %v21259_v32, 0.0  ;;  %v507_v54 = vand.u32 2147483648, %v21259_v32  ;;  %v21415_v35 = vsel %vm471_vm11, %v472_v62, %v470_v47  ;;  %v20658_v61 = vld [vmem:[%s25236_s1] sm:$0xff] }
  0xb2   :  { %v21342_v12 = vpop.xlane.xlu0 %364  ;;  %v21344_v15 = vpop.xlane.xlu1 %367  ;;  %v477_v44 = vsel %vm476_vm10, %v21203_v59, %v475_v20  ;;  %v642_v60 = vmax.f32 %v21405_v53, 1e-12  ;;  %vm511_vm6 = vcmp.eq.f32.partialorder %v21301_v51, inf  ;;  %v643_v2 = vmax.f32 %v21415_v35, 1e-12 }
  0xb3   :  { %v20421_v17 = vpop.eup %20420  ;;  %20438 = vrsqrt.f32 %v21342_v12  ;;  %v21419_v48 = vsel %vm478_vm12, %v479_v1, %v477_v44  ;;  %vm518_vm7 = vcmp.eq.f32.partialorder %v21303_v52, inf  ;;  %vm513_vm8 = vcmp.eq.f32.partialorder %v21301_v51, 0.0 }
  0xb4   :  { %v20423_v21 = vpop.eup %20422  ;;  %v482_v37 = vmul.f32 %v20421_v17, %v21226_v13  ;;  %20440 = vrsqrt.f32 %v21344_v15  ;;  %v644_v5 = vmax.f32 %v21419_v48, 1e-12  ;;  %vm520_vm9 = vcmp.eq.f32.partialorder %v21303_v52, 0.0 }
  0xb5   :  { %v21368_v28 = vpop.eup %20424  ;;  %v489_v45 = vmul.f32 %v20423_v21, %v21228_v14  ;;  %20442 = vrcp.f32 %v637_v49  ;;  %vm525_vm10 = vcmp.eq.f32.partialorder %v21342_v12, inf  ;;  %v528_v36 = vand.u32 2147483648, %v21342_v12 }
  0xb6   :  { %v21379_v38 = vpop.xlane.xlu0 %370  ;;  %v21381_v41 = vpop.xlane.xlu1 %373  ;;  %20444 = vrcp.f32 %v638_v0  ;;  %v484_v49 = vsel %vm483_vm13, %v21226_v13, %v482_v37  ;;  %v514_v0 = vand.u32 2147483648, %v21301_v51  ;;  %vm527_vm11 = vcmp.eq.f32.partialorder %v21342_v12, 0.0 }
  0xb7   :  { %v20427_v19 = vpop.eup %20426  ;;  %20446 = vrsqrt.f32 %v21379_v38  ;;  %v491_v58 = vsel %vm490_vm14, %v21228_v14, %v489_v45  ;;  %v21448_v11 = vsel %vm485_vm15, %v486_v23, %v484_v49  ;;  %vm532_vm12 = vcmp.eq.f32.partialorder %v21344_v15, inf }
  0xb8   :  { %v20429_v18 = vpop.eup %20428  ;;  %v496_v56 = vmul.f32 %v20427_v19, %v21257_v31  ;;  %20448 = vrsqrt.f32 %v21381_v41  ;;  %v21452_v16 = vsel %vm492_vm1, %v493_v27, %v491_v58  ;;  %v645_v27 = vmax.f32 %v21448_v11, 1e-12 }
  0xb9   :  { %v20431_v30 = vpop.eup %20430  ;;  %v503_v59 = vmul.f32 %v20429_v18, %v21259_v32  ;;  %20450 = vrcp.f32 %v639_v25  ;;  %v521_v25 = vand.u32 2147483648, %v21303_v52  ;;  %v646_v33 = vmax.f32 %v21452_v16, 1e-12 }
  0xba   :  { %v21425_v50 = vpop.xlane.xlu0 %376  ;;  %v21427_v55 = vpop.xlane.xlu1 %379  ;;  %v21439_v62 = vmul.f32 %v20658_v61, %v20431_v30  ;;  %20452 = vrcp.f32 %v640_v26  ;;  %v498_v13 = vsel %vm497_vm2, %v21257_v31, %v496_v56  ;;  %vm534_vm13 = vcmp.eq.f32.partialorder %v21344_v15, 0.0  ;;  %v20660_v31 = vld [vmem:[%s25236_s1 + $0x10] sm:$0xff] }
  0xbb   :  { %v20433_v57 = vpop.eup %20432  ;;  %v505_v14 = vsel %vm504_vm3, %v21259_v32, %v503_v59  ;;  %20454 = vrsqrt.f32 %v21425_v50  ;;  %v21486_v42 = vsel %vm499_vm4, %v500_v46, %v498_v13  ;;  %v535_v45 = vand.u32 2147483648, %v21344_v15 }
  0xbc   :  { %v20435_v1 = vpop.eup %20434  ;;  %17624 = vmatprep.mubr.msk.f32.mxu1 %vm314_vm0, %v21439_v62  ;;  %v510_v23 = vmul.f32 %v20433_v57, %v21301_v51  ;;  %20456 = vrsqrt.f32 %v21427_v55  ;;  %v21490_v19 = vsel %vm506_vm5, %v507_v54, %v505_v14  ;;  %v20661_v54 = vld [vmem:[%s25236_s1 + $0x18] sm:$0xff]  ;;  %vm539_vm14 = vcmp.eq.f32.partialorder %v21379_v38, inf }
  0xbd   :  { %v20437_v6 = vpop.eup %20436  ;;  %v517_v24 = vmul.f32 %v20435_v1, %v21303_v52  ;;  %20458 = vrcp.f32 %v641_v29  ;;  %v647_v56 = vmax.f32 %v21486_v42, 1e-12  ;;  %v648_v59 = vmax.f32 %v21490_v19, 1e-12 }
  0xbe   :  { %v21458_v17 = vpop.xlane.xlu0 %382  ;;  %v21460_v39 = vpop.xlane.xlu1 %385  ;;  %v21471_v20 = vmul.f32 %v20659_v40, %v20437_v6  ;;  %20460 = vrcp.f32 %v642_v60  ;;  %v512_v29 = vsel %vm511_vm6, %v21301_v51, %v510_v23  ;;  %v542_v60 = vand.u32 2147483648, %v21379_v38 }
  0xbf   :  { %v20439_v21 = vpop.eup %20438  ;;  %v519_v53 = vsel %vm518_vm7, %v21303_v52, %v517_v24  ;;  %20462 = vrsqrt.f32 %v21458_v17  ;;  %vm546_vm15 = vcmp.eq.f32.partialorder %v21381_v41, inf  ;;  %v549_v61 = vand.u32 2147483648, %v21381_v41  ;;  %v20662_v52 = vld [vmem:[%s25236_s1 + $0x20] sm:$0xff] }
  0xc0   :  { %v20441_v26 = vpop.eup %20440  ;;  %17625 = vmatmul.mubr.msk.f32.vlgmr.msra.gmra.mrb[0].mxu1 %vm314_vm0, %v21471_v20  ;;  %v524_v44 = vmul.f32 %v20439_v21, %v21342_v12  ;;  %20464 = vrsqrt.f32 %v21460_v39  ;;  %v21534_v6 = vsel %vm513_vm8, %v514_v0, %v512_v29  ;;  %v21538_v13 = vsel %vm520_vm9, %v521_v25, %v519_v53 }
  0xc1   :  { %v20443_v37 = vpop.eup %20442  ;;  %v531_v57 = vmul.f32 %v20441_v26, %v21344_v15  ;;  %vm541_vm1 = vcmp.eq.f32.partialorder %v21379_v38, 0.0  ;;  %vm548_vm2 = vcmp.eq.f32.partialorder %v21381_v41, 0.0  ;;  %20466 = vrcp.f32 %v643_v2  ;;  %v20663_v2 = vld [vmem:[%s25236_s1 + $0x28] sm:$0xff] }
  0xc2   :  { %v20445_v47 = vpop.eup %20444  ;;  %v21500_v18 = vmul.f32 %v20660_v31, %v20443_v37  ;;  %v21502_v32 = vpop.xlane.xlu0 %388  ;;  %v526_v14 = vsel %vm525_vm10, %v21342_v12, %v524_v44  ;;  %20468 = vrcp.f32 %v644_v5  ;;  %vm553_vm3 = vcmp.eq.f32.partialorder %v21425_v50, inf }
  0xc3   :  { %v20447_v46 = vpop.eup %20446  ;;  %v21513_v49 = vmul.f32 %v20661_v54, %v20445_v47  ;;  %v21516_v30 = vpop.xlane.xlu1 %391  ;;  %v533_v35 = vsel %vm532_vm12, %v21344_v15, %v531_v57  ;;  %20470 = vrsqrt.f32 %v21502_v32  ;;  %v649_v48 = vmax.f32 %v21534_v6, 1e-12  ;;  %v20664_v15 = vld [vmem:[%s25236_s1 + $0x30] sm:$0xff]  ;;  %v20665_v57 = vld [vmem:[%s25236_s1 + $0x38] sm:$0xff] }
  0xc4   :  { %v20449_v58 = vpop.eup %20448  ;;  %17627 = vmatprep.mubr.msk.f32.mxu1 %vm314_vm0, %v21500_v18  ;;  %v538_v51 = vmul.f32 %v20447_v46, %v21379_v38  ;;  %v650_v5 = vmax.f32 %v21538_v13, 1e-12  ;;  %v556_v37 = vand.u32 2147483648, %v21425_v50  ;;  %vm560_vm4 = vcmp.eq.f32.partialorder %v21427_v55, inf  ;;  %v20669_v6 = vld [vmem:[%s25236_s1 + $0x58] sm:$0xff] }
  0xc5   :  { %17628 = vmatmul.mubr.msk.f32.gmra.mrb[2].mxu1 %vm314_vm0, %v21513_v49  ;;  %v20451_v1 = vpop.eup %20450  ;;  %v545_v0 = vmul.f32 %v20449_v58, %v21381_v41  ;;  %v21578_v44 = vsel %vm527_vm11, %v528_v36, %v526_v14  ;;  %vm555_vm5 = vcmp.eq.f32.partialorder %v21425_v50, 0.0  ;;  %vm562_vm6 = vcmp.eq.f32.partialorder %v21427_v55, 0.0 }
  0xc6   :  { %v20453_v40 = vpop.eup %20452  ;;  %v21552_v21 = vmul.f32 %v20662_v52, %v20451_v1  ;;  %v21566_v25 = vpop.xlane.xlu0 %394  ;;  %v563_v31 = vand.u32 2147483648, %v21427_v55  ;;  %20472 = vrsqrt.f32 %v21516_v30  ;;  %v21588_v29 = vsel %vm534_vm13, %v535_v45, %v533_v35 }
  0xc7   :  { %v20455_v23 = vpop.eup %20454  ;;  %v21562_v24 = vmul.f32 %v20663_v2, %v20453_v40  ;;  %v21574_v47 = vpop.xlane.xlu1 %397  ;;  %v540_v12 = vsel %vm539_vm14, %v21379_v38, %v538_v51  ;;  %v547_v36 = vsel %vm546_vm15, %v21381_v41, %v545_v0  ;;  %20474 = vrcp.f32 %v645_v27  ;;  %v20666_v2 = vld [vmem:[%s25236_s1 + $0x40] sm:$0xff] }
  0xc8   :  { %v20457_v26 = vpop.eup %20456  ;;  %17630 = vmatprep.mubr.msk.f32.mxu1 %vm314_vm0, %v21552_v21  ;;  %v552_v54 = vmul.f32 %v20455_v23, %v21425_v50  ;;  %20476 = vrcp.f32 %v646_v33  ;;  %vm567_vm7 = vcmp.eq.f32.partialorder %v21458_v17, inf  ;;  %vm569_vm8 = vcmp.eq.f32.partialorder %v21458_v17, 0.0 }
  0xc9   :  { %17631 = vmatmul.mubr.msk.f32.gmra.mrb[4].mxu1 %vm314_vm0, %v21562_v24  ;;  %v20459_v46 = vpop.eup %20458  ;;  %v559_v58 = vmul.f32 %v20457_v26, %v21427_v55  ;;  %20478 = vrsqrt.f32 %v21566_v25  ;;  %v651_v1 = vmax.f32 %v21578_v44, 1e-12  ;;  %v652_v14 = vmax.f32 %v21588_v29, 1e-12  ;;  %v20671_v29 = vld [vmem:[%s25236_s1 + $0x68] sm:$0xff] }
  0xca   :  { %v20461_v53 = vpop.eup %20460  ;;  %v21603_v45 = vmul.f32 %v20664_v15, %v20459_v46  ;;  %v570_v16 = vand.u32 2147483648, %v21458_v17  ;;  %vm574_vm9 = vcmp.eq.f32.partialorder %v21460_v39, inf  ;;  %v21621_v33 = vpop.xlane.xlu0 %400  ;;  %v21625_v51 = vsel %vm541_vm1, %v542_v60, %v540_v12 }
  0xcb   :  { %v21610_v11 = vmul.f32 %v20665_v57, %v20461_v53  ;;  %v20463_v27 = vpop.eup %20462  ;;  %v21629_v0 = vsel %vm548_vm2, %v549_v61, %v547_v36  ;;  %v577_v52 = vand.u32 2147483648, %v21460_v39  ;;  %20480 = vrsqrt.f32 %v21574_v47  ;;  %v21635_v23 = vpop.xlane.xlu1 %403 }
  0xcc   :  { %17633 = vmatprep.mubr.msk.f32.mxu1 %vm314_vm0, %v21603_v45  ;;  %v20465_v40 = vpop.eup %20464  ;;  %v554_v38 = vsel %vm553_vm3, %v21425_v50, %v552_v54  ;;  %v561_v41 = vsel %vm560_vm4, %v21427_v55, %v559_v58  ;;  %vm576_vm10 = vcmp.eq.f32.partialorder %v21460_v39, 0.0  ;;  %vm581_vm11 = vcmp.eq.f32.partialorder %v21502_v32, inf }
  0xcd   :  { %17634 = vmatmul.mubr.msk.f32.gmra.mrb[6].mxu1 %vm314_vm0, %v21610_v11  ;;  %v20467_v35 = vpop.eup %20466  ;;  %20482 = vrcp.f32 %v647_v56  ;;  %v566_v61 = vmul.f32 %v20463_v27, %v21458_v17  ;;  %vm583_vm12 = vcmp.eq.f32.partialorder %v21502_v32, 0.0  ;;  %v653_v12 = vmax.f32 %v21625_v51, 1e-12  ;;  %v20667_v56 = vld [vmem:[%s25236_s1 + $0x48] sm:$0xff] }
  0xce   :  { %v20469_v60 = vpop.eup %20468  ;;  %v21651_v26 = vmul.f32 %v20666_v2, %v20467_v35  ;;  %20484 = vrcp.f32 %v648_v59  ;;  %v654_v42 = vmax.f32 %v21629_v0, 1e-12  ;;  %v21666_v53 = vsel %vm555_vm5, %v556_v37, %v554_v38  ;;  %v21683_v55 = vpop.xlane.xlu0 %406  ;;  %v20668_v38 = vld [vmem:[%s25236_s1 + $0x50] sm:$0xff] }
  0xcf   :  { %v20471_v46 = vpop.eup %20470  ;;  %v21661_v36 = vmul.f32 %v20667_v56, %v20469_v60  ;;  %20486 = vrsqrt.f32 %v21621_v33  ;;  %v21670_v19 = vsel %vm562_vm6, %v563_v31, %v561_v41  ;;  %v584_v59 = vand.u32 2147483648, %v21502_v32  ;;  %v21692_v57 = vpop.xlane.xlu1 %409 }
  0xd0   :  { %17636 = vmatprep.mubr.msk.f32.mxu1 %vm314_vm0, %v21651_v26  ;;  %vm588_vm13 = vcmp.eq.f32.partialorder %v21516_v30, inf  ;;  %v20473_v54 = vpop.eup %20472  ;;  %v573_v58 = vmul.f32 %v20465_v40, %v21460_v39  ;;  %vm590_vm14 = vcmp.eq.f32.partialorder %v21516_v30, 0.0  ;;  %v591_v50 = vand.u32 2147483648, %v21516_v30 }
  0xd1   :  { %17637 = vmatmul.mubr.msk.f32.gmra.mrb[8].mxu1 %vm314_vm0, %v21661_v36  ;;  %vm595_vm15 = vcmp.eq.f32.partialorder %v21566_v25, inf  ;;  %20488 = vrsqrt.f32 %v21635_v23  ;;  %v20475_v37 = vpop.eup %20474  ;;  %v568_v31 = vsel %vm567_vm7, %v21458_v17, %v566_v61  ;;  %v580_v15 = vmul.f32 %v20471_v46, %v21502_v32 }
  0xd2   :  { %vm597_vm1 = vcmp.eq.f32.partialorder %v21566_v25, 0.0  ;;  %20490 = vrcp.f32 %v649_v48  ;;  %v20477_v27 = vpop.eup %20476  ;;  %v655_v40 = vmax.f32 %v21666_v53, 1e-12  ;;  %v656_v35 = vmax.f32 %v21670_v19, 1e-12 }
  0xd3   :  { %v21699_v41 = vmul.f32 %v20668_v38, %v20475_v37  ;;  %20492 = vrcp.f32 %v650_v5  ;;  %v20479_v60 = vpop.eup %20478  ;;  %v21706_v48 = vmul.f32 %v20669_v6, %v20477_v27  ;;  %v598_v61 = vand.u32 2147483648, %v21566_v25  ;;  %v20670_v27 = vld [vmem:[%s25236_s1 + $0x60] sm:$0xff] }
  0xd4   :  { %vm602_vm2 = vcmp.eq.f32.partialorder %v21574_v47, inf  ;;  %20494 = vrsqrt.f32 %v21683_v55  ;;  %v571_v2 = vsel %vm569_vm8, %v570_v16, %v568_v31  ;;  %v575_v13 = vsel %vm574_vm9, %v21460_v39, %v573_v58 }
  0xd5   :  { %v587_v5 = vmul.f32 %v20473_v54, %v21516_v30  ;;  %17639 = vmatprep.mubr.msk.f32.mxu1 %vm314_vm0, %v21699_v41  ;;  %20496 = vrsqrt.f32 %v21692_v57  ;;  %v20481_v46 = vpop.eup %20480  ;;  %v582_v56 = vsel %vm581_vm11, %v21502_v32, %v580_v15  ;;  %v594_v17 = vmul.f32 %v20479_v60, %v21566_v25 }
  0xd6   :  { %17640 = vmatmul.mubr.msk.f32.gmra.mrb[10].mxu1 %vm314_vm0, %v21706_v48  ;;  %vm604_vm3 = vcmp.eq.f32.partialorder %v21574_v47, 0.0  ;;  %v605_v16 = vand.u32 2147483648, %v21574_v47  ;;  %vm609_vm4 = vcmp.eq.f32.partialorder %v21621_v33, inf  ;;  %20498 = vrcp.f32 %v651_v1 }
  0xd7   :  { %v20483_v53 = vpop.eup %20482  ;;  %v241_v54 = vmul.f32 2.0, %v21264_v34  ;;  %v243_v58 = vmul.f32 2.0, %v21282_v43  ;;  %v657_v31 = vmax.f32 %v571_v2, 1e-12  ;;  %v578_v15 = vsel %vm576_vm10, %v577_v52, %v575_v13  ;;  %v805_v34 = vld [vmem:[%s25238_s0 + $0xd8] sm:$0xff]  ;;  %v806_v43 = vld [vmem:[%s25238_s0 + $0xe0] sm:$0xff] }
  0xd8   :  { %v20485_v37 = vpop.eup %20484  ;;  %v21740_v38 = vmul.f32 %v20670_v27, %v20483_v53  ;;  %20500 = vrcp.f32 %v652_v14  ;;  %v585_v39 = vsel %vm583_vm12, %v584_v59, %v582_v56  ;;  %v589_v1 = vsel %vm588_vm13, %v21516_v30, %v587_v5  ;;  %17608 = vmatmul.mubr.msk.f32.gmra.mrb[26].mxu0 %vm314_vm0, %v805_v34  ;;  %vm22047_vm12 = vmpackc.low %vm314_vm0, %vm314_vm0 }
  0xd9   :  { %v20487_v44 = vpop.eup %20486  ;;  %v21758_v14 = vmul.f32 %v20671_v29, %v20485_v37  ;;  %20502 = vrcp.f32 %v653_v12  ;;  %1781 = vperm.xlu0 %20272, %v241_v54   ;;  %1786 = vperm.xlu1 %20273, %v243_v58   ;;  %v596_v32 = vsel %vm595_vm15, %v21566_v25, %v594_v17  ;;  %v601_v52 = vmul.f32 %v20481_v46, %v21574_v47  ;;  %v20673_v25 = vld [vmem:[%s25236_s1 + $0x78] sm:$0xff] }
  0xda   :  { %17642 = vmatprep.mubr.msk.f32.mxu1 %vm314_vm0, %v21740_v38  ;;  %20504 = vrcp.f32 %v654_v42  ;;  %v245_v59 = vmul.f32 2.0, %v21320_v63  ;;  %v608_v12 = vmul.f32 %v20487_v44, %v21621_v33  ;;  %vm611_vm5 = vcmp.eq.f32.partialorder %v21621_v33, 0.0  ;;  %17610 = vmatprep.mubr.msk.f32.mxu0 %vm314_vm0, %v806_v43  ;;  %v20674_v44 = vld [vmem:[%s25236_s1 + $0x80] sm:$0xff] }
  0xdb   :  { %v20489_v51 = vpop.eup %20488  ;;  %17643 = vmatmul.mubr.msk.f32.gmra.mrb[12].mxu1 %vm314_vm0, %v21758_v14  ;;  %20506 = vrcp.f32 %v655_v40  ;;  %v247_v60 = vmul.f32 2.0, %v21330_v4  ;;  %v658_v0 = vmax.f32 %v578_v15, 1e-12  ;;  %v659_v42 = vmax.f32 %v585_v39, 1e-12  ;;  %v20672_v4 = vld [vmem:[%s25236_s1 + $0x70] sm:$0xff] }
  0xdc   :  { %v20491_v6 = vpop.eup %20490  ;;  %v592_v63 = vsel %vm590_vm14, %v591_v50, %v589_v1  ;;  %v612_v2 = vand.u32 2147483648, %v21621_v33  ;;  %v599_v5 = vsel %vm597_vm1, %v598_v61, %v596_v32  ;;  %20508 = vrcp.f32 %v657_v31 }
  0xdd   :  { %v20493_v13 = vpop.eup %20492  ;;  %v21788_v40 = vmul.f32 %v20672_v4, %v20491_v6  ;;  %1791 = vperm.xlu0 %20272, %v245_v59   ;;  %1796 = vperm.xlu1 %20273, %v247_v60   ;;  %v249_v46 = vmul.f32 2.0, %v21368_v28  ;;  %v603_v30 = vsel %vm602_vm2, %v21574_v47, %v601_v52  ;;  %v615_v50 = vmul.f32 %v20489_v51, %v21635_v23  ;;  %v20676_v52 = vld [vmem:[%s25236_s1 + $0x90] sm:$0xff] }
  0xde   :  { %v20495_v56 = vpop.eup %20494  ;;  %v21798_v61 = vmul.f32 %v20673_v25, %v20493_v13  ;;  %20510 = vrcp.f32 %v656_v35  ;;  %v610_v28 = vsel %vm609_vm4, %v21621_v33, %v608_v12  ;;  %vm616_vm6 = vcmp.eq.f32.partialorder %v21635_v23, inf  ;;  %v20675_v33 = vld [vmem:[%s25236_s1 + $0x88] sm:$0xff] }
  0xdf   :  { %v20497_v17 = vpop.eup %20496  ;;  %vm618_vm7 = vcmp.eq.f32.partialorder %v21635_v23, 0.0  ;;  %17645 = vmatprep.mubr.msk.f32.mxu1 %vm314_vm0, %v21788_v40  ;;  %v622_v53 = vmul.f32 %v20495_v56, %v21683_v55  ;;  %v660_v54 = vmax.f32 %v592_v63, 1e-12  ;;  %v619_v58 = vand.u32 2147483648, %v21635_v23 }
  0xe0   :  { %17646 = vmatmul.mubr.msk.f32.gmra.mrb[14].mxu1 %vm314_vm0, %v21798_v61  ;;  %vm623_vm8 = vcmp.eq.f32.partialorder %v21683_v55, inf  ;;  %20512 = vrcp.f32 %v658_v0  ;;  %v20499_v19 = vpop.eup %20498  ;;  %v661_v35 = vmax.f32 %v599_v5, 1e-12  ;;  %v606_v37 = vsel %vm604_vm3, %v605_v16, %v603_v30  ;;  %v20679_v30 = vld [vmem:[%s25236_s1 + $0xb0] sm:$0xff] }
  0xe1   :  { %v626_v31 = vand.u32 2147483648, %v21683_v55  ;;  %20514 = vrcp.f32 %v659_v42  ;;  %1801 = vperm.xlu0 %20272, %v249_v46   ;;  %v613_v27 = vsel %vm611_vm5, %v612_v2, %v610_v28  ;;  %v617_v34 = vsel %vm616_vm6, %v21635_v23, %v615_v50  ;;  %v20677_v23 = vld [vmem:[%s25236_s1 + $0xa0] sm:$0xff] }
  0xe2   :  { %v20501_v15 = vpop.eup %20500  ;;  %v629_v43 = vmul.f32 %v20497_v17, %v21692_v57  ;;  %v21828_v47 = vmul.f32 %v20674_v44, %v20499_v19  ;;  %v624_v39 = vsel %vm623_vm8, %v21683_v55, %v622_v53  ;;  %vm625_vm9 = vcmp.eq.f32.partialorder %v21683_v55, 0.0  ;;  %v20678_v55 = vld [vmem:[%s25236_s1 + $0x98] sm:$0xff]  ;;  %v20680_v17 = vld [vmem:[%s25236_s1 + $0xa8] sm:$0xff] }
  0xe3   :  { %v20503_v16 = vpop.eup %20502  ;;  %vm630_vm10 = vcmp.eq.f32.partialorder %v21692_v57, inf  ;;  %v21836_v1 = vmul.f32 %v20675_v33, %v20501_v15  ;;  %v662_v32 = vmax.f32 %v606_v37, 1e-12  ;;  %20516 = vrcp.f32 %v660_v54  ;;  %v20681_v54 = vld [vmem:[%s25236_s1 + $0xb8] sm:$0xff]  ;;  %v20683_v15 = vld [vmem:[%s25236_s1 + $0xc8] sm:$0xff] }
  0xe4   :  { %v20505_v29 = vpop.eup %20504  ;;  %17648 = vmatprep.mubr.msk.f32.mxu1 %vm314_vm0, %v21828_v47  ;;  %v21843_v59 = vmul.f32 %v20676_v52, %v20503_v16  ;;  %v663_v12 = vmax.f32 %v613_v27, 1e-12  ;;  %v620_v60 = vsel %vm618_vm7, %v619_v58, %v617_v34  ;;  %v633_v6 = vand.u32 2147483648, %v21692_v57 }
  0xe5   :  { %v20507_v51 = vpop.eup %20506  ;;  %17649 = vmatmul.mubr.msk.f32.gmra.mrb[16].mxu1 %vm314_vm0, %v21836_v1  ;;  %20518 = vrcp.f32 %v661_v35  ;;  %v627_v0 = vsel %vm625_vm9, %v626_v31, %v624_v39  ;;  %v631_v42 = vsel %vm630_vm10, %v21692_v57, %v629_v43  ;;  %vm632_vm11 = vcmp.eq.f32.partialorder %v21692_v57, 0.0  ;;  %v20682_v35 = vld [vmem:[%s25236_s1 + $0xc0] sm:$0xff]  ;;  %v20684_v43 = vld [vmem:[%s25236_s1 + $0xd0] sm:$0xff]  ;;  %v20685_v39 = vld [vmem:[%s25236_s1 + $0xd8] sm:$0xff] }
  0xe6   :  { %17651 = vmatprep.mubr.msk.f32.mxu1 %vm314_vm0, %v21843_v59  ;;  %v21861_v63 = vmul.f32 %v20677_v23, %v20507_v51  ;;  %v20509_v2 = vpop.eup %20508  ;;  %v21866_v13 = vmul.f32 %v20678_v55, %v20505_v29  ;;  %v664_v4 = vmax.f32 %v620_v60, 1e-12  ;;  %20520 = vrcp.f32 %v662_v32  ;;  %v20686_v32 = vld [vmem:[%s25236_s1 + $0xe0] sm:$0xff]  ;;  %v20689_v23 = vld [vmem:[%s25236_s1 + $0xf8] sm:$0xff]  ;;  %v807_v55 = vld [vmem:[%s25238_s0 + $0xe8] sm:$0xff] }
  0xe7   :  { %v665_v57 = vmax.f32 %v627_v0, 1e-12  ;;  %v634_v46 = vsel %vm632_vm11, %v633_v6, %v631_v42  ;;  %20522 = vrcp.f32 %v663_v12  ;;  %v21875_v50 = vmul.f32 %v20679_v30, %v20509_v2  ;;  %v20687_v12 = vld [vmem:[%s25236_s1 + $0xe8] sm:$0xff]  ;;  %v20688_v0 = vld [vmem:[%s25236_s1 + $0xf0] sm:$0xff]  ;;  %17611 = vmatmul.mubr.msk.f32.gmra.mrb[28].mxu0 %vm314_vm0, %v807_v55 }
  0xe8   :  { %v20511_v5 = vpop.eup %20510  ;;  %v666_v53 = vmax.f32 %v634_v46, 1e-12  ;;  %20524 = vrcp.f32 %v664_v4  ;;  %v809_v4 = vld [vmem:[%s25238_s0 + $0xf8] sm:$0xff]  ;;  %vm3826_vm5 = vcmask 130048   ;;  %vm11905_vm6 = vcmask 523264  }
  0xe9   :  { %17652 = vmatmul.mubr.msk.f32.gmra.mrb[18].mxu1 %vm314_vm0, %v21866_v13  ;;  %v21880_v28 = vmul.f32 %v20680_v17, %v20511_v5  ;;  %20526 = vrcp.f32 %v665_v57  ;;  %v808_v5 = vld [vmem:[%s25238_s0 + $0xf0] sm:$0xff]  ;;  %v1652_v57 = vpop.permute.xlu1 %1651 }
  0xea   :  { %v20513_v56 = vpop.eup %20512  ;;  %17654 = vmatprep.mubr.msk.f32.mxu1 %vm314_vm0, %v21861_v63  ;;  %20528 = vrcp.f32 %v666_v53  ;;  %17613 = vmatprep.mubr.msk.f32.mxu0 %vm314_vm0, %v808_v5  ;;  %v1647_v53 = vpop.permute.xlu0 %1646 }
  0xeb   :  { %v20515_v25 = vpop.eup %20514  ;;  %v21887_v58 = vmul.f32 %v20681_v54, %v20513_v56  ;;  %17614 = vmatmul.mubr.msk.f32.gmra.mrb[30].mxu0 %vm314_vm0, %v809_v4  ;;  %v22012_v4 = vld [vmem:[%s25240_s4 + $0x18] sm:$0xff] }
  0xec   :  { %v21894_v37 = vmul.f32 %v20682_v35, %v20515_v25 }
  0xed   :  { %17655 = vmatmul.mubr.msk.f32.gmra.mrb[20].mxu1 %vm314_vm0, %v21880_v28  ;;  %v20517_v19 = vpop.eup %20516  ;;  %v1657_v46 = vpop.permute.xlu1 %1656 }
  0xee   :  { %17657 = vmatprep.mubr.msk.f32.mxu1 %vm314_vm0, %v21875_v50  ;;  %25342 = vst [vmem:[#allocation8_spill] sm:$0xff] %v21894_v37  ;;  %v21901_v27 = vmul.f32 %v20683_v15, %v20517_v19  ;;  %v21969_v19 = vpop.permute.xlu0 %1731 }
  0xef   :  { %v20519_v31 = vpop.eup %20518 }
  0xf0   :  { %25343 = vst [vmem:[#allocation9_spill] sm:$0xff] %v21901_v27  ;;  %v20521_v34 = vpop.eup %20520  ;;  %v21908_v44 = vmul.f32 %v20684_v43, %v20519_v31  ;;  %v21985_v43 = vld [vmem:[%s25239_s5 + $0x8] sm:$0xff] }
  0xf1   :  { %17658 = vmatmul.mubr.msk.f32.gmra.mrb[22].mxu1 %vm314_vm0, %v21887_v58  ;;  %v20523_v16 = vpop.eup %20522  ;;  %v21915_v33 = vmul.f32 %v20685_v39, %v20521_v34  ;;  %v1662_v56 = vpop.permute.xlu1 %1661  ;;  %v21980_v34 = vld [vmem:[%s25240_s4 + $0x8] sm:$0xff] }
  0xf2   :  { %17660 = vmatprep.mubr.msk.f32.mxu1 %vm314_vm0, %v21894_v37  ;;  %25344 = vst [vmem:[#allocation10_spill] sm:$0xff] %v21908_v44  ;;  %v20525_v29 = vpop.eup %20524  ;;  %v21922_v52 = vmul.f32 %v20686_v32, %v20523_v16  ;;  %v21973_v31 = vpop.permute.xlu0 %1741  ;;  %v21990_v16 = vld [vmem:[%s25240_s4] sm:$0xff] }
  0xf3   :  { %25345 = vst [vmem:[#allocation11_spill] sm:$0xff] %v21915_v33  ;;  %v20527_v51 = vpop.eup %20526  ;;  %v21929_v60 = vmul.f32 %v20687_v12, %v20525_v29  ;;  %v21997_v29 = vld [vmem:[%s25239_s5] sm:$0xff]  ;;  %v1549_v12 = vmul.f32 %v21980_v34, %v21471_v20 }
  0xf4   :  { %25346 = vst [vmem:[#allocation12_spill] sm:$0xff] %v21922_v52  ;;  %v20529_v6 = vpop.eup %20528  ;;  %v21936_v42 = vmul.f32 %v20688_v0, %v20527_v51 }
  0xf5   :  { %17661 = vmatmul.mubr.msk.f32.gmra.mrb[24].mxu1 %vm314_vm0, %v21901_v27  ;;  %25347 = vst [vmem:[#allocation13_spill] sm:$0xff] %v21929_v60  ;;  %v21943_v2 = vmul.f32 %v20689_v23, %v20529_v6  ;;  %v21961_v30 = vpop.permute.xlu1 %1666  ;;  %v1548_v23 = vmul.f32 %v21990_v16, %v21439_v62  ;;  %v22024_v62 = vld [vmem:[%s25240_s4 + $0x10] sm:$0xff] }
  0xf6   :  { %17663 = vmatprep.mubr.msk.f32.mxu1 %vm314_vm0, %v21908_v44  ;;  %25348 = vst [vmem:[#allocation14_spill] sm:$0xff] %v21936_v42  ;;  %v21992_v39 = vpop.permute.xlu0 %1751  ;;  %v1550_v8 = vmul.f32 %v22024_v62, %v21500_v18  ;;  %v22063_v18 = vld [vmem:[%s25239_s5 + $0x28] sm:$0xff] }
  0xf7   :  { %25349 = vst [vmem:[#allocation15_spill] sm:$0xff] %v21943_v2 }
  0xf9   :  { %17664 = vmatmul.mubr.msk.f32.gmra.mrb[26].mxu1 %vm314_vm0, %v21915_v33  ;;  %v21963_v25 = vpop.permute.xlu1 %1671 }
  0xfa   :  { %17666 = vmatprep.mubr.msk.f32.mxu1 %vm314_vm0, %v21922_v52 }
  0xfd   :  { %17667 = vmatmul.mubr.msk.f32.gmra.mrb[28].mxu1 %vm314_vm0, %v21929_v60  ;;  %v21965_v17 = vpop.permute.xlu1 %1676 }
  0xfe   :  { %17669 = vmatprep.mubr.msk.f32.mxu1 %vm314_vm0, %v21936_v42 }
 0x101   :  { %17670 = vmatmul.mubr.msk.f32.gmra.mrb[30].mxu1 %vm314_vm0, %v21943_v2  ;;  %v21967_v54 = vpop.permute.xlu1 %1681 }
 0x105   :  { %v21971_v35 = vpop.permute.xlu1 %1726 }
 0x109   :  { %v21975_v15 = vpop.permute.xlu1 %1736 }
 0x10d   :  { %v21999_v32 = vpop.permute.xlu1 %1746 }
 0x10e   :  { %25350 = vst [vmem:[#allocation16_spill] sm:$0xff] %v21999_v32 }
 0x111   :  { %v22034_v10 = vpop.permute.xlu1 %1756 }
 0x112   :  { %25353 = vst [vmem:[#allocation19_spill] sm:$0xff] %v22034_v10 }
 0x115   :  { %v1687_v52 = vpop.permute.xlu1 %1686 }
 0x119   :  { %v1707_v33 = vpop.permute.xlu1 %1706 }
 0x193   :  { %v17626_v51 = vpop.f32.mrb[0].mxu1 }
 0x194   :  { %v1581_v6 = vmul.f32 %v17626_v51, %v21985_v43  ;;  %v1389_v0 = vpop.f32.mrb[1].mxu1  ;;  %v22029_v51 = vld [vmem:[%s25239_s5 + $0x10] sm:$0xff] }
 0x195   :  { %v1580_v55 = vmul.f32 %v1389_v0, %v21997_v29 }
 0x196   :  { %v22007_v5 = vadd.f32 %v1581_v6, %v1549_v12  ;;  %v22031_v12 = vpop.permute.xlu0 %1761 }
 0x197   :  { %v22019_v20 = vadd.f32 %v1580_v55, %v1548_v23  ;;  %25352 = vst [vmem:[#allocation18_spill] sm:$0xff] %v22031_v12  ;;  %v1551_v55 = vmul.f32 %v22012_v4, %v21513_v49 }
 0x198   :  { %v1805_v6 = vmul.f32 %v1652_v57, %v22007_v5  ;;  %v17629_v0 = vpop.f32.mrb[2].mxu1  ;;  %v25354_v57 = vmov 0 }
 0x199   :  { %25351 = vst [vmem:[#allocation17_spill] sm:$0xff] %v22019_v20  ;;  %v1804_v23 = vmul.f32 %v1647_v53, %v22019_v20  ;;  %v1583_v7 = vmul.f32 %v17629_v0, %v22017_v22  ;;  %v1399_v3 = vpop.f32.mrb[3].mxu1  ;;  %17688 = vmatprep.mubr.msk.f32.mxu0 %vm314_vm0, %v22019_v20  ;;  %v25355_v57 = vsel %vm22047_vm12, 4294967295, %v25354_v57  ;;  %v22058_v0 = vld [vmem:[%s25240_s4 + $0x28] sm:$0xff]  ;;  %v22070_v20 = vld [vmem:[%s25240_s4 + $0x20] sm:$0xff] }
 0x19a   :  { %v1582_v9 = vmul.f32 %v1399_v3, %v22029_v51  ;;  %25356 = vst [vmem:[#allocation20_spill] sm:$0xff] %v25355_v57 }
 0x19b   :  { %v22051_v53 = vpack.c.bf16 %v1805_v6, %v1804_v23  ;;  %v22053_v49 = vadd.f32 %v1583_v7, %v1551_v55  ;;  %v22075_v7 = vld [vmem:[%s25239_s5 + $0x20] sm:$0xff]  ;;  %v1692_v55 = vpop.permute.xlu0 %1691 }
 0x19c   :  { %v22065_v3 = vadd.f32 %v1582_v9, %v1550_v8  ;;  %v17632_v23 = vpop.f32.mrb[4].mxu1  ;;  %v1553_v9 = vmul.f32 %v22058_v0, %v21562_v24  ;;  %v22098_v24 = vld [vmem:[%s25240_s4 + $0x38] sm:$0xff] }
 0x19d   :  { %25357 = vst [vmem:[#allocation21_spill] sm:$0xff] %v22051_v53  ;;  %v1807_v6 = vmul.f32 %v1662_v56, %v22053_v49  ;;  %19230 = vmatprep.subr.msk.bf16.mxu0 %vm22047_vm12, %v22051_v53  ;;  %v1585_v42 = vmul.f32 %v17632_v23, %v22063_v18  ;;  %v1409_v2 = vpop.f32.mrb[5].mxu1  ;;  %v1552_v56 = vmul.f32 %v22070_v20, %v21552_v21  ;;  %v22110_v21 = vld [vmem:[%s25240_s4 + $0x30] sm:$0xff] }
 0x19e   :  { %25358 = vst [vmem:[#allocation22_spill] sm:$0xff] %v22065_v3  ;;  %v1806_v8 = vmul.f32 %v1657_v46, %v22065_v3  ;;  %19233 = vmatpush3.bf16.xpose.msk.msra.mxu0 %vm22047_vm12, %v22051_v53  ;;  %v1584_v60 = vmul.f32 %v1409_v2, %v22075_v7  ;;  %v22103_v46 = vld [vmem:[%s25239_s5 + $0x38] sm:$0xff]  ;;  %v1554_v44 = vmul.f32 %v22110_v21, %v21603_v45 }
 0x19f   :  { %v22093_v12 = vadd.f32 %v1585_v42, %v1553_v9  ;;  %v22115_v42 = vld [vmem:[%s25239_s5 + $0x30] sm:$0xff]  ;;  %v1712_v53 = vpop.permute.xlu0 %1711  ;;  %v1557_v45 = vmul.f32 %v21980_v34, %v21661_v36 }
 0x1a0   :  { %v22091_v10 = vpack.c.bf16 %v1807_v6, %v1806_v8  ;;  %v22105_v23 = vadd.f32 %v1584_v60, %v1552_v56  ;;  %v17635_v6 = vpop.f32.mrb[6].mxu1  ;;  %v1555_v8 = vmul.f32 %v22098_v24, %v21610_v11 }
 0x1a1   :  { %v1809_v2 = vmul.f32 %v21963_v25, %v22093_v12  ;;  %v1587_v9 = vmul.f32 %v17635_v6, %v22103_v46  ;;  %v1419_v56 = vpop.f32.mrb[7].mxu1 }
 0x1a2   :  { %25359 = vst [vmem:[#allocation23_spill] sm:$0xff] %v22091_v10  ;;  %19236 = vmatprep.subr.msk.bf16.mxu0 %vm22047_vm12, %v22091_v10  ;;  %v1808_v60 = vmul.f32 %v21961_v30, %v22105_v23  ;;  %v1586_v25 = vmul.f32 %v1419_v56, %v22115_v42 }
 0x1a3   :  { %v22132_v27 = vadd.f32 %v1587_v9, %v1555_v8  ;;  %v22152_v9 = vpop.permute.xlu0 %1771 }
 0x1a4   :  { %v22130_v37 = vpack.c.bf16 %v1809_v2, %v1808_v60  ;;  %v22134_v32 = vadd.f32 %v1586_v25, %v1554_v44  ;;  %v17638_v11 = vpop.f32.mrb[8].mxu1  ;;  %v1556_v60 = vmul.f32 %v21990_v16, %v21651_v26  ;;  %v22156_v25 = vpop.permute.xlu1 %1766  ;;  %v1559_v26 = vmul.f32 %v22012_v4, %v21706_v48 }
 0x1a5   :  { %25361 = vst [vmem:[#allocation25_spill] sm:$0xff] %v22132_v27  ;;  %v1589_v30 = vmul.f32 %v17638_v11, %v21985_v43  ;;  %v1429_v2 = vpop.f32.mrb[9].mxu1  ;;  %v1811_v6 = vmul.f32 %v21967_v54, %v22132_v27 }
 0x1a6   :  { %25360 = vst [vmem:[#allocation24_spill] sm:$0xff] %v22130_v37  ;;  %19239 = vmatpush3.bf16.xpose.msk.msra.mxu0 %vm22047_vm12, %v22091_v10  ;;  %v1810_v44 = vmul.f32 %v21965_v17, %v22134_v32  ;;  %v1588_v8 = vmul.f32 %v1429_v2, %v21997_v29 }
 0x1a7   :  { %19242 = vmatprep.subr.msk.bf16.mxu0 %vm22047_vm12, %v22130_v37  ;;  %v22154_v56 = vadd.f32 %v1589_v30, %v1557_v45  ;;  %v1558_v45 = vmul.f32 %v22024_v62, %v21699_v41 }
 0x1a8   :  { %v22158_v36 = vadd.f32 %v1588_v8, %v1556_v60  ;;  %v22161_v54 = vpack.c.bf16 %v1811_v6, %v1810_v44  ;;  %v1697_v6 = vpop.permute.xlu1 %1696  ;;  %v1561_v60 = vmul.f32 %v22058_v0, %v21758_v14 }
 0x1a9   :  { %v1813_v11 = vmul.f32 %v1692_v55, %v22154_v56  ;;  %v17641_v10 = vpop.f32.mrb[10].mxu1 }
 0x1aa   :  { %25362 = vst [vmem:[#allocation26_spill] sm:$0xff] %v22161_v54  ;;  %v1812_v17 = vmul.f32 %v1687_v52, %v22158_v36  ;;  %v1591_v2 = vmul.f32 %v17641_v10, %v22017_v22  ;;  %v1439_v27 = vpop.f32.mrb[11].mxu1  ;;  %17716 = vmatprep.mubr.msk.f32.mxu1 %vm314_vm0, %v22158_v36  ;;  %v1702_v10 = vpop.permute.xlu0 %1701 }
 0x1ab   :  { %v1590_v30 = vmul.f32 %v1439_v27, %v22029_v51 }
 0x1ac   :  { %v22175_v55 = vpack.c.bf16 %v1813_v11, %v1812_v17  ;;  %v22177_v52 = vadd.f32 %v1591_v2, %v1559_v26  ;;  %v1560_v17 = vmul.f32 %v22070_v20, %v21740_v38 }
 0x1ad   :  { %v22182_v48 = vadd.f32 %v1590_v30, %v1558_v45 }
 0x1ae   :  { %19245 = vmatpush3.bf16.xpose.msk.msra.mxu0 %vm22047_vm12, %v22130_v37  ;;  %25363 = vst [vmem:[#allocation27_spill] sm:$0xff] %v22175_v55  ;;  %v1815_v41 = vmul.f32 %v1702_v10, %v22177_v52  ;;  %v17644_v44 = vpop.f32.mrb[12].mxu1  ;;  %19254 = vmatprep.subr.msk.bf16.mxu1 %vm22047_vm12, %v22175_v55 }
 0x1af   :  { %19248 = vmatprep.subr.msk.bf16.mxu0 %vm22047_vm12, %v22161_v54  ;;  %v1814_v27 = vmul.f32 %v1697_v6, %v22182_v48  ;;  %v1593_v8 = vmul.f32 %v17644_v44, %v22063_v18  ;;  %v1449_v11 = vpop.f32.mrb[13].mxu1  ;;  %19257 = vmatpush3.bf16.xpose.msk.msra.mxu1 %vm22047_vm12, %v22175_v55  ;;  %v1563_v6 = vmul.f32 %v22098_v24, %v21798_v61 }
 0x1b0   :  { %v1592_v26 = vmul.f32 %v1449_v11, %v22075_v7 }
 0x1b1   :  { %v22198_v2 = vpack.c.bf16 %v1815_v41, %v1814_v27  ;;  %v22200_v45 = vadd.f32 %v1593_v8, %v1561_v60 }
 0x1b2   :  { %v22202_v30 = vadd.f32 %v1592_v26, %v1560_v17  ;;  %v1722_v26 = vpop.permute.xlu0 %1721 }
 0x1b3   :  { %25364 = vst [vmem:[#allocation28_spill] sm:$0xff] %v22198_v2  ;;  %v1817_v14 = vmul.f32 %v1712_v53, %v22200_v45  ;;  %v17647_v10 = vpop.f32.mrb[14].mxu1  ;;  %19260 = vmatprep.subr.msk.bf16.mxu1 %vm22047_vm12, %v22198_v2  ;;  %v1562_v53 = vmul.f32 %v22110_v21, %v21788_v40  ;;  %v20690_v40 = vld [vmem:[%s25238_s0] sm:$0xff] }
 0x1b4   :  { %v1816_v38 = vmul.f32 %v1707_v33, %v22202_v30  ;;  %v1595_v41 = vmul.f32 %v17647_v10, %v22103_v46  ;;  %v1459_v44 = vpop.f32.mrb[15].mxu1  ;;  %v1717_v33 = vpop.permute.xlu1 %1716  ;;  %v1131_v17 = vmul.f32 %v20690_v40, %v21990_v16 }
 0x1b5   :  { %v1594_v27 = vmul.f32 %v1459_v44, %v22115_v42  ;;  %v1564_v44 = vmul.f32 %v21990_v16, %v21828_v47 }
 0x1b6   :  { %19251 = vmatpush3.bf16.xpose.msk.msra.mxu0 %vm22047_vm12, %v22161_v54  ;;  %v22218_v60 = vpack.c.bf16 %v1817_v14, %v1816_v38  ;;  %v22220_v8 = vadd.f32 %v1595_v41, %v1563_v6  ;;  %v1565_v14 = vmul.f32 %v21980_v34, %v21836_v1 }
 0x1b7   :  { %v22222_v11 = vadd.f32 %v1594_v27, %v1562_v53  ;;  %19263 = vmatpush3.bf16.xpose.msk.msra.mxu1 %vm22047_vm12, %v22198_v2  ;;  %v22244_v27 = vpop.f32.mrb[0].mxu0 }
 0x1b8   :  { %25365 = vst [vmem:[#allocation29_spill] sm:$0xff] %v22218_v60  ;;  %v17650_v61 = vpop.f32.mrb[16].mxu1  ;;  %19266 = vmatprep.subr.msk.bf16.mxu1 %vm22047_vm12, %v22218_v60  ;;  %v1819_v6 = vmul.f32 %v1722_v26, %v22220_v8  ;;  %25366 = vst [vmem:[#allocation30_spill] sm:$0xff] %v22244_v27  ;;  %v972_v1 = vpop.f32.mrb[1].mxu0  ;;  %v1566_v27 = vmul.f32 %v22024_v62, %v21843_v59 }
 0x1b9   :  { %v1597_v10 = vmul.f32 %v17650_v61, %v21985_v43  ;;  %v1469_v38 = vpop.f32.mrb[17].mxu1  ;;  %v1818_v41 = vmul.f32 %v1717_v33, %v22222_v11  ;;  %v1163_v33 = vmul.f32 %v972_v1, %v21997_v29  ;;  %v22253_v2 = vpop.f32.mrb[2].mxu0 }
 0x1ba   :  { %v1596_v53 = vmul.f32 %v1469_v38, %v21997_v29  ;;  %25367 = vst [vmem:[#allocation31_spill] sm:$0xff] %v22253_v2  ;;  %v1567_v38 = vmul.f32 %v22012_v4, %v21866_v13  ;;  %v1777_v2 = vpop.permute.xlu1 %1776 }
 0x1bb   :  { %v22246_v40 = vadd.f32 %v1597_v10, %v1565_v14 }
 0x1bc   :  { %v22250_v61 = vadd.f32 %v1596_v53, %v1564_v44  ;;  %v17653_v26 = vpop.f32.mrb[18].mxu1  ;;  %v22264_v44 = vpack.c.bf16 %v1819_v6, %v1818_v41 }
 0x1bd   :  { %17689 = vmatmul.mubr.msk.f32.vlgmr.msra.gmra.mrb[32].mxu0 %vm314_vm0, %v22007_v5  ;;  %v1821_v47 = vmul.f32 %v21969_v19, %v22246_v40  ;;  %v1599_v14 = vmul.f32 %v17653_v26, %v22017_v22  ;;  %v1479_v10 = vpop.f32.mrb[19].mxu1  ;;  %v22271_v19 = vadd.f32 %v1163_v33, %v1131_v17 }
 0x1be   :  { %17691 = vmatprep.mubr.msk.f32.mxu0 %vm314_vm0, %v22065_v3  ;;  %v22262_v3 = vpop.f32.mrb[3].mxu0  ;;  %25369 = vst [vmem:[#allocation33_spill] sm:$0xff] %v22264_v44  ;;  %v1820_v53 = vmul.f32 %v21971_v35, %v22250_v61  ;;  %v1598_v1 = vmul.f32 %v1479_v10, %v22029_v51 }
 0x1bf   :  { %25368 = vst [vmem:[#allocation32_spill] sm:$0xff] %v22262_v3  ;;  %25370 = vst [vmem:[#allocation34_spill] sm:$0xff] %v22271_v19  ;;  %v22273_v13 = vpop.f32.mrb[4].mxu0  ;;  %v22275_v26 = vadd.f32 %v1599_v14, %v1567_v38  ;;  %19269 = vmatpush3.bf16.xpose.msk.msra.mxu1 %vm22047_vm12, %v22218_v60  ;;  %v1569_v38 = vmul.f32 %v22058_v0, %v21880_v28 }
 0x1c0   :  { %25371 = vst [vmem:[#allocation35_spill] sm:$0xff] %v22273_v13  ;;  %v22282_v59 = vpop.f32.mrb[5].mxu0  ;;  %v22284_v35 = vpack.c.bf16 %v1821_v47, %v1820_v53  ;;  %v22286_v6 = vadd.f32 %v1598_v1, %v1566_v27  ;;  %v17656_v41 = vpop.f32.mrb[20].mxu1  ;;  %19272 = vmatprep.subr.msk.bf16.mxu1 %vm22047_vm12, %v22264_v44  ;;  %v1568_v53 = vmul.f32 %v22070_v20, %v21861_v63 }
 0x1c1   :  { %17692 = vmatmul.mubr.msk.f32.gmra.mrb[34].mxu0 %vm314_vm0, %v22053_v49  ;;  %25372 = vst [vmem:[#allocation36_spill] sm:$0xff] %v22282_v59  ;;  %v22291_v17 = vpop.f32.mrb[6].mxu0  ;;  %v1823_v33 = vmul.f32 %v21973_v31, %v22275_v26  ;;  %v1601_v14 = vmul.f32 %v17656_v41, %v22063_v18  ;;  %v1489_v10 = vpop.f32.mrb[21].mxu1 }
 0x1c2   :  { %17694 = vmatprep.mubr.msk.f32.mxu0 %vm314_vm0, %v22105_v23  ;;  %25373 = vst [vmem:[#allocation37_spill] sm:$0xff] %v22284_v35  ;;  %25374 = vst [vmem:[#allocation38_spill] sm:$0xff] %v22291_v17  ;;  %v22298_v47 = vpop.f32.mrb[7].mxu0  ;;  %v1822_v27 = vmul.f32 %v21975_v15, %v22286_v6  ;;  %v1600_v1 = vmul.f32 %v1489_v10, %v22075_v7  ;;  %19278 = vmatprep.subr.msk.bf16.mxu0 %vm22047_vm12, %v22284_v35 }
 0x1c3   :  { %25375 = vst [vmem:[#allocation39_spill] sm:$0xff] %v22298_v47  ;;  %v22310_v28 = vpop.f32.mrb[8].mxu0  ;;  %v22312_v31 = vadd.f32 %v1601_v14, %v1569_v38  ;;  %19281 = vmatpush3.bf16.xpose.msk.msra.mxu0 %vm22047_vm12, %v22284_v35  ;;  %v1571_v38 = vmul.f32 %v22098_v24, %v21887_v58  ;;  %v1570_v47 = vmul.f32 %v22110_v21, %v21875_v50  ;;  %v25382_v58 = vld [vmem:[#allocation25_spill] sm:$0xff] }
 0x1c4   :  { %25376 = vst [vmem:[#allocation40_spill] sm:$0xff] %v22310_v28  ;;  %v22319_v63 = vpop.f32.mrb[9].mxu0  ;;  %v22321_v15 = vpack.c.bf16 %v1823_v33, %v1822_v27  ;;  %v22323_v41 = vadd.f32 %v1600_v1, %v1568_v53  ;;  %v17659_v10 = vpop.f32.mrb[22].mxu1  ;;  %v25381_v27 = vld [vmem:[#allocation16_spill] sm:$0xff] }
 0x1c5   :  { %17695 = vmatmul.mubr.msk.f32.gmra.mrb[36].mxu0 %vm314_vm0, %v22093_v12  ;;  %25377 = vst [vmem:[#allocation41_spill] sm:$0xff] %v22319_v63  ;;  %v22325_v17 = vpop.f32.mrb[10].mxu0  ;;  %v1603_v14 = vmul.f32 %v17659_v10, %v22103_v46  ;;  %v1499_v28 = vpop.f32.mrb[23].mxu1  ;;  %v1825_v33 = vmul.f32 %v21992_v39, %v22312_v31  ;;  %v25389_v63 = vld [vmem:[#allocation8_spill] sm:$0xff] }
 0x1c6   :  { %17697 = vmatprep.mubr.msk.f32.mxu0 %vm314_vm0, %v22134_v32  ;;  %25378 = vst [vmem:[#allocation42_spill] sm:$0xff] %v22321_v15  ;;  %25379 = vst [vmem:[#allocation43_spill] sm:$0xff] %v22325_v17  ;;  %v22332_v13 = vpop.f32.mrb[11].mxu0  ;;  %v1824_v53 = vmul.f32 %v25381_v27, %v22323_v41  ;;  %v1602_v1 = vmul.f32 %v1499_v28, %v22115_v42  ;;  %19284 = vmatprep.subr.msk.bf16.mxu0 %vm22047_vm12, %v22321_v15 }
 0x1c7   :  { %25380 = vst [vmem:[#allocation44_spill] sm:$0xff] %v22332_v13  ;;  %v22344_v10 = vpop.f32.mrb[12].mxu0  ;;  %v22346_v50 = vadd.f32 %v1603_v14, %v1571_v38  ;;  %19275 = vmatpush3.bf16.xpose.msk.msra.mxu1 %vm22047_vm12, %v22264_v44  ;;  %v25386_v13 = vld [vmem:[#allocation9_spill] sm:$0xff]  ;;  %v1572_v19 = vmul.f32 %v21990_v16, %v25389_v63 }
 0x1c8   :  { %25383 = vst [vmem:[#allocation16_spill] sm:$0xff] %v22344_v10  ;;  %v22353_v39 = vpop.f32.mrb[13].mxu0  ;;  %v22355_v28 = vadd.f32 %v1602_v1, %v1570_v47  ;;  %v17662_v27 = vpop.f32.mrb[24].mxu1  ;;  %v1573_v59 = vmul.f32 %v21980_v34, %v25386_v13  ;;  %v22364_v3 = vpack.c.bf16 %v1825_v33, %v1824_v53 }
 0x1c9   :  { %17698 = vmatmul.mubr.msk.f32.gmra.mrb[38].mxu0 %vm314_vm0, %v25382_v58  ;;  %25384 = vst [vmem:[#allocation25_spill] sm:$0xff] %v22353_v39  ;;  %v22357_v17 = vpop.f32.mrb[14].mxu0  ;;  %v1605_v38 = vmul.f32 %v17662_v27, %v21985_v43  ;;  %v1509_v14 = vpop.f32.mrb[25].mxu1  ;;  %v25394_v27 = vld [vmem:[#allocation10_spill] sm:$0xff] }
 0x1ca   :  { %17744 = vmatprep.mubr.msk.f32.mxu0 %vm314_vm0, %v22250_v61  ;;  %25385 = vst [vmem:[#allocation45_spill] sm:$0xff] %v22357_v17  ;;  %v22362_v10 = vpop.f32.mrb[15].mxu0  ;;  %25388 = vst [vmem:[#allocation46_spill] sm:$0xff] %v22364_v3  ;;  %v1604_v47 = vmul.f32 %v1509_v14, %v21997_v29  ;;  %v1782_v39 = vpop.permute.xlu0 %1781  ;;  %v25396_v14 = vld [vmem:[#allocation18_spill] sm:$0xff] }
 0x1cb   :  { %25387 = vst [vmem:[#allocation9_spill] sm:$0xff] %v22362_v10  ;;  %v22369_v1 = vpop.f32.mrb[16].mxu0  ;;  %v22371_v17 = vadd.f32 %v1605_v38, %v1573_v59  ;;  %19287 = vmatpush3.bf16.xpose.msk.msra.mxu0 %vm22047_vm12, %v22321_v15  ;;  %v25393_v59 = vld [vmem:[#allocation11_spill] sm:$0xff] }
 0x1cc   :  { %25390 = vst [vmem:[#allocation8_spill] sm:$0xff] %v22369_v1  ;;  %v22376_v34 = vpop.f32.mrb[17].mxu0  ;;  %v22378_v43 = vadd.f32 %v1604_v47, %v1572_v19  ;;  %v17665_v13 = vpop.f32.mrb[26].mxu1  ;;  %19290 = vmatprep.subr.msk.bf16.mxu0 %vm22047_vm12, %v22364_v3  ;;  %v1575_v63 = vmul.f32 %v22012_v4, %v25393_v59  ;;  %v1574_v19 = vmul.f32 %v22024_v62, %v25394_v27  ;;  %v25397_v1 = vld [vmem:[#allocation19_spill] sm:$0xff] }
 0x1cd   :  { %25391 = vst [vmem:[#allocation47_spill] sm:$0xff] %v22376_v34  ;;  %v22383_v16 = vpop.f32.mrb[18].mxu0  ;;  %v1829_v29 = vmul.f32 %v22152_v9, %v22371_v17  ;;  %v1607_v33 = vmul.f32 %v17665_v13, %v22017_v22  ;;  %v1519_v53 = vpop.f32.mrb[27].mxu1  ;;  %v1827_v47 = vmul.f32 %v25396_v14, %v22346_v50  ;;  %v25403_v14 = vld [vmem:[#allocation12_spill] sm:$0xff] }
 0x1ce   :  { %25392 = vst [vmem:[#allocation48_spill] sm:$0xff] %v22383_v16  ;;  %v22392_v38 = vpop.f32.mrb[19].mxu0  ;;  %v1826_v16 = vmul.f32 %v25397_v1, %v22355_v28  ;;  %v1828_v9 = vmul.f32 %v22156_v25, %v22378_v43  ;;  %v1606_v10 = vmul.f32 %v1519_v53, %v22029_v51  ;;  %17717 = vmatmul.mubr.msk.f32.vlgmr.msra.gmra.mrb[32].mxu1 %vm314_vm0, %v22154_v56  ;;  %v25402_v53 = vld [vmem:[#allocation13_spill] sm:$0xff] }
 0x1cf   :  { %25395 = vst [vmem:[#allocation11_spill] sm:$0xff] %v22392_v38  ;;  %v22403_v22 = vpop.f32.mrb[20].mxu0  ;;  %v22405_v4 = vadd.f32 %v1607_v33, %v1575_v63  ;;  %17719 = vmatprep.mubr.msk.f32.mxu1 %vm314_vm0, %v22182_v48  ;;  %v1577_v27 = vmul.f32 %v22058_v0, %v25402_v53 }
 0x1d0   :  { %25398 = vst [vmem:[#allocation10_spill] sm:$0xff] %v22403_v22  ;;  %v22409_v62 = vpop.f32.mrb[21].mxu0  ;;  %v22411_v13 = vpack.c.bf16 %v1829_v29, %v1828_v9  ;;  %v22413_v1 = vadd.f32 %v1606_v10, %v1574_v19  ;;  %v17668_v59 = vpop.f32.mrb[28].mxu1  ;;  %v1576_v22 = vmul.f32 %v22070_v20, %v25403_v14  ;;  %v22425_v9 = vpack.c.bf16 %v1827_v47, %v1826_v16 }
 0x1d1   :  { %25399 = vst [vmem:[#allocation18_spill] sm:$0xff] %v22409_v62  ;;  %v22415_v25 = vpop.f32.mrb[22].mxu0  ;;  %v1831_v51 = vmul.f32 %v1782_v39, %v22405_v4  ;;  %v1609_v63 = vmul.f32 %v17668_v59, %v22063_v18  ;;  %v1529_v33 = vpop.f32.mrb[29].mxu1 }
 0x1d2   :  { %25400 = vst [vmem:[#allocation19_spill] sm:$0xff] %v22411_v13  ;;  %25401 = vst [vmem:[#allocation49_spill] sm:$0xff] %v22415_v25  ;;  %v22423_v38 = vpop.f32.mrb[23].mxu0  ;;  %v1787_v29 = vpop.permute.xlu1 %1786  ;;  %v1830_v10 = vmul.f32 %v1777_v2, %v22413_v1  ;;  %v1608_v19 = vmul.f32 %v1529_v33, %v22075_v7  ;;  %19302 = vmatprep.subr.msk.bf16.mxu1 %vm22047_vm12, %v22411_v13  ;;  %17720 = vmatmul.mubr.msk.f32.gmra.mrb[34].mxu1 %vm314_vm0, %v22177_v52  ;;  %v25411_v33 = vld [vmem:[#allocation15_spill] sm:$0xff] }
 0x1d3   :  { %25404 = vst [vmem:[#allocation13_spill] sm:$0xff] %v22423_v38  ;;  %25405 = vst [vmem:[#allocation12_spill] sm:$0xff] %v22425_v9  ;;  %v22434_v0 = vpop.f32.mrb[24].mxu0  ;;  %v1792_v18 = vpop.permute.xlu0 %1791  ;;  %v22436_v20 = vadd.f32 %v1609_v63, %v1577_v27  ;;  %19293 = vmatpush3.bf16.xpose.msk.msra.mxu0 %vm22047_vm12, %v22364_v3  ;;  %19305 = vmatpush3.bf16.xpose.msk.msra.mxu1 %vm22047_vm12, %v22411_v13  ;;  %v1579_v14 = vmul.f32 %v22098_v24, %v25411_v33  ;;  %v25414_v24 = vld [vmem:[#allocation21_spill] sm:$0xff] }
 0x1d4   :  { %25406 = vst [vmem:[#allocation50_spill] sm:$0xff] %v22434_v0  ;;  %v22444_v7 = vpop.f32.mrb[25].mxu0  ;;  %v22446_v2 = vpack.c.bf16 %v1831_v51, %v1830_v10  ;;  %v22448_v39 = vadd.f32 %v1608_v19, %v1576_v22  ;;  %v17671_v16 = vpop.f32.mrb[30].mxu1  ;;  %19296 = vmatprep.subr.msk.bf16.mxu0 %vm22047_vm12, %v22425_v9  ;;  %17722 = vmatprep.mubr.msk.f32.mxu1 %vm314_vm0, %v22202_v30  ;;  %v25412_v10 = vld [vmem:[#allocation14_spill] sm:$0xff]  ;;  %v25419_v33 = vld [vmem:[#allocation17_spill] sm:$0xff] }
 0x1d5   :  { %25407 = vst [vmem:[#allocation51_spill] sm:$0xff] %v22444_v7  ;;  %v22455_v47 = vpop.f32.mrb[26].mxu0  ;;  %v1833_v59 = vmul.f32 %v1792_v18, %v22436_v20  ;;  %v1539_v53 = vpop.f32.mrb[31].mxu1  ;;  %v1611_v22 = vmul.f32 %v17671_v16, %v22103_v46 }
 0x1d6   :  { %25408 = vst [vmem:[#allocation52_spill] sm:$0xff] %v22446_v2  ;;  %25409 = vst [vmem:[#allocation53_spill] sm:$0xff] %v22455_v47  ;;  %v22458_v27 = vpop.f32.mrb[27].mxu0  ;;  %v1832_v51 = vmul.f32 %v1787_v29, %v22448_v39  ;;  %v1610_v63 = vmul.f32 %v1539_v53, %v22115_v42  ;;  %19308 = vmatprep.subr.msk.bf16.mxu1 %vm22047_vm12, %v22446_v2  ;;  %17723 = vmatmul.mubr.msk.f32.gmra.mrb[36].mxu1 %vm314_vm0, %v22200_v45 }
 0x1d7   :  { %25410 = vst [vmem:[#allocation54_spill] sm:$0xff] %v22458_v27  ;;  %17725 = vmatprep.mubr.msk.f32.mxu1 %vm314_vm0, %v22222_v11  ;;  %v1578_v29 = vmul.f32 %v22110_v21, %v25412_v10  ;;  %v22476_v46 = vadd.f32 %v1611_v22, %v1579_v14  ;;  %v1797_v21 = vpop.permute.xlu1 %1796  ;;  %v1802_v18 = vpop.permute.xlu0 %1801 }
 0x1d8   :  { %v22474_v19 = vpack.c.bf16 %v1833_v59, %v1832_v51  ;;  %v25416_v51 = vld [vmem:[#allocation23_spill] sm:$0xff]  ;;  %v22530_v22 = vpop.f32.mrb[28].mxu0 }
 0x1d9   :  { %v22478_v42 = vadd.f32 %v1610_v63, %v1578_v29  ;;  %v1835_v16 = vmul.f32 %v1802_v18, %v22476_v46  ;;  %25417 = vst [vmem:[#allocation55_spill] sm:$0xff] %v22530_v22  ;;  %v22532_v63 = vpop.f32.mrb[29].mxu0 }
 0x1da   :  { %25413 = vst [vmem:[#allocation15_spill] sm:$0xff] %v22474_v19  ;;  %17726 = vmatmul.mubr.msk.f32.gmra.mrb[38].mxu1 %vm314_vm0, %v22220_v8  ;;  %25418 = vst [vmem:[#allocation56_spill] sm:$0xff] %v22532_v63  ;;  %v22538_v14 = vpop.f32.mrb[30].mxu0 }
 0x1db   :  { %19299 = vmatpush3.bf16.xpose.msk.msra.mxu0 %vm22047_vm12, %v22425_v9  ;;  %19311 = vmatpush3.bf16.xpose.msk.msra.mxu1 %vm22047_vm12, %v22446_v2  ;;  %v1834_v59 = vmul.f32 %v1797_v21, %v22478_v42  ;;  %25420 = vst [vmem:[#allocation17_spill] sm:$0xff] %v22538_v14  ;;  %v22544_v10 = vpop.f32.mrb[31].mxu0  ;;  %v25445_v21 = vld [vmem:[#allocation4_spill] sm:$0xff] }
 0x1dc   :  { %19314 = vmatprep.subr.msk.bf16.mxu1 %vm22047_vm12, %v22474_v19  ;;  %19326 = vmatprep.subr.msk.bf16.mxu0 %vm22047_vm12, %v25414_v24  ;;  %25421 = vst [vmem:[#allocation57_spill] sm:$0xff] %v22544_v10 }
 0x1dd   :  { %17772 = vmatprep.mubr.msk.f32.mxu1 %vm314_vm0, %v22378_v43  ;;  %v22498_v53 = vpack.c.bf16 %v1835_v16, %v1834_v59 }
 0x1df   :  { %25415 = vst [vmem:[#allocation14_spill] sm:$0xff] %v22498_v53 }
 0x1e2   :  { %17745 = vmatmul.mubr.msk.f32.vlgmr.msra.gmra.mrb[40].mxu0 %vm314_vm0, %v22246_v40 }
 0x1e3   :  { %17747 = vmatprep.mubr.msk.f32.mxu0 %vm314_vm0, %v22286_v6  ;;  %19317 = vmatpush3.bf16.xpose.msk.msra.mxu1 %vm22047_vm12, %v22474_v19 }
 0x1e4   :  { %19329 = vmatpush3.bf16.xpose.msk.msra.mxu0 %vm22047_vm12, %v25414_v24  ;;  %19320 = vmatprep.subr.msk.bf16.mxu1 %vm22047_vm12, %v22498_v53 }
 0x1e5   :  { %19338 = vmatprep.subr.msk.bf16.mxu0 %vm22047_vm12, %v22130_v37 }
 0x1e6   :  { %17748 = vmatmul.mubr.msk.f32.gmra.mrb[42].mxu0 %vm314_vm0, %v22275_v26 }
 0x1e7   :  { %17750 = vmatprep.mubr.msk.f32.mxu0 %vm314_vm0, %v22323_v41 }
 0x1ea   :  { %17751 = vmatmul.mubr.msk.f32.gmra.mrb[44].mxu0 %vm314_vm0, %v22312_v31 }
 0x1eb   :  { %17753 = vmatprep.mubr.msk.f32.mxu0 %vm314_vm0, %v22355_v28  ;;  %19323 = vmatpush3.bf16.xpose.msk.msra.mxu1 %vm22047_vm12, %v22498_v53 }
 0x1ec   :  { %19332 = vmatprep.subr.msk.bf16.mxu1 %vm22047_vm12, %v25416_v51 }
 0x1ee   :  { %17754 = vmatmul.mubr.msk.f32.gmra.mrb[46].mxu0 %vm314_vm0, %v22346_v50 }
 0x1ef   :  { %17788 = vmatprep.mubr.msk.f32.mxu0 %vm314_vm0, %v25419_v33 }
 0x1f2   :  { %17773 = vmatmul.mubr.msk.f32.vlgmr.msra.gmra.mrb[40].mxu1 %vm314_vm0, %v22371_v17  ;;  %17789 = vmatmul.mubr.msk.f32.vlgmr.msra.gmra.mrb[48].mxu0 %vm314_vm0, %v22007_v5  ;;  %v25422_v5 = vld [vmem:[#allocation22_spill] sm:$0xff] }
 0x1f3   :  { %19341 = vmatpush3.bf16.xpose.msk.msra.mxu0 %vm22047_vm12, %v22130_v37  ;;  %17775 = vmatprep.mubr.msk.f32.mxu1 %vm314_vm0, %v22413_v1 }
 0x1f4   :  { %19335 = vmatpush3.bf16.xpose.msk.msra.mxu1 %vm22047_vm12, %v25416_v51  ;;  %17802 = vmatprep.mubr.msk.f32.mxu0 %vm314_vm0, %v22105_v23 }
 0x1f5   :  { %19350 = vmatprep.subr.msk.bf16.mxu0 %vm22047_vm12, %v22175_v55  ;;  %19344 = vmatprep.subr.msk.bf16.mxu1 %vm22047_vm12, %v22161_v54 }
 0x1f6   :  { %17776 = vmatmul.mubr.msk.f32.gmra.mrb[42].mxu1 %vm314_vm0, %v22405_v4 }
 0x1f7   :  { %17778 = vmatprep.mubr.msk.f32.mxu1 %vm314_vm0, %v22448_v39 }
 0x1fa   :  { %17803 = vmatmul.mubr.msk.f32.vlgmr.msra.gmra.mrb[50].mxu0 %vm314_vm0, %v22093_v12  ;;  %17779 = vmatmul.mubr.msk.f32.gmra.mrb[44].mxu1 %vm314_vm0, %v22436_v20  ;;  %v25423_v12 = vld [vmem:[#allocation28_spill] sm:$0xff] }
 0x1fb   :  { %19353 = vmatpush3.bf16.xpose.msk.msra.mxu0 %vm22047_vm12, %v22175_v55  ;;  %17816 = vmatprep.mubr.msk.f32.mxu0 %vm314_vm0, %v22158_v36 }
 0x1fc   :  { %17781 = vmatprep.mubr.msk.f32.mxu1 %vm314_vm0, %v22478_v42  ;;  %19362 = vmatprep.subr.msk.bf16.mxu0 %vm22047_vm12, %v22218_v60 }
 0x1fe   :  { %17782 = vmatmul.mubr.msk.f32.gmra.mrb[46].mxu1 %vm314_vm0, %v22476_v46 }
 0x1ff   :  { %17795 = vmatprep.mubr.msk.f32.mxu1 %vm314_vm0, %v25422_v5  ;;  %v25450_v5 = vmov 0.0  }
 0x202   :  { %17817 = vmatmul.mubr.msk.f32.vlgmr.msra.gmra.mrb[52].mxu0 %vm314_vm0, %v22154_v56  ;;  %17796 = vmatmul.mubr.msk.f32.vlgmr.msra.gmra.mrb[48].mxu1 %vm314_vm0, %v22053_v49 }
 0x203   :  { %19347 = vmatpush3.bf16.xpose.msk.msra.mxu1 %vm22047_vm12, %v22161_v54  ;;  %19365 = vmatpush3.bf16.xpose.msk.msra.mxu0 %vm22047_vm12, %v22218_v60 }
 0x204   :  { %17830 = vmatprep.mubr.msk.f32.mxu0 %vm314_vm0, %v22202_v30  ;;  %17809 = vmatprep.mubr.msk.f32.mxu1 %vm314_vm0, %v22134_v32 }
 0x205   :  { %19356 = vmatprep.subr.msk.bf16.mxu1 %vm22047_vm12, %v25423_v12  ;;  %19374 = vmatprep.subr.msk.bf16.mxu0 %vm22047_vm12, %v22284_v35 }
 0x20a   :  { %17810 = vmatmul.mubr.msk.f32.vlgmr.msra.gmra.mrb[50].mxu1 %vm314_vm0, %v25382_v58  ;;  %17831 = vmatmul.mubr.msk.f32.vlgmr.msra.gmra.mrb[54].mxu0 %vm314_vm0, %v22200_v45 }
 0x20b   :  { %19359 = vmatpush3.bf16.xpose.msk.msra.mxu1 %vm22047_vm12, %v25423_v12  ;;  %17823 = vmatprep.mubr.msk.f32.mxu1 %vm314_vm0, %v22182_v48 }
 0x20c   :  { %19377 = vmatpush3.bf16.xpose.msk.msra.mxu0 %vm22047_vm12, %v22284_v35  ;;  %17844 = vmatprep.mubr.msk.f32.mxu0 %vm314_vm0, %v22250_v61 }
 0x20d   :  { %19368 = vmatprep.subr.msk.bf16.mxu1 %vm22047_vm12, %v22264_v44  ;;  %19386 = vmatprep.subr.msk.bf16.mxu0 %vm22047_vm12, %v22364_v3 }
 0x212   :  { %17824 = vmatmul.mubr.msk.f32.vlgmr.msra.gmra.mrb[52].mxu1 %vm314_vm0, %v22177_v52 }
 0x213   :  { %17845 = vmatmul.mubr.msk.f32.vlgmr.msra.gmra.mrb[56].mxu0 %vm314_vm0, %v22246_v40  ;;  %19371 = vmatpush3.bf16.xpose.msk.msra.mxu1 %vm22047_vm12, %v22264_v44 }
 0x214   :  { %17837 = vmatprep.mubr.msk.f32.mxu1 %vm314_vm0, %v22222_v11  ;;  %19389 = vmatpush3.bf16.xpose.msk.msra.mxu0 %vm22047_vm12, %v22364_v3 }
 0x215   :  { %17858 = vmatprep.mubr.msk.f32.mxu0 %vm314_vm0, %v22323_v41  ;;  %19380 = vmatprep.subr.msk.bf16.mxu1 %vm22047_vm12, %v22321_v15 }
 0x216   :  { %19398 = vmatprep.subr.msk.bf16.mxu0 %vm22047_vm12, %v22411_v13 }
 0x21a   :  { %17838 = vmatmul.mubr.msk.f32.vlgmr.msra.gmra.mrb[54].mxu1 %vm314_vm0, %v22220_v8 }
 0x21b   :  { %17859 = vmatmul.mubr.msk.f32.vlgmr.msra.gmra.mrb[58].mxu0 %vm314_vm0, %v22312_v31  ;;  %19383 = vmatpush3.bf16.xpose.msk.msra.mxu1 %vm22047_vm12, %v22321_v15 }
 0x21c   :  { %17851 = vmatprep.mubr.msk.f32.mxu1 %vm314_vm0, %v22286_v6  ;;  %19401 = vmatpush3.bf16.xpose.msk.msra.mxu0 %vm22047_vm12, %v22411_v13 }
 0x21d   :  { %17872 = vmatprep.mubr.msk.f32.mxu0 %vm314_vm0, %v22378_v43  ;;  %19392 = vmatprep.subr.msk.bf16.mxu1 %vm22047_vm12, %v22425_v9  ;;  %v25439_v43 = vld [vmem:[#allocation3_spill] sm:$0xff] }
 0x21e   :  { %19410 = vmatprep.subr.msk.bf16.mxu0 %vm22047_vm12, %v22474_v19  ;;  %v22743_v29 = vadd.s32 48, %v25439_v43 }
 0x220   :  { %25443 = vst [vmem:[#allocation73_spill] sm:$0xff] %v22743_v29 }
 0x222   :  { %17852 = vmatmul.mubr.msk.f32.vlgmr.msra.gmra.mrb[56].mxu1 %vm314_vm0, %v22275_v26 }
 0x223   :  { %17873 = vmatmul.mubr.msk.f32.vlgmr.msra.gmra.mrb[60].mxu0 %vm314_vm0, %v22371_v17  ;;  %19395 = vmatpush3.bf16.xpose.msk.msra.mxu1 %vm22047_vm12, %v22425_v9 }
 0x224   :  { %17865 = vmatprep.mubr.msk.f32.mxu1 %vm314_vm0, %v22355_v28  ;;  %19413 = vmatpush3.bf16.xpose.msk.msra.mxu0 %vm22047_vm12, %v22474_v19  ;;  %v25438_v28 = vld [vmem:[#allocation5_spill] sm:$0xff] }
 0x225   :  { %17886 = vmatprep.mubr.msk.f32.mxu0 %vm314_vm0, %v22448_v39  ;;  %19404 = vmatprep.subr.msk.bf16.mxu1 %vm22047_vm12, %v22446_v2 }
 0x22a   :  { %17866 = vmatmul.mubr.msk.f32.vlgmr.msra.gmra.mrb[58].mxu1 %vm314_vm0, %v22346_v50  ;;  %v25437_v50 = vld [vmem:[#allocation6_spill] sm:$0xff] }
 0x22b   :  { %17887 = vmatmul.mubr.msk.f32.vlgmr.msra.gmra.mrb[62].mxu0 %vm314_vm0, %v22436_v20  ;;  %19407 = vmatpush3.bf16.xpose.msk.msra.mxu1 %vm22047_vm12, %v22446_v2  ;;  %vm1872_vm13 = vcmp.gt.s32.totalorder %v25438_v28, %v25437_v50  ;;  %vm2519_vm15 = vcmp.eq.s32.totalorder %v25445_v21, %v25437_v50  ;;  %vm2518_vm1 = vcmp.eq.s32.totalorder %v25439_v43, %v25437_v50 }
 0x22c   :  { %17879 = vmatprep.mubr.msk.f32.mxu1 %vm314_vm0, %v22413_v1  ;;  %19416 = vmatprep.subr.msk.bf16.mxu1 %vm22047_vm12, %v22498_v53  ;;  %vm1876_vm2 = vcmp.gt.s32.totalorder %v22743_v29, %v25437_v50  ;;  %vm22760_vm3 = vcmp.gt.s32.totalorder %v25445_v21, %v25437_v50  ;;  %vm22774_vm4 = vcmp.gt.s32.totalorder %v25439_v43, %v25437_v50 }
 0x232   :  { %17880 = vmatmul.mubr.msk.f32.vlgmr.msra.gmra.mrb[60].mxu1 %vm314_vm0, %v22405_v4  ;;  %v22731_v4 = vadd.s32 32, %v25439_v43 }
 0x233   :  { %19419 = vmatpush3.bf16.xpose.msk.msra.mxu1 %vm22047_vm12, %v22498_v53  ;;  %17893 = vmatprep.mubr.msk.f32.mxu1 %vm314_vm0, %v22478_v42 }
 0x234   :  { %25440 = vst [vmem:[#allocation70_spill] sm:$0xff] %v22731_v4  ;;  %vm1874_vm14 = vcmp.gt.s32.totalorder %v22731_v4, %v25437_v50 }
 0x23a   :  { %17894 = vmatmul.mubr.msk.f32.vlgmr.msra.gmra.mrb[62].mxu1 %vm314_vm0, %v22476_v46 }
 0x290   :  { %v17690_v32 = vpop.f32.mrb[32].mxu0 }
 0x291   :  { %v1992_v49 = vpop.f32.mrb[33].mxu0  ;;  %v22770_v32 = vsel %vm2519_vm15, 1.0, %v25450_v5 }
 0x294   :  { %v22702_v23 = vpop.f32.mrb[34].mxu0 }
 0x295   :  { %25424 = vst [vmem:[#allocation22_spill] sm:$0xff] %v22702_v23  ;;  %v22704_v56 = vpop.f32.mrb[35].mxu0 }
 0x296   :  { %25425 = vst [vmem:[#allocation58_spill] sm:$0xff] %v22704_v56 }
 0x298   :  { %v22706_v36 = vpop.f32.mrb[36].mxu0 }
 0x299   :  { %25426 = vst [vmem:[#allocation59_spill] sm:$0xff] %v22706_v36  ;;  %v22708_v52 = vpop.f32.mrb[37].mxu0 }
 0x29a   :  { %25427 = vst [vmem:[#allocation60_spill] sm:$0xff] %v22708_v52 }
 0x29c   :  { %v22710_v48 = vpop.f32.mrb[38].mxu0 }
 0x29d   :  { %25428 = vst [vmem:[#allocation61_spill] sm:$0xff] %v22710_v48  ;;  %v22712_v45 = vpop.f32.mrb[39].mxu0 }
 0x29e   :  { %25429 = vst [vmem:[#allocation62_spill] sm:$0xff] %v22712_v45 }
 0x2a1   :  { %v17718_v30 = vpop.f32.mrb[32].mxu1 }
 0x2a2   :  { %v2143_v8 = vpop.f32.mrb[33].mxu1  ;;  %v22779_v30 = vsel %vm2518_vm1, 1.0, %v25450_v5 }
 0x2a5   :  { %v22714_v11 = vpop.f32.mrb[34].mxu1 }
 0x2a6   :  { %25430 = vst [vmem:[#allocation63_spill] sm:$0xff] %v22714_v11  ;;  %v22716_v40 = vpop.f32.mrb[35].mxu1 }
 0x2a7   :  { %25431 = vst [vmem:[#allocation64_spill] sm:$0xff] %v22716_v40 }
 0x2a9   :  { %v22718_v61 = vpop.f32.mrb[36].mxu1 }
 0x2aa   :  { %25432 = vst [vmem:[#allocation65_spill] sm:$0xff] %v22718_v61  ;;  %v22720_v26 = vpop.f32.mrb[37].mxu1 }
 0x2ab   :  { %25433 = vst [vmem:[#allocation66_spill] sm:$0xff] %v22720_v26 }
 0x2ad   :  { %v22722_v6 = vpop.f32.mrb[38].mxu1 }
 0x2ae   :  { %25434 = vst [vmem:[#allocation67_spill] sm:$0xff] %v22722_v6  ;;  %v22724_v17 = vpop.f32.mrb[39].mxu1 }
 0x2af   :  { %25435 = vst [vmem:[#allocation68_spill] sm:$0xff] %v22724_v17 }
 0x2b5   :  { %v17746_v31 = vpop.f32.mrb[40].mxu0 }
 0x2b6   :  { %v2294_v41 = vpop.f32.mrb[41].mxu0 }
 0x2b9   :  { %v22726_v58 = vpop.f32.mrb[42].mxu0 }
 0x2ba   :  { %25436 = vst [vmem:[#allocation69_spill] sm:$0xff] %v22726_v58  ;;  %v2302_v1 = vpop.f32.mrb[43].mxu0 }
 0x2bb   :  { %v22736_v20 = vsel %vm1872_vm13, %v2302_v1, 0.0 }
 0x2bc   :  { %25441 = vst [vmem:[#allocation71_spill] sm:$0xff] %v22736_v20 }
 0x2bd   :  { %v22738_v39 = vpop.f32.mrb[44].mxu0 }
 0x2be   :  { %25442 = vst [vmem:[#allocation72_spill] sm:$0xff] %v22738_v39  ;;  %v2312_v46 = vpop.f32.mrb[45].mxu0 }
 0x2bf   :  { %v22748_v42 = vsel %vm1874_vm14, %v2312_v46, 0.0 }
 0x2c0   :  { %25444 = vst [vmem:[#allocation74_spill] sm:$0xff] %v22748_v42 }
 0x2c1   :  { %v22752_v18 = vpop.f32.mrb[46].mxu0 }
 0x2c2   :  { %25446 = vst [vmem:[#allocation75_spill] sm:$0xff] %v22752_v18  ;;  %v2322_v16 = vpop.f32.mrb[47].mxu0 }
 0x2c3   :  { %v22767_v33 = vsel %vm1876_vm2, %v2322_v16, 0.0 }
 0x2c4   :  { %25449 = vst [vmem:[#allocation76_spill] sm:$0xff] %v22767_v33 }
 0x2c5   :  { %v17774_v8 = vpop.f32.mrb[40].mxu1  ;;  %v17790_v31 = vpop.f32.mrb[48].mxu0 }
 0x2c6   :  { %v3731_v41 = vsel %vm22760_vm3, %v17790_v31, 0.0  ;;  %v2445_v1 = vpop.f32.mrb[41].mxu1  ;;  %v2592_v46 = vpop.f32.mrb[49].mxu0 }
 0x2c7   :  { %v22784_v16 = vsub.f32 %v22770_v32, %v3731_v41  ;;  %v3730_v21 = vsel %vm22774_vm4, %v2592_v46, 0.0 }
 0x2c8   :  { %v22789_v14 = vadd.f32 %v22779_v30, %v3730_v21  ;;  %v22792_v5 = vsub.f32 %v22779_v30, %v3730_v21  ;;  %v22808_v21 = vadd.f32 %v22770_v32, %v3731_v41 }
 0x2c9   :  { %v22794_v8 = vpop.f32.mrb[42].mxu1 }
 0x2ca   :  { %25453 = vst [vmem:[#allocation77_spill] sm:$0xff] %v22794_v8  ;;  %v19420_v31 = vpack.c.bf16 %v22784_v16, %v22792_v5  ;;  %v2453_v1 = vpop.f32.mrb[43].mxu1  ;;  %17900 = vmatprep.mubr.msk.f32.mxu0 %vm3826_vm5, %v22789_v14 }
 0x2cb   :  { %v22803_v46 = vsel %vm1872_vm13, %v2453_v1, 0.0 }
 0x2cc   :  { %25454 = vst [vmem:[#allocation78_spill] sm:$0xff] %v22803_v46  ;;  %19421 = vmatprep.subr.bf16.mxu0 %v19420_v31 }
 0x2cd   :  { %v17804_v10 = vpop.f32.mrb[50].mxu0  ;;  %v22805_v22 = vpop.f32.mrb[44].mxu1  ;;  %19423 = vmatpush3.bf16.msra.mxu0 %v19420_v31 }
 0x2ce   :  { %25455 = vst [vmem:[#allocation79_spill] sm:$0xff] %v22805_v22  ;;  %v3735_v63 = vsel %vm22760_vm3, %v17804_v10, 0.0  ;;  %v2742_v47 = vpop.f32.mrb[51].mxu0  ;;  %v2463_v27 = vpop.f32.mrb[45].mxu1 }
 0x2cf   :  { %v22813_v0 = vsub.f32 %v22770_v32, %v3735_v63  ;;  %v3734_v1 = vsel %vm22774_vm4, %v2742_v47, 0.0  ;;  %v22820_v25 = vsel %vm1874_vm14, %v2463_v27, 0.0  ;;  %v22842_v62 = vadd.f32 %v22770_v32, %v3735_v63 }
 0x2d0   :  { %25456 = vst [vmem:[#allocation80_spill] sm:$0xff] %v22820_v25  ;;  %v22823_v31 = vadd.f32 %v22779_v30, %v3734_v1  ;;  %v22826_v41 = vsub.f32 %v22779_v30, %v3734_v1  ;;  %17901 = vmatmul.mubr.msk.f32.vlgmr.msra.gmra.mrb[64].mxu0 %vm3826_vm5, %v22808_v21 }
 0x2d1   :  { %v22830_v10 = vpop.f32.mrb[46].mxu1 }
 0x2d2   :  { %25457 = vst [vmem:[#allocation81_spill] sm:$0xff] %v22830_v10  ;;  %v19428_v38 = vpack.c.bf16 %v22813_v0, %v22826_v41  ;;  %17914 = vmatprep.mubr.msk.f32.mxu0 %vm3826_vm5, %v22823_v31  ;;  %v2473_v47 = vpop.f32.mrb[47].mxu1 }
 0x2d3   :  { %v22839_v27 = vsel %vm1876_vm2, %v2473_v47, 0.0 }
 0x2d4   :  { %25458 = vst [vmem:[#allocation82_spill] sm:$0xff] %v22839_v27  ;;  %19429 = vmatprep.subr.bf16.mxu0 %v19428_v38 }
 0x2d5   :  { %v17818_v1 = vpop.f32.mrb[52].mxu0  ;;  %19431 = vmatpush3.bf16.msra.mxu0 %v19428_v38  ;;  %v17797_v53 = vpop.f32.mrb[48].mxu1 }
 0x2d6   :  { %v3739_v19 = vsel %vm22760_vm3, %v17818_v1, 0.0  ;;  %v3733_v7 = vsel %vm22760_vm3, %v17797_v53, 0.0  ;;  %v2892_v9 = vpop.f32.mrb[53].mxu0  ;;  %v2667_v2 = vpop.f32.mrb[49].mxu1 }
 0x2d7   :  { %v22849_v3 = vsub.f32 %v22770_v32, %v3739_v19  ;;  %v22852_v47 = vsub.f32 %v22770_v32, %v3733_v7  ;;  %v3738_v38 = vsel %vm22774_vm4, %v2892_v9, 0.0  ;;  %v3732_v63 = vsel %vm22774_vm4, %v2667_v2, 0.0 }
 0x2d8   :  { %17915 = vmatmul.mubr.msk.f32.vlgmr.msra.gmra.mrb[66].mxu0 %vm3826_vm5, %v22842_v62  ;;  %v22861_v1 = vadd.f32 %v22779_v30, %v3738_v38  ;;  %v22864_v53 = vsub.f32 %v22779_v30, %v3738_v38  ;;  %v22867_v13 = vadd.f32 %v22779_v30, %v3732_v63  ;;  %v22870_v34 = vsub.f32 %v22779_v30, %v3732_v63 }
 0x2d9   :  { %v22885_v12 = vadd.f32 %v22770_v32, %v3739_v19  ;;  %v22894_v55 = vadd.f32 %v22770_v32, %v3733_v7 }
 0x2da   :  { %v19436_v9 = vpack.c.bf16 %v22849_v3, %v22864_v53  ;;  %v19424_v2 = vpack.c.bf16 %v22852_v47, %v22870_v34  ;;  %17928 = vmatprep.mubr.msk.f32.mxu0 %vm3826_vm5, %v22861_v1  ;;  %17907 = vmatprep.mubr.msk.f32.mxu1 %vm3826_vm5, %v22867_v13 }
 0x2dc   :  { %19437 = vmatprep.subr.bf16.mxu0 %v19436_v9  ;;  %19425 = vmatprep.subr.bf16.mxu1 %v19424_v2 }
 0x2dd   :  { %v17811_v38 = vpop.f32.mrb[50].mxu1  ;;  %v17832_v15 = vpop.f32.mrb[54].mxu0  ;;  %19439 = vmatpush3.bf16.msra.mxu0 %v19436_v9  ;;  %19427 = vmatpush3.bf16.msra.mxu1 %v19424_v2 }
 0x2de   :  { %v3737_v63 = vsel %vm22760_vm3, %v17811_v38, 0.0  ;;  %v3743_v44 = vsel %vm22760_vm3, %v17832_v15, 0.0  ;;  %v2817_v35 = vpop.f32.mrb[51].mxu1  ;;  %v3042_v60 = vpop.f32.mrb[55].mxu0 }
 0x2df   :  { %v22888_v54 = vsub.f32 %v22770_v32, %v3737_v63  ;;  %v22891_v37 = vsub.f32 %v22770_v32, %v3743_v44  ;;  %v3736_v38 = vsel %vm22774_vm4, %v2817_v35, 0.0  ;;  %v3742_v15 = vsel %vm22774_vm4, %v3042_v60, 0.0 }
 0x2e0   :  { %v22901_v9 = vadd.f32 %v22779_v30, %v3736_v38  ;;  %v22904_v19 = vsub.f32 %v22779_v30, %v3736_v38  ;;  %v22907_v2 = vadd.f32 %v22779_v30, %v3742_v15  ;;  %v22910_v51 = vsub.f32 %v22779_v30, %v3742_v15  ;;  %17929 = vmatmul.mubr.msk.f32.vlgmr.msra.gmra.mrb[68].mxu0 %vm3826_vm5, %v22885_v12 }
 0x2e1   :  { %17908 = vmatmul.mubr.msk.f32.vlgmr.msra.gmra.mrb[64].mxu1 %vm3826_vm5, %v22894_v55  ;;  %v22925_v38 = vadd.f32 %v22770_v32, %v3737_v63  ;;  %v22930_v10 = vadd.f32 %v22770_v32, %v3743_v44 }
 0x2e2   :  { %v19432_v60 = vpack.c.bf16 %v22888_v54, %v22904_v19  ;;  %v19444_v35 = vpack.c.bf16 %v22891_v37, %v22910_v51  ;;  %17921 = vmatprep.mubr.msk.f32.mxu1 %vm3826_vm5, %v22901_v9  ;;  %17942 = vmatprep.mubr.msk.f32.mxu0 %vm3826_vm5, %v22907_v2 }
 0x2e4   :  { %19433 = vmatprep.subr.bf16.mxu1 %v19432_v60  ;;  %19445 = vmatprep.subr.bf16.mxu0 %v19444_v35 }
 0x2e5   :  { %v17825_v7 = vpop.f32.mrb[52].mxu1  ;;  %19435 = vmatpush3.bf16.msra.mxu1 %v19432_v60  ;;  %19447 = vmatpush3.bf16.msra.mxu0 %v19444_v35 }
 0x2e6   :  { %v3741_v15 = vsel %vm22760_vm3, %v17825_v7, 0.0  ;;  %v17846_v57 = vpop.f32.mrb[56].mxu0  ;;  %v2967_v24 = vpop.f32.mrb[53].mxu1 }
 0x2e7   :  { %v22933_v18 = vsub.f32 %v22770_v32, %v3741_v15  ;;  %v3747_v27 = vsel %vm22760_vm3, %v17846_v57, 0.0  ;;  %v3740_v63 = vsel %vm22774_vm4, %v2967_v24, 0.0  ;;  %v3192_v6 = vpop.f32.mrb[57].mxu0  ;;  %v22969_v48 = vadd.f32 %v22770_v32, %v3741_v15 }
 0x2e8   :  { %v22940_v33 = vsub.f32 %v22770_v32, %v3747_v27  ;;  %v22943_v60 = vadd.f32 %v22779_v30, %v3740_v63  ;;  %v22946_v35 = vsub.f32 %v22779_v30, %v3740_v63  ;;  %v3746_v44 = vsel %vm22774_vm4, %v3192_v6, 0.0  ;;  %17922 = vmatmul.mubr.msk.f32.vlgmr.msra.gmra.mrb[66].mxu1 %vm3826_vm5, %v22925_v38  ;;  %17943 = vmatmul.mubr.msk.f32.vlgmr.msra.gmra.mrb[70].mxu0 %vm3826_vm5, %v22930_v10 }
 0x2e9   :  { %v22957_v24 = vadd.f32 %v22779_v30, %v3746_v44  ;;  %v22960_v7 = vsub.f32 %v22779_v30, %v3746_v44  ;;  %v22981_v15 = vadd.f32 %v22770_v32, %v3747_v27 }
 0x2ea   :  { %v19440_v57 = vpack.c.bf16 %v22933_v18, %v22946_v35  ;;  %17935 = vmatprep.mubr.msk.f32.mxu1 %vm3826_vm5, %v22943_v60 }
 0x2eb   :  { %v19452_v6 = vpack.c.bf16 %v22940_v33, %v22960_v7  ;;  %17956 = vmatprep.mubr.msk.f32.mxu0 %vm3826_vm5, %v22957_v24 }
 0x2ec   :  { %19441 = vmatprep.subr.bf16.mxu1 %v19440_v57 }
 0x2ed   :  { %v17839_v63 = vpop.f32.mrb[54].mxu1  ;;  %19443 = vmatpush3.bf16.msra.mxu1 %v19440_v57  ;;  %19453 = vmatprep.subr.bf16.mxu0 %v19452_v6 }
 0x2ee   :  { %v3745_v44 = vsel %vm22760_vm3, %v17839_v63, 0.0  ;;  %v17860_v17 = vpop.f32.mrb[58].mxu0  ;;  %v3117_v29 = vpop.f32.mrb[55].mxu1  ;;  %19455 = vmatpush3.bf16.msra.mxu0 %v19452_v6 }
 0x2ef   :  { %v22974_v45 = vsub.f32 %v22770_v32, %v3745_v44  ;;  %v3751_v22 = vsel %vm22760_vm3, %v17860_v17, 0.0  ;;  %v3744_v39 = vsel %vm22774_vm4, %v3117_v29, 0.0  ;;  %v3342_v57 = vpop.f32.mrb[59].mxu0  ;;  %v23013_v42 = vadd.f32 %v22770_v32, %v3745_v44 }
 0x2f0   :  { %v22984_v25 = vsub.f32 %v22770_v32, %v3751_v22  ;;  %v22987_v63 = vadd.f32 %v22779_v30, %v3744_v39  ;;  %v22990_v61 = vsub.f32 %v22779_v30, %v3744_v39  ;;  %17936 = vmatmul.mubr.msk.f32.vlgmr.msra.gmra.mrb[68].mxu1 %vm3826_vm5, %v22969_v48  ;;  %v3750_v17 = vsel %vm22774_vm4, %v3342_v57, 0.0 }
 0x2f1   :  { %v22999_v27 = vadd.f32 %v22779_v30, %v3750_v17  ;;  %v23002_v6 = vsub.f32 %v22779_v30, %v3750_v17  ;;  %17957 = vmatmul.mubr.msk.f32.vlgmr.msra.gmra.mrb[72].mxu0 %vm3826_vm5, %v22981_v15  ;;  %v23025_v44 = vadd.f32 %v22770_v32, %v3751_v22 }
 0x2f2   :  { %v19448_v29 = vpack.c.bf16 %v22974_v45, %v22990_v61  ;;  %17949 = vmatprep.mubr.msk.f32.mxu1 %vm3826_vm5, %v22987_v63 }
 0x2f3   :  { %v19460_v39 = vpack.c.bf16 %v22984_v25, %v23002_v6  ;;  %17970 = vmatprep.mubr.msk.f32.mxu0 %vm3826_vm5, %v22999_v27 }
 0x2f4   :  { %19449 = vmatprep.subr.bf16.mxu1 %v19448_v29 }
 0x2f5   :  { %v17853_v57 = vpop.f32.mrb[56].mxu1  ;;  %19451 = vmatpush3.bf16.msra.mxu1 %v19448_v29  ;;  %19461 = vmatprep.subr.bf16.mxu0 %v19460_v39 }
 0x2f6   :  { %v3749_v17 = vsel %vm22760_vm3, %v17853_v57, 0.0  ;;  %v17874_v36 = vpop.f32.mrb[60].mxu0  ;;  %v3267_v43 = vpop.f32.mrb[57].mxu1  ;;  %19463 = vmatpush3.bf16.msra.mxu0 %v19460_v39 }
 0x2f7   :  { %v23018_v26 = vsub.f32 %v22770_v32, %v3749_v17  ;;  %v3755_v4 = vsel %vm22760_vm3, %v17874_v36, 0.0  ;;  %v3748_v52 = vsel %vm22774_vm4, %v3267_v43, 0.0  ;;  %v3492_v29 = vpop.f32.mrb[61].mxu0  ;;  %v23057_v46 = vadd.f32 %v22770_v32, %v3749_v17 }
 0x2f8   :  { %v23028_v8 = vsub.f32 %v22770_v32, %v3755_v4  ;;  %v23031_v57 = vadd.f32 %v22779_v30, %v3748_v52  ;;  %v23034_v58 = vsub.f32 %v22779_v30, %v3748_v52  ;;  %17950 = vmatmul.mubr.msk.f32.vlgmr.msra.gmra.mrb[70].mxu1 %vm3826_vm5, %v23013_v42  ;;  %v3754_v36 = vsel %vm22774_vm4, %v3492_v29, 0.0 }
 0x2f9   :  { %v23043_v22 = vadd.f32 %v22779_v30, %v3754_v36  ;;  %v23046_v39 = vsub.f32 %v22779_v30, %v3754_v36  ;;  %17971 = vmatmul.mubr.msk.f32.vlgmr.msra.gmra.mrb[74].mxu0 %vm3826_vm5, %v23025_v44  ;;  %25460 = vst [vmem:[#allocation84_spill] sm:$0xff] %v23057_v46  ;;  %v23069_v17 = vadd.f32 %v22770_v32, %v3755_v4 }
 0x2fa   :  { %v19456_v43 = vpack.c.bf16 %v23018_v26, %v23034_v58  ;;  %17963 = vmatprep.mubr.msk.f32.mxu1 %vm3826_vm5, %v23031_v57 }
 0x2fb   :  { %25459 = vst [vmem:[#allocation83_spill] sm:$0xff] %v23043_v22  ;;  %v19468_v52 = vpack.c.bf16 %v23028_v8, %v23046_v39  ;;  %17984 = vmatprep.mubr.msk.f32.mxu0 %vm3826_vm5, %v23043_v22  ;;  %25461 = vst [vmem:[#allocation85_spill] sm:$0xff] %v23069_v17 }
 0x2fc   :  { %19457 = vmatprep.subr.bf16.mxu1 %v19456_v43 }
 0x2fd   :  { %v17867_v29 = vpop.f32.mrb[58].mxu1  ;;  %19459 = vmatpush3.bf16.msra.mxu1 %v19456_v43  ;;  %19469 = vmatprep.subr.bf16.mxu0 %v19468_v52 }
 0x2fe   :  { %v3753_v36 = vsel %vm22760_vm3, %v17867_v29, 0.0  ;;  %v17888_v11 = vpop.f32.mrb[62].mxu0  ;;  %v3417_v20 = vpop.f32.mrb[59].mxu1  ;;  %19471 = vmatpush3.bf16.msra.mxu0 %v19468_v52 }
 0x2ff   :  { %v23062_v23 = vsub.f32 %v22770_v32, %v3753_v36  ;;  %v3759_v40 = vsel %vm22760_vm3, %v17888_v11, 0.0  ;;  %v3752_v50 = vsel %vm22774_vm4, %v3417_v20, 0.0  ;;  %v3642_v43 = vpop.f32.mrb[63].mxu0 }
 0x300   :  { %v23072_v28 = vsub.f32 %v22770_v32, %v3759_v40  ;;  %v23075_v29 = vadd.f32 %v22779_v30, %v3752_v50  ;;  %v23078_v56 = vsub.f32 %v22779_v30, %v3752_v50  ;;  %17964 = vmatmul.mubr.msk.f32.vlgmr.msra.gmra.mrb[72].mxu1 %vm3826_vm5, %v23057_v46  ;;  %v3758_v11 = vsel %vm22774_vm4, %v3642_v43, 0.0 }
 0x301   :  { %v23087_v4 = vadd.f32 %v22779_v30, %v3758_v11  ;;  %v23090_v52 = vsub.f32 %v22779_v30, %v3758_v11  ;;  %17985 = vmatmul.mubr.msk.f32.vlgmr.msra.gmra.mrb[76].mxu0 %vm3826_vm5, %v23069_v17  ;;  %v23101_v46 = vadd.f32 %v22770_v32, %v3753_v36 }
 0x302   :  { %25462 = vst [vmem:[#allocation86_spill] sm:$0xff] %v23075_v29  ;;  %v19464_v20 = vpack.c.bf16 %v23062_v23, %v23078_v56  ;;  %17977 = vmatprep.mubr.msk.f32.mxu1 %vm3826_vm5, %v23075_v29 }
 0x303   :  { %25463 = vst [vmem:[#allocation87_spill] sm:$0xff] %v23087_v4  ;;  %v19476_v50 = vpack.c.bf16 %v23072_v28, %v23090_v52  ;;  %17998 = vmatprep.mubr.msk.f32.mxu0 %vm3826_vm5, %v23087_v4  ;;  %25464 = vst [vmem:[#allocation88_spill] sm:$0xff] %v23101_v46  ;;  %v23111_v4 = vadd.f32 %v22770_v32, %v3759_v40 }
 0x304   :  { %19465 = vmatprep.subr.bf16.mxu1 %v19464_v20 }
 0x305   :  { %v17881_v43 = vpop.f32.mrb[60].mxu1  ;;  %19467 = vmatpush3.bf16.msra.mxu1 %v19464_v20  ;;  %19477 = vmatprep.subr.bf16.mxu0 %v19476_v50  ;;  %25465 = vst [vmem:[#allocation89_spill] sm:$0xff] %v23111_v4 }
 0x306   :  { %v3757_v11 = vsel %vm22760_vm3, %v17881_v43, 0.0  ;;  %v3567_v17 = vpop.f32.mrb[61].mxu1  ;;  %19479 = vmatpush3.bf16.msra.mxu0 %v19476_v50 }
 0x307   :  { %v23106_v22 = vsub.f32 %v22770_v32, %v3757_v11  ;;  %v3756_v29 = vsel %vm22774_vm4, %v3567_v17, 0.0  ;;  %v23130_v17 = vadd.f32 %v22770_v32, %v3757_v11  ;;  %v23162_v11 = vmul.f32 2.0, %v22779_v30 }
 0x308   :  { %v23114_v20 = vadd.f32 %v22779_v30, %v3756_v29  ;;  %v23117_v36 = vsub.f32 %v22779_v30, %v3756_v29  ;;  %17978 = vmatmul.mubr.msk.f32.vlgmr.msra.gmra.mrb[74].mxu1 %vm3826_vm5, %v23101_v46 }
 0x309   :  { %17999 = vmatmul.mubr.msk.f32.vlgmr.msra.gmra.mrb[78].mxu0 %vm3826_vm5, %v23111_v4  ;;  %25467 = vst [vmem:[#allocation91_spill] sm:$0xff] %v23130_v17 }
 0x30a   :  { %25466 = vst [vmem:[#allocation90_spill] sm:$0xff] %v23114_v20  ;;  %v19472_v43 = vpack.c.bf16 %v23106_v22, %v23117_v36  ;;  %17991 = vmatprep.mubr.msk.f32.mxu1 %vm3826_vm5, %v23114_v20  ;;  %18012 = vmatprep.mubr.msk.f32.mxu0 %vm3826_vm5, %v22792_v5 }
 0x30c   :  { %19473 = vmatprep.subr.bf16.mxu1 %v19472_v43 }
 0x30d   :  { %v17895_v40 = vpop.f32.mrb[62].mxu1  ;;  %19475 = vmatpush3.bf16.msra.mxu1 %v19472_v43 }
 0x30e   :  { %v3761_v29 = vsel %vm22760_vm3, %v17895_v40, 0.0  ;;  %v3717_v50 = vpop.f32.mrb[63].mxu1 }
 0x30f   :  { %v23135_v46 = vsub.f32 %v22770_v32, %v3761_v29  ;;  %v3760_v4 = vsel %vm22774_vm4, %v3717_v50, 0.0  ;;  %v23152_v49 = vadd.f32 %v22770_v32, %v3761_v29 }
 0x310   :  { %v23140_v20 = vadd.f32 %v22779_v30, %v3760_v4  ;;  %v23143_v5 = vsub.f32 %v22779_v30, %v3760_v4  ;;  %17992 = vmatmul.mubr.msk.f32.vlgmr.msra.gmra.mrb[76].mxu1 %vm3826_vm5, %v23130_v17  ;;  %v23159_v4 = vmul.f32 2.0, %v22770_v32 }
 0x311   :  { %25469 = vst [vmem:[#allocation93_spill] sm:$0xff] %v23152_v49 }
 0x312   :  { %25468 = vst [vmem:[#allocation92_spill] sm:$0xff] %v23140_v20  ;;  %v19480_v59 = vpack.c.bf16 %v23135_v46, %v23143_v5  ;;  %18005 = vmatprep.mubr.msk.f32.mxu1 %vm3826_vm5, %v23140_v20 }
 0x314   :  { %19481 = vmatprep.subr.bf16.mxu1 %v19480_v59 }
 0x315   :  { %19483 = vmatpush3.bf16.msra.mxu1 %v19480_v59 }
 0x318   :  { %18006 = vmatmul.mubr.msk.f32.vlgmr.msra.gmra.mrb[78].mxu1 %vm3826_vm5, %v23152_v49 }
 0x319   :  { %18019 = vmatprep.mubr.msk.f32.mxu1 %vm3826_vm5, %v22870_v34 }
 0x3a3   :  { %v17902_v43 = vpop.f32.mrb[64].mxu0 }
 0x3a4   :  { %v5126_v40 = vsub.f32 %v23159_v4, %v17902_v43  ;;  %v3899_v50 = vpop.f32.mrb[65].mxu0 }
 0x3a5   :  { %v5125_v59 = vsub.f32 %v23162_v11, %v3899_v50 }
 0x3a7   :  { %v19484_v29 = vpack.c.bf16 %v5126_v40, %v5125_v59 }
 0x3a9   :  { %19485 = vmatprep.subr.bf16.mxu0 %v19484_v29 }
 0x3aa   :  { %19487 = vmatpush3.bf16.msra.mxu0 %v19484_v29 }
 0x3ab   :  { %v17916_v20 = vpop.f32.mrb[66].mxu0 }
 0x3ac   :  { %v5130_v49 = vsub.f32 %v23159_v4, %v17916_v20  ;;  %v4061_v17 = vpop.f32.mrb[67].mxu0 }
 0x3ad   :  { %v5129_v34 = vsub.f32 %v23162_v11, %v4061_v17  ;;  %18013 = vmatmul.mubr.msk.f32.vlgmr.msra.gmra.mrb[80].mxu0 %vm3826_vm5, %v22784_v16 }
 0x3ae   :  { %18026 = vmatprep.mubr.msk.f32.mxu0 %vm3826_vm5, %v22826_v41 }
 0x3af   :  { %v19492_v32 = vpack.c.bf16 %v5130_v49, %v5129_v34 }
 0x3b1   :  { %19493 = vmatprep.subr.bf16.mxu0 %v19492_v32 }
 0x3b2   :  { %19495 = vmatpush3.bf16.msra.mxu0 %v19492_v32 }
 0x3b3   :  { %v17930_v30 = vpop.f32.mrb[68].mxu0 }
 0x3b4   :  { %v5134_v43 = vsub.f32 %v23159_v4, %v17930_v30  ;;  %v17909_v40 = vpop.f32.mrb[64].mxu1  ;;  %v4223_v50 = vpop.f32.mrb[69].mxu0 }
 0x3b5   :  { %18027 = vmatmul.mubr.msk.f32.vlgmr.msra.gmra.mrb[82].mxu0 %vm3826_vm5, %v22813_v0  ;;  %v5128_v20 = vsub.f32 %v23159_v4, %v17909_v40  ;;  %v5133_v17 = vsub.f32 %v23162_v11, %v4223_v50  ;;  %v3980_v59 = vpop.f32.mrb[65].mxu1 }
 0x3b6   :  { %18040 = vmatprep.mubr.msk.f32.mxu0 %vm3826_vm5, %v22864_v53  ;;  %v5127_v16 = vsub.f32 %v23162_v11, %v3980_v59 }
 0x3b7   :  { %v19500_v41 = vpack.c.bf16 %v5134_v43, %v5133_v17 }
 0x3b8   :  { %v19488_v49 = vpack.c.bf16 %v5128_v20, %v5127_v16 }
 0x3b9   :  { %19501 = vmatprep.subr.bf16.mxu0 %v19500_v41 }
 0x3ba   :  { %19489 = vmatprep.subr.bf16.mxu1 %v19488_v49  ;;  %19503 = vmatpush3.bf16.msra.mxu0 %v19500_v41 }
 0x3bb   :  { %v17923_v29 = vpop.f32.mrb[66].mxu1  ;;  %v17944_v34 = vpop.f32.mrb[70].mxu0  ;;  %19491 = vmatpush3.bf16.msra.mxu1 %v19488_v49 }
 0x3bc   :  { %v5132_v0 = vsub.f32 %v23159_v4, %v17923_v29  ;;  %v5138_v32 = vsub.f32 %v23159_v4, %v17944_v34  ;;  %v4142_v30 = vpop.f32.mrb[67].mxu1  ;;  %v4385_v40 = vpop.f32.mrb[71].mxu0 }
 0x3bd   :  { %v5131_v50 = vsub.f32 %v23162_v11, %v4142_v30  ;;  %v5137_v53 = vsub.f32 %v23162_v11, %v4385_v40  ;;  %18041 = vmatmul.mubr.msk.f32.vlgmr.msra.gmra.mrb[84].mxu0 %vm3826_vm5, %v22849_v3 }
 0x3be   :  { %18020 = vmatmul.mubr.msk.f32.vlgmr.msra.gmra.mrb[80].mxu1 %vm3826_vm5, %v22852_v47  ;;  %18054 = vmatprep.mubr.msk.f32.mxu0 %vm3826_vm5, %v22910_v51 }
 0x3bf   :  { %v19496_v43 = vpack.c.bf16 %v5132_v0, %v5131_v50  ;;  %v19508_v20 = vpack.c.bf16 %v5138_v32, %v5137_v53  ;;  %18033 = vmatprep.mubr.msk.f32.mxu1 %vm3826_vm5, %v22904_v19 }
 0x3c1   :  { %19497 = vmatprep.subr.bf16.mxu1 %v19496_v43  ;;  %19509 = vmatprep.subr.bf16.mxu0 %v19508_v20 }
 0x3c2   :  { %19499 = vmatpush3.bf16.msra.mxu1 %v19496_v43  ;;  %19511 = vmatpush3.bf16.msra.mxu0 %v19508_v20 }
 0x3c3   :  { %v17937_v17 = vpop.f32.mrb[68].mxu1 }
 0x3c4   :  { %v5136_v59 = vsub.f32 %v23159_v4, %v17937_v17  ;;  %v4304_v16 = vpop.f32.mrb[69].mxu1  ;;  %v17958_v3 = vpop.f32.mrb[72].mxu0 }
 0x3c5   :  { %v5135_v41 = vsub.f32 %v23162_v11, %v4304_v16  ;;  %v5142_v47 = vsub.f32 %v23159_v4, %v17958_v3  ;;  %v4547_v49 = vpop.f32.mrb[73].mxu0  ;;  %18034 = vmatmul.mubr.msk.f32.vlgmr.msra.gmra.mrb[82].mxu1 %vm3826_vm5, %v22888_v54  ;;  %18055 = vmatmul.mubr.msk.f32.vlgmr.msra.gmra.mrb[86].mxu0 %vm3826_vm5, %v22891_v37 }
 0x3c6   :  { %v5141_v19 = vsub.f32 %v23162_v11, %v4547_v49  ;;  %18047 = vmatprep.mubr.msk.f32.mxu1 %vm3826_vm5, %v22946_v35  ;;  %18068 = vmatprep.mubr.msk.f32.mxu0 %vm3826_vm5, %v22960_v7 }
 0x3c7   :  { %v19504_v51 = vpack.c.bf16 %v5136_v59, %v5135_v41 }
 0x3c8   :  { %v19516_v29 = vpack.c.bf16 %v5142_v47, %v5141_v19 }
 0x3c9   :  { %19505 = vmatprep.subr.bf16.mxu1 %v19504_v51 }
 0x3ca   :  { %19507 = vmatpush3.bf16.msra.mxu1 %v19504_v51  ;;  %19517 = vmatprep.subr.bf16.mxu0 %v19516_v29 }
 0x3cb   :  { %v17951_v34 = vpop.f32.mrb[70].mxu1  ;;  %19519 = vmatpush3.bf16.msra.mxu0 %v19516_v29 }
 0x3cc   :  { %v5140_v54 = vsub.f32 %v23159_v4, %v17951_v34  ;;  %v4466_v0 = vpop.f32.mrb[71].mxu1  ;;  %v17972_v32 = vpop.f32.mrb[74].mxu0 }
 0x3cd   :  { %v5139_v37 = vsub.f32 %v23162_v11, %v4466_v0  ;;  %18048 = vmatmul.mubr.msk.f32.vlgmr.msra.gmra.mrb[84].mxu1 %vm3826_vm5, %v22933_v18  ;;  %v5146_v35 = vsub.f32 %v23159_v4, %v17972_v32  ;;  %v4709_v30 = vpop.f32.mrb[75].mxu0 }
 0x3ce   :  { %18061 = vmatprep.mubr.msk.f32.mxu1 %vm3826_vm5, %v22990_v61  ;;  %v5145_v40 = vsub.f32 %v23162_v11, %v4709_v30  ;;  %18069 = vmatmul.mubr.msk.f32.vlgmr.msra.gmra.mrb[88].mxu0 %vm3826_vm5, %v22940_v33 }
 0x3cf   :  { %v19512_v7 = vpack.c.bf16 %v5140_v54, %v5139_v37  ;;  %18082 = vmatprep.mubr.msk.f32.mxu0 %vm3826_vm5, %v23002_v6 }
 0x3d0   :  { %v19524_v50 = vpack.c.bf16 %v5146_v35, %v5145_v40 }
 0x3d1   :  { %19513 = vmatprep.subr.bf16.mxu1 %v19512_v7 }
 0x3d2   :  { %19515 = vmatpush3.bf16.msra.mxu1 %v19512_v7  ;;  %19525 = vmatprep.subr.bf16.mxu0 %v19524_v50 }
 0x3d3   :  { %v17965_v18 = vpop.f32.mrb[72].mxu1  ;;  %19527 = vmatpush3.bf16.msra.mxu0 %v19524_v50 }
 0x3d4   :  { %v5144_v53 = vsub.f32 %v23159_v4, %v17965_v18  ;;  %v4628_v43 = vpop.f32.mrb[73].mxu1  ;;  %v17986_v20 = vpop.f32.mrb[76].mxu0 }
 0x3d5   :  { %v5143_v61 = vsub.f32 %v23162_v11, %v4628_v43  ;;  %18062 = vmatmul.mubr.msk.f32.vlgmr.msra.gmra.mrb[86].mxu1 %vm3826_vm5, %v22974_v45  ;;  %v5150_v33 = vsub.f32 %v23159_v4, %v17986_v20  ;;  %v4871_v17 = vpop.f32.mrb[77].mxu0 }
 0x3d6   :  { %18075 = vmatprep.mubr.msk.f32.mxu1 %vm3826_vm5, %v23034_v58  ;;  %v5149_v59 = vsub.f32 %v23162_v11, %v4871_v17  ;;  %18083 = vmatmul.mubr.msk.f32.vlgmr.msra.gmra.mrb[90].mxu0 %vm3826_vm5, %v22984_v25 }
 0x3d7   :  { %v19520_v6 = vpack.c.bf16 %v5144_v53, %v5143_v61  ;;  %18096 = vmatprep.mubr.msk.f32.mxu0 %vm3826_vm5, %v23046_v39 }
 0x3d8   :  { %v19532_v16 = vpack.c.bf16 %v5150_v33, %v5149_v59 }
 0x3d9   :  { %19521 = vmatprep.subr.bf16.mxu1 %v19520_v6 }
 0x3da   :  { %19523 = vmatpush3.bf16.msra.mxu1 %v19520_v6  ;;  %19533 = vmatprep.subr.bf16.mxu0 %v19532_v16 }
 0x3db   :  { %v17979_v45 = vpop.f32.mrb[74].mxu1  ;;  %19535 = vmatpush3.bf16.msra.mxu0 %v19532_v16 }
 0x3dc   :  { %v5148_v3 = vsub.f32 %v23159_v4, %v17979_v45  ;;  %v4790_v41 = vpop.f32.mrb[75].mxu1  ;;  %v18000_v47 = vpop.f32.mrb[78].mxu0 }
 0x3dd   :  { %v5147_v58 = vsub.f32 %v23162_v11, %v4790_v41  ;;  %18076 = vmatmul.mubr.msk.f32.vlgmr.msra.gmra.mrb[88].mxu1 %vm3826_vm5, %v23018_v26  ;;  %v5154_v25 = vsub.f32 %v23159_v4, %v18000_v47  ;;  %v5033_v49 = vpop.f32.mrb[79].mxu0 }
 0x3de   :  { %18089 = vmatprep.mubr.msk.f32.mxu1 %vm3826_vm5, %v23078_v56  ;;  %v5153_v51 = vsub.f32 %v23162_v11, %v5033_v49  ;;  %18097 = vmatmul.mubr.msk.f32.vlgmr.msra.gmra.mrb[92].mxu0 %vm3826_vm5, %v23028_v8 }
 0x3df   :  { %v19528_v39 = vpack.c.bf16 %v5148_v3, %v5147_v58  ;;  %18110 = vmatprep.mubr.msk.f32.mxu0 %vm3826_vm5, %v23090_v52 }
 0x3e0   :  { %v19540_v19 = vpack.c.bf16 %v5154_v25, %v5153_v51 }
 0x3e1   :  { %19529 = vmatprep.subr.bf16.mxu1 %v19528_v39 }
 0x3e2   :  { %19531 = vmatpush3.bf16.msra.mxu1 %v19528_v39  ;;  %19541 = vmatprep.subr.bf16.mxu0 %v19540_v19 }
 0x3e3   :  { %v17993_v26 = vpop.f32.mrb[76].mxu1  ;;  %19543 = vmatpush3.bf16.msra.mxu0 %v19540_v19 }
 0x3e4   :  { %v5152_v29 = vsub.f32 %v23159_v4, %v17993_v26  ;;  %v4952_v34 = vpop.f32.mrb[77].mxu1 }
 0x3e5   :  { %v5151_v56 = vsub.f32 %v23162_v11, %v4952_v34  ;;  %18090 = vmatmul.mubr.msk.f32.vlgmr.msra.gmra.mrb[90].mxu1 %vm3826_vm5, %v23062_v23 }
 0x3e6   :  { %18103 = vmatprep.mubr.msk.f32.mxu1 %vm3826_vm5, %v23117_v36  ;;  %18111 = vmatmul.mubr.msk.f32.vlgmr.msra.gmra.mrb[94].mxu0 %vm3826_vm5, %v23072_v28 }
 0x3e7   :  { %v19536_v8 = vpack.c.bf16 %v5152_v29, %v5151_v56  ;;  %18124 = vmatprep.mubr.msk.f32.mxu0 %vm3826_vm5, %v22789_v14 }
 0x3e9   :  { %19537 = vmatprep.subr.bf16.mxu1 %v19536_v8 }
 0x3ea   :  { %19539 = vmatpush3.bf16.msra.mxu1 %v19536_v8  ;;  %v25470_v8 = vld [vmem:[#allocation83_spill] sm:$0xff] }
 0x3eb   :  { %v18007_v52 = vpop.f32.mrb[78].mxu1 }
 0x3ec   :  { %v5156_v54 = vsub.f32 %v23159_v4, %v18007_v52  ;;  %v5114_v0 = vpop.f32.mrb[79].mxu1 }
 0x3ed   :  { %v5155_v32 = vsub.f32 %v23162_v11, %v5114_v0  ;;  %18104 = vmatmul.mubr.msk.f32.vlgmr.msra.gmra.mrb[92].mxu1 %vm3826_vm5, %v23106_v22  ;;  %v25471_v0 = vld [vmem:[#allocation84_spill] sm:$0xff] }
 0x3ee   :  { %18117 = vmatprep.mubr.msk.f32.mxu1 %vm3826_vm5, %v23143_v5 }
 0x3ef   :  { %v19544_v23 = vpack.c.bf16 %v5156_v54, %v5155_v32 }
 0x3f1   :  { %19545 = vmatprep.subr.bf16.mxu1 %v19544_v23 }
 0x3f2   :  { %19547 = vmatpush3.bf16.msra.mxu1 %v19544_v23  ;;  %v25472_v23 = vld [vmem:[#allocation86_spill] sm:$0xff] }
 0x3f5   :  { %18118 = vmatmul.mubr.msk.f32.vlgmr.msra.gmra.mrb[94].mxu1 %vm3826_vm5, %v23135_v46 }
 0x3f6   :  { %18131 = vmatprep.mubr.msk.f32.mxu1 %vm3826_vm5, %v22867_v13 }
 0x480   :  { %v23260_v28 = vpop.f32.mrb[80].mxu0 }
 0x481   :  { %v23262_v36 = vpop.f32.mrb[81].mxu0 }
 0x482   :  { %v19548_v37 = vpack.c.bf16 %v23260_v28, %v23262_v36 }
 0x484   :  { %19549 = vmatprep.subr.bf16.mxu0 %v19548_v37 }
 0x485   :  { %19551 = vmatpush3.bf16.msra.mxu0 %v19548_v37 }
 0x488   :  { %v23266_v22 = vpop.f32.mrb[82].mxu0  ;;  %18125 = vmatmul.mubr.msk.f32.vlgmr.msra.gmra.mrb[96].mxu0 %vm3826_vm5, %v22808_v21 }
 0x489   :  { %v23270_v5 = vpop.f32.mrb[83].mxu0  ;;  %18138 = vmatprep.mubr.msk.f32.mxu0 %vm3826_vm5, %v22823_v31 }
 0x48a   :  { %v19556_v46 = vpack.c.bf16 %v23266_v22, %v23270_v5 }
 0x48c   :  { %19557 = vmatprep.subr.bf16.mxu0 %v19556_v46 }
 0x48d   :  { %19559 = vmatpush3.bf16.msra.mxu0 %v19556_v46  ;;  %v25473_v46 = vld [vmem:[#allocation85_spill] sm:$0xff] }
 0x490   :  { %18139 = vmatmul.mubr.msk.f32.vlgmr.msra.gmra.mrb[98].mxu0 %vm3826_vm5, %v22842_v62  ;;  %v23278_v35 = vpop.f32.mrb[84].mxu0 }
 0x491   :  { %18152 = vmatprep.mubr.msk.f32.mxu0 %vm3826_vm5, %v22861_v1  ;;  %v23282_v30 = vpop.f32.mrb[80].mxu1  ;;  %v23284_v7 = vpop.f32.mrb[85].mxu0 }
 0x492   :  { %v19564_v40 = vpack.c.bf16 %v23278_v35, %v23284_v7  ;;  %v23288_v50 = vpop.f32.mrb[81].mxu1 }
 0x493   :  { %v19552_v18 = vpack.c.bf16 %v23282_v30, %v23288_v50 }
 0x494   :  { %19565 = vmatprep.subr.bf16.mxu0 %v19564_v40 }
 0x495   :  { %19553 = vmatprep.subr.bf16.mxu1 %v19552_v18  ;;  %19567 = vmatpush3.bf16.msra.mxu0 %v19564_v40 }
 0x496   :  { %19555 = vmatpush3.bf16.msra.mxu1 %v19552_v18 }
 0x498   :  { %v23292_v53 = vpop.f32.mrb[82].mxu1  ;;  %v23294_v43 = vpop.f32.mrb[86].mxu0  ;;  %18153 = vmatmul.mubr.msk.f32.vlgmr.msra.gmra.mrb[100].mxu0 %vm3826_vm5, %v22885_v12 }
 0x499   :  { %v23298_v20 = vpop.f32.mrb[83].mxu1  ;;  %v23300_v61 = vpop.f32.mrb[87].mxu0  ;;  %18132 = vmatmul.mubr.msk.f32.vlgmr.msra.gmra.mrb[96].mxu1 %vm3826_vm5, %v22894_v55  ;;  %18166 = vmatprep.mubr.msk.f32.mxu0 %vm3826_vm5, %v22907_v2 }
 0x49a   :  { %v19560_v33 = vpack.c.bf16 %v23292_v53, %v23298_v20  ;;  %v19572_v17 = vpack.c.bf16 %v23294_v43, %v23300_v61  ;;  %18145 = vmatprep.mubr.msk.f32.mxu1 %vm3826_vm5, %v22901_v9 }
 0x49c   :  { %19561 = vmatprep.subr.bf16.mxu1 %v19560_v33  ;;  %19573 = vmatprep.subr.bf16.mxu0 %v19572_v17 }
 0x49d   :  { %19563 = vmatpush3.bf16.msra.mxu1 %v19560_v33  ;;  %19575 = vmatpush3.bf16.msra.mxu0 %v19572_v17  ;;  %v25474_v33 = vld [vmem:[#allocation87_spill] sm:$0xff] }
 0x4a0   :  { %v23312_v6 = vpop.f32.mrb[84].mxu1  ;;  %18146 = vmatmul.mubr.msk.f32.vlgmr.msra.gmra.mrb[98].mxu1 %vm3826_vm5, %v22925_v38  ;;  %18167 = vmatmul.mubr.msk.f32.vlgmr.msra.gmra.mrb[102].mxu0 %vm3826_vm5, %v22930_v10 }
 0x4a1   :  { %v23318_v59 = vpop.f32.mrb[85].mxu1  ;;  %v23320_v16 = vpop.f32.mrb[88].mxu0  ;;  %18159 = vmatprep.mubr.msk.f32.mxu1 %vm3826_vm5, %v22943_v60  ;;  %18180 = vmatprep.mubr.msk.f32.mxu0 %vm3826_vm5, %v22957_v24 }
 0x4a2   :  { %v19568_v45 = vpack.c.bf16 %v23312_v6, %v23318_v59  ;;  %v23328_v3 = vpop.f32.mrb[89].mxu0 }
 0x4a3   :  { %v19580_v41 = vpack.c.bf16 %v23320_v16, %v23328_v3 }
 0x4a4   :  { %19569 = vmatprep.subr.bf16.mxu1 %v19568_v45 }
 0x4a5   :  { %19571 = vmatpush3.bf16.msra.mxu1 %v19568_v45  ;;  %19581 = vmatprep.subr.bf16.mxu0 %v19580_v41 }
 0x4a6   :  { %19583 = vmatpush3.bf16.msra.mxu0 %v19580_v41  ;;  %v25475_v41 = vld [vmem:[#allocation88_spill] sm:$0xff] }
 0x4a8   :  { %v23332_v47 = vpop.f32.mrb[86].mxu1  ;;  %18160 = vmatmul.mubr.msk.f32.vlgmr.msra.gmra.mrb[100].mxu1 %vm3826_vm5, %v22969_v48 }
 0x4a9   :  { %v23336_v58 = vpop.f32.mrb[87].mxu1  ;;  %18173 = vmatprep.mubr.msk.f32.mxu1 %vm3826_vm5, %v22987_v63  ;;  %v23340_v25 = vpop.f32.mrb[90].mxu0  ;;  %18181 = vmatmul.mubr.msk.f32.vlgmr.msra.gmra.mrb[104].mxu0 %vm3826_vm5, %v22981_v15 }
 0x4aa   :  { %v19576_v49 = vpack.c.bf16 %v23332_v47, %v23336_v58  ;;  %v23346_v39 = vpop.f32.mrb[91].mxu0  ;;  %18194 = vmatprep.mubr.msk.f32.mxu0 %vm3826_vm5, %v22999_v27 }
 0x4ab   :  { %v19588_v51 = vpack.c.bf16 %v23340_v25, %v23346_v39 }
 0x4ac   :  { %19577 = vmatprep.subr.bf16.mxu1 %v19576_v49 }
 0x4ad   :  { %19579 = vmatpush3.bf16.msra.mxu1 %v19576_v49  ;;  %19589 = vmatprep.subr.bf16.mxu0 %v19588_v51 }
 0x4ae   :  { %19591 = vmatpush3.bf16.msra.mxu0 %v19588_v51  ;;  %v25476_v51 = vld [vmem:[#allocation90_spill] sm:$0xff] }
 0x4b0   :  { %v23352_v19 = vpop.f32.mrb[88].mxu1  ;;  %18174 = vmatmul.mubr.msk.f32.vlgmr.msra.gmra.mrb[102].mxu1 %vm3826_vm5, %v23013_v42 }
 0x4b1   :  { %v23356_v26 = vpop.f32.mrb[89].mxu1  ;;  %18187 = vmatprep.mubr.msk.f32.mxu1 %vm3826_vm5, %v23031_v57  ;;  %v23360_v29 = vpop.f32.mrb[92].mxu0  ;;  %18195 = vmatmul.mubr.msk.f32.vlgmr.msra.gmra.mrb[106].mxu0 %vm3826_vm5, %v23025_v44 }
 0x4b2   :  { %v19584_v34 = vpack.c.bf16 %v23352_v19, %v23356_v26  ;;  %v23366_v56 = vpop.f32.mrb[93].mxu0  ;;  %18208 = vmatprep.mubr.msk.f32.mxu0 %vm3826_vm5, %v25470_v8 }
 0x4b3   :  { %v19596_v52 = vpack.c.bf16 %v23360_v29, %v23366_v56 }
 0x4b4   :  { %19585 = vmatprep.subr.bf16.mxu1 %v19584_v34 }
 0x4b5   :  { %19587 = vmatpush3.bf16.msra.mxu1 %v19584_v34  ;;  %19597 = vmatprep.subr.bf16.mxu0 %v19596_v52  ;;  %v25477_v34 = vld [vmem:[#allocation89_spill] sm:$0xff] }
 0x4b6   :  { %19599 = vmatpush3.bf16.msra.mxu0 %v19596_v52 }
 0x4b8   :  { %v23372_v54 = vpop.f32.mrb[90].mxu1  ;;  %18188 = vmatmul.mubr.msk.f32.vlgmr.msra.gmra.mrb[104].mxu1 %vm3826_vm5, %v25471_v0 }
 0x4b9   :  { %v23376_v32 = vpop.f32.mrb[91].mxu1  ;;  %18201 = vmatprep.mubr.msk.f32.mxu1 %vm3826_vm5, %v25472_v23  ;;  %v23380_v37 = vpop.f32.mrb[94].mxu0  ;;  %18209 = vmatmul.mubr.msk.f32.vlgmr.msra.gmra.mrb[108].mxu0 %vm3826_vm5, %v25473_v46 }
 0x4ba   :  { %v19592_v40 = vpack.c.bf16 %v23372_v54, %v23376_v32  ;;  %v23386_v18 = vpop.f32.mrb[95].mxu0  ;;  %18222 = vmatprep.mubr.msk.f32.mxu0 %vm3826_vm5, %v25474_v33  ;;  %v25479_v33 = vld [vmem:[#allocation92_spill] sm:$0xff] }
 0x4bb   :  { %v19604_v17 = vpack.c.bf16 %v23380_v37, %v23386_v18 }
 0x4bc   :  { %19593 = vmatprep.subr.bf16.mxu1 %v19592_v40 }
 0x4bd   :  { %19595 = vmatpush3.bf16.msra.mxu1 %v19592_v40  ;;  %19605 = vmatprep.subr.bf16.mxu0 %v19604_v17 }
 0x4be   :  { %19607 = vmatpush3.bf16.msra.mxu0 %v19604_v17  ;;  %v25478_v17 = vld [vmem:[#allocation91_spill] sm:$0xff] }
 0x4c0   :  { %v23392_v45 = vpop.f32.mrb[92].mxu1  ;;  %18202 = vmatmul.mubr.msk.f32.vlgmr.msra.gmra.mrb[106].mxu1 %vm3826_vm5, %v25475_v41 }
 0x4c1   :  { %v23396_v49 = vpop.f32.mrb[93].mxu1  ;;  %18215 = vmatprep.mubr.msk.f32.mxu1 %vm3826_vm5, %v25476_v51  ;;  %18223 = vmatmul.mubr.msk.f32.vlgmr.msra.gmra.mrb[110].mxu0 %vm3826_vm5, %v25477_v34  ;;  %v25480_v51 = vld [vmem:[#allocation93_spill] sm:$0xff] }
 0x4c2   :  { %v19600_v52 = vpack.c.bf16 %v23392_v45, %v23396_v49  ;;  %18236 = vmatprep.mubr.msk.f32.mxu0 %vm3826_vm5, %v23262_v36 }
 0x4c4   :  { %19601 = vmatprep.subr.bf16.mxu1 %v19600_v52 }
 0x4c5   :  { %19603 = vmatpush3.bf16.msra.mxu1 %v19600_v52 }
 0x4c8   :  { %v23406_v40 = vpop.f32.mrb[94].mxu1  ;;  %18216 = vmatmul.mubr.msk.f32.vlgmr.msra.gmra.mrb[108].mxu1 %vm3826_vm5, %v25478_v17 }
 0x4c9   :  { %v23410_v41 = vpop.f32.mrb[95].mxu1  ;;  %18229 = vmatprep.mubr.msk.f32.mxu1 %vm3826_vm5, %v25479_v33 }
 0x4ca   :  { %v19608_v34 = vpack.c.bf16 %v23406_v40, %v23410_v41 }
 0x4cc   :  { %19609 = vmatprep.subr.bf16.mxu1 %v19608_v34 }
 0x4cd   :  { %19611 = vmatpush3.bf16.msra.mxu1 %v19608_v34 }
 0x4d0   :  { %18230 = vmatmul.mubr.msk.f32.vlgmr.msra.gmra.mrb[110].mxu1 %vm3826_vm5, %v25480_v51 }
 0x4d1   :  { %18243 = vmatprep.mubr.msk.f32.mxu1 %vm3826_vm5, %v23288_v50 }
 0x55b   :  { %v18126_v36 = vpop.f32.mrb[96].mxu0 }
 0x55c   :  { %v7654_v52 = vsub.f32 %v23159_v4, %v18126_v36  ;;  %v6519_v17 = vpop.f32.mrb[97].mxu0 }
 0x55d   :  { %v7653_v46 = vsub.f32 %v23162_v11, %v6519_v17 }
 0x55f   :  { %v19612_v23 = vpack.c.bf16 %v7654_v52, %v7653_v46 }
 0x561   :  { %19613 = vmatprep.subr.bf16.mxu0 %v19612_v23 }
 0x562   :  { %19615 = vmatpush3.bf16.msra.mxu0 %v19612_v23 }
 0x563   :  { %v18140_v33 = vpop.f32.mrb[98].mxu0 }
 0x564   :  { %v7658_v0 = vsub.f32 %v23159_v4, %v18140_v33  ;;  %v6669_v8 = vpop.f32.mrb[99].mxu0 }
 0x565   :  { %v7657_v34 = vsub.f32 %v23162_v11, %v6669_v8  ;;  %18237 = vmatmul.mubr.msk.f32.vlgmr.msra.gmra.mrb[112].mxu0 %vm3826_vm5, %v23260_v28 }
 0x566   :  { %18250 = vmatprep.mubr.msk.f32.mxu0 %vm3826_vm5, %v23270_v5 }
 0x567   :  { %v19620_v50 = vpack.c.bf16 %v7658_v0, %v7657_v34 }
 0x569   :  { %19621 = vmatprep.subr.bf16.mxu0 %v19620_v50 }
 0x56a   :  { %19623 = vmatpush3.bf16.msra.mxu0 %v19620_v50 }
 0x56b   :  { %v18154_v36 = vpop.f32.mrb[100].mxu0 }
 0x56c   :  { %v7662_v46 = vsub.f32 %v23159_v4, %v18154_v36  ;;  %v18133_v17 = vpop.f32.mrb[96].mxu1  ;;  %v6819_v23 = vpop.f32.mrb[101].mxu0 }
 0x56d   :  { %18251 = vmatmul.mubr.msk.f32.vlgmr.msra.gmra.mrb[114].mxu0 %vm3826_vm5, %v23266_v22  ;;  %v7656_v33 = vsub.f32 %v23159_v4, %v18133_v17  ;;  %v7661_v8 = vsub.f32 %v23162_v11, %v6819_v23  ;;  %v6594_v52 = vpop.f32.mrb[97].mxu1 }
 0x56e   :  { %18264 = vmatprep.mubr.msk.f32.mxu0 %vm3826_vm5, %v23284_v7  ;;  %v7655_v28 = vsub.f32 %v23162_v11, %v6594_v52 }
 0x56f   :  { %v19628_v5 = vpack.c.bf16 %v7662_v46, %v7661_v8 }
 0x570   :  { %v19616_v0 = vpack.c.bf16 %v7656_v33, %v7655_v28 }
 0x571   :  { %19629 = vmatprep.subr.bf16.mxu0 %v19628_v5 }
 0x572   :  { %19617 = vmatprep.subr.bf16.mxu1 %v19616_v0  ;;  %19631 = vmatpush3.bf16.msra.mxu0 %v19628_v5 }
 0x573   :  { %v18147_v34 = vpop.f32.mrb[98].mxu1  ;;  %v18168_v50 = vpop.f32.mrb[102].mxu0  ;;  %19619 = vmatpush3.bf16.msra.mxu1 %v19616_v0 }
 0x574   :  { %v7660_v22 = vsub.f32 %v23159_v4, %v18147_v34  ;;  %v7666_v36 = vsub.f32 %v23159_v4, %v18168_v50  ;;  %v6744_v17 = vpop.f32.mrb[99].mxu1  ;;  %v6969_v23 = vpop.f32.mrb[103].mxu0 }
 0x575   :  { %v7659_v51 = vsub.f32 %v23162_v11, %v6744_v17  ;;  %v7665_v7 = vsub.f32 %v23162_v11, %v6969_v23  ;;  %18265 = vmatmul.mubr.msk.f32.vlgmr.msra.gmra.mrb[116].mxu0 %vm3826_vm5, %v23278_v35 }
 0x576   :  { %18244 = vmatmul.mubr.msk.f32.vlgmr.msra.gmra.mrb[112].mxu1 %vm3826_vm5, %v23282_v30  ;;  %18278 = vmatprep.mubr.msk.f32.mxu0 %vm3826_vm5, %v23300_v61 }
 0x577   :  { %v19624_v46 = vpack.c.bf16 %v7660_v22, %v7659_v51  ;;  %v19636_v33 = vpack.c.bf16 %v7666_v36, %v7665_v7  ;;  %18257 = vmatprep.mubr.msk.f32.mxu1 %vm3826_vm5, %v23298_v20 }
 0x579   :  { %19625 = vmatprep.subr.bf16.mxu1 %v19624_v46  ;;  %19637 = vmatprep.subr.bf16.mxu0 %v19636_v33 }
 0x57a   :  { %19627 = vmatpush3.bf16.msra.mxu1 %v19624_v46  ;;  %19639 = vmatpush3.bf16.msra.mxu0 %v19636_v33 }
 0x57b   :  { %v18161_v8 = vpop.f32.mrb[100].mxu1 }
 0x57c   :  { %v7664_v52 = vsub.f32 %v23159_v4, %v18161_v8  ;;  %v6894_v28 = vpop.f32.mrb[101].mxu1  ;;  %v18182_v35 = vpop.f32.mrb[104].mxu0 }
 0x57d   :  { %v7663_v5 = vsub.f32 %v23162_v11, %v6894_v28  ;;  %v7670_v30 = vsub.f32 %v23159_v4, %v18182_v35  ;;  %v7119_v0 = vpop.f32.mrb[105].mxu0  ;;  %18258 = vmatmul.mubr.msk.f32.vlgmr.msra.gmra.mrb[114].mxu1 %vm3826_vm5, %v23292_v53  ;;  %18279 = vmatmul.mubr.msk.f32.vlgmr.msra.gmra.mrb[118].mxu0 %vm3826_vm5, %v23294_v43 }
 0x57e   :  { %v7669_v61 = vsub.f32 %v23162_v11, %v7119_v0  ;;  %18271 = vmatprep.mubr.msk.f32.mxu1 %vm3826_vm5, %v23318_v59  ;;  %18292 = vmatprep.mubr.msk.f32.mxu0 %vm3826_vm5, %v23328_v3 }
 0x57f   :  { %v19632_v20 = vpack.c.bf16 %v7664_v52, %v7663_v5 }
 0x580   :  { %v19644_v51 = vpack.c.bf16 %v7670_v30, %v7669_v61 }
 0x581   :  { %19633 = vmatprep.subr.bf16.mxu1 %v19632_v20 }
 0x582   :  { %19635 = vmatpush3.bf16.msra.mxu1 %v19632_v20  ;;  %19645 = vmatprep.subr.bf16.mxu0 %v19644_v51 }
 0x583   :  { %v18175_v34 = vpop.f32.mrb[102].mxu1  ;;  %19647 = vmatpush3.bf16.msra.mxu0 %v19644_v51 }
 0x584   :  { %v7668_v53 = vsub.f32 %v23159_v4, %v18175_v34  ;;  %v7044_v50 = vpop.f32.mrb[103].mxu1  ;;  %v18196_v22 = vpop.f32.mrb[106].mxu0 }
 0x585   :  { %v7667_v43 = vsub.f32 %v23162_v11, %v7044_v50  ;;  %18272 = vmatmul.mubr.msk.f32.vlgmr.msra.gmra.mrb[116].mxu1 %vm3826_vm5, %v23312_v6  ;;  %v7674_v59 = vsub.f32 %v23159_v4, %v18196_v22  ;;  %v7269_v36 = vpop.f32.mrb[107].mxu0 }
 0x586   :  { %18285 = vmatprep.mubr.msk.f32.mxu1 %vm3826_vm5, %v23336_v58  ;;  %v7673_v17 = vsub.f32 %v23162_v11, %v7269_v36  ;;  %18293 = vmatmul.mubr.msk.f32.vlgmr.msra.gmra.mrb[120].mxu0 %vm3826_vm5, %v23320_v16 }
 0x587   :  { %v19640_v3 = vpack.c.bf16 %v7668_v53, %v7667_v43  ;;  %18306 = vmatprep.mubr.msk.f32.mxu0 %vm3826_vm5, %v23346_v39 }
 0x588   :  { %v19652_v23 = vpack.c.bf16 %v7674_v59, %v7673_v17 }
 0x589   :  { %19641 = vmatprep.subr.bf16.mxu1 %v19640_v3 }
 0x58a   :  { %19643 = vmatpush3.bf16.msra.mxu1 %v19640_v3  ;;  %19653 = vmatprep.subr.bf16.mxu0 %v19652_v23 }
 0x58b   :  { %v18189_v6 = vpop.f32.mrb[104].mxu1  ;;  %19655 = vmatpush3.bf16.msra.mxu0 %v19652_v23 }
 0x58c   :  { %v7672_v7 = vsub.f32 %v23159_v4, %v18189_v6  ;;  %v7194_v46 = vpop.f32.mrb[105].mxu1  ;;  %v18210_v33 = vpop.f32.mrb[108].mxu0 }
 0x58d   :  { %v7671_v58 = vsub.f32 %v23162_v11, %v7194_v46  ;;  %18286 = vmatmul.mubr.msk.f32.vlgmr.msra.gmra.mrb[118].mxu1 %vm3826_vm5, %v23332_v47  ;;  %v7678_v16 = vsub.f32 %v23159_v4, %v18210_v33  ;;  %v7419_v8 = vpop.f32.mrb[109].mxu0 }
 0x58e   :  { %18299 = vmatprep.mubr.msk.f32.mxu1 %vm3826_vm5, %v23356_v26  ;;  %v7677_v52 = vsub.f32 %v23162_v11, %v7419_v8  ;;  %18307 = vmatmul.mubr.msk.f32.vlgmr.msra.gmra.mrb[122].mxu0 %vm3826_vm5, %v23340_v25  ;;  %v25481_v8 = vld [vmem:[#allocation83_spill] sm:$0xff] }
 0x58f   :  { %v19648_v39 = vpack.c.bf16 %v7672_v7, %v7671_v58  ;;  %18320 = vmatprep.mubr.msk.f32.mxu0 %vm3826_vm5, %v23366_v56 }
 0x590   :  { %v19660_v28 = vpack.c.bf16 %v7678_v16, %v7677_v52  ;;  %v25483_v52 = vld [vmem:[#allocation86_spill] sm:$0xff] }
 0x591   :  { %19649 = vmatprep.subr.bf16.mxu1 %v19648_v39 }
 0x592   :  { %19651 = vmatpush3.bf16.msra.mxu1 %v19648_v39  ;;  %19661 = vmatprep.subr.bf16.mxu0 %v19660_v28  ;;  %v25482_v39 = vld [vmem:[#allocation84_spill] sm:$0xff] }
 0x593   :  { %v18203_v47 = vpop.f32.mrb[106].mxu1  ;;  %19663 = vmatpush3.bf16.msra.mxu0 %v19660_v28 }
 0x594   :  { %v7676_v35 = vsub.f32 %v23159_v4, %v18203_v47  ;;  %v7344_v5 = vpop.f32.mrb[107].mxu1  ;;  %v18224_v30 = vpop.f32.mrb[110].mxu0  ;;  %v25484_v47 = vld [vmem:[#allocation85_spill] sm:$0xff] }
 0x595   :  { %v7675_v26 = vsub.f32 %v23162_v11, %v7344_v5  ;;  %18300 = vmatmul.mubr.msk.f32.vlgmr.msra.gmra.mrb[120].mxu1 %vm3826_vm5, %v23352_v19  ;;  %v7682_v25 = vsub.f32 %v23159_v4, %v18224_v30  ;;  %v7569_v0 = vpop.f32.mrb[111].mxu0  ;;  %v25485_v30 = vld [vmem:[#allocation87_spill] sm:$0xff] }
 0x596   :  { %18313 = vmatprep.mubr.msk.f32.mxu1 %vm3826_vm5, %v23376_v32  ;;  %v7681_v20 = vsub.f32 %v23162_v11, %v7569_v0  ;;  %18321 = vmatmul.mubr.msk.f32.vlgmr.msra.gmra.mrb[124].mxu0 %vm3826_vm5, %v23360_v29  ;;  %v25486_v0 = vld [vmem:[#allocation88_spill] sm:$0xff] }
 0x597   :  { %v19656_v56 = vpack.c.bf16 %v7676_v35, %v7675_v26  ;;  %18334 = vmatprep.mubr.msk.f32.mxu0 %vm3826_vm5, %v23386_v18 }
 0x598   :  { %v19668_v61 = vpack.c.bf16 %v7682_v25, %v7681_v20  ;;  %v25487_v20 = vld [vmem:[#allocation90_spill] sm:$0xff] }
 0x599   :  { %19657 = vmatprep.subr.bf16.mxu1 %v19656_v56 }
 0x59a   :  { %19659 = vmatpush3.bf16.msra.mxu1 %v19656_v56  ;;  %19669 = vmatprep.subr.bf16.mxu0 %v19668_v61 }
 0x59b   :  { %v18217_v19 = vpop.f32.mrb[108].mxu1  ;;  %19671 = vmatpush3.bf16.msra.mxu0 %v19668_v61  ;;  %v25488_v61 = vld [vmem:[#allocation89_spill] sm:$0xff] }
 0x59c   :  { %v7680_v51 = vsub.f32 %v23159_v4, %v18217_v19  ;;  %v7494_v34 = vpop.f32.mrb[109].mxu1 }
 0x59d   :  { %v7679_v32 = vsub.f32 %v23162_v11, %v7494_v34  ;;  %18314 = vmatmul.mubr.msk.f32.vlgmr.msra.gmra.mrb[122].mxu1 %vm3826_vm5, %v23372_v54  ;;  %v25489_v34 = vld [vmem:[#allocation91_spill] sm:$0xff] }
 0x59e   :  { %18327 = vmatprep.mubr.msk.f32.mxu1 %vm3826_vm5, %v23396_v49  ;;  %18335 = vmatmul.mubr.msk.f32.vlgmr.msra.gmra.mrb[126].mxu0 %vm3826_vm5, %v23380_v37 }
 0x59f   :  { %v19664_v29 = vpack.c.bf16 %v7680_v51, %v7679_v32  ;;  %18348 = vmatprep.mubr.msk.f32.mxu0 %vm3826_vm5, %v22789_v14 }
 0x5a1   :  { %19665 = vmatprep.subr.bf16.mxu1 %v19664_v29 }
 0x5a2   :  { %19667 = vmatpush3.bf16.msra.mxu1 %v19664_v29  ;;  %v25490_v29 = vld [vmem:[#allocation92_spill] sm:$0xff] }
 0x5a3   :  { %v18231_v18 = vpop.f32.mrb[110].mxu1 }
 0x5a4   :  { %v7684_v53 = vsub.f32 %v23159_v4, %v18231_v18  ;;  %v7644_v50 = vpop.f32.mrb[111].mxu1 }
 0x5a5   :  { %v7683_v22 = vsub.f32 %v23162_v11, %v7644_v50  ;;  %18328 = vmatmul.mubr.msk.f32.vlgmr.msra.gmra.mrb[124].mxu1 %vm3826_vm5, %v23392_v45 }
 0x5a6   :  { %18341 = vmatprep.mubr.msk.f32.mxu1 %vm3826_vm5, %v23410_v41 }
 0x5a7   :  { %v19672_v54 = vpack.c.bf16 %v7684_v53, %v7683_v22  ;;  %v25491_v53 = vld [vmem:[#allocation93_spill] sm:$0xff] }
 0x5a9   :  { %19673 = vmatprep.subr.bf16.mxu1 %v19672_v54 }
 0x5aa   :  { %19675 = vmatpush3.bf16.msra.mxu1 %v19672_v54 }
 0x5ad   :  { %18342 = vmatmul.mubr.msk.f32.vlgmr.msra.gmra.mrb[126].mxu1 %vm3826_vm5, %v23406_v40 }
 0x5ae   :  { %18355 = vmatprep.mubr.msk.f32.mxu1 %vm3826_vm5, %v22867_v13 }
 0x638   :  { %v23516_v14 = vpop.f32.mrb[112].mxu0 }
 0x639   :  { %v23518_v37 = vpop.f32.mrb[113].mxu0 }
 0x63a   :  { %v19676_v49 = vpack.c.bf16 %v23516_v14, %v23518_v37 }
 0x63c   :  { %19677 = vmatprep.subr.bf16.mxu0 %v19676_v49 }
 0x63d   :  { %19679 = vmatpush3.bf16.msra.mxu0 %v19676_v49 }
 0x640   :  { %v23522_v45 = vpop.f32.mrb[114].mxu0  ;;  %18349 = vmatmul.mubr.msk.f32.vlgmr.msra.gmra.mrb[128].mxu0 %vm3826_vm5, %v22808_v21 }
 0x641   :  { %v23526_v41 = vpop.f32.mrb[115].mxu0  ;;  %18362 = vmatprep.mubr.msk.f32.mxu0 %vm3826_vm5, %v22823_v31 }
 0x642   :  { %v19684_v13 = vpack.c.bf16 %v23522_v45, %v23526_v41 }
 0x644   :  { %19685 = vmatprep.subr.bf16.mxu0 %v19684_v13 }
 0x645   :  { %19687 = vmatpush3.bf16.msra.mxu0 %v19684_v13 }
 0x648   :  { %18363 = vmatmul.mubr.msk.f32.vlgmr.msra.gmra.mrb[130].mxu0 %vm3826_vm5, %v22842_v62  ;;  %v23534_v40 = vpop.f32.mrb[116].mxu0 }
 0x649   :  { %18376 = vmatprep.mubr.msk.f32.mxu0 %vm3826_vm5, %v22861_v1  ;;  %v23538_v43 = vpop.f32.mrb[112].mxu1  ;;  %v23540_v21 = vpop.f32.mrb[117].mxu0 }
 0x64a   :  { %v19692_v31 = vpack.c.bf16 %v23534_v40, %v23540_v21  ;;  %v23544_v59 = vpop.f32.mrb[113].mxu1 }
 0x64b   :  { %v19680_v36 = vpack.c.bf16 %v23538_v43, %v23544_v59 }
 0x64c   :  { %19693 = vmatprep.subr.bf16.mxu0 %v19692_v31 }
 0x64d   :  { %19681 = vmatprep.subr.bf16.mxu1 %v19680_v36  ;;  %19695 = vmatpush3.bf16.msra.mxu0 %v19692_v31 }
 0x64e   :  { %19683 = vmatpush3.bf16.msra.mxu1 %v19680_v36 }
 0x650   :  { %v23548_v62 = vpop.f32.mrb[114].mxu1  ;;  %v23550_v3 = vpop.f32.mrb[118].mxu0  ;;  %18377 = vmatmul.mubr.msk.f32.vlgmr.msra.gmra.mrb[132].mxu0 %vm3826_vm5, %v22885_v12 }
 0x651   :  { %v23554_v1 = vpop.f32.mrb[115].mxu1  ;;  %v23556_v17 = vpop.f32.mrb[119].mxu0  ;;  %18356 = vmatmul.mubr.msk.f32.vlgmr.msra.gmra.mrb[128].mxu1 %vm3826_vm5, %v22894_v55  ;;  %18390 = vmatprep.mubr.msk.f32.mxu0 %vm3826_vm5, %v22907_v2 }
 0x652   :  { %v19688_v23 = vpack.c.bf16 %v23548_v62, %v23554_v1  ;;  %v19700_v6 = vpack.c.bf16 %v23550_v3, %v23556_v17  ;;  %18369 = vmatprep.mubr.msk.f32.mxu1 %vm3826_vm5, %v22901_v9 }
 0x654   :  { %19689 = vmatprep.subr.bf16.mxu1 %v19688_v23  ;;  %19701 = vmatprep.subr.bf16.mxu0 %v19700_v6 }
 0x655   :  { %19691 = vmatpush3.bf16.msra.mxu1 %v19688_v23  ;;  %19703 = vmatpush3.bf16.msra.mxu0 %v19700_v6 }
 0x658   :  { %v23568_v12 = vpop.f32.mrb[116].mxu1  ;;  %18370 = vmatmul.mubr.msk.f32.vlgmr.msra.gmra.mrb[130].mxu1 %vm3826_vm5, %v22925_v38  ;;  %18391 = vmatmul.mubr.msk.f32.vlgmr.msra.gmra.mrb[134].mxu0 %vm3826_vm5, %v22930_v10 }
 0x659   :  { %v23574_v55 = vpop.f32.mrb[117].mxu1  ;;  %v23576_v2 = vpop.f32.mrb[120].mxu0  ;;  %18383 = vmatprep.mubr.msk.f32.mxu1 %vm3826_vm5, %v22943_v60  ;;  %18404 = vmatprep.mubr.msk.f32.mxu0 %vm3826_vm5, %v22957_v24 }
 0x65a   :  { %v19696_v7 = vpack.c.bf16 %v23568_v12, %v23574_v55  ;;  %v23584_v9 = vpop.f32.mrb[121].mxu0 }
 0x65b   :  { %v19708_v38 = vpack.c.bf16 %v23576_v2, %v23584_v9 }
 0x65c   :  { %19697 = vmatprep.subr.bf16.mxu1 %v19696_v7 }
 0x65d   :  { %19699 = vmatpush3.bf16.msra.mxu1 %v19696_v7  ;;  %19709 = vmatprep.subr.bf16.mxu0 %v19708_v38 }
 0x65e   :  { %19711 = vmatpush3.bf16.msra.mxu0 %v19708_v38 }
 0x660   :  { %v23588_v10 = vpop.f32.mrb[118].mxu1  ;;  %18384 = vmatmul.mubr.msk.f32.vlgmr.msra.gmra.mrb[132].mxu1 %vm3826_vm5, %v22969_v48 }
 0x661   :  { %v23592_v46 = vpop.f32.mrb[119].mxu1  ;;  %18397 = vmatprep.mubr.msk.f32.mxu1 %vm3826_vm5, %v22987_v63  ;;  %v23596_v60 = vpop.f32.mrb[122].mxu0  ;;  %18405 = vmatmul.mubr.msk.f32.vlgmr.msra.gmra.mrb[136].mxu0 %vm3826_vm5, %v22981_v15 }
 0x662   :  { %v19704_v24 = vpack.c.bf16 %v23588_v10, %v23592_v46  ;;  %v23602_v33 = vpop.f32.mrb[123].mxu0  ;;  %18418 = vmatprep.mubr.msk.f32.mxu0 %vm3826_vm5, %v22999_v27 }
 0x663   :  { %v19716_v48 = vpack.c.bf16 %v23596_v60, %v23602_v33 }
 0x664   :  { %19705 = vmatprep.subr.bf16.mxu1 %v19704_v24 }
 0x665   :  { %19707 = vmatpush3.bf16.msra.mxu1 %v19704_v24  ;;  %19717 = vmatprep.subr.bf16.mxu0 %v19716_v48 }
 0x666   :  { %19719 = vmatpush3.bf16.msra.mxu0 %v19716_v48 }
 0x668   :  { %v23608_v63 = vpop.f32.mrb[120].mxu1  ;;  %18398 = vmatmul.mubr.msk.f32.vlgmr.msra.gmra.mrb[134].mxu1 %vm3826_vm5, %v23013_v42 }
 0x669   :  { %v23612_v15 = vpop.f32.mrb[121].mxu1  ;;  %18411 = vmatprep.mubr.msk.f32.mxu1 %vm3826_vm5, %v23031_v57  ;;  %v23616_v58 = vpop.f32.mrb[124].mxu0  ;;  %18419 = vmatmul.mubr.msk.f32.vlgmr.msra.gmra.mrb[138].mxu0 %vm3826_vm5, %v23025_v44 }
 0x66a   :  { %v19712_v27 = vpack.c.bf16 %v23608_v63, %v23612_v15  ;;  %v23622_v16 = vpop.f32.mrb[125].mxu0  ;;  %18432 = vmatprep.mubr.msk.f32.mxu0 %vm3826_vm5, %v25481_v8 }
 0x66b   :  { %v19724_v42 = vpack.c.bf16 %v23616_v58, %v23622_v16 }
 0x66c   :  { %19713 = vmatprep.subr.bf16.mxu1 %v19712_v27 }
 0x66d   :  { %19715 = vmatpush3.bf16.msra.mxu1 %v19712_v27  ;;  %19725 = vmatprep.subr.bf16.mxu0 %v19724_v42 }
 0x66e   :  { %19727 = vmatpush3.bf16.msra.mxu0 %v19724_v42 }
 0x670   :  { %v23628_v57 = vpop.f32.mrb[122].mxu1  ;;  %18412 = vmatmul.mubr.msk.f32.vlgmr.msra.gmra.mrb[136].mxu1 %vm3826_vm5, %v25482_v39 }
 0x671   :  { %v23632_v44 = vpop.f32.mrb[123].mxu1  ;;  %18425 = vmatprep.mubr.msk.f32.mxu1 %vm3826_vm5, %v25483_v52  ;;  %v23636_v28 = vpop.f32.mrb[126].mxu0  ;;  %18433 = vmatmul.mubr.msk.f32.vlgmr.msra.gmra.mrb[140].mxu0 %vm3826_vm5, %v25484_v47 }
 0x672   :  { %v19720_v35 = vpack.c.bf16 %v23628_v57, %v23632_v44  ;;  %v23642_v5 = vpop.f32.mrb[127].mxu0  ;;  %18446 = vmatprep.mubr.msk.f32.mxu0 %vm3826_vm5, %v25485_v30 }
 0x673   :  { %v19732_v26 = vpack.c.bf16 %v23636_v28, %v23642_v5 }
 0x674   :  { %19721 = vmatprep.subr.bf16.mxu1 %v19720_v35 }
 0x675   :  { %19723 = vmatpush3.bf16.msra.mxu1 %v19720_v35  ;;  %19733 = vmatprep.subr.bf16.mxu0 %v19732_v26 }
 0x676   :  { %19735 = vmatpush3.bf16.msra.mxu0 %v19732_v26 }
 0x678   :  { %v23648_v25 = vpop.f32.mrb[124].mxu1  ;;  %18426 = vmatmul.mubr.msk.f32.vlgmr.msra.gmra.mrb[138].mxu1 %vm3826_vm5, %v25486_v0 }
 0x679   :  { %v23652_v56 = vpop.f32.mrb[125].mxu1  ;;  %18439 = vmatprep.mubr.msk.f32.mxu1 %vm3826_vm5, %v25487_v20  ;;  %18447 = vmatmul.mubr.msk.f32.vlgmr.msra.gmra.mrb[142].mxu0 %vm3826_vm5, %v25488_v61 }
 0x67a   :  { %v19728_v19 = vpack.c.bf16 %v23648_v25, %v23652_v56  ;;  %18460 = vmatprep.mubr.msk.f32.mxu0 %vm3826_vm5, %v23518_v37 }
 0x67c   :  { %19729 = vmatprep.subr.bf16.mxu1 %v19728_v19 }
 0x67d   :  { %19731 = vmatpush3.bf16.msra.mxu1 %v19728_v19 }
 0x680   :  { %v23662_v51 = vpop.f32.mrb[126].mxu1  ;;  %18440 = vmatmul.mubr.msk.f32.vlgmr.msra.gmra.mrb[140].mxu1 %vm3826_vm5, %v25489_v34 }
 0x681   :  { %v23666_v32 = vpop.f32.mrb[127].mxu1  ;;  %18453 = vmatprep.mubr.msk.f32.mxu1 %vm3826_vm5, %v25490_v29 }
 0x682   :  { %v19736_v18 = vpack.c.bf16 %v23662_v51, %v23666_v32 }
 0x684   :  { %19737 = vmatprep.subr.bf16.mxu1 %v19736_v18 }
 0x685   :  { %19739 = vmatpush3.bf16.msra.mxu1 %v19736_v18 }
 0x688   :  { %18454 = vmatmul.mubr.msk.f32.vlgmr.msra.gmra.mrb[142].mxu1 %vm3826_vm5, %v25491_v53 }
 0x689   :  { %18467 = vmatprep.mubr.msk.f32.mxu1 %vm3826_vm5, %v23544_v59 }
 0x713   :  { %v18350_v50 = vpop.f32.mrb[128].mxu0 }
 0x714   :  { %v10182_v22 = vsub.f32 %v23159_v4, %v18350_v50  ;;  %v9047_v54 = vpop.f32.mrb[129].mxu0 }
 0x715   :  { %v10181_v37 = vsub.f32 %v23162_v11, %v9047_v54 }
 0x717   :  { %v19740_v49 = vpack.c.bf16 %v10182_v22, %v10181_v37 }
 0x719   :  { %19741 = vmatprep.subr.bf16.mxu0 %v19740_v49 }
 0x71a   :  { %19743 = vmatpush3.bf16.msra.mxu0 %v19740_v49 }
 0x71b   :  { %v18364_v13 = vpop.f32.mrb[130].mxu0 }
 0x71c   :  { %v10186_v31 = vsub.f32 %v23159_v4, %v18364_v13  ;;  %v9197_v36 = vpop.f32.mrb[131].mxu0 }
 0x71d   :  { %v10185_v23 = vsub.f32 %v23162_v11, %v9197_v36  ;;  %18461 = vmatmul.mubr.msk.f32.vlgmr.msra.gmra.mrb[144].mxu0 %vm3826_vm5, %v23516_v14 }
 0x71e   :  { %18474 = vmatprep.mubr.msk.f32.mxu0 %vm3826_vm5, %v23526_v41 }
 0x71f   :  { %v19748_v59 = vpack.c.bf16 %v10186_v31, %v10185_v23 }
 0x721   :  { %19749 = vmatprep.subr.bf16.mxu0 %v19748_v59 }
 0x722   :  { %19751 = vmatpush3.bf16.msra.mxu0 %v19748_v59 }
 0x723   :  { %v18378_v6 = vpop.f32.mrb[132].mxu0 }
 0x724   :  { %v10190_v7 = vsub.f32 %v23159_v4, %v18378_v6  ;;  %v18357_v38 = vpop.f32.mrb[128].mxu1  ;;  %v9347_v24 = vpop.f32.mrb[133].mxu0 }
 0x725   :  { %18475 = vmatmul.mubr.msk.f32.vlgmr.msra.gmra.mrb[146].mxu0 %vm3826_vm5, %v23522_v45  ;;  %v10184_v48 = vsub.f32 %v23159_v4, %v18357_v38  ;;  %v10189_v27 = vsub.f32 %v23162_v11, %v9347_v24  ;;  %v9122_v8 = vpop.f32.mrb[129].mxu1 }
 0x726   :  { %18488 = vmatprep.mubr.msk.f32.mxu0 %vm3826_vm5, %v23540_v21  ;;  %v10183_v14 = vsub.f32 %v23162_v11, %v9122_v8  ;;  %v1837_v8 = vld [vmem:[%s25241_s2 + $0x8] sm:$0xff] }
 0x727   :  { %v19756_v41 = vpack.c.bf16 %v10190_v7, %v10189_v27 }
 0x728   :  { %v19744_v42 = vpack.c.bf16 %v10184_v48, %v10183_v14 }
 0x729   :  { %19757 = vmatprep.subr.bf16.mxu0 %v19756_v41 }
 0x72a   :  { %19745 = vmatprep.subr.bf16.mxu1 %v19744_v42  ;;  %19759 = vmatpush3.bf16.msra.mxu0 %v19756_v41 }
 0x72b   :  { %v18371_v39 = vpop.f32.mrb[130].mxu1  ;;  %v18392_v52 = vpop.f32.mrb[134].mxu0  ;;  %19747 = vmatpush3.bf16.msra.mxu1 %v19744_v42 }
 0x72c   :  { %v10188_v45 = vsub.f32 %v23159_v4, %v18371_v39  ;;  %v10194_v47 = vsub.f32 %v23159_v4, %v18392_v52  ;;  %v9272_v35 = vpop.f32.mrb[131].mxu1  ;;  %v9497_v30 = vpop.f32.mrb[135].mxu0 }
 0x72d   :  { %v10187_v26 = vsub.f32 %v23162_v11, %v9272_v35  ;;  %v10193_v21 = vsub.f32 %v23162_v11, %v9497_v30  ;;  %18489 = vmatmul.mubr.msk.f32.vlgmr.msra.gmra.mrb[148].mxu0 %vm3826_vm5, %v23534_v40 }
 0x72e   :  { %18468 = vmatmul.mubr.msk.f32.vlgmr.msra.gmra.mrb[144].mxu1 %vm3826_vm5, %v23538_v43  ;;  %18502 = vmatprep.mubr.msk.f32.mxu0 %vm3826_vm5, %v23556_v17 }
 0x72f   :  { %v19752_v0 = vpack.c.bf16 %v10188_v45, %v10187_v26  ;;  %v19764_v20 = vpack.c.bf16 %v10194_v47, %v10193_v21  ;;  %18481 = vmatprep.mubr.msk.f32.mxu1 %vm3826_vm5, %v23554_v1  ;;  %v1861_v26 = vld [vmem:[%s25241_s2 + $0xc8] sm:$0xff] }
 0x731   :  { %19753 = vmatprep.subr.bf16.mxu1 %v19752_v0  ;;  %19765 = vmatprep.subr.bf16.mxu0 %v19764_v20 }
 0x732   :  { %19755 = vmatpush3.bf16.msra.mxu1 %v19752_v0  ;;  %19767 = vmatpush3.bf16.msra.mxu0 %v19764_v20 }
 0x733   :  { %v18385_v61 = vpop.f32.mrb[132].mxu1 }
 0x734   :  { %v10192_v19 = vsub.f32 %v23159_v4, %v18385_v61  ;;  %v9422_v34 = vpop.f32.mrb[133].mxu1  ;;  %v18406_v40 = vpop.f32.mrb[136].mxu0 }
 0x735   :  { %v10191_v29 = vsub.f32 %v23162_v11, %v9422_v34  ;;  %v10198_v43 = vsub.f32 %v23159_v4, %v18406_v40  ;;  %v9647_v18 = vpop.f32.mrb[137].mxu0  ;;  %18482 = vmatmul.mubr.msk.f32.vlgmr.msra.gmra.mrb[146].mxu1 %vm3826_vm5, %v23548_v62  ;;  %18503 = vmatmul.mubr.msk.f32.vlgmr.msra.gmra.mrb[150].mxu0 %vm3826_vm5, %v23550_v3 }
 0x736   :  { %v10197_v17 = vsub.f32 %v23162_v11, %v9647_v18  ;;  %18495 = vmatprep.mubr.msk.f32.mxu1 %vm3826_vm5, %v23574_v55  ;;  %18516 = vmatprep.mubr.msk.f32.mxu0 %vm3826_vm5, %v23584_v9 }
 0x737   :  { %v19760_v1 = vpack.c.bf16 %v10192_v19, %v10191_v29 }
 0x738   :  { %v19772_v53 = vpack.c.bf16 %v10198_v43, %v10197_v17 }
 0x739   :  { %19761 = vmatprep.subr.bf16.mxu1 %v19760_v1 }
 0x73a   :  { %19763 = vmatpush3.bf16.msra.mxu1 %v19760_v1  ;;  %19773 = vmatprep.subr.bf16.mxu0 %v19772_v53 }
 0x73b   :  { %v18399_v50 = vpop.f32.mrb[134].mxu1  ;;  %19775 = vmatpush3.bf16.msra.mxu0 %v19772_v53 }
 0x73c   :  { %v10196_v62 = vsub.f32 %v23159_v4, %v18399_v50  ;;  %v9572_v22 = vpop.f32.mrb[135].mxu1  ;;  %v18420_v54 = vpop.f32.mrb[138].mxu0 }
 0x73d   :  { %v10195_v3 = vsub.f32 %v23162_v11, %v9572_v22  ;;  %18496 = vmatmul.mubr.msk.f32.vlgmr.msra.gmra.mrb[148].mxu1 %vm3826_vm5, %v23568_v12  ;;  %v10202_v55 = vsub.f32 %v23159_v4, %v18420_v54  ;;  %v9797_v37 = vpop.f32.mrb[139].mxu0 }
 0x73e   :  { %18509 = vmatprep.mubr.msk.f32.mxu1 %vm3826_vm5, %v23592_v46  ;;  %v10201_v49 = vsub.f32 %v23162_v11, %v9797_v37  ;;  %18517 = vmatmul.mubr.msk.f32.vlgmr.msra.gmra.mrb[152].mxu0 %vm3826_vm5, %v23576_v2  ;;  %v25494_v37 = vld [vmem:[#allocation6_spill] sm:$0xff] }
 0x73f   :  { %v19768_v9 = vpack.c.bf16 %v10196_v62, %v10195_v3  ;;  %18530 = vmatprep.mubr.msk.f32.mxu0 %vm3826_vm5, %v23602_v33  ;;  %v25492_v3 = vld [vmem:[#allocation58_spill] sm:$0xff] }
 0x740   :  { %v19780_v13 = vpack.c.bf16 %v10202_v55, %v10201_v49  ;;  %v25493_v55 = vld [vmem:[#allocation5_spill] sm:$0xff] }
 0x741   :  { %19769 = vmatprep.subr.bf16.mxu1 %v19768_v9 }
 0x742   :  { %19771 = vmatpush3.bf16.msra.mxu1 %v19768_v9  ;;  %19781 = vmatprep.subr.bf16.mxu0 %v19780_v13  ;;  %v2494_v9 = vsel %vm1872_vm13, %v25492_v3, 0.0 }
 0x743   :  { %v18413_v12 = vpop.f32.mrb[136].mxu1  ;;  %19783 = vmatpush3.bf16.msra.mxu0 %v19780_v13 }
 0x744   :  { %v10200_v31 = vsub.f32 %v23159_v4, %v18413_v12  ;;  %v9722_v36 = vpop.f32.mrb[137].mxu1  ;;  %v18434_v23 = vpop.f32.mrb[140].mxu0 }
 0x745   :  { %v10199_v46 = vsub.f32 %v23162_v11, %v9722_v36  ;;  %18510 = vmatmul.mubr.msk.f32.vlgmr.msra.gmra.mrb[150].mxu1 %vm3826_vm5, %v23588_v10  ;;  %v10206_v2 = vsub.f32 %v23159_v4, %v18434_v23  ;;  %v9947_v59 = vpop.f32.mrb[141].mxu0 }
 0x746   :  { %18523 = vmatprep.mubr.msk.f32.mxu1 %vm3826_vm5, %v23612_v15  ;;  %v10205_v6 = vsub.f32 %v23162_v11, %v9947_v59  ;;  %18531 = vmatmul.mubr.msk.f32.vlgmr.msra.gmra.mrb[154].mxu0 %vm3826_vm5, %v23596_v60  ;;  %v25495_v59 = vld [vmem:[#allocation64_spill] sm:$0xff] }
 0x747   :  { %v19776_v33 = vpack.c.bf16 %v10200_v31, %v10199_v46  ;;  %18544 = vmatprep.mubr.msk.f32.mxu0 %vm3826_vm5, %v23622_v16  ;;  %v1836_v16 = vld [vmem:[%s25241_s2] sm:$0xff] }
 0x748   :  { %v19788_v7 = vpack.c.bf16 %v10206_v2, %v10205_v6 }
 0x749   :  { %19777 = vmatprep.subr.bf16.mxu1 %v19776_v33 }
 0x74a   :  { %19779 = vmatpush3.bf16.msra.mxu1 %v19776_v33  ;;  %19789 = vmatprep.subr.bf16.mxu0 %v19788_v7  ;;  %v2500_v33 = vsel %vm1872_vm13, %v25495_v59, 0.0  ;;  %vm14512_vm13 = vcmp.ge.s32.totalorder %v25493_v55, %v25494_v37 }
 0x74b   :  { %v18427_v10 = vpop.f32.mrb[138].mxu1  ;;  %19791 = vmatpush3.bf16.msra.mxu0 %v19788_v7 }
 0x74c   :  { %v10204_v38 = vsub.f32 %v23159_v4, %v18427_v10  ;;  %v9872_v24 = vpop.f32.mrb[139].mxu1  ;;  %v18448_v48 = vpop.f32.mrb[142].mxu0 }
 0x74d   :  { %v10203_v15 = vsub.f32 %v23162_v11, %v9872_v24  ;;  %18524 = vmatmul.mubr.msk.f32.vlgmr.msra.gmra.mrb[152].mxu1 %vm3826_vm5, %v23608_v63  ;;  %v10210_v60 = vsub.f32 %v23159_v4, %v18448_v48  ;;  %v10097_v27 = vpop.f32.mrb[143].mxu0 }
 0x74e   :  { %18537 = vmatprep.mubr.msk.f32.mxu1 %vm3826_vm5, %v23632_v44  ;;  %v10209_v41 = vsub.f32 %v23162_v11, %v10097_v27  ;;  %18545 = vmatmul.mubr.msk.f32.vlgmr.msra.gmra.mrb[156].mxu0 %vm3826_vm5, %v23616_v58  ;;  %v19804_v44 = vpack.c.bf16 %v1837_v8, %v1836_v16  ;;  %v11875_v8 = vld [vmem:[#allocation2 + $0x10] sm:$0xff] }
 0x74f   :  { %v19784_v14 = vpack.c.bf16 %v10204_v38, %v10203_v15  ;;  %18558 = vmatprep.mubr.msk.f32.mxu0 %vm3826_vm5, %v23642_v5 }
 0x750   :  { %v19796_v63 = vpack.c.bf16 %v10210_v60, %v10209_v41 }
 0x751   :  { %19785 = vmatprep.subr.bf16.mxu1 %v19784_v14 }
 0x752   :  { %19787 = vmatpush3.bf16.msra.mxu1 %v19784_v14  ;;  %19797 = vmatprep.subr.bf16.mxu0 %v19796_v63  ;;  %v11876_v14 = vld [vmem:[#allocation2 + $0x18] sm:$0xff] }
 0x753   :  { %v18441_v42 = vpop.f32.mrb[140].mxu1  ;;  %19799 = vmatpush3.bf16.msra.mxu0 %v19796_v63 }
 0x754   :  { %v10208_v39 = vsub.f32 %v23159_v4, %v18441_v42  ;;  %v10022_v52 = vpop.f32.mrb[141].mxu1  ;;  %19805 = vmatprep.subr.bf16.mxu0 %v19804_v44  ;;  %v19824_v42 = vpack.c.bf16 %v11876_v14, %v11875_v8 }
 0x755   :  { %v10207_v45 = vsub.f32 %v23162_v11, %v10022_v52  ;;  %18538 = vmatmul.mubr.msk.f32.vlgmr.msra.gmra.mrb[154].mxu1 %vm3826_vm5, %v23628_v57  ;;  %v11878_v52 = vld [vmem:[#allocation2 + $0x28] sm:$0xff] }
 0x756   :  { %18551 = vmatprep.mubr.msk.f32.mxu1 %vm3826_vm5, %v23652_v56  ;;  %18559 = vmatmul.mubr.msk.f32.vlgmr.msra.gmra.mrb[158].mxu0 %vm3826_vm5, %v23636_v28  ;;  %v1844_v28 = vld [vmem:[%s25241_s2 + $0x40] sm:$0xff]  ;;  %v1853_v56 = vld [vmem:[%s25241_s2 + $0x88] sm:$0xff] }
 0x757   :  { %v19792_v58 = vpack.c.bf16 %v10208_v39, %v10207_v45  ;;  %19807 = vmatpush3.bf16.msra.mxu0 %v19804_v44  ;;  %v11877_v39 = vld [vmem:[#allocation2 + $0x20] sm:$0xff] }
 0x758   :  { %v23864_v45 = vpack.c.bf16 %v11878_v52, %v11877_v39  ;;  %v11895_v52 = vld [vmem:[#allocation2 + $0xb0] sm:$0xff] }
 0x759   :  { %19793 = vmatprep.subr.bf16.mxu1 %v19792_v58 }
 0x75a   :  { %19795 = vmatpush3.bf16.msra.mxu1 %v19792_v58  ;;  %v11879_v58 = vld [vmem:[#allocation2 + $0x30] sm:$0xff] }
 0x75b   :  { %v18455_v5 = vpop.f32.mrb[142].mxu1 }
 0x75c   :  { %v10212_v47 = vsub.f32 %v23159_v4, %v18455_v5  ;;  %v10172_v35 = vpop.f32.mrb[143].mxu1  ;;  %v1845_v4 = vld [vmem:[%s25241_s2 + $0x48] sm:$0xff]  ;;  %v11880_v5 = vld [vmem:[#allocation2 + $0x38] sm:$0xff] }
 0x75d   :  { %v10211_v30 = vsub.f32 %v23162_v11, %v10172_v35  ;;  %18552 = vmatmul.mubr.msk.f32.vlgmr.msra.gmra.mrb[156].mxu1 %vm3826_vm5, %v23648_v25  ;;  %v19808_v11 = vpack.c.bf16 %v1845_v4, %v1844_v28  ;;  %v1852_v25 = vld [vmem:[%s25241_s2 + $0x80] sm:$0xff]  ;;  %v11883_v28 = vld [vmem:[#allocation2 + $0x50] sm:$0xff]  ;;  %v11884_v4 = vld [vmem:[#allocation2 + $0x58] sm:$0xff] }
 0x75e   :  { %18565 = vmatprep.mubr.msk.f32.mxu1 %vm3826_vm5, %v23666_v32  ;;  %v1860_v32 = vld [vmem:[%s25241_s2 + $0xc0] sm:$0xff] }
 0x75f   :  { %v19800_v57 = vpack.c.bf16 %v10212_v47, %v10211_v30  ;;  %v19816_v21 = vpack.c.bf16 %v1861_v26, %v1860_v32  ;;  %v23868_v30 = vpack.c.bf16 %v11880_v5, %v11879_v58  ;;  %v19840_v26 = vpack.c.bf16 %v11884_v4, %v11883_v28  ;;  %v11896_v58 = vld [vmem:[#allocation2 + $0xb8] sm:$0xff]  ;;  %v11899_v28 = vld [vmem:[#allocation2 + $0xd0] sm:$0xff] }
 0x760   :  { %v11900_v4 = vld [vmem:[#allocation2 + $0xd8] sm:$0xff] }
 0x761   :  { %19801 = vmatprep.subr.bf16.mxu1 %v19800_v57 }
 0x762   :  { %19803 = vmatpush3.bf16.msra.mxu1 %v19800_v57  ;;  %v25496_v57 = vld [vmem:[#allocation7_spill] sm:$0xff] }
 0x763   :  { %19809 = vmatprep.subr.bf16.mxu1 %v19808_v11  ;;  %vm1873_vm7 = vcmp.gt.s32.totalorder %v25496_v57, %v25494_v37 }
 0x765   :  { %18566 = vmatmul.mubr.msk.f32.vlgmr.msra.gmra.mrb[158].mxu1 %vm3826_vm5, %v23662_v51  ;;  %v19812_v51 = vpack.c.bf16 %v1853_v56, %v1852_v25  ;;  %v25497_v56 = vld [vmem:[#allocation22_spill] sm:$0xff] }
 0x766   :  { %19811 = vmatpush3.bf16.msra.mxu1 %v19808_v11 }
 0x767   :  { %19813 = vmatprep.subr.bf16.mxu0 %v19812_v51  ;;  %19817 = vmatprep.subr.bf16.mxu1 %v19816_v21 }
 0x7f0   :  { %v18462_v0 = vpop.f32.mrb[144].mxu0 }
 0x7f1   :  { %v10285_v20 = vpop.f32.mrb[145].mxu0 }
 0x7f2   :  { %18572 = vmatprep.mubr.msk.f32.mxu0 %vm3826_vm5, %v10285_v20  ;;  %v25498_v20 = vld [vmem:[#allocation71_spill] sm:$0xff] }
 0x7f3   :  { %18573 = vmatmul.mubr.msk.f32.vlgmr.msra.gmra.mrb[160].mxu0 %vm3826_vm5, %v18462_v0  ;;  %v11886_v0 = vld [vmem:[#allocation2 + $0x68] sm:$0xff] }
 0x7f4   :  { %19815 = vmatpush3.bf16.msra.mxu0 %v19812_v51  ;;  %v2495_v51 = vsel %vm1873_vm7, %v25497_v56, 0.0 }
 0x7f8   :  { %v23794_v61 = vpop.f32.mrb[146].mxu0 }
 0x7f9   :  { %v23796_v19 = vpop.f32.mrb[147].mxu0 }
 0x800   :  { %v18490_v34 = vpop.f32.mrb[148].mxu0 }
 0x801   :  { %v23798_v40 = vpop.f32.mrb[144].mxu1  ;;  %v10609_v29 = vpop.f32.mrb[149].mxu0 }
 0x802   :  { %v23800_v43 = vpop.f32.mrb[145].mxu1  ;;  %18579 = vmatprep.mubr.msk.f32.mxu1 %vm3826_vm5, %v10609_v29  ;;  %v11887_v29 = vld [vmem:[#allocation2 + $0x70] sm:$0xff] }
 0x803   :  { %18580 = vmatmul.mubr.msk.f32.vlgmr.msra.gmra.mrb[160].mxu1 %vm3826_vm5, %v18490_v34 }
 0x804   :  { %19819 = vmatpush3.bf16.msra.mxu1 %v19816_v21  ;;  %v11885_v21 = vld [vmem:[#allocation2 + $0x60] sm:$0xff] }
 0x805   :  { %v23887_v34 = vpack.c.bf16 %v11886_v0, %v11885_v21  ;;  %v11901_v0 = vld [vmem:[#allocation2 + $0xe0] sm:$0xff] }
 0x808   :  { %v23804_v18 = vpop.f32.mrb[146].mxu1  ;;  %v23806_v1 = vpop.f32.mrb[150].mxu0 }
 0x809   :  { %v23808_v17 = vpop.f32.mrb[147].mxu1  ;;  %v23810_v53 = vpop.f32.mrb[151].mxu0 }
 0x810   :  { %v23812_v50 = vpop.f32.mrb[148].mxu1 }
 0x811   :  { %v23814_v62 = vpop.f32.mrb[149].mxu1  ;;  %v18518_v22 = vpop.f32.mrb[152].mxu0 }
 0x812   :  { %v10933_v54 = vpop.f32.mrb[153].mxu0 }
 0x813   :  { %18586 = vmatprep.mubr.msk.f32.mxu0 %vm3826_vm5, %v10933_v54 }
 0x814   :  { %18587 = vmatmul.mubr.msk.f32.vlgmr.msra.gmra.mrb[162].mxu0 %vm3826_vm5, %v18518_v22  ;;  %v11888_v22 = vld [vmem:[#allocation2 + $0x78] sm:$0xff] }
 0x815   :  { %18612 = vmatprep.mubr.msk.f32.mxu0 %vm11905_vm6, %v2494_v9  ;;  %v23891_v9 = vpack.c.bf16 %v11888_v22, %v11887_v29  ;;  %v11903_v22 = vld [vmem:[#allocation2 + $0xf0] sm:$0xff] }
 0x818   :  { %v23823_v49 = vpop.f32.mrb[150].mxu1 }
 0x819   :  { %v23825_v13 = vpop.f32.mrb[151].mxu1  ;;  %v23827_v12 = vpop.f32.mrb[154].mxu0 }
 0x81a   :  { %v23829_v31 = vpop.f32.mrb[155].mxu0 }
 0x820   :  { %v23831_v36 = vpop.f32.mrb[152].mxu1 }
 0x821   :  { %v23833_v23 = vpop.f32.mrb[153].mxu1  ;;  %v18546_v46 = vpop.f32.mrb[156].mxu0 }
 0x822   :  { %v11257_v2 = vpop.f32.mrb[157].mxu0 }
 0x823   :  { %18593 = vmatprep.mubr.msk.f32.mxu1 %vm3826_vm5, %v11257_v2  ;;  %v11892_v2 = vld [vmem:[#allocation2 + $0x98] sm:$0xff] }
 0x824   :  { %18594 = vmatmul.mubr.msk.f32.vlgmr.msra.gmra.mrb[162].mxu1 %vm3826_vm5, %v18546_v46  ;;  %v11891_v46 = vld [vmem:[#allocation2 + $0x90] sm:$0xff] }
 0x825   :  { %18631 = vmatprep.mubr.msk.f32.mxu1 %vm11905_vm6, %v2500_v33  ;;  %v19856_v14 = vpack.c.bf16 %v11892_v2, %v11891_v46  ;;  %v25502_v46 = vld [vmem:[#allocation77_spill] sm:$0xff]  ;;  %v1839_v2 = vld [vmem:[%s25241_s2 + $0x18] sm:$0xff] }
 0x828   :  { %v23842_v6 = vpop.f32.mrb[154].mxu1 }
 0x829   :  { %v23844_v7 = vpop.f32.mrb[155].mxu1  ;;  %v23846_v10 = vpop.f32.mrb[158].mxu0 }
 0x82a   :  { %v23848_v38 = vpop.f32.mrb[159].mxu0 }
 0x830   :  { %v23850_v24 = vpop.f32.mrb[156].mxu1 }
 0x831   :  { %v23852_v48 = vpop.f32.mrb[157].mxu1 }
 0x838   :  { %v23854_v15 = vpop.f32.mrb[158].mxu1 }
 0x839   :  { %v23856_v60 = vpop.f32.mrb[159].mxu1 }
 0x8c6   :  { %v18574_v27 = vpop.f32.mrb[160].mxu0 }
 0x8c7   :  { %11866 = vst.msk [vmem:[#allocation2 + $0x8] sm:$0xff] %vm314_vm0, %v18574_v27  ;;  %v11613_v16 = vpop.f32.mrb[161].mxu0  ;;  %v25499_v27 = vld [vmem:[#allocation63_spill] sm:$0xff] }
 0x8c8   :  { %11865 = vst.msk [vmem:[#allocation2] sm:$0xff] %vm314_vm0, %v11613_v16  ;;  %v2501_v16 = vsel %vm1873_vm7, %v25499_v27, 0.0 }
 0x8ce   :  { %v11874_v41 = vld [vmem:[#allocation2 + $0x8] sm:$0xff] }
 0x8cf   :  { %v11873_v63 = vld [vmem:[#allocation2] sm:$0xff] }
 0x8d0   :  { %v23860_v44 = vpack.c.bf16 %v11874_v41, %v11873_v63  ;;  %v11893_v41 = vld [vmem:[#allocation2 + $0xa0] sm:$0xff]  ;;  %v11894_v63 = vld [vmem:[#allocation2 + $0xa8] sm:$0xff] }
 0x8d1   :  { %v23908_v39 = vpack.c.bf16 %v11894_v63, %v11893_v41  ;;  %v1846_v63 = vld [vmem:[%s25241_s2 + $0x50] sm:$0xff] }
 0x8d2   :  { %19821 = vmatprep.subr.bf16.mxu0 %v23860_v44 }
 0x8d3   :  { %19823 = vmatpush3.bf16.msra.mxu0 %v23860_v44 }
 0x8d4   :  { %19825 = vmatprep.subr.bf16.mxu0 %v19824_v42 }
 0x8d6   :  { %v18581_v47 = vpop.f32.mrb[160].mxu1 }
 0x8d7   :  { %19827 = vmatpush3.bf16.msra.mxu0 %v19824_v42  ;;  %11868 = vst.msk [vmem:[#allocation2 + $0x48] sm:$0xff] %vm314_vm0, %v18581_v47  ;;  %v11694_v35 = vpop.f32.mrb[161].mxu1  ;;  %v25500_v42 = vld [vmem:[#allocation78_spill] sm:$0xff] }
 0x8d8   :  { %19829 = vmatprep.subr.bf16.mxu0 %v23864_v45  ;;  %11867 = vst.msk [vmem:[#allocation2 + $0x40] sm:$0xff] %vm314_vm0, %v11694_v35  ;;  %v23913_v35 = vpack.c.bf16 %v11896_v58, %v11895_v52 }
 0x8db   :  { %19831 = vmatpush3.bf16.msra.mxu0 %v23864_v45 }
 0x8dc   :  { %19833 = vmatprep.subr.bf16.mxu0 %v23868_v30 }
 0x8de   :  { %v11882_v11 = vld [vmem:[#allocation2 + $0x48] sm:$0xff] }
 0x8df   :  { %19835 = vmatpush3.bf16.msra.mxu0 %v23868_v30  ;;  %v11881_v25 = vld [vmem:[#allocation2 + $0x40] sm:$0xff] }
 0x8e0   :  { %v23880_v32 = vpack.c.bf16 %v11882_v11, %v11881_v25 }
 0x8e2   :  { %18613 = vmatmul.mubr.msk.f32.vlgmr.msra.gmra.mrb[164].mxu0 %vm11905_vm6, %v2495_v51  ;;  %19837 = vmatprep.subr.bf16.mxu1 %v23880_v32  ;;  %v19872_v51 = vpack.c.bf16 %v11900_v4, %v11899_v28 }
 0x8e3   :  { %18650 = vmatprep.mubr.msk.f32.mxu0 %vm11905_vm6, %v25498_v20  ;;  %19839 = vmatpush3.bf16.msra.mxu1 %v23880_v32  ;;  %v11902_v20 = vld [vmem:[#allocation2 + $0xe8] sm:$0xff] }
 0x8e4   :  { %19841 = vmatprep.subr.bf16.mxu1 %v19840_v26  ;;  %v23929_v29 = vpack.c.bf16 %v11902_v20, %v11901_v0  ;;  %v1862_v0 = vld [vmem:[%s25241_s2 + $0xd0] sm:$0xff] }
 0x8e7   :  { %v18588_v54 = vpop.f32.mrb[162].mxu0  ;;  %19843 = vmatpush3.bf16.msra.mxu1 %v19840_v26  ;;  %v25501_v26 = vld [vmem:[#allocation69_spill] sm:$0xff] }
 0x8e8   :  { %11870 = vst.msk [vmem:[#allocation2 + $0x88] sm:$0xff] %vm314_vm0, %v18588_v54  ;;  %v11775_v3 = vpop.f32.mrb[163].mxu0  ;;  %19845 = vmatprep.subr.bf16.mxu1 %v23887_v34  ;;  %v2507_v21 = vsel %vm1873_vm7, %v25501_v26, 0.0  ;;  %v11904_v54 = vld [vmem:[#allocation2 + $0xf8] sm:$0xff] }
 0x8e9   :  { %11869 = vst.msk [vmem:[#allocation2 + $0x80] sm:$0xff] %vm314_vm0, %v11775_v3  ;;  %v23932_v3 = vpack.c.bf16 %v11904_v54, %v11903_v22  ;;  %v25504_v26 = vld [vmem:[#allocation70_spill] sm:$0xff] }
 0x8ea   :  { %vm14514_vm15 = vcmp.ge.s32.totalorder %v25504_v26, %v25494_v37 }
 0x8eb   :  { %19847 = vmatpush3.bf16.msra.mxu1 %v23887_v34 }
 0x8ec   :  { %19849 = vmatprep.subr.bf16.mxu1 %v23891_v9 }
 0x8ef   :  { %19851 = vmatpush3.bf16.msra.mxu1 %v23891_v9  ;;  %v11890_v59 = vld [vmem:[#allocation2 + $0x88] sm:$0xff] }
 0x8f0   :  { %v11889_v33 = vld [vmem:[#allocation2 + $0x80] sm:$0xff] }
 0x8f1   :  { %v23901_v8 = vpack.c.bf16 %v11890_v59, %v11889_v33  ;;  %v1838_v59 = vld [vmem:[%s25241_s2 + $0x10] sm:$0xff] }
 0x8f2   :  { %18632 = vmatmul.mubr.msk.f32.vlgmr.msra.gmra.mrb[164].mxu1 %vm11905_vm6, %v2501_v16 }
 0x8f3   :  { %19853 = vmatprep.subr.bf16.mxu0 %v23901_v8  ;;  %18669 = vmatprep.mubr.msk.f32.mxu1 %vm11905_vm6, %v25500_v42 }
 0x8f4   :  { %19855 = vmatpush3.bf16.msra.mxu0 %v23901_v8 }
 0x8f5   :  { %19857 = vmatprep.subr.bf16.mxu0 %v19856_v14 }
 0x8f7   :  { %v18595_v5 = vpop.f32.mrb[162].mxu1 }
 0x8f8   :  { %11872 = vst.msk [vmem:[#allocation2 + $0xc8] sm:$0xff] %vm314_vm0, %v18595_v5  ;;  %v11856_v47 = vpop.f32.mrb[163].mxu1  ;;  %19859 = vmatpush3.bf16.msra.mxu0 %v19856_v14 }
 0x8f9   :  { %11871 = vst.msk [vmem:[#allocation2 + $0xc0] sm:$0xff] %vm314_vm0, %v11856_v47  ;;  %19861 = vmatprep.subr.bf16.mxu0 %v23908_v39 }
 0x8fc   :  { %19863 = vmatpush3.bf16.msra.mxu0 %v23908_v39 }
 0x8fd   :  { %19865 = vmatprep.subr.bf16.mxu0 %v23913_v35 }
 0x8ff   :  { %v11898_v11 = vld [vmem:[#allocation2 + $0xc8] sm:$0xff] }
 0x900   :  { %19867 = vmatpush3.bf16.msra.mxu0 %v23913_v35  ;;  %v11897_v25 = vld [vmem:[#allocation2 + $0xc0] sm:$0xff] }
 0x901   :  { %v23918_v56 = vpack.c.bf16 %v11898_v11, %v11897_v25 }
 0x903   :  { %18651 = vmatmul.mubr.msk.f32.vlgmr.msra.gmra.mrb[166].mxu0 %vm11905_vm6, %v2507_v21  ;;  %19869 = vmatprep.subr.bf16.mxu1 %v23918_v56  ;;  %v1863_v21 = vld [vmem:[%s25241_s2 + $0xd8] sm:$0xff] }
 0x904   :  { %19871 = vmatpush3.bf16.msra.mxu1 %v23918_v56  ;;  %18676 = vmatprep.mubr.msk.f32.mxu0 %vm3826_vm5, %v23800_v43  ;;  %v2513_v43 = vsel %vm1873_vm7, %v25502_v46, 0.0 }
 0x905   :  { %19873 = vmatprep.subr.bf16.mxu1 %v19872_v51 }
 0x908   :  { %19875 = vmatpush3.bf16.msra.mxu1 %v19872_v51 }
 0x909   :  { %19877 = vmatprep.subr.bf16.mxu1 %v23929_v29 }
 0x90c   :  { %19879 = vmatpush3.bf16.msra.mxu1 %v23929_v29 }
 0x90d   :  { %19881 = vmatprep.subr.bf16.mxu1 %v23932_v3 }
 0x910   :  { %19883 = vmatpush3.bf16.msra.mxu1 %v23932_v3 }
 0x913   :  { %18670 = vmatmul.mubr.msk.f32.vlgmr.msra.gmra.mrb[166].mxu1 %vm11905_vm6, %v2513_v43 }
 0x914   :  { %18683 = vmatprep.mubr.msk.f32.mxu1 %vm3826_vm5, %v23814_v62  ;;  %v1847_v62 = vld [vmem:[%s25241_s2 + $0x58] sm:$0xff] }
 0x9b5   :  { %v18614_v33 = vpop.f32.mrb[164].mxu0 }
 0x9b6   :  { %v12231_v27 = vsub.f32 %v1839_v2, %v18614_v33  ;;  %v11978_v16 = vpop.f32.mrb[165].mxu0 }
 0x9b7   :  { %v12230_v14 = vsub.f32 %v1838_v59, %v11978_v16 }
 0x9b9   :  { %v19884_v41 = vpack.c.bf16 %v12231_v27, %v12230_v14 }
 0x9bb   :  { %19885 = vmatprep.subr.bf16.mxu0 %v19884_v41 }
 0x9bc   :  { %19887 = vmatpush3.bf16.msra.mxu0 %v19884_v41 }
 0x9bf   :  { %18677 = vmatmul.mubr.msk.f32.vlgmr.msra.gmra.mrb[168].mxu0 %vm3826_vm5, %v23798_v40  ;;  %v1855_v40 = vld [vmem:[%s25241_s2 + $0x98] sm:$0xff] }
 0x9c0   :  { %18690 = vmatprep.mubr.msk.f32.mxu0 %vm3826_vm5, %v23833_v23  ;;  %v1854_v23 = vld [vmem:[%s25241_s2 + $0x90] sm:$0xff] }
 0x9c5   :  { %v18633_v42 = vpop.f32.mrb[164].mxu1 }
 0x9c6   :  { %v12233_v52 = vsub.f32 %v1847_v62, %v18633_v42  ;;  %v12059_v58 = vpop.f32.mrb[165].mxu1  ;;  %v25507_v42 = vld [vmem:[#allocation59_spill] sm:$0xff] }
 0x9c7   :  { %v12232_v5 = vsub.f32 %v1846_v63, %v12059_v58 }
 0x9c9   :  { %v19888_v47 = vpack.c.bf16 %v12233_v52, %v12232_v5 }
 0x9cb   :  { %19889 = vmatprep.subr.bf16.mxu1 %v19888_v47 }
 0x9cc   :  { %19891 = vmatpush3.bf16.msra.mxu1 %v19888_v47 }
 0x9cf   :  { %18684 = vmatmul.mubr.msk.f32.vlgmr.msra.gmra.mrb[168].mxu1 %vm3826_vm5, %v23812_v50  ;;  %v25503_v50 = vld [vmem:[#allocation60_spill] sm:$0xff] }
 0x9d0   :  { %18697 = vmatprep.mubr.msk.f32.mxu1 %vm3826_vm5, %v23852_v48  ;;  %v2496_v48 = vsel %vm1874_vm14, %v25503_v50, 0.0 }
 0x9d6   :  { %v18652_v28 = vpop.f32.mrb[166].mxu0 }
 0x9d7   :  { %v12235_v4 = vsub.f32 %v1855_v40, %v18652_v28  ;;  %v12140_v11 = vpop.f32.mrb[167].mxu0  ;;  %v25509_v28 = vld [vmem:[#allocation65_spill] sm:$0xff] }
 0x9d8   :  { %v12234_v25 = vsub.f32 %v1854_v23, %v12140_v11 }
 0x9da   :  { %v19892_v51 = vpack.c.bf16 %v12235_v4, %v12234_v25 }
 0x9dc   :  { %19893 = vmatprep.subr.bf16.mxu0 %v19892_v51 }
 0x9dd   :  { %19895 = vmatpush3.bf16.msra.mxu0 %v19892_v51 }
 0x9de   :  { %19901 = vmatprep.subr.bf16.mxu0 %v23860_v44 }
 0x9e0   :  { %18691 = vmatmul.mubr.msk.f32.vlgmr.msra.gmra.mrb[170].mxu0 %vm3826_vm5, %v23831_v36  ;;  %v25505_v36 = vld [vmem:[#allocation66_spill] sm:$0xff] }
 0x9e1   :  { %19903 = vmatpush3.bf16.msra.mxu0 %v23860_v44  ;;  %18716 = vmatprep.mubr.msk.f32.mxu0 %vm11905_vm6, %v2496_v48  ;;  %v2502_v2 = vsel %vm1874_vm14, %v25505_v36, 0.0 }
 0x9e6   :  { %v18671_v20 = vpop.f32.mrb[166].mxu1 }
 0x9e7   :  { %v12237_v22 = vsub.f32 %v1863_v21, %v18671_v20  ;;  %v12221_v54 = vpop.f32.mrb[167].mxu1  ;;  %v25511_v21 = vld [vmem:[#allocation72_spill] sm:$0xff] }
 0x9e8   :  { %v12236_v46 = vsub.f32 %v1862_v0, %v12221_v54 }
 0x9ea   :  { %v19896_v43 = vpack.c.bf16 %v12237_v22, %v12236_v46  ;;  %v1841_v46 = vld [vmem:[%s25241_s2 + $0x28] sm:$0xff] }
 0x9ec   :  { %19897 = vmatprep.subr.bf16.mxu1 %v19896_v43 }
 0x9ed   :  { %19899 = vmatpush3.bf16.msra.mxu1 %v19896_v43 }
 0x9ee   :  { %19917 = vmatprep.subr.bf16.mxu1 %v23880_v32 }
 0x9f0   :  { %18698 = vmatmul.mubr.msk.f32.vlgmr.msra.gmra.mrb[170].mxu1 %vm3826_vm5, %v23850_v24  ;;  %v25506_v24 = vld [vmem:[#allocation3_spill] sm:$0xff] }
 0x9f1   :  { %19919 = vmatpush3.bf16.msra.mxu1 %v23880_v32  ;;  %18735 = vmatprep.mubr.msk.f32.mxu1 %vm11905_vm6, %v2502_v2  ;;  %v24002_v41 = vadd.s32 40, %v25506_v24  ;;  %vm14510_vm11 = vcmp.ge.s32.totalorder %v25506_v24, %v25494_v37 }
 0x9f3   :  { %vm1875_vm8 = vcmp.gt.s32.totalorder %v24002_v41, %v25494_v37  ;;  %vm14515_vm14 = vcmp.ge.s32.totalorder %v24002_v41, %v25494_v37 }
 0x9f4   :  { %v2497_v52 = vsel %vm1875_vm8, %v25507_v42, 0.0  ;;  %v2503_v4 = vsel %vm1875_vm8, %v25509_v28, 0.0  ;;  %v2509_v0 = vsel %vm1875_vm8, %v25511_v21, 0.0  ;;  %v25514_v28 = vld [vmem:[#allocation73_spill] sm:$0xff]  ;;  %v25515_v21 = vld [vmem:[#allocation68_spill] sm:$0xff] }
 0xa92   :  { %v18678_v59 = vpop.f32.mrb[168].mxu0 }
 0xa93   :  { %12563 = vst.msk [vmem:[#allocation2 + $0x18] sm:$0xff] %vm314_vm0, %v18678_v59  ;;  %v12310_v33 = vpop.f32.mrb[169].mxu0 }
 0xa94   :  { %12562 = vst.msk [vmem:[#allocation2 + $0x10] sm:$0xff] %vm314_vm0, %v12310_v33 }
 0xa9a   :  { %v12573_v27 = vld [vmem:[#allocation2 + $0x18] sm:$0xff] }
 0xa9b   :  { %v12572_v16 = vld [vmem:[#allocation2 + $0x10] sm:$0xff] }
 0xa9c   :  { %v23996_v14 = vpack.c.bf16 %v12573_v27, %v12572_v16  ;;  %v1848_v27 = vld [vmem:[%s25241_s2 + $0x60] sm:$0xff] }
 0xa9e   :  { %19905 = vmatprep.subr.bf16.mxu0 %v23996_v14 }
 0xa9f   :  { %19907 = vmatpush3.bf16.msra.mxu0 %v23996_v14 }
 0xaa0   :  { %19909 = vmatprep.subr.bf16.mxu0 %v23864_v45 }
 0xaa2   :  { %v18685_v62 = vpop.f32.mrb[168].mxu1 }
 0xaa3   :  { %19911 = vmatpush3.bf16.msra.mxu0 %v23864_v45  ;;  %12565 = vst.msk [vmem:[#allocation2 + $0x58] sm:$0xff] %vm314_vm0, %v18685_v62  ;;  %v12391_v63 = vpop.f32.mrb[169].mxu1  ;;  %v25508_v45 = vld [vmem:[#allocation74_spill] sm:$0xff] }
 0xaa4   :  { %19913 = vmatprep.subr.bf16.mxu0 %v23868_v30  ;;  %12564 = vst.msk [vmem:[#allocation2 + $0x50] sm:$0xff] %vm314_vm0, %v12391_v63 }
 0xaa7   :  { %19915 = vmatpush3.bf16.msra.mxu0 %v23868_v30 }
 0xaa8   :  { %19933 = vmatprep.subr.bf16.mxu0 %v23901_v8 }
 0xaaa   :  { %18717 = vmatmul.mubr.msk.f32.vlgmr.msra.gmra.mrb[172].mxu0 %vm11905_vm6, %v2497_v52  ;;  %v12581_v58 = vld [vmem:[#allocation2 + $0x58] sm:$0xff] }
 0xaab   :  { %19935 = vmatpush3.bf16.msra.mxu0 %v23901_v8  ;;  %18754 = vmatprep.mubr.msk.f32.mxu0 %vm11905_vm6, %v25508_v45  ;;  %v12580_v5 = vld [vmem:[#allocation2 + $0x50] sm:$0xff] }
 0xaac   :  { %v24020_v47 = vpack.c.bf16 %v12581_v58, %v12580_v5 }
 0xaae   :  { %19921 = vmatprep.subr.bf16.mxu1 %v24020_v47 }
 0xaaf   :  { %19923 = vmatpush3.bf16.msra.mxu1 %v24020_v47 }
 0xab0   :  { %19925 = vmatprep.subr.bf16.mxu1 %v23887_v34 }
 0xab3   :  { %v18692_v40 = vpop.f32.mrb[170].mxu0  ;;  %19927 = vmatpush3.bf16.msra.mxu1 %v23887_v34  ;;  %v25510_v34 = vld [vmem:[#allocation80_spill] sm:$0xff] }
 0xab4   :  { %12567 = vst.msk [vmem:[#allocation2 + $0x98] sm:$0xff] %vm314_vm0, %v18692_v40  ;;  %v12472_v23 = vpop.f32.mrb[171].mxu0  ;;  %19929 = vmatprep.subr.bf16.mxu1 %v23891_v9 }
 0xab5   :  { %12566 = vst.msk [vmem:[#allocation2 + $0x90] sm:$0xff] %vm314_vm0, %v12472_v23 }
 0xab7   :  { %19931 = vmatpush3.bf16.msra.mxu1 %v23891_v9 }
 0xab8   :  { %19949 = vmatprep.subr.bf16.mxu1 %v23918_v56 }
 0xaba   :  { %18736 = vmatmul.mubr.msk.f32.vlgmr.msra.gmra.mrb[172].mxu1 %vm11905_vm6, %v2503_v4  ;;  %v1865_v4 = vld [vmem:[%s25241_s2 + $0xe8] sm:$0xff] }
 0xabb   :  { %19951 = vmatpush3.bf16.msra.mxu1 %v23918_v56  ;;  %18773 = vmatprep.mubr.msk.f32.mxu1 %vm11905_vm6, %v25510_v34  ;;  %v12589_v11 = vld [vmem:[#allocation2 + $0x98] sm:$0xff]  ;;  %v1864_v34 = vld [vmem:[%s25241_s2 + $0xe0] sm:$0xff] }
 0xabc   :  { %v12588_v25 = vld [vmem:[#allocation2 + $0x90] sm:$0xff] }
 0xabd   :  { %v24039_v51 = vpack.c.bf16 %v12589_v11, %v12588_v25 }
 0xabf   :  { %19937 = vmatprep.subr.bf16.mxu0 %v24039_v51 }
 0xac0   :  { %19939 = vmatpush3.bf16.msra.mxu0 %v24039_v51 }
 0xac1   :  { %19941 = vmatprep.subr.bf16.mxu0 %v23908_v39 }
 0xac3   :  { %v18699_v50 = vpop.f32.mrb[170].mxu1 }
 0xac4   :  { %12569 = vst.msk [vmem:[#allocation2 + $0xd8] sm:$0xff] %vm314_vm0, %v18699_v50  ;;  %v12553_v48 = vpop.f32.mrb[171].mxu1  ;;  %19943 = vmatpush3.bf16.msra.mxu0 %v23908_v39  ;;  %v25512_v39 = vld [vmem:[#allocation79_spill] sm:$0xff] }
 0xac5   :  { %12568 = vst.msk [vmem:[#allocation2 + $0xd0] sm:$0xff] %vm314_vm0, %v12553_v48  ;;  %19945 = vmatprep.subr.bf16.mxu0 %v23913_v35 }
 0xac8   :  { %19947 = vmatpush3.bf16.msra.mxu0 %v23913_v35 }
 0xacb   :  { %18755 = vmatmul.mubr.msk.f32.vlgmr.msra.gmra.mrb[174].mxu0 %vm11905_vm6, %v2509_v0  ;;  %v12597_v20 = vld [vmem:[#allocation2 + $0xd8] sm:$0xff]  ;;  %v2504_v0 = vsel %vm1876_vm2, %v25515_v21, 0.0 }
 0xacc   :  { %18780 = vmatprep.mubr.msk.f32.mxu0 %vm3826_vm5, %v23796_v19  ;;  %v12596_v22 = vld [vmem:[#allocation2 + $0xd0] sm:$0xff]  ;;  %v2515_v19 = vsel %vm1875_vm8, %v25512_v39, 0.0 }
 0xacd   :  { %v24056_v54 = vpack.c.bf16 %v12597_v20, %v12596_v22 }
 0xacf   :  { %19953 = vmatprep.subr.bf16.mxu1 %v24056_v54 }
 0xad0   :  { %19955 = vmatpush3.bf16.msra.mxu1 %v24056_v54 }
 0xad1   :  { %19957 = vmatprep.subr.bf16.mxu1 %v23929_v29 }
 0xad4   :  { %19959 = vmatpush3.bf16.msra.mxu1 %v23929_v29  ;;  %v1840_v29 = vld [vmem:[%s25241_s2 + $0x20] sm:$0xff] }
 0xad5   :  { %19961 = vmatprep.subr.bf16.mxu1 %v23932_v3 }
 0xad8   :  { %19963 = vmatpush3.bf16.msra.mxu1 %v23932_v3 }
 0xadb   :  { %18774 = vmatmul.mubr.msk.f32.vlgmr.msra.gmra.mrb[174].mxu1 %vm11905_vm6, %v2515_v19 }
 0xadc   :  { %18787 = vmatprep.mubr.msk.f32.mxu1 %vm3826_vm5, %v23810_v53  ;;  %v1849_v53 = vld [vmem:[%s25241_s2 + $0x68] sm:$0xff] }
 0xb7d   :  { %v18718_v43 = vpop.f32.mrb[172].mxu0 }
 0xb7e   :  { %v12927_v36 = vsub.f32 %v1841_v46, %v18718_v43  ;;  %v12674_v2 = vpop.f32.mrb[173].mxu0 }
 0xb7f   :  { %v12926_v59 = vsub.f32 %v1840_v29, %v12674_v2 }
 0xb81   :  { %v19964_v33 = vpack.c.bf16 %v12927_v36, %v12926_v59  ;;  %v25516_v36 = vld [vmem:[#allocation61_spill] sm:$0xff]  ;;  %v25517_v59 = vld [vmem:[#allocation76_spill] sm:$0xff] }
 0xb83   :  { %19965 = vmatprep.subr.bf16.mxu0 %v19964_v33 }
 0xb84   :  { %19967 = vmatpush3.bf16.msra.mxu0 %v19964_v33 }
 0xb87   :  { %18781 = vmatmul.mubr.msk.f32.vlgmr.msra.gmra.mrb[176].mxu0 %vm3826_vm5, %v23794_v61  ;;  %v1857_v61 = vld [vmem:[%s25241_s2 + $0xa8] sm:$0xff] }
 0xb88   :  { %18794 = vmatprep.mubr.msk.f32.mxu0 %vm3826_vm5, %v23829_v31  ;;  %v1856_v31 = vld [vmem:[%s25241_s2 + $0xa0] sm:$0xff] }
 0xb8d   :  { %v18737_v16 = vpop.f32.mrb[172].mxu1 }
 0xb8e   :  { %v12929_v62 = vsub.f32 %v1849_v53, %v18737_v16  ;;  %v12755_v63 = vpop.f32.mrb[173].mxu1 }
 0xb8f   :  { %v12928_v42 = vsub.f32 %v1848_v27, %v12755_v63  ;;  %v25519_v63 = vld [vmem:[#allocation82_spill] sm:$0xff] }
 0xb91   :  { %v19968_v52 = vpack.c.bf16 %v12929_v62, %v12928_v42  ;;  %v25518_v62 = vld [vmem:[#allocation67_spill] sm:$0xff] }
 0xb93   :  { %19969 = vmatprep.subr.bf16.mxu1 %v19968_v52 }
 0xb94   :  { %19971 = vmatpush3.bf16.msra.mxu1 %v19968_v52 }
 0xb97   :  { %18788 = vmatmul.mubr.msk.f32.vlgmr.msra.gmra.mrb[176].mxu1 %vm3826_vm5, %v23806_v1  ;;  %v25513_v1 = vld [vmem:[#allocation62_spill] sm:$0xff] }
 0xb98   :  { %18801 = vmatprep.mubr.msk.f32.mxu1 %vm3826_vm5, %v23848_v38  ;;  %v2498_v38 = vsel %vm1876_vm2, %v25513_v1, 0.0  ;;  %v1842_v1 = vld [vmem:[%s25241_s2 + $0x30] sm:$0xff]  ;;  %vm14516_vm2 = vcmp.ge.s32.totalorder %v25514_v28, %v25494_v37 }
 0xb9e   :  { %v18756_v45 = vpop.f32.mrb[174].mxu0 }
 0xb9f   :  { %v12931_v58 = vsub.f32 %v1857_v61, %v18756_v45  ;;  %v12836_v5 = vpop.f32.mrb[175].mxu0  ;;  %v25520_v45 = vld [vmem:[#allocation75_spill] sm:$0xff] }
 0xba0   :  { %v12930_v40 = vsub.f32 %v1856_v31, %v12836_v5 }
 0xba2   :  { %v19972_v23 = vpack.c.bf16 %v12931_v58, %v12930_v40 }
 0xba4   :  { %19973 = vmatprep.subr.bf16.mxu0 %v19972_v23 }
 0xba5   :  { %19975 = vmatpush3.bf16.msra.mxu0 %v19972_v23 }
 0xba6   :  { %19981 = vmatprep.subr.bf16.mxu0 %v23860_v44 }
 0xba8   :  { %18795 = vmatmul.mubr.msk.f32.vlgmr.msra.gmra.mrb[178].mxu0 %vm3826_vm5, %v23827_v12 }
 0xba9   :  { %19983 = vmatpush3.bf16.msra.mxu0 %v23860_v44  ;;  %18820 = vmatprep.mubr.msk.f32.mxu0 %vm11905_vm6, %v2498_v38 }
 0xbaa   :  { %19985 = vmatprep.subr.bf16.mxu0 %v23996_v14 }
 0xbad   :  { %19987 = vmatpush3.bf16.msra.mxu0 %v23996_v14 }
 0xbae   :  { %v18775_v11 = vpop.f32.mrb[174].mxu1 }
 0xbaf   :  { %v12933_v25 = vsub.f32 %v1865_v4, %v18775_v11  ;;  %v12917_v50 = vpop.f32.mrb[175].mxu1 }
 0xbb0   :  { %v12932_v12 = vsub.f32 %v1864_v34, %v12917_v50 }
 0xbb2   :  { %v19976_v48 = vpack.c.bf16 %v12933_v25, %v12932_v12  ;;  %v1850_v25 = vld [vmem:[%s25241_s2 + $0x70] sm:$0xff] }
 0xbb4   :  { %19977 = vmatprep.subr.bf16.mxu1 %v19976_v48 }
 0xbb5   :  { %19979 = vmatpush3.bf16.msra.mxu1 %v19976_v48 }
 0xbb6   :  { %19997 = vmatprep.subr.bf16.mxu1 %v23880_v32 }
 0xbb8   :  { %18802 = vmatmul.mubr.msk.f32.vlgmr.msra.gmra.mrb[178].mxu1 %vm3826_vm5, %v23846_v10  ;;  %v24130_v10 = vadd.s32 56, %v25506_v24 }
 0xbb9   :  { %19999 = vmatpush3.bf16.msra.mxu1 %v23880_v32  ;;  %18839 = vmatprep.mubr.msk.f32.mxu1 %vm11905_vm6, %v2504_v0 }
 0xbba   :  { %20001 = vmatprep.subr.bf16.mxu1 %v24020_v47  ;;  %vm1877_vm9 = vcmp.gt.s32.totalorder %v24130_v10, %v25494_v37  ;;  %vm14517_vm1 = vcmp.ge.s32.totalorder %v24130_v10, %v25494_v37 }
 0xbbb   :  { %v2499_v2 = vsel %vm1877_vm9, %v25516_v36, 0.0  ;;  %v1867_v36 = vld [vmem:[%s25241_s2 + $0xf8] sm:$0xff] }
 0xbbd   :  { %20003 = vmatpush3.bf16.msra.mxu1 %v24020_v47 }
 0xc5a   :  { %v18782_v20 = vpop.f32.mrb[176].mxu0 }
 0xc5b   :  { %13259 = vst.msk [vmem:[#allocation2 + $0x28] sm:$0xff] %vm314_vm0, %v18782_v20  ;;  %v13006_v22 = vpop.f32.mrb[177].mxu0 }
 0xc5c   :  { %13258 = vst.msk [vmem:[#allocation2 + $0x20] sm:$0xff] %vm314_vm0, %v13006_v22 }
 0xc62   :  { %v13271_v39 = vld [vmem:[#allocation2 + $0x28] sm:$0xff] }
 0xc63   :  { %v13270_v19 = vld [vmem:[#allocation2 + $0x20] sm:$0xff] }
 0xc64   :  { %v24127_v46 = vpack.c.bf16 %v13271_v39, %v13270_v19 }
 0xc66   :  { %19989 = vmatprep.subr.bf16.mxu0 %v24127_v46 }
 0xc67   :  { %19991 = vmatpush3.bf16.msra.mxu0 %v24127_v46 }
 0xc68   :  { %19993 = vmatprep.subr.bf16.mxu0 %v23868_v30 }
 0xc6a   :  { %v18789_v29 = vpop.f32.mrb[176].mxu1 }
 0xc6b   :  { %19995 = vmatpush3.bf16.msra.mxu0 %v23868_v30  ;;  %13261 = vst.msk [vmem:[#allocation2 + $0x68] sm:$0xff] %vm314_vm0, %v18789_v29  ;;  %v13087_v43 = vpop.f32.mrb[177].mxu1 }
 0xc6c   :  { %20013 = vmatprep.subr.bf16.mxu0 %v23901_v8  ;;  %13260 = vst.msk [vmem:[#allocation2 + $0x60] sm:$0xff] %vm314_vm0, %v13087_v43  ;;  %v25522_v43 = vld [vmem:[#allocation21_spill] sm:$0xff] }
 0xc6e   :  { %18821 = vmatmul.mubr.msk.f32.vlgmr.msra.gmra.mrb[180].mxu0 %vm11905_vm6, %v2499_v2  ;;  %v1866_v2 = vld [vmem:[%s25241_s2 + $0xf0] sm:$0xff] }
 0xc6f   :  { %20015 = vmatpush3.bf16.msra.mxu0 %v23901_v8  ;;  %18858 = vmatprep.mubr.msk.f32.mxu0 %vm11905_vm6, %v25517_v59 }
 0xc70   :  { %20017 = vmatprep.subr.bf16.mxu0 %v24039_v51 }
 0xc72   :  { %v13279_v30 = vld [vmem:[#allocation2 + $0x68] sm:$0xff] }
 0xc73   :  { %20019 = vmatpush3.bf16.msra.mxu0 %v24039_v51  ;;  %v13278_v33 = vld [vmem:[#allocation2 + $0x60] sm:$0xff]  ;;  %v2505_v51 = vsel %vm1877_vm9, %v25518_v62, 0.0 }
 0xc74   :  { %v24151_v53 = vpack.c.bf16 %v13279_v30, %v13278_v33  ;;  %v20691_v62 = vld [vmem:[%s25238_s0 + $0x40] sm:$0xff] }
 0xc76   :  { %20005 = vmatprep.subr.bf16.mxu1 %v24151_v53 }
 0xc77   :  { %20007 = vmatpush3.bf16.msra.mxu1 %v24151_v53 }
 0xc78   :  { %20009 = vmatprep.subr.bf16.mxu1 %v23891_v9 }
 0xc7b   :  { %v18796_v27 = vpop.f32.mrb[178].mxu0  ;;  %20011 = vmatpush3.bf16.msra.mxu1 %v23891_v9 }
 0xc7c   :  { %13263 = vst.msk [vmem:[#allocation2 + $0xa8] sm:$0xff] %vm314_vm0, %v18796_v27  ;;  %v13168_v16 = vpop.f32.mrb[179].mxu0  ;;  %20029 = vmatprep.subr.bf16.mxu1 %v23918_v56  ;;  %v25525_v27 = vld [vmem:[#allocation23_spill] sm:$0xff] }
 0xc7d   :  { %13262 = vst.msk [vmem:[#allocation2 + $0xa0] sm:$0xff] %vm314_vm0, %v13168_v16 }
 0xc7e   :  { %18840 = vmatmul.mubr.msk.f32.vlgmr.msra.gmra.mrb[180].mxu1 %vm11905_vm6, %v2505_v51  ;;  %v24249_v51 = vld [vmem:[%s25240_s4] sm:$0xff] }
 0xc7f   :  { %20031 = vmatpush3.bf16.msra.mxu1 %v23918_v56  ;;  %18877 = vmatprep.mubr.msk.f32.mxu1 %vm11905_vm6, %v25519_v63  ;;  %v1139_v63 = vmul.f32 %v24249_v51, %v20691_v62 }
 0xc80   :  { %20033 = vmatprep.subr.bf16.mxu1 %v24056_v54 }
 0xc83   :  { %20035 = vmatpush3.bf16.msra.mxu1 %v24056_v54  ;;  %v13287_v9 = vld [vmem:[#allocation2 + $0xa8] sm:$0xff]  ;;  %v2511_v54 = vsel %vm1877_vm9, %v25520_v45, 0.0 }
 0xc84   :  { %v13286_v42 = vld [vmem:[#allocation2 + $0xa0] sm:$0xff] }
 0xc85   :  { %v24170_v52 = vpack.c.bf16 %v13287_v9, %v13286_v42  ;;  %v24255_v9 = vld [vmem:[%s25239_s5] sm:$0xff]  ;;  %v25526_v42 = vld [vmem:[#allocation41_spill] sm:$0xff] }
 0xc87   :  { %20021 = vmatprep.subr.bf16.mxu0 %v24170_v52 }
 0xc88   :  { %20023 = vmatpush3.bf16.msra.mxu0 %v24170_v52 }
 0xc89   :  { %20025 = vmatprep.subr.bf16.mxu0 %v23913_v35 }
 0xc8b   :  { %v18803_v61 = vpop.f32.mrb[178].mxu1 }
 0xc8c   :  { %13265 = vst.msk [vmem:[#allocation2 + $0xe8] sm:$0xff] %vm314_vm0, %v18803_v61  ;;  %v13249_v31 = vpop.f32.mrb[179].mxu1  ;;  %20027 = vmatpush3.bf16.msra.mxu0 %v23913_v35  ;;  %v25521_v35 = vld [vmem:[#allocation81_spill] sm:$0xff]  ;;  %v1171_v61 = vmul.f32 %v24255_v9, %v25526_v42 }
 0xc8d   :  { %13264 = vst.msk [vmem:[#allocation2 + $0xe0] sm:$0xff] %vm314_vm0, %v13249_v31  ;;  %v2517_v23 = vsel %vm1877_vm9, %v25521_v35, 0.0  ;;  %v25527_v31 = vld [vmem:[#allocation27_spill] sm:$0xff]  ;;  %v24295_v35 = vld [vmem:[%s25240_s4 + $0x8] sm:$0xff] }
 0xc8e   :  { %v1203_v45 = vadd.f32 %v1171_v61, %v1139_v63  ;;  %v25538_v63 = vld [vmem:[#allocation33_spill] sm:$0xff] }
 0xc8f   :  { %18859 = vmatmul.mubr.msk.f32.vlgmr.msra.gmra.mrb[182].mxu0 %vm11905_vm6, %v2511_v54  ;;  %v25528_v54 = vld [vmem:[#allocation24_spill] sm:$0xff]  ;;  %v20709_v61 = vld [vmem:[%s25238_s0 + $0x30] sm:$0xff] }
 0xc90   :  { %18884 = vmatprep.mubr.msk.f32.mxu0 %vm3826_vm5, %v23808_v17  ;;  %v1843_v17 = vld [vmem:[%s25241_s2 + $0x38] sm:$0xff] }
 0xc93   :  { %v13295_v58 = vld [vmem:[#allocation2 + $0xe8] sm:$0xff] }
 0xc94   :  { %v13294_v5 = vld [vmem:[#allocation2 + $0xe0] sm:$0xff] }
 0xc95   :  { %v24185_v40 = vpack.c.bf16 %v13295_v58, %v13294_v5  ;;  %v25529_v58 = vld [vmem:[#allocation26_spill] sm:$0xff]  ;;  %v25530_v5 = vld [vmem:[#allocation28_spill] sm:$0xff] }
 0xc97   :  { %20037 = vmatprep.subr.bf16.mxu1 %v24185_v40 }
 0xc98   :  { %20039 = vmatpush3.bf16.msra.mxu1 %v24185_v40 }
 0xc99   :  { %20041 = vmatprep.subr.bf16.mxu1 %v23932_v3 }
 0xc9c   :  { %20043 = vmatpush3.bf16.msra.mxu1 %v23932_v3 }
 0xc9f   :  { %18878 = vmatmul.mubr.msk.f32.vlgmr.msra.gmra.mrb[182].mxu1 %vm11905_vm6, %v2517_v23 }
 0xca0   :  { %18891 = vmatprep.mubr.msk.f32.mxu1 %vm3826_vm5, %v23825_v13  ;;  %v1851_v13 = vld [vmem:[%s25241_s2 + $0x78] sm:$0xff] }
 0xd41   :  { %v18822_v38 = vpop.f32.mrb[180].mxu0 }
 0xd42   :  { %v13623_v3 = vsub.f32 %v1843_v17, %v18822_v38  ;;  %v13370_v4 = vpop.f32.mrb[181].mxu0  ;;  %v24301_v17 = vld [vmem:[%s25239_s5 + $0x8] sm:$0xff] }
 0xd43   :  { %v13622_v34 = vsub.f32 %v1842_v1, %v13370_v4  ;;  %v25531_v1 = vld [vmem:[#allocation30_spill] sm:$0xff]  ;;  %v25533_v4 = vld [vmem:[#allocation37_spill] sm:$0xff] }
 0xd44   :  { %v1164_v38 = vmul.f32 %v24301_v17, %v25531_v1  ;;  %v20712_v1 = vld [vmem:[%s25238_s0 + $0x38] sm:$0xff] }
 0xd45   :  { %v20044_v11 = vpack.c.bf16 %v13623_v3, %v13622_v34  ;;  %v25532_v3 = vld [vmem:[#allocation29_spill] sm:$0xff] }
 0xd46   :  { %v20697_v34 = vld [vmem:[%s25238_s0 + $0x10] sm:$0xff] }
 0xd47   :  { %20045 = vmatprep.subr.bf16.mxu0 %v20044_v11 }
 0xd48   :  { %20047 = vmatpush3.bf16.msra.mxu0 %v20044_v11  ;;  %v24317_v11 = vld [vmem:[%s25240_s4 + $0x10] sm:$0xff] }
 0xd4b   :  { %18885 = vmatmul.mubr.msk.f32.vlgmr.msra.gmra.mrb[184].mxu0 %vm3826_vm5, %v23804_v18  ;;  %v1859_v18 = vld [vmem:[%s25241_s2 + $0xb8] sm:$0xff] }
 0xd4c   :  { %18898 = vmatprep.mubr.msk.f32.mxu0 %vm3826_vm5, %v23844_v7  ;;  %v1858_v7 = vld [vmem:[%s25241_s2 + $0xb0] sm:$0xff] }
 0xd51   :  { %v18841_v50 = vpop.f32.mrb[180].mxu1 }
 0xd52   :  { %v13625_v12 = vsub.f32 %v1851_v13, %v18841_v50  ;;  %v13451_v48 = vpop.f32.mrb[181].mxu1  ;;  %v1133_v13 = vmul.f32 %v24317_v11, %v20697_v34  ;;  %v25534_v50 = vld [vmem:[#allocation32_spill] sm:$0xff]  ;;  %v25541_v34 = vld [vmem:[#allocation38_spill] sm:$0xff] }
 0xd53   :  { %v13624_v21 = vsub.f32 %v1850_v25, %v13451_v48  ;;  %v24323_v25 = vld [vmem:[%s25239_s5 + $0x10] sm:$0xff] }
 0xd55   :  { %v20048_v0 = vpack.c.bf16 %v13625_v12, %v13624_v21  ;;  %v1165_v12 = vmul.f32 %v24323_v25, %v25534_v50  ;;  %v20700_v21 = vld [vmem:[%s25238_s0 + $0x18] sm:$0xff] }
 0xd57   :  { %20049 = vmatprep.subr.bf16.mxu1 %v20048_v0 }
 0xd58   :  { %20051 = vmatpush3.bf16.msra.mxu1 %v20048_v0  ;;  %v24333_v0 = vld [vmem:[%s25240_s4 + $0x18] sm:$0xff] }
 0xd5b   :  { %18892 = vmatmul.mubr.msk.f32.vlgmr.msra.gmra.mrb[184].mxu1 %vm3826_vm5, %v23823_v49 }
 0xd5c   :  { %18905 = vmatprep.mubr.msk.f32.mxu1 %vm3826_vm5, %v23856_v60  ;;  %v25524_v60 = vld [vmem:[#allocation34_spill] sm:$0xff] }
 0xd62   :  { %v18860_v20 = vpop.f32.mrb[182].mxu0 }
 0xd63   :  { %v13627_v22 = vsub.f32 %v1859_v18, %v18860_v20  ;;  %v13532_v39 = vpop.f32.mrb[183].mxu0  ;;  %v1134_v18 = vmul.f32 %v24333_v0, %v20700_v21  ;;  %v25535_v20 = vld [vmem:[#allocation31_spill] sm:$0xff] }
 0xd64   :  { %v13626_v19 = vsub.f32 %v1858_v7, %v13532_v39  ;;  %v24339_v7 = vld [vmem:[%s25239_s5 + $0x18] sm:$0xff]  ;;  %v1197_v39 = vadd.f32 %v1165_v12, %v1133_v13  ;;  %v20715_v12 = vld [vmem:[%s25238_s0 + $0x80] sm:$0xff] }
 0xd65   :  { %v25542_v21 = vld [vmem:[#allocation47_spill] sm:$0xff] }
 0xd66   :  { %v20052_v29 = vpack.c.bf16 %v13627_v22, %v13626_v19  ;;  %v1166_v22 = vmul.f32 %v24339_v7, %v25535_v20  ;;  %v20703_v19 = vld [vmem:[%s25238_s0 + $0x20] sm:$0xff] }
 0xd68   :  { %20053 = vmatprep.subr.bf16.mxu0 %v20052_v29 }
 0xd69   :  { %20055 = vmatpush3.bf16.msra.mxu0 %v20052_v29  ;;  %v24349_v29 = vld [vmem:[%s25240_s4 + $0x20] sm:$0xff] }
 0xd6a   :  { %20062 = vmatprep.subr.msk.bf16.mxu0 %vm22047_vm12, %v25522_v43 }
 0xd6c   :  { %18899 = vmatmul.mubr.msk.f32.vlgmr.msra.gmra.mrb[186].mxu0 %vm3826_vm5, %v23842_v6 }
 0xd6d   :  { %18924 = vmatprep.mubr.msk.f32.mxu0 %vm314_vm0, %v25524_v60  ;;  %v24355_v60 = vld [vmem:[%s25239_s5 + $0x20] sm:$0xff] }
 0xd72   :  { %v18879_v59 = vpop.f32.mrb[182].mxu1  ;;  %20065 = vmatpush3.bf16.xpose.msk.msra.mxu0 %vm22047_vm12, %v25522_v43  ;;  %v1135_v43 = vmul.f32 %v24349_v29, %v20703_v19  ;;  %v25543_v19 = vld [vmem:[#allocation40_spill] sm:$0xff] }
 0xd73   :  { %v13629_v30 = vsub.f32 %v1867_v36, %v18879_v59  ;;  %v13613_v33 = vpop.f32.mrb[183].mxu1  ;;  %20068 = vmatprep.subr.msk.bf16.mxu0 %vm22047_vm12, %v25525_v27  ;;  %v25536_v36 = vld [vmem:[#allocation36_spill] sm:$0xff]  ;;  %v1198_v59 = vadd.f32 %v1166_v22, %v1134_v18  ;;  %v1179_v18 = vmul.f32 %v24255_v9, %v25542_v21 }
 0xd74   :  { %v13628_v6 = vsub.f32 %v1866_v2, %v13613_v33  ;;  %v1167_v2 = vmul.f32 %v24355_v60, %v25536_v36  ;;  %v24370_v33 = vld [vmem:[%s25240_s4 + $0x28] sm:$0xff]  ;;  %v25544_v36 = vld [vmem:[#allocation19_spill] sm:$0xff] }
 0xd75   :  { %v20716_v22 = vld [vmem:[%s25238_s0 + $0x48] sm:$0xff] }
 0xd76   :  { %v20056_v16 = vpack.c.bf16 %v13629_v30, %v13628_v6  ;;  %v20706_v30 = vld [vmem:[%s25238_s0 + $0x28] sm:$0xff]  ;;  %v1199_v42 = vadd.f32 %v1167_v2, %v1135_v43  ;;  %v1172_v43 = vmul.f32 %v24301_v17, %v25543_v19  ;;  %v20717_v2 = vld [vmem:[%s25238_s0 + $0x50] sm:$0xff] }
 0xd77   :  { %v24376_v6 = vld [vmem:[%s25239_s5 + $0x28] sm:$0xff] }
 0xd78   :  { %20057 = vmatprep.subr.bf16.mxu1 %v20056_v16  ;;  %v25550_v21 = vld [vmem:[#allocation52_spill] sm:$0xff] }
 0xd79   :  { %20059 = vmatpush3.bf16.msra.mxu1 %v20056_v16  ;;  %v25537_v16 = vld [vmem:[#allocation35_spill] sm:$0xff] }
 0xd7a   :  { %20071 = vmatpush3.bf16.xpose.msk.msra.mxu0 %vm22047_vm12, %v25525_v27  ;;  %20086 = vmatprep.subr.msk.bf16.mxu1 %vm22047_vm12, %v25527_v31  ;;  %v1136_v27 = vmul.f32 %v24370_v33, %v20706_v30  ;;  %v1168_v62 = vmul.f32 %v24376_v6, %v25537_v16  ;;  %v25545_v30 = vld [vmem:[#allocation44_spill] sm:$0xff] }
 0xd7b   :  { %20074 = vmatprep.subr.msk.bf16.mxu0 %vm22047_vm12, %v25528_v54 }
 0xd7c   :  { %18906 = vmatmul.mubr.msk.f32.vlgmr.msra.gmra.mrb[186].mxu1 %vm3826_vm5, %v23854_v15  ;;  %v20694_v15 = vld [vmem:[%s25238_s0 + $0x8] sm:$0xff] }
 0xd7d   :  { %18952 = vmatprep.mubr.msk.f32.mxu1 %vm314_vm0, %v1203_v45  ;;  %v1132_v23 = vmul.f32 %v24295_v35, %v20694_v15  ;;  %v25540_v15 = vld [vmem:[#allocation42_spill] sm:$0xff] }
 0xd7f   :  { %v1196_v48 = vadd.f32 %v1164_v38, %v1132_v23  ;;  %v1200_v23 = vadd.f32 %v1168_v62, %v1136_v27  ;;  %v24413_v38 = vld [vmem:[%s25240_s4 + $0x38] sm:$0xff]  ;;  %v1173_v27 = vmul.f32 %v24323_v25, %v25545_v30  ;;  %v25553_v30 = vld [vmem:[#allocation45_spill] sm:$0xff] }
 0xd80   :  { %v25546_v62 = vld [vmem:[#allocation46_spill] sm:$0xff] }
 0xd82   :  { %20077 = vmatpush3.bf16.xpose.msk.msra.mxu0 %vm22047_vm12, %v25528_v54  ;;  %20089 = vmatpush3.bf16.xpose.msk.msra.mxu1 %vm22047_vm12, %v25527_v31  ;;  %v24392_v31 = vld [vmem:[%s25240_s4 + $0x30] sm:$0xff] }
 0xd83   :  { %20080 = vmatprep.subr.msk.bf16.mxu0 %vm22047_vm12, %v25529_v58  ;;  %20092 = vmatprep.subr.msk.bf16.mxu1 %vm22047_vm12, %v25530_v5  ;;  %v1137_v45 = vmul.f32 %v24392_v31, %v20709_v61  ;;  %v24398_v54 = vld [vmem:[%s25239_s5 + $0x30] sm:$0xff] }
 0xd8a   :  { %20083 = vmatpush3.bf16.xpose.msk.msra.mxu0 %vm22047_vm12, %v25529_v58  ;;  %20095 = vmatpush3.bf16.xpose.msk.msra.mxu1 %vm22047_vm12, %v25530_v5  ;;  %v25539_v58 = vld [vmem:[#allocation39_spill] sm:$0xff] }
 0xd8b   :  { %20098 = vmatprep.subr.msk.bf16.mxu1 %vm22047_vm12, %v25532_v3  ;;  %20110 = vmatprep.subr.msk.bf16.mxu0 %vm22047_vm12, %v25533_v4  ;;  %v1169_v5 = vmul.f32 %v24398_v54, %v25539_v58 }
 0xd8d   :  { %v1201_v50 = vadd.f32 %v1169_v5, %v1137_v45  ;;  %v25547_v45 = vld [vmem:[#allocation43_spill] sm:$0xff] }
 0xd8e   :  { %v1174_v58 = vmul.f32 %v24339_v7, %v25547_v45 }
 0xd91   :  { %18925 = vmatmul.mubr.msk.f32.vlgmr.msra.gmra.mrb[188].mxu0 %vm314_vm0, %v1196_v48  ;;  %v1147_v48 = vmul.f32 %v20715_v12, %v24249_v51  ;;  %v25549_v12 = vld [vmem:[#allocation16_spill] sm:$0xff] }
 0xd92   :  { %18927 = vmatprep.mubr.msk.f32.mxu0 %vm314_vm0, %v1197_v39  ;;  %20101 = vmatpush3.bf16.xpose.msk.msra.mxu1 %vm22047_vm12, %v25532_v3  ;;  %v1138_v3 = vmul.f32 %v24413_v38, %v20712_v1  ;;  %v1140_v39 = vmul.f32 %v20716_v22, %v24295_v35  ;;  %v25548_v1 = vld [vmem:[#allocation25_spill] sm:$0xff] }
 0xd93   :  { %20113 = vmatpush3.bf16.xpose.msk.msra.mxu0 %vm22047_vm12, %v25533_v4  ;;  %20104 = vmatprep.subr.msk.bf16.mxu1 %vm22047_vm12, %v25538_v63  ;;  %v24419_v4 = vld [vmem:[%s25239_s5 + $0x38] sm:$0xff]  ;;  %v1211_v16 = vadd.f32 %v1179_v18, %v1147_v48  ;;  %v1176_v48 = vmul.f32 %v24376_v6, %v25549_v12 }
 0xd94   :  { %20116 = vmatprep.subr.msk.bf16.mxu0 %vm22047_vm12, %v25540_v15  ;;  %v1170_v13 = vmul.f32 %v24419_v4, %v25541_v34  ;;  %v20726_v12 = vld [vmem:[%s25238_s0 + $0x98] sm:$0xff] }
 0xd95   :  { %18928 = vmatmul.mubr.msk.f32.gmra.mrb[190].mxu0 %vm314_vm0, %v1198_v59  ;;  %v1141_v59 = vmul.f32 %v20717_v2, %v24317_v11  ;;  %v20722_v2 = vld [vmem:[%s25238_s0 + $0x78] sm:$0xff] }
 0xd96   :  { %18930 = vmatprep.mubr.msk.f32.mxu0 %vm314_vm0, %v1199_v42  ;;  %v1202_v20 = vadd.f32 %v1170_v13, %v1138_v3  ;;  %v20718_v42 = vld [vmem:[%s25238_s0 + $0x58] sm:$0xff]  ;;  %v1175_v3 = vmul.f32 %v24355_v60, %v25548_v1  ;;  %v20720_v13 = vld [vmem:[%s25238_s0 + $0x68] sm:$0xff]  ;;  %v20725_v1 = vld [vmem:[%s25238_s0 + $0x90] sm:$0xff] }
 0xd97   :  { %v1142_v61 = vmul.f32 %v20718_v42, %v24333_v0  ;;  %v1205_v5 = vadd.f32 %v1173_v27, %v1141_v59  ;;  %v1146_v59 = vmul.f32 %v20722_v2, %v24413_v38  ;;  %v1178_v27 = vmul.f32 %v24419_v4, %v25553_v30  ;;  %v25554_v42 = vld [vmem:[#allocation51_spill] sm:$0xff]  ;;  %v20728_v2 = vld [vmem:[%s25238_s0 + $0xa8] sm:$0xff]  ;;  %v25560_v30 = vld [vmem:[#allocation10_spill] sm:$0xff] }
 0xd99   :  { %18931 = vmatmul.mubr.msk.f32.gmra.mrb[192].mxu0 %vm314_vm0, %v1200_v23  ;;  %v1206_v34 = vadd.f32 %v1174_v58, %v1142_v61  ;;  %v1187_v61 = vmul.f32 %v24255_v9, %v25554_v42  ;;  %v1210_v45 = vadd.f32 %v1178_v27, %v1146_v59  ;;  %v25555_v58 = vld [vmem:[#allocation15_spill] sm:$0xff]  ;;  %v1152_v59 = vmul.f32 %v20728_v2, %v24370_v33  ;;  %v25562_v42 = vld [vmem:[#allocation13_spill] sm:$0xff] }
 0xd9a   :  { %18933 = vmatprep.mubr.msk.f32.mxu0 %vm314_vm0, %v1201_v50  ;;  %20107 = vmatpush3.bf16.xpose.msk.msra.mxu1 %vm22047_vm12, %v25538_v63  ;;  %v1204_v63 = vadd.f32 %v1172_v43, %v1140_v39  ;;  %v1144_v50 = vmul.f32 %v20720_v13, %v24370_v33  ;;  %v25551_v39 = vld [vmem:[#allocation9_spill] sm:$0xff]  ;;  %v25552_v43 = vld [vmem:[#allocation12_spill] sm:$0xff]  ;;  %v1184_v27 = vmul.f32 %v24376_v6, %v25560_v30 }
 0xd9b   :  { %20119 = vmatpush3.bf16.xpose.msk.msra.mxu0 %vm22047_vm12, %v25540_v15  ;;  %20134 = vmatprep.subr.msk.bf16.mxu1 %vm22047_vm12, %v25544_v36  ;;  %v20719_v15 = vld [vmem:[%s25238_s0 + $0x60] sm:$0xff]  ;;  %v1177_v19 = vmul.f32 %v24398_v54, %v25551_v39  ;;  %v25570_v30 = vld [vmem:[#allocation17_spill] sm:$0xff] }
 0xd9c   :  { %20122 = vmatprep.subr.msk.bf16.mxu0 %vm22047_vm12, %v25546_v62  ;;  %v1143_v23 = vmul.f32 %v20719_v15, %v24349_v29 }
 0xd9d   :  { %18934 = vmatmul.mubr.msk.f32.gmra.mrb[194].mxu0 %vm314_vm0, %v1202_v20  ;;  %v20721_v20 = vld [vmem:[%s25238_s0 + $0x70] sm:$0xff] }
 0xd9e   :  { %18980 = vmatprep.mubr.msk.f32.mxu0 %vm314_vm0, %v1211_v16  ;;  %v1207_v18 = vadd.f32 %v1175_v3, %v1143_v23  ;;  %v1145_v22 = vmul.f32 %v20721_v20, %v24392_v31  ;;  %v1149_v3 = vmul.f32 %v20725_v1, %v24317_v11  ;;  %v25564_v1 = vld [vmem:[#allocation50_spill] sm:$0xff] }
 0xda0   :  { %v1209_v16 = vadd.f32 %v1177_v19, %v1145_v22  ;;  %v20727_v22 = vld [vmem:[%s25238_s0 + $0xa0] sm:$0xff]  ;;  %v25559_v19 = vld [vmem:[#allocation18_spill] sm:$0xff] }
 0xda1   :  { %18953 = vmatmul.mubr.msk.f32.vlgmr.msra.gmra.mrb[188].mxu1 %vm314_vm0, %v1204_v63  ;;  %v1151_v39 = vmul.f32 %v20727_v22, %v24349_v29 }
 0xda2   :  { %18955 = vmatprep.mubr.msk.f32.mxu1 %vm314_vm0, %v1205_v5  ;;  %20137 = vmatpush3.bf16.xpose.msk.msra.mxu1 %vm22047_vm12, %v25544_v36  ;;  %v1208_v36 = vadd.f32 %v1176_v48, %v1144_v50  ;;  %v25556_v5 = vld [vmem:[#allocation8_spill] sm:$0xff]  ;;  %v1150_v48 = vmul.f32 %v20726_v12, %v24333_v0 }
 0xda3   :  { %20125 = vmatpush3.bf16.xpose.msk.msra.mxu0 %vm22047_vm12, %v25546_v62  ;;  %20140 = vmatprep.subr.msk.bf16.mxu1 %vm22047_vm12, %v25550_v21  ;;  %v20723_v62 = vld [vmem:[%s25238_s0 + $0xc0] sm:$0xff]  ;;  %v1180_v15 = vmul.f32 %v24301_v17, %v25556_v5 }
 0xda4   :  { %20128 = vmatprep.subr.msk.bf16.mxu0 %vm22047_vm12, %v25552_v43  ;;  %v1155_v63 = vmul.f32 %v20723_v62, %v24249_v51  ;;  %v20724_v51 = vld [vmem:[%s25238_s0 + $0x88] sm:$0xff] }
 0xda5   :  { %18956 = vmatmul.mubr.msk.f32.gmra.mrb[190].mxu1 %vm314_vm0, %v1206_v34  ;;  %v1148_v9 = vmul.f32 %v20724_v51, %v24295_v35  ;;  %v25557_v34 = vld [vmem:[#allocation11_spill] sm:$0xff] }
 0xda6   :  { %18958 = vmatprep.mubr.msk.f32.mxu1 %vm314_vm0, %v1207_v18  ;;  %v1219_v23 = vadd.f32 %v1187_v61, %v1155_v63  ;;  %v1181_v13 = vmul.f32 %v24323_v25, %v25557_v34  ;;  %v1185_v61 = vmul.f32 %v24398_v54, %v25562_v42 }
 0xda7   :  { %v1212_v50 = vadd.f32 %v1180_v15, %v1148_v9  ;;  %v25563_v9 = vld [vmem:[#allocation49_spill] sm:$0xff] }
 0xda8   :  { %v1213_v20 = vadd.f32 %v1181_v13, %v1149_v3  ;;  %v1186_v5 = vmul.f32 %v24419_v4, %v25563_v9  ;;  %v1188_v3 = vmul.f32 %v24301_v17, %v25564_v1  ;;  %v20732_v13 = vld [vmem:[%s25238_s0 + $0xd0] sm:$0xff]  ;;  %v20733_v17 = vld [vmem:[%s25238_s0 + $0xd8] sm:$0xff] }
 0xda9   :  { %18959 = vmatmul.mubr.msk.f32.gmra.mrb[192].mxu1 %vm314_vm0, %v1208_v36  ;;  %v1157_v49 = vmul.f32 %v20732_v13, %v24317_v11  ;;  %v20734_v11 = vld [vmem:[%s25238_s0 + $0xe0] sm:$0xff] }
 0xdaa   :  { %18961 = vmatprep.mubr.msk.f32.mxu1 %vm314_vm0, %v1209_v16  ;;  %20143 = vmatpush3.bf16.xpose.msk.msra.mxu1 %vm22047_vm12, %v25550_v21  ;;  %v25558_v21 = vld [vmem:[#allocation48_spill] sm:$0xff]  ;;  %v25561_v16 = vld [vmem:[#allocation14_spill] sm:$0xff] }
 0xdab   :  { %20131 = vmatpush3.bf16.xpose.msk.msra.mxu0 %vm22047_vm12, %v25552_v43  ;;  %20146 = vmatprep.subr.msk.bf16.mxu1 %vm22047_vm12, %v25555_v58  ;;  %v1182_v18 = vmul.f32 %v24339_v7, %v25558_v21  ;;  %v1183_v43 = vmul.f32 %v24355_v60, %v25559_v19  ;;  %v25568_v19 = vld [vmem:[#allocation55_spill] sm:$0xff] }
 0xdac   :  { %20157 = vmatprep.subr.bf16.mxu0 %v23860_v44 }
 0xdad   :  { %18962 = vmatmul.mubr.msk.f32.gmra.mrb[194].mxu1 %vm314_vm0, %v1210_v45  ;;  %v1214_v36 = vadd.f32 %v1182_v18, %v1150_v48  ;;  %v1215_v62 = vadd.f32 %v1183_v43, %v1151_v39  ;;  %v1216_v45 = vadd.f32 %v1184_v27, %v1152_v59  ;;  %v25566_v48 = vld [vmem:[#allocation53_spill] sm:$0xff]  ;;  %v1192_v43 = vmul.f32 %v24376_v6, %v25568_v19  ;;  %v20737_v6 = vld [vmem:[%s25238_s0 + $0xf8] sm:$0xff] }
 0xdae   :  { %19008 = vmatprep.mubr.msk.f32.mxu1 %vm314_vm0, %v1219_v23  ;;  %v1190_v21 = vmul.f32 %v24339_v7, %v25566_v48  ;;  %v20735_v7 = vld [vmem:[%s25238_s0 + $0xe8] sm:$0xff]  ;;  %v1162_v59 = vmul.f32 %v20737_v6, %v24413_v38  ;;  %v1194_v27 = vmul.f32 %v24419_v4, %v25570_v30 }
 0xdaf   :  { %v1160_v39 = vmul.f32 %v20735_v7, %v24370_v33 }
 0xdb1   :  { %v1224_v33 = vadd.f32 %v1192_v43, %v1160_v39 }
 0xdb2   :  { %18981 = vmatmul.mubr.msk.f32.vlgmr.msra.gmra.mrb[196].mxu0 %vm314_vm0, %v1212_v50  ;;  %20149 = vmatpush3.bf16.xpose.msk.msra.mxu1 %vm22047_vm12, %v25555_v58  ;;  %v20730_v58 = vld [vmem:[%s25238_s0 + $0xb8] sm:$0xff] }
 0xdb3   :  { %18983 = vmatprep.mubr.msk.f32.mxu0 %vm314_vm0, %v1213_v20  ;;  %20159 = vmatpush3.bf16.msra.mxu0 %v23860_v44  ;;  %v20729_v44 = vld [vmem:[%s25238_s0 + $0xb0] sm:$0xff]  ;;  %v1154_v51 = vmul.f32 %v20730_v58, %v24413_v38  ;;  %v25565_v50 = vld [vmem:[#allocation54_spill] sm:$0xff]  ;;  %v25567_v20 = vld [vmem:[#allocation56_spill] sm:$0xff] }
 0xdb4   :  { %20152 = vmatprep.subr.msk.bf16.mxu1 %vm22047_vm12, %v25561_v16  ;;  %20161 = vmatprep.subr.bf16.mxu0 %v23996_v14  ;;  %v1153_v63 = vmul.f32 %v20729_v44, %v24392_v31  ;;  %v1189_v12 = vmul.f32 %v24323_v25, %v25565_v50  ;;  %v1159_v25 = vmul.f32 %v20734_v11, %v24349_v29 }
 0xdb5   :  { %v1218_v34 = vadd.f32 %v1186_v5, %v1154_v51  ;;  %v1191_v22 = vmul.f32 %v24355_v60, %v25567_v20  ;;  %v20736_v60 = vld [vmem:[%s25238_s0 + $0xf0] sm:$0xff] }
 0xdb6   :  { %18984 = vmatmul.mubr.msk.f32.gmra.mrb[198].mxu0 %vm314_vm0, %v1214_v36  ;;  %v1217_v15 = vadd.f32 %v1185_v61, %v1153_v63  ;;  %v1221_v18 = vadd.f32 %v1189_v12, %v1157_v49  ;;  %v1161_v36 = vmul.f32 %v20736_v60, %v24392_v31 }
 0xdb7   :  { %18986 = vmatprep.mubr.msk.f32.mxu0 %vm314_vm0, %v1215_v62  ;;  %20163 = vmatpush3.bf16.msra.mxu0 %v23996_v14  ;;  %v20731_v14 = vld [vmem:[%s25238_s0 + $0xc8] sm:$0xff]  ;;  %v1223_v29 = vadd.f32 %v1191_v22, %v1159_v25 }
 0xdb8   :  { %20165 = vmatprep.subr.bf16.mxu0 %v24127_v46  ;;  %v1156_v23 = vmul.f32 %v20731_v14, %v24295_v35 }
 0xdba   :  { %18987 = vmatmul.mubr.msk.f32.gmra.mrb[200].mxu0 %vm314_vm0, %v1216_v45  ;;  %20155 = vmatpush3.bf16.xpose.msk.msra.mxu1 %vm22047_vm12, %v25561_v16  ;;  %v1220_v35 = vadd.f32 %v1188_v3, %v1156_v23  ;;  %vm14513_vm12 = vcmp.ge.s32.totalorder %v25496_v57, %v25494_v37 }
 0xdbb   :  { %18989 = vmatprep.mubr.msk.f32.mxu0 %vm314_vm0, %v1217_v15  ;;  %20167 = vmatpush3.bf16.msra.mxu0 %v24127_v46  ;;  %v1158_v46 = vmul.f32 %v20733_v17, %v24333_v0  ;;  %v25571_v15 = vld [vmem:[#allocation4_spill] sm:$0xff] }
 0xdbc   :  { %20173 = vmatprep.subr.bf16.mxu1 %v23880_v32  ;;  %vm14511_vm10 = vcmp.ge.s32.totalorder %v25571_v15, %v25494_v37 }
 0xdbd   :  { %v1222_v0 = vadd.f32 %v1190_v21, %v1158_v46 }
 0xdbe   :  { %18990 = vmatmul.mubr.msk.f32.gmra.mrb[202].mxu0 %vm314_vm0, %v1218_v34 }
 0xdc1   :  { %19009 = vmatmul.mubr.msk.f32.vlgmr.msra.gmra.mrb[196].mxu1 %vm314_vm0, %v1220_v35 }
 0xdc2   :  { %19011 = vmatprep.mubr.msk.f32.mxu1 %vm314_vm0, %v1221_v18  ;;  %20175 = vmatpush3.bf16.msra.mxu1 %v23880_v32  ;;  %v25569_v32 = vld [vmem:[#allocation57_spill] sm:$0xff] }
 0xdc3   :  { %20177 = vmatprep.subr.bf16.mxu1 %v24020_v47  ;;  %v1193_v2 = vmul.f32 %v24398_v54, %v25569_v32 }
 0xdc5   :  { %19012 = vmatmul.mubr.msk.f32.gmra.mrb[198].mxu1 %vm314_vm0, %v1222_v0  ;;  %v1225_v31 = vadd.f32 %v1193_v2, %v1161_v36 }
 0xdc6   :  { %19014 = vmatprep.mubr.msk.f32.mxu1 %vm314_vm0, %v1223_v29  ;;  %20179 = vmatpush3.bf16.msra.mxu1 %v24020_v47  ;;  %v1226_v47 = vadd.f32 %v1194_v27, %v1162_v59 }
 0xdc7   :  { %20181 = vmatprep.subr.bf16.mxu1 %v24151_v53 }
 0xdc9   :  { %19015 = vmatmul.mubr.msk.f32.gmra.mrb[200].mxu1 %vm314_vm0, %v1224_v33 }
 0xdca   :  { %19017 = vmatprep.mubr.msk.f32.mxu1 %vm314_vm0, %v1225_v31  ;;  %20183 = vmatpush3.bf16.msra.mxu1 %v24151_v53 }
 0xdcd   :  { %19018 = vmatmul.mubr.msk.f32.gmra.mrb[202].mxu1 %vm314_vm0, %v1226_v47 }
 0xe1e   :  { %v18886_v54 = vpop.f32.mrb[184].mxu0 }
 0xe1f   :  { %13955 = vst.msk [vmem:[#allocation2 + $0x38] sm:$0xff] %vm314_vm0, %v18886_v54  ;;  %v13702_v16 = vpop.f32.mrb[185].mxu0 }
 0xe20   :  { %13954 = vst.msk [vmem:[#allocation2 + $0x30] sm:$0xff] %vm314_vm0, %v13702_v16 }
 0xe26   :  { %v14861_v38 = vld [vmem:[#allocation2 + $0x38] sm:$0xff] }
 0xe27   :  { %v14860_v4 = vld [vmem:[#allocation2 + $0x30] sm:$0xff] }
 0xe28   :  { %v20168_v62 = vpack.c.bf16 %v14861_v38, %v14860_v4 }
 0xe2a   :  { %20169 = vmatprep.subr.bf16.mxu0 %v20168_v62 }
 0xe2b   :  { %20171 = vmatpush3.bf16.msra.mxu0 %v20168_v62 }
 0xe2c   :  { %20189 = vmatprep.subr.bf16.mxu0 %v23901_v8 }
 0xe2e   :  { %v18893_v44 = vpop.f32.mrb[184].mxu1 }
 0xe2f   :  { %13957 = vst.msk [vmem:[#allocation2 + $0x78] sm:$0xff] %vm314_vm0, %v18893_v44  ;;  %v13783_v53 = vpop.f32.mrb[185].mxu1 }
 0xe30   :  { %13956 = vst.msk [vmem:[#allocation2 + $0x70] sm:$0xff] %vm314_vm0, %v13783_v53 }
 0xe36   :  { %v14869_v63 = vld [vmem:[#allocation2 + $0x78] sm:$0xff] }
 0xe37   :  { %v14868_v42 = vld [vmem:[#allocation2 + $0x70] sm:$0xff] }
 0xe38   :  { %v20184_v61 = vpack.c.bf16 %v14869_v63, %v14868_v42 }
 0xe3a   :  { %20185 = vmatprep.subr.bf16.mxu1 %v20184_v61 }
 0xe3b   :  { %20187 = vmatpush3.bf16.msra.mxu1 %v20184_v61 }
 0xe3c   :  { %20205 = vmatprep.subr.bf16.mxu1 %v23918_v56 }
 0xe3f   :  { %v18900_v45 = vpop.f32.mrb[186].mxu0 }
 0xe40   :  { %13959 = vst.msk [vmem:[#allocation2 + $0xb8] sm:$0xff] %vm314_vm0, %v18900_v45  ;;  %v13864_v58 = vpop.f32.mrb[187].mxu0 }
 0xe41   :  { %13958 = vst.msk [vmem:[#allocation2 + $0xb0] sm:$0xff] %vm314_vm0, %v13864_v58 }
 0xe4f   :  { %v18907_v51 = vpop.f32.mrb[186].mxu1 }
 0xe50   :  { %13961 = vst.msk [vmem:[#allocation2 + $0xf8] sm:$0xff] %vm314_vm0, %v18907_v51  ;;  %v13945_v9 = vpop.f32.mrb[187].mxu1 }
 0xe51   :  { %13960 = vst.msk [vmem:[#allocation2 + $0xf0] sm:$0xff] %vm314_vm0, %v13945_v9 }
 0xe64   :  { %v18926_v5 = vpop.f32.mrb[188].mxu0 }
 0xe65   :  { %v14479_v14 = vmul.f32 0.17677669, %v18926_v5  ;;  %v14052_v23 = vpop.f32.mrb[189].mxu0 }
 0xe66   :  { %v14478_v1 = vmul.f32 0.17677669, %v14052_v23 }
 0xe67   :  { %v24658_v3 = vsel %vm14511_vm10, %v14479_v14, -1e+30 }
 0xe68   :  { %v18929_v34 = vpop.f32.mrb[190].mxu0  ;;  %v14569_v13 = vsel %vm11905_vm6, %v24658_v3, -inf  ;;  %v24665_v12 = vsel %vm14510_vm11, %v14478_v1, -1e+30 }
 0xe69   :  { %v14481_v49 = vmul.f32 0.17677669, %v18929_v34  ;;  %14570 = vmax.xlane.f32.xlu0 %v14569_v13  ;;  %v14062_v50 = vpop.f32.mrb[191].mxu0  ;;  %v14566_v17 = vsel %vm11905_vm6, %v24665_v12, -inf }
 0xe6a   :  { %v14480_v46 = vmul.f32 0.17677669, %v14062_v50 }
 0xe6b   :  { %v24674_v21 = vsel %vm14513_vm12, %v14481_v49, -1e+30 }
 0xe6c   :  { %v18932_v35 = vpop.f32.mrb[192].mxu0  ;;  %v14575_v11 = vsel %vm11905_vm6, %v24674_v21, -inf  ;;  %v24685_v20 = vsel %vm14512_vm13, %v14480_v46, -1e+30 }
 0xe6d   :  { %14567 = vmax.xlane.f32.xlu0 %v14566_v17  ;;  %v14072_v48 = vpop.f32.mrb[193].mxu0  ;;  %v14572_v0 = vsel %vm11905_vm6, %v24685_v20, -inf  ;;  %v14483_v14 = vmul.f32 0.17677669, %v18932_v35 }
 0xe6e   :  { %v14482_v45 = vmul.f32 0.17677669, %v14072_v48 }
 0xe6f   :  { %v24768_v46 = vsel %vm14515_vm14, %v14483_v14, -1e+30 }
 0xe70   :  { %v24678_v18 = vpop.f32.mrb[194].mxu0  ;;  %v24756_v49 = vsel %vm14514_vm15, %v14482_v45, -1e+30 }
 0xe71   :  { %14576 = vmax.xlane.f32.xlu0 %v14575_v11  ;;  %v14082_v25 = vpop.f32.mrb[195].mxu0  ;;  %v14578_v35 = vsel %vm11905_vm6, %v24756_v49, -inf }
 0xe72   :  { %v14484_v48 = vmul.f32 0.17677669, %v14082_v25 }
 0xe74   :  { %v18954_v22 = vpop.f32.mrb[188].mxu1  ;;  %v24783_v25 = vsel %vm14516_vm2, %v14484_v48, -1e+30 }
 0xe75   :  { %v14487_v7 = vmul.f32 0.17677669, %v18954_v22  ;;  %v14181_v39 = vpop.f32.mrb[189].mxu1  ;;  %14573 = vmax.xlane.f32.xlu0 %v14572_v0 }
 0xe76   :  { %v14486_v19 = vmul.f32 0.17677669, %v14181_v39  ;;  %v14581_v39 = vsel %vm11905_vm6, %v24768_v46, -inf }
 0xe77   :  { %v24692_v43 = vsel %vm14511_vm10, %v14487_v7, -1e+30 }
 0xe78   :  { %v18957_v29 = vpop.f32.mrb[190].mxu1  ;;  %v14593_v60 = vsel %vm11905_vm6, %v24692_v43, -inf  ;;  %v24699_v36 = vsel %vm14510_vm11, %v14486_v19, -1e+30  ;;  %v14485_v19 = vmul.f32 0.17677669, %v24678_v18 }
 0xe79   :  { %v14489_v32 = vmul.f32 0.17677669, %v18957_v29  ;;  %v14191_v2 = vpop.f32.mrb[191].mxu1  ;;  %14594 = vmax.xlane.f32.xlu0 %v14593_v60  ;;  %v14590_v33 = vsel %vm11905_vm6, %v24699_v36, -inf }
 0xe7a   :  { %v14488_v6 = vmul.f32 0.17677669, %v14191_v2  ;;  %14591 = vmax.xlane.f32.xlu1 %v14590_v33 }
 0xe7b   :  { %v24706_v59 = vsel %vm14513_vm12, %v14489_v32, -1e+30  ;;  %v14584_v32 = vsel %vm11905_vm6, %v24783_v25, -inf }
 0xe7c   :  { %v18960_v30 = vpop.f32.mrb[192].mxu1  ;;  %v14599_v27 = vsel %vm11905_vm6, %v24706_v59, -inf  ;;  %v24713_v31 = vsel %vm14512_vm13, %v14488_v6, -1e+30  ;;  %v24792_v6 = vsel %vm14517_vm1, %v14485_v19, -1e+30 }
 0xe7d   :  { %v14491_v47 = vmul.f32 0.17677669, %v18960_v30  ;;  %v14201_v54 = vpop.f32.mrb[193].mxu1  ;;  %v14596_v16 = vsel %vm11905_vm6, %v24713_v31, -inf }
 0xe7e   :  { %v14490_v38 = vmul.f32 0.17677669, %v14201_v54  ;;  %14600 = vmax.xlane.f32.xlu1 %v14599_v27  ;;  %14597 = vmax.xlane.f32.xlu0 %v14596_v16 }
 0xe7f   :  { %v24722_v4 = vsel %vm14515_vm14, %v14491_v47, -1e+30  ;;  %v14587_v47 = vsel %vm11905_vm6, %v24792_v6, -inf }
 0xe80   :  { %v18963_v62 = vpop.f32.mrb[194].mxu1  ;;  %v14605_v44 = vsel %vm11905_vm6, %v24722_v4, -inf  ;;  %v24731_v53 = vsel %vm14514_vm15, %v14490_v38, -1e+30 }
 0xe81   :  { %v14493_v63 = vmul.f32 0.17677669, %v18963_v62  ;;  %v14211_v42 = vpop.f32.mrb[195].mxu1  ;;  %v14602_v61 = vsel %vm11905_vm6, %v24731_v53, -inf }
 0xe82   :  { %v14492_v58 = vmul.f32 0.17677669, %v14211_v42  ;;  %14606 = vmax.xlane.f32.xlu1 %v14605_v44  ;;  %14603 = vmax.xlane.f32.xlu0 %v14602_v61 }
 0xe83   :  { %v24740_v51 = vsel %vm14517_vm1, %v14493_v63, -1e+30 }
 0xe84   :  { %v14611_v9 = vsel %vm11905_vm6, %v24740_v51, -inf  ;;  %v24749_v5 = vsel %vm14516_vm2, %v14492_v58, -1e+30 }
 0xe85   :  { %v18982_v23 = vpop.f32.mrb[196].mxu0  ;;  %v14608_v1 = vsel %vm11905_vm6, %v24749_v5, -inf }
 0xe86   :  { %v14495_v34 = vmul.f32 0.17677669, %v18982_v23  ;;  %v14310_v13 = vpop.f32.mrb[197].mxu0  ;;  %14612 = vmax.xlane.f32.xlu1 %v14611_v9  ;;  %14609 = vmax.xlane.f32.xlu0 %v14608_v1 }
 0xe87   :  { %v14494_v2 = vmul.f32 0.17677669, %v14310_v13 }
 0xe88   :  { %v24761_v50 = vsel %vm14511_vm10, %v14495_v34, -1e+30 }
 0xe89   :  { %v18985_v17 = vpop.f32.mrb[198].mxu0  ;;  %v24799_v38 = vsel %vm14510_vm11, %v14494_v2, -1e+30 }
 0xe8a   :  { %v14497_v11 = vmul.f32 0.17677669, %v18985_v17  ;;  %v14320_v22 = vpop.f32.mrb[199].mxu0  ;;  %14579 = vmax.xlane.f32.xlu0 %v14578_v35  ;;  %v14614_v45 = vsel %vm11905_vm6, %v24799_v38, -inf }
 0xe8b   :  { %v14496_v54 = vmul.f32 0.17677669, %v14320_v22 }
 0xe8c   :  { %v24773_v0 = vsel %vm14513_vm12, %v14497_v11, -1e+30 }
 0xe8d   :  { %v24775_v7 = vpop.f32.mrb[200].mxu0  ;;  %v24818_v15 = vsel %vm14512_vm13, %v14496_v54, -1e+30 }
 0xe8e   :  { %v14330_v29 = vpop.f32.mrb[201].mxu0  ;;  %14582 = vmax.xlane.f32.xlu0 %v14581_v39  ;;  %v14620_v13 = vsel %vm11905_vm6, %v24818_v15, -inf  ;;  %v14499_v28 = vmul.f32 0.17677669, %v24775_v7 }
 0xe8f   :  { %v14498_v9 = vmul.f32 0.17677669, %v14330_v29 }
 0xe91   :  { %v24785_v60 = vpop.f32.mrb[202].mxu0  ;;  %v24832_v35 = vsel %vm14514_vm15, %v14498_v9, -1e+30 }
 0xe92   :  { %v14340_v33 = vpop.f32.mrb[203].mxu0  ;;  %14585 = vmax.xlane.f32.xlu0 %v14584_v32  ;;  %v14626_v19 = vsel %vm11905_vm6, %v24832_v35, -inf  ;;  %v14501_v9 = vmul.f32 0.17677669, %v24785_v60 }
 0xe93   :  { %v14500_v17 = vmul.f32 0.17677669, %v14340_v33 }
 0xe94   :  { %v19010_v18 = vpop.f32.mrb[196].mxu1 }
 0xe95   :  { %v14503_v30 = vmul.f32 0.17677669, %v19010_v18  ;;  %v14439_v27 = vpop.f32.mrb[197].mxu1  ;;  %v24846_v29 = vsel %vm14516_vm2, %v14500_v17, -1e+30 }
 0xe96   :  { %v14502_v16 = vmul.f32 0.17677669, %v14439_v27  ;;  %14588 = vmax.xlane.f32.xlu0 %v14587_v47  ;;  %v14632_v33 = vsel %vm11905_vm6, %v24846_v29, -inf }
 0xe97   :  { %v24804_v62 = vsel %vm14511_vm10, %v14503_v30, -1e+30 }
 0xe98   :  { %v19013_v44 = vpop.f32.mrb[198].mxu1  ;;  %v14641_v63 = vsel %vm11905_vm6, %v24804_v62, -inf  ;;  %v24813_v58 = vsel %vm14510_vm11, %v14502_v16, -1e+30 }
 0xe99   :  { %v14505_v42 = vmul.f32 0.17677669, %v19013_v44  ;;  %14642 = vmax.xlane.f32.xlu1 %v14641_v63  ;;  %v14449_v61 = vpop.f32.mrb[199].mxu1  ;;  %v14638_v23 = vsel %vm11905_vm6, %v24813_v58, -inf }
 0xe9a   :  { %14615 = vmax.xlane.f32.xlu0 %v14614_v45  ;;  %v14504_v1 = vmul.f32 0.17677669, %v14449_v61  ;;  %v14623_v61 = vsel %vm11905_vm6, %v24773_v0, -inf  ;;  %v24888_v45 = vsel %vm14515_vm14, %v14499_v28, -1e+30 }
 0xe9b   :  { %v24827_v24 = vsel %vm14513_vm12, %v14505_v42, -1e+30  ;;  %v14617_v42 = vsel %vm11905_vm6, %v24761_v50, -inf }
 0xe9c   :  { %v19016_v14 = vpop.f32.mrb[200].mxu1  ;;  %v14647_v11 = vsel %vm11905_vm6, %v24827_v24, -inf  ;;  %v24841_v57 = vsel %vm14512_vm13, %v14504_v1, -1e+30 }
 0xe9d   :  { %14639 = vmax.xlane.f32.xlu1 %v14638_v23  ;;  %v14459_v34 = vpop.f32.mrb[201].mxu1  ;;  %v14507_v22 = vmul.f32 0.17677669, %v19016_v14  ;;  %v14644_v32 = vsel %vm11905_vm6, %v24841_v57, -inf  ;;  %v14629_v14 = vsel %vm11905_vm6, %v24888_v45, -inf }
 0xe9e   :  { %14621 = vmax.xlane.f32.xlu0 %v14620_v13  ;;  %v14506_v2 = vmul.f32 0.17677669, %v14459_v34  ;;  %v24896_v23 = vsel %vm14517_vm1, %v14501_v9, -1e+30 }
 0xe9f   :  { %v24855_v55 = vsel %vm14515_vm14, %v14507_v22, -1e+30  ;;  %v14635_v7 = vsel %vm11905_vm6, %v24896_v23, -inf }
 0xea0   :  { %v19019_v48 = vpop.f32.mrb[202].mxu1  ;;  %v14653_v18 = vsel %vm11905_vm6, %v24855_v55, -inf  ;;  %v24862_v27 = vsel %vm14514_vm15, %v14506_v2, -1e+30  ;;  %v14872_v2 = vld [vmem:[#allocation2 + $0x90] sm:$0xff] }
 0xea1   :  { %14648 = vmax.xlane.f32.xlu1 %v14647_v11  ;;  %v14469_v39 = vpop.f32.mrb[203].mxu1  ;;  %v14650_v47 = vsel %vm11905_vm6, %v24862_v27, -inf  ;;  %v14509_v54 = vmul.f32 0.17677669, %v19019_v48 }
 0xea2   :  { %14627 = vmax.xlane.f32.xlu0 %v14626_v19  ;;  %v14508_v30 = vmul.f32 0.17677669, %v14469_v39 }
 0xea3   :  { %v24876_v26 = vsel %vm14517_vm1, %v14509_v54, -1e+30 }
 0xea4   :  { %v24869_v16 = vsel %vm14516_vm2, %v14508_v30, -1e+30  ;;  %v14659_v63 = vsel %vm11905_vm6, %v24876_v26, -inf }
 0xea5   :  { %14645 = vmax.xlane.f32.xlu1 %v14644_v32  ;;  %v14656_v44 = vsel %vm11905_vm6, %v24869_v16, -inf }
 0xea6   :  { %14633 = vmax.xlane.f32.xlu0 %v14632_v33  ;;  %v14873_v33 = vld [vmem:[#allocation2 + $0x98] sm:$0xff] }
 0xea7   :  { %v20192_v54 = vpack.c.bf16 %v14873_v33, %v14872_v2  ;;  %v14885_v33 = vld [vmem:[#allocation2 + $0xf8] sm:$0xff] }
 0xea9   :  { %14654 = vmax.xlane.f32.xlu1 %v14653_v18 }
 0xead   :  { %14651 = vmax.xlane.f32.xlu1 %v14650_v47 }
 0xeb1   :  { %14657 = vmax.xlane.f32.xlu1 %v14656_v44 }
 0xeb5   :  { %14660 = vmax.xlane.f32.xlu1 %v14659_v63 }
 0xeb9   :  { %14618 = vmax.xlane.f32.xlu1 %v14617_v42 }
 0xebd   :  { %14624 = vmax.xlane.f32.xlu1 %v14623_v61 }
 0xec1   :  { %14630 = vmax.xlane.f32.xlu1 %v14629_v14 }
 0xec5   :  { %14636 = vmax.xlane.f32.xlu1 %v14635_v7  ;;  %v14876_v7 = vld [vmem:[#allocation2 + $0xb0] sm:$0xff] }
 0xef6   :  { %v14571_v1 = vpop.xlane.xlu0 %14570 }
 0xef7   :  { %v14663_v41 = vsub.f32 %v24658_v3, %v14571_v1  ;;  %v14877_v1 = vld [vmem:[#allocation2 + $0xb8] sm:$0xff] }
 0xef9   :  { %v14696_v13 = vmul.f32 1.442695, %v14663_v41 }
 0xefa   :  { %v14568_v34 = vpop.xlane.xlu0 %14567 }
 0xefb   :  { %v14662_v60 = vsub.f32 %v24665_v12, %v14568_v34 }
 0xefd   :  { %v14694_v17 = vmul.f32 1.442695, %v14662_v60 }
 0xefe   :  { %v14577_v48 = vpop.xlane.xlu0 %14576 }
 0xeff   :  { %20530 = vpow2.f32 %v14694_v17  ;;  %v14665_v37 = vsub.f32 %v24674_v21, %v14577_v48  ;;  %v14880_v17 = vld [vmem:[#allocation2 + $0xd0] sm:$0xff]  ;;  %v14881_v48 = vld [vmem:[#allocation2 + $0xd8] sm:$0xff] }
 0xf00   :  { %20532 = vpow2.f32 %v14696_v13 }
 0xf01   :  { %v14700_v22 = vmul.f32 1.442695, %v14665_v37 }
 0xf02   :  { %v14574_v10 = vpop.xlane.xlu0 %14573 }
 0xf03   :  { %v14664_v11 = vsub.f32 %v24685_v20, %v14574_v10 }
 0xf05   :  { %v14698_v39 = vmul.f32 1.442695, %v14664_v11 }
 0xf06   :  { %v14595_v19 = vpop.xlane.xlu0 %14594 }
 0xf07   :  { %20534 = vpow2.f32 %v14698_v39  ;;  %v14671_v32 = vsub.f32 %v24692_v43, %v14595_v19  ;;  %v14592_v3 = vpop.xlane.xlu1 %14591 }
 0xf08   :  { %20536 = vpow2.f32 %v14700_v22  ;;  %v14670_v12 = vsub.f32 %v24699_v36, %v14592_v3 }
 0xf09   :  { %v24906_v18 = vpop.eup %20530  ;;  %v14712_v30 = vmul.f32 1.442695, %v14671_v32 }
 0xf0a   :  { %v24908_v47 = vpop.eup %20532  ;;  %v14710_v21 = vmul.f32 1.442695, %v14670_v12  ;;  %19036 = vmatprep.mubr.msk.f32.mxu0 %vm11905_vm6, %v24906_v18 }
 0xf0b   :  { %v14601_v20 = vpop.xlane.xlu1 %14600  ;;  %19037 = vmatmul.mubr.msk.f32.vlgmr.msra.gmra.mrb[204].mxu0 %vm11905_vm6, %v24908_v47  ;;  %v14598_v43 = vpop.xlane.xlu0 %14597 }
 0xf0c   :  { %20538 = vpow2.f32 %v14710_v21  ;;  %v14673_v36 = vsub.f32 %v24706_v59, %v14601_v20  ;;  %20191 = vmatpush3.bf16.msra.mxu0 %v23901_v8  ;;  %v14672_v44 = vsub.f32 %v24713_v31, %v14598_v43 }
 0xf0d   :  { %20540 = vpow2.f32 %v14712_v30  ;;  %20193 = vmatprep.subr.bf16.mxu0 %v20192_v54 }
 0xf0e   :  { %v14716_v63 = vmul.f32 1.442695, %v14673_v36  ;;  %v14714_v42 = vmul.f32 1.442695, %v14672_v44 }
 0xf0f   :  { %v14607_v28 = vpop.xlane.xlu1 %14606  ;;  %v14604_v61 = vpop.xlane.xlu0 %14603 }
 0xf10   :  { %20542 = vpow2.f32 %v14716_v63  ;;  %v14675_v9 = vsub.f32 %v24722_v4, %v14607_v28  ;;  %20195 = vmatpush3.bf16.msra.mxu0 %v20192_v54  ;;  %v14674_v14 = vsub.f32 %v24731_v53, %v14604_v61  ;;  %v20200_v53 = vpack.c.bf16 %v14877_v1, %v14876_v7 }
 0xf11   :  { %v24919_v41 = vpop.eup %20534  ;;  %20544 = vpow2.f32 %v14714_v42  ;;  %20197 = vmatprep.subr.bf16.mxu0 %v24170_v52 }
 0xf12   :  { %v24922_v8 = vpop.eup %20536  ;;  %v14720_v59 = vmul.f32 1.442695, %v14675_v9  ;;  %v14718_v31 = vmul.f32 1.442695, %v14674_v14  ;;  %19039 = vmatprep.mubr.msk.f32.mxu0 %vm11905_vm6, %v24919_v41 }
 0xf13   :  { %v14613_v34 = vpop.xlane.xlu1 %14612  ;;  %19040 = vmatmul.mubr.msk.f32.gmra.mrb[206].mxu0 %vm11905_vm6, %v24922_v8  ;;  %v14610_v4 = vpop.xlane.xlu0 %14609 }
 0xf14   :  { %20546 = vpow2.f32 %v14720_v59  ;;  %v14677_v60 = vsub.f32 %v24740_v51, %v14613_v34  ;;  %20199 = vmatpush3.bf16.msra.mxu0 %v24170_v52  ;;  %v14676_v13 = vsub.f32 %v24749_v5, %v14610_v4  ;;  %v20208_v52 = vpack.c.bf16 %v14881_v48, %v14880_v17 }
 0xf15   :  { %20548 = vpow2.f32 %v14718_v31  ;;  %20201 = vmatprep.subr.bf16.mxu0 %v20200_v53 }
 0xf16   :  { %v24931_v37 = vpop.eup %20538  ;;  %v14724_v10 = vmul.f32 1.442695, %v14677_v60  ;;  %v14722_v11 = vmul.f32 1.442695, %v14676_v13 }
 0xf17   :  { %v24933_v22 = vpop.eup %20540  ;;  %v14580_v39 = vpop.xlane.xlu0 %14579  ;;  %19064 = vmatprep.mubr.msk.f32.mxu1 %vm11905_vm6, %v24931_v37 }
 0xf18   :  { %20550 = vpow2.f32 %v14724_v10  ;;  %v14666_v51 = vsub.f32 %v24756_v49, %v14580_v39  ;;  %20203 = vmatpush3.bf16.msra.mxu0 %v20200_v53  ;;  %19065 = vmatmul.mubr.msk.f32.vlgmr.msra.gmra.mrb[204].mxu1 %vm11905_vm6, %v24933_v22 }
 0xf19   :  { %20552 = vpow2.f32 %v14722_v11  ;;  %20207 = vmatpush3.bf16.msra.mxu1 %v23918_v56  ;;  %v14884_v56 = vld [vmem:[#allocation2 + $0xf0] sm:$0xff] }
 0xf1a   :  { %v24941_v5 = vpop.eup %20542  ;;  %v14702_v19 = vmul.f32 1.442695, %v14666_v51  ;;  %20209 = vmatprep.subr.bf16.mxu1 %v20208_v52  ;;  %v20216_v20 = vpack.c.bf16 %v14885_v33, %v14884_v56 }
 0xf1b   :  { %v24943_v32 = vpop.eup %20544  ;;  %v14583_v3 = vpop.xlane.xlu0 %14582 }
 0xf1c   :  { %20554 = vpow2.f32 %v14702_v19  ;;  %v14667_v12 = vsub.f32 %v24768_v46, %v14583_v3  ;;  %19067 = vmatprep.mubr.msk.f32.mxu1 %vm11905_vm6, %v24943_v32 }
 0xf1d   :  { %19068 = vmatmul.mubr.msk.f32.gmra.mrb[206].mxu1 %vm11905_vm6, %v24941_v5 }
 0xf1e   :  { %v24950_v49 = vpop.eup %20546  ;;  %v14704_v2 = vmul.f32 1.442695, %v14667_v12  ;;  %20211 = vmatpush3.bf16.msra.mxu1 %v20208_v52 }
 0xf1f   :  { %v24952_v30 = vpop.eup %20548  ;;  %20213 = vmatprep.subr.bf16.mxu1 %v24185_v40  ;;  %v14586_v21 = vpop.xlane.xlu0 %14585 }
 0xf20   :  { %20556 = vpow2.f32 %v14704_v2  ;;  %v14668_v46 = vsub.f32 %v24783_v25, %v14586_v21  ;;  %19070 = vmatprep.mubr.msk.f32.mxu1 %vm11905_vm6, %v24952_v30 }
 0xf21   :  { %19071 = vmatmul.mubr.msk.f32.gmra.mrb[208].mxu1 %vm11905_vm6, %v24950_v49 }
 0xf22   :  { %v24960_v43 = vpop.eup %20550  ;;  %v14706_v54 = vmul.f32 1.442695, %v14668_v46  ;;  %20215 = vmatpush3.bf16.msra.mxu1 %v24185_v40 }
 0xf23   :  { %v24963_v36 = vpop.eup %20552  ;;  %20217 = vmatprep.subr.bf16.mxu1 %v20216_v20  ;;  %v14589_v44 = vpop.xlane.xlu0 %14588 }
 0xf24   :  { %20558 = vpow2.f32 %v14706_v54  ;;  %v14669_v63 = vsub.f32 %v24792_v6, %v14589_v44  ;;  %19073 = vmatprep.mubr.msk.f32.mxu1 %vm11905_vm6, %v24963_v36 }
 0xf25   :  { %19074 = vmatmul.mubr.msk.f32.gmra.mrb[210].mxu1 %vm11905_vm6, %v24960_v43 }
 0xf26   :  { %v24970_v25 = vpop.eup %20554  ;;  %v14708_v42 = vmul.f32 1.442695, %v14669_v63  ;;  %20219 = vmatpush3.bf16.msra.mxu1 %v20216_v20  ;;  %v14643_v28 = vpop.xlane.xlu1 %14642 }
 0xf27   :  { %v14687_v40 = vsub.f32 %v24804_v62, %v14643_v28  ;;  %19042 = vmatprep.mubr.msk.f32.mxu0 %vm11905_vm6, %v24970_v25  ;;  %v14616_v61 = vpop.xlane.xlu0 %14615 }
 0xf28   :  { %20560 = vpow2.f32 %v14708_v42  ;;  %v14678_v6 = vsub.f32 %v24799_v38, %v14616_v61 }
 0xf29   :  { %v14744_v9 = vmul.f32 1.442695, %v14687_v40 }
 0xf2a   :  { %v24976_v14 = vpop.eup %20556  ;;  %v14726_v7 = vmul.f32 1.442695, %v14678_v6  ;;  %v14640_v1 = vpop.xlane.xlu1 %14639 }
 0xf2b   :  { %20562 = vpow2.f32 %v14744_v9  ;;  %v14686_v59 = vsub.f32 %v24813_v58, %v14640_v1  ;;  %19043 = vmatmul.mubr.msk.f32.gmra.mrb[208].mxu0 %vm11905_vm6, %v24976_v14 }
 0xf2c   :  { %20564 = vpow2.f32 %v14726_v7 }
 0xf2d   :  { %v14742_v62 = vmul.f32 1.442695, %v14686_v59 }
 0xf2e   :  { %v24981_v31 = vpop.eup %20558  ;;  %v14649_v34 = vpop.xlane.xlu1 %14648 }
 0xf2f   :  { %20566 = vpow2.f32 %v14742_v62  ;;  %v14689_v4 = vsub.f32 %v24827_v24, %v14649_v34  ;;  %19045 = vmatprep.mubr.msk.f32.mxu0 %vm11905_vm6, %v24981_v31 }
 0xf31   :  { %v14748_v38 = vmul.f32 1.442695, %v14689_v4 }
 0xf32   :  { %v24986_v53 = vpop.eup %20560  ;;  %v14646_v60 = vpop.xlane.xlu1 %14645 }
 0xf33   :  { %20568 = vpow2.f32 %v14748_v38  ;;  %v14688_v58 = vsub.f32 %v24841_v57, %v14646_v60  ;;  %19046 = vmatmul.mubr.msk.f32.gmra.mrb[210].mxu0 %vm11905_vm6, %v24986_v53  ;;  %v14622_v57 = vpop.xlane.xlu0 %14621 }
 0xf34   :  { %v14680_v20 = vsub.f32 %v24818_v15, %v14622_v57 }
 0xf35   :  { %v20563_v13 = vpop.eup %20562  ;;  %v14746_v17 = vmul.f32 1.442695, %v14688_v58 }
 0xf36   :  { %v24991_v48 = vpop.eup %20564  ;;  %v14655_v10 = vpop.xlane.xlu1 %14654  ;;  %v14833_v24 = vsel %vm11905_vm6, %v20563_v13, 0.0  ;;  %v14730_v28 = vmul.f32 1.442695, %v14680_v20  ;;  %v14788_v20 = vsel %vm11905_vm6, %v24943_v32, 0.0  ;;  %v14797_v32 = vsel %vm11905_vm6, %v24950_v49, 0.0 }
 0xf37   :  { %20570 = vpow2.f32 %v14746_v17  ;;  %v14691_v11 = vsub.f32 %v24855_v55, %v14655_v10  ;;  %19092 = vmatprep.mubr.msk.f32.mxu0 %vm11905_vm6, %v24991_v48  ;;  %14834 = vadd.xlane.f32.xlu1 %v14833_v24  ;;  %v14628_v21 = vpop.xlane.xlu0 %14627  ;;  %v14806_v10 = vsel %vm11905_vm6, %v24991_v48, 0.0  ;;  %v14770_v49 = vsel %vm11905_vm6, %v24970_v25, 0.0  ;;  %v15471_v25 = vld [vmem:[%s25242_s6 + $0x28] sm:$0xff] }
 0xf39   :  { %v20567_v39 = vpop.eup %20566  ;;  %v14752_v51 = vmul.f32 1.442695, %v14691_v11 }
 0xf3a   :  { %v14652_v52 = vpop.xlane.xlu1 %14651  ;;  %19120 = vmatprep.mubr.msk.f32.mxu1 %vm11905_vm6, %v20567_v39  ;;  %v14830_v19 = vsel %vm11905_vm6, %v20567_v39, 0.0 }
 0xf3b   :  { %20572 = vpow2.f32 %v14752_v51  ;;  %v14690_v3 = vsub.f32 %v24862_v27, %v14652_v52  ;;  %14831 = vadd.xlane.f32.xlu0 %v14830_v19  ;;  %19121 = vmatmul.mubr.msk.f32.vlgmr.msra.gmra.mrb[212].mxu1 %vm11905_vm6, %v20563_v13  ;;  %v14634_v61 = vpop.xlane.xlu0 %14633 }
 0xf3d   :  { %v20569_v12 = vpop.eup %20568  ;;  %v14750_v55 = vmul.f32 1.442695, %v14690_v3 }
 0xf3e   :  { %v14658_v2 = vpop.xlane.xlu1 %14657  ;;  %v14839_v56 = vsel %vm11905_vm6, %v20569_v12, 0.0 }
 0xf3f   :  { %20574 = vpow2.f32 %v14750_v55  ;;  %v14692_v33 = vsub.f32 %v24869_v16, %v14658_v2  ;;  %14840 = vadd.xlane.f32.xlu1 %v14839_v56  ;;  %v14682_v16 = vsub.f32 %v24832_v35, %v14628_v21  ;;  %v14782_v21 = vsel %vm11905_vm6, %v24931_v37, 0.0 }
 0xf40   :  { %v14800_v37 = vsel %vm11905_vm6, %v24963_v36, 0.0  ;;  %v14761_v36 = vsel %vm11905_vm6, %v24908_v47, 0.0  ;;  %v15470_v47 = vld [vmem:[%s25242_s6 + $0x20] sm:$0xff] }
 0xf41   :  { %v20571_v46 = vpop.eup %20570  ;;  %v14754_v54 = vmul.f32 1.442695, %v14692_v33  ;;  %v14734_v1 = vmul.f32 1.442695, %v14682_v16 }
 0xf42   :  { %19123 = vmatprep.mubr.msk.f32.mxu1 %vm11905_vm6, %v20571_v46  ;;  %v14661_v27 = vpop.xlane.xlu1 %14660  ;;  %v14836_v44 = vsel %vm11905_vm6, %v20571_v46, 0.0 }
 0xf43   :  { %20576 = vpow2.f32 %v14754_v54  ;;  %v14693_v63 = vsub.f32 %v24876_v26, %v14661_v27  ;;  %14837 = vadd.xlane.f32.xlu0 %v14836_v44  ;;  %19124 = vmatmul.mubr.msk.f32.gmra.mrb[214].mxu1 %vm11905_vm6, %v20569_v12  ;;  %v14684_v26 = vsub.f32 %v24846_v29, %v14634_v61  ;;  %v14785_v54 = vsel %vm11905_vm6, %v24933_v22, 0.0 }
 0xf44   :  { %v14794_v27 = vsel %vm11905_vm6, %v24952_v30, 0.0  ;;  %v14791_v44 = vsel %vm11905_vm6, %v24941_v5, 0.0  ;;  %v14758_v22 = vsel %vm11905_vm6, %v24906_v18, 0.0  ;;  %v14803_v30 = vsel %vm11905_vm6, %v24960_v43, 0.0 }
 0xf45   :  { %v20573_v42 = vpop.eup %20572  ;;  %v14756_v40 = vmul.f32 1.442695, %v14693_v63  ;;  %v14764_v5 = vsel %vm11905_vm6, %v24919_v41, 0.0  ;;  %v14767_v18 = vsel %vm11905_vm6, %v24922_v8, 0.0  ;;  %v14776_v43 = vsel %vm11905_vm6, %v24981_v31, 0.0  ;;  %v15472_v8 = vld [vmem:[%s25242_s6 + $0x30] sm:$0xff] }
 0xf46   :  { %v14619_v6 = vpop.xlane.xlu1 %14618  ;;  %v14845_v15 = vsel %vm11905_vm6, %v20573_v42, 0.0  ;;  %v14773_v41 = vsel %vm11905_vm6, %v24976_v14, 0.0  ;;  %v14779_v31 = vsel %vm11905_vm6, %v24986_v53, 0.0  ;;  %v20220_v63 = vpack.c.bf16 %v15471_v25, %v15470_v47  ;;  %v15473_v14 = vld [vmem:[%s25242_s6 + $0x38] sm:$0xff]  ;;  %v15467_v53 = vld [vmem:[%s25242_s6 + $0x8] sm:$0xff] }
 0xf47   :  { %20578 = vpow2.f32 %v14756_v40  ;;  %v14679_v9 = vsub.f32 %v24761_v50, %v14619_v6  ;;  %14846 = vadd.xlane.f32.xlu1 %v14845_v15  ;;  %v14738_v50 = vmul.f32 1.442695, %v14684_v26 }
 0xf48   :  { %20580 = vpow2.f32 %v14730_v28  ;;  %20221 = vmatprep.subr.bf16.mxu0 %v20220_v63  ;;  %20237 = vmatprep.subr.bf16.mxu1 %v20220_v63  ;;  %v15466_v28 = vld [vmem:[%s25242_s6] sm:$0xff] }
 0xf49   :  { %v20575_v7 = vpop.eup %20574  ;;  %v14728_v59 = vmul.f32 1.442695, %v14679_v9  ;;  %20239 = vmatpush3.bf16.msra.mxu1 %v20220_v63  ;;  %v25088_v16 = vpack.c.bf16 %v15467_v53, %v15466_v28 }
 0xf4a   :  { %19126 = vmatprep.mubr.msk.f32.mxu1 %vm11905_vm6, %v20575_v7  ;;  %v14625_v62 = vpop.xlane.xlu1 %14624  ;;  %v14842_v35 = vsel %vm11905_vm6, %v20575_v7, 0.0 }
 0xf4b   :  { %20582 = vpow2.f32 %v14728_v59  ;;  %v14681_v34 = vsub.f32 %v24773_v0, %v14625_v62  ;;  %14843 = vadd.xlane.f32.xlu0 %v14842_v35  ;;  %19127 = vmatmul.mubr.msk.f32.gmra.mrb[216].mxu1 %vm11905_vm6, %v20573_v42  ;;  %v20224_v42 = vpack.c.bf16 %v15473_v14, %v15472_v8 }
 0xf4c   :  { %20584 = vpow2.f32 %v14734_v1 }
 0xf4d   :  { %v20577_v4 = vpop.eup %20576  ;;  %v14732_v38 = vmul.f32 1.442695, %v14681_v34  ;;  %20241 = vmatprep.subr.bf16.mxu1 %v20224_v42 }
 0xf4e   :  { %19129 = vmatprep.mubr.msk.f32.mxu1 %vm11905_vm6, %v20577_v4  ;;  %v14631_v60 = vpop.xlane.xlu1 %14630  ;;  %v14848_v29 = vsel %vm11905_vm6, %v20577_v4, 0.0  ;;  %20243 = vmatpush3.bf16.msra.mxu1 %v20224_v42 }
 0xf4f   :  { %20586 = vpow2.f32 %v14732_v38  ;;  %v14683_v58 = vsub.f32 %v24888_v45, %v14631_v60  ;;  %14849 = vadd.xlane.f32.xlu0 %v14848_v29  ;;  %20245 = vmatprep.subr.bf16.mxu1 %v25088_v16 }
 0xf50   :  { %20588 = vpow2.f32 %v14738_v50 }
 0xf51   :  { %v20579_v13 = vpop.eup %20578  ;;  %v14736_v17 = vmul.f32 1.442695, %v14683_v58 }
 0xf52   :  { %19130 = vmatmul.mubr.msk.f32.gmra.mrb[218].mxu1 %vm11905_vm6, %v20579_v13  ;;  %v14637_v0 = vpop.xlane.xlu1 %14636  ;;  %v14851_v24 = vsel %vm11905_vm6, %v20579_v13, 0.0  ;;  %v20581_v11 = vpop.eup %20580 }
 0xf53   :  { %20590 = vpow2.f32 %v14736_v17  ;;  %v14685_v39 = vsub.f32 %v24896_v23, %v14637_v0  ;;  %14807 = vadd.xlane.f32.xlu0 %v14806_v10  ;;  %14852 = vadd.xlane.f32.xlu1 %v14851_v24  ;;  %v14812_v57 = vsel %vm11905_vm6, %v20581_v11, 0.0 }
 0xf55   :  { %v20583_v51 = vpop.eup %20582  ;;  %v14740_v45 = vmul.f32 1.442695, %v14685_v39 }
 0xf56   :  { %19093 = vmatmul.mubr.msk.f32.vlgmr.msra.gmra.mrb[212].mxu0 %vm11905_vm6, %v20583_v51  ;;  %v14809_v52 = vsel %vm11905_vm6, %v20583_v51, 0.0  ;;  %v20585_v19 = vpop.eup %20584 }
 0xf57   :  { %20592 = vpow2.f32 %v14740_v45  ;;  %14813 = vadd.xlane.f32.xlu0 %v14812_v57  ;;  %19095 = vmatprep.mubr.msk.f32.mxu0 %vm11905_vm6, %v20581_v11  ;;  %v14818_v23 = vsel %vm11905_vm6, %v20585_v19, 0.0 }
 0xf58   :  { %14810 = vadd.xlane.f32.xlu1 %v14809_v52  ;;  %20223 = vmatpush3.bf16.msra.mxu0 %v20220_v63 }
 0xf59   :  { %v20587_v48 = vpop.eup %20586  ;;  %20225 = vmatprep.subr.bf16.mxu0 %v20224_v42 }
 0xf5a   :  { %19096 = vmatmul.mubr.msk.f32.gmra.mrb[214].mxu0 %vm11905_vm6, %v20587_v48  ;;  %v14815_v3 = vsel %vm11905_vm6, %v20587_v48, 0.0  ;;  %v20589_v12 = vpop.eup %20588 }
 0xf5b   :  { %14819 = vadd.xlane.f32.xlu0 %v14818_v23  ;;  %19098 = vmatprep.mubr.msk.f32.mxu0 %vm11905_vm6, %v20585_v19  ;;  %v14824_v2 = vsel %vm11905_vm6, %v20589_v12, 0.0 }
 0xf5c   :  { %14816 = vadd.xlane.f32.xlu1 %v14815_v3  ;;  %20227 = vmatpush3.bf16.msra.mxu0 %v20224_v42 }
 0xf5d   :  { %v20591_v55 = vpop.eup %20590  ;;  %20229 = vmatprep.subr.bf16.mxu0 %v25088_v16 }
 0xf5e   :  { %19099 = vmatmul.mubr.msk.f32.gmra.mrb[216].mxu0 %vm11905_vm6, %v20591_v55  ;;  %v14821_v56 = vsel %vm11905_vm6, %v20591_v55, 0.0 }
 0xf5f   :  { %14825 = vadd.xlane.f32.xlu0 %v14824_v2  ;;  %19101 = vmatprep.mubr.msk.f32.mxu0 %vm11905_vm6, %v20589_v12 }
 0xf60   :  { %14822 = vadd.xlane.f32.xlu1 %v14821_v56 }
 0xf61   :  { %v20593_v33 = vpop.eup %20592 }
 0xf62   :  { %19102 = vmatmul.mubr.msk.f32.gmra.mrb[218].mxu0 %vm11905_vm6, %v20593_v33  ;;  %v14827_v46 = vsel %vm11905_vm6, %v20593_v33, 0.0 }
 0xf63   :  { %14783 = vadd.xlane.f32.xlu0 %v14782_v21  ;;  %v15468_v21 = vld [vmem:[%s25242_s6 + $0x10] sm:$0xff] }
 0xf64   :  { %14828 = vadd.xlane.f32.xlu1 %v14827_v46  ;;  %v15469_v46 = vld [vmem:[%s25242_s6 + $0x18] sm:$0xff]  ;;  %s20741_s6 = smov 64  }
 0xf67   :  { %14789 = vadd.xlane.f32.xlu0 %v14788_v20 }
 0xf68   :  { %14786 = vadd.xlane.f32.xlu1 %v14785_v54 }
 0xf6b   :  { %14795 = vadd.xlane.f32.xlu0 %v14794_v27 }
 0xf6c   :  { %14792 = vadd.xlane.f32.xlu1 %v14791_v44 }
 0xf6f   :  { %14801 = vadd.xlane.f32.xlu0 %v14800_v37 }
 0xf70   :  { %14798 = vadd.xlane.f32.xlu1 %v14797_v32 }
 0xf73   :  { %14759 = vadd.xlane.f32.xlu0 %v14758_v22 }
 0xf74   :  { %14804 = vadd.xlane.f32.xlu1 %v14803_v30  ;;  %v25141_v30 = vpack.c.bf16 %v15469_v46, %v15468_v21 }
 0xf77   :  { %14765 = vadd.xlane.f32.xlu0 %v14764_v5 }
 0xf78   :  { %14762 = vadd.xlane.f32.xlu1 %v14761_v36 }
 0xf7b   :  { %14771 = vadd.xlane.f32.xlu0 %v14770_v49 }
 0xf7c   :  { %14768 = vadd.xlane.f32.xlu1 %v14767_v18 }
 0xf7f   :  { %14777 = vadd.xlane.f32.xlu0 %v14776_v43 }
 0xf80   :  { %14774 = vadd.xlane.f32.xlu1 %v14773_v41 }
 0xf84   :  { %14780 = vadd.xlane.f32.xlu1 %v14779_v31 }
 0xfc4   :  { %v14835_v61 = vpop.xlane.xlu1 %14834 }
 0xfc8   :  { %v14832_v40 = vpop.xlane.xlu0 %14831 }
 0xfcc   :  { %v25094_v15 = vpop.xlane.xlu1 %14840 }
 0xfd0   :  { %v25092_v6 = vpop.xlane.xlu0 %14837 }
 0xfd4   :  { %v25098_v7 = vpop.xlane.xlu1 %14846 }
 0xfd8   :  { %v25096_v9 = vpop.xlane.xlu0 %14843 }
 0xfdc   :  { %v25100_v1 = vpop.xlane.xlu0 %14849 }
 0xfde   :  { %v25102_v26 = vpop.f32.mrb[204].mxu0 }
 0xfdf   :  { %v25104_v59 = vpop.f32.mrb[205].mxu0 }
 0xfe0   :  { %v25106_v62 = vpop.xlane.xlu0 %14807  ;;  %v25108_v35 = vpop.xlane.xlu1 %14852 }
 0xfe4   :  { %v25110_v34 = vpop.xlane.xlu0 %14813 }
 0xfe5   :  { %v25112_v4 = vpop.xlane.xlu1 %14810 }
 0xfe6   :  { %v25114_v50 = vpop.f32.mrb[206].mxu0 }
 0xfe7   :  { %v25116_v38 = vpop.f32.mrb[207].mxu0 }
 0xfe8   :  { %v25118_v60 = vpop.xlane.xlu0 %14819 }
 0xfe9   :  { %v25120_v29 = vpop.xlane.xlu1 %14816 }
 0xfeb   :  { %v19066_v58 = vpop.f32.mrb[204].mxu1 }
 0xfec   :  { %v15105_v13 = vpop.f32.mrb[205].mxu1  ;;  %v25122_v17 = vpop.xlane.xlu0 %14825 }
 0xfed   :  { %v25124_v0 = vpop.xlane.xlu1 %14822 }
 0xff0   :  { %v19069_v10 = vpop.f32.mrb[206].mxu1  ;;  %v14784_v24 = vpop.xlane.xlu0 %14783 }
 0xff1   :  { %v15115_v11 = vpop.f32.mrb[207].mxu1  ;;  %20594 = vrcp.f32 %v14784_v24  ;;  %v25126_v39 = vpop.xlane.xlu1 %14828 }
 0xff4   :  { %v19072_v51 = vpop.f32.mrb[208].mxu1  ;;  %v14790_v45 = vpop.xlane.xlu0 %14789 }
 0xff5   :  { %v15125_v57 = vpop.f32.mrb[209].mxu1  ;;  %20596 = vrcp.f32 %v14790_v45  ;;  %v14787_v52 = vpop.xlane.xlu1 %14786 }
 0xff6   :  { %20598 = vrcp.f32 %v14787_v52 }
 0xff8   :  { %v25128_v19 = vpop.f32.mrb[210].mxu1  ;;  %v14796_v48 = vpop.xlane.xlu0 %14795 }
 0xff9   :  { %v15135_v23 = vpop.f32.mrb[211].mxu1  ;;  %20600 = vrcp.f32 %v14796_v48  ;;  %v14793_v3 = vpop.xlane.xlu1 %14792 }
 0xffa   :  { %20602 = vrcp.f32 %v14793_v3 }
 0xffb   :  { %v20595_v12 = vpop.eup %20594 }
 0xffc   :  { %v14802_v55 = vpop.xlane.xlu0 %14801  ;;  %v15442_v2 = vmul.f32 %v20595_v12, %v15105_v13 }
 0xffd   :  { %20604 = vrcp.f32 %v14802_v55  ;;  %v14799_v56 = vpop.xlane.xlu1 %14798 }
 0xffe   :  { %20606 = vrcp.f32 %v14799_v56  ;;  %v25130_v33 = vpop.f32.mrb[208].mxu0  ;;  %19140 = vmatprep.mubr.msk.f32.mxu0 %vm314_vm0, %v15442_v2 }
 0xfff   :  { %v20597_v20 = vpop.eup %20596  ;;  %v25139_v54 = vpop.f32.mrb[209].mxu0 }
0x1000   :  { %v20599_v27 = vpop.eup %20598  ;;  %v14760_v44 = vpop.xlane.xlu0 %14759  ;;  %v15444_v37 = vmul.f32 %v20597_v20, %v15115_v11 }
0x1001   :  { %v15443_v32 = vmul.f32 %v20599_v27, %v19066_v58  ;;  %20608 = vrcp.f32 %v14760_v44  ;;  %v14805_v22 = vpop.xlane.xlu1 %14804 }
0x1002   :  { %20610 = vrcp.f32 %v14805_v22 }
0x1003   :  { %v20601_v5 = vpop.eup %20600  ;;  %20612 = vrcp.f32 %v14835_v61  ;;  %19141 = vmatmul.mubr.msk.f32.vlgmr.msra.gmra.mrb[220].mxu0 %vm314_vm0, %v15443_v32 }
0x1004   :  { %v20603_v36 = vpop.eup %20602  ;;  %20614 = vrcp.f32 %v14832_v40  ;;  %19143 = vmatprep.mubr.msk.f32.mxu0 %vm314_vm0, %v15444_v37  ;;  %v14766_v49 = vpop.xlane.xlu0 %14765  ;;  %v15446_v18 = vmul.f32 %v20601_v5, %v15125_v57  ;;  %20231 = vmatpush3.bf16.msra.mxu0 %v25088_v16 }
0x1005   :  { %20616 = vrcp.f32 %v14766_v49  ;;  %v14763_v43 = vpop.xlane.xlu1 %14762  ;;  %v15445_v41 = vmul.f32 %v20603_v36, %v19069_v10  ;;  %20233 = vmatprep.subr.bf16.mxu0 %v25141_v30 }
0x1006   :  { %20618 = vrcp.f32 %v14763_v43  ;;  %v25147_v47 = vpop.f32.mrb[210].mxu0 }
0x1007   :  { %v20605_v25 = vpop.eup %20604  ;;  %19144 = vmatmul.mubr.msk.f32.gmra.mrb[222].mxu0 %vm314_vm0, %v15445_v41  ;;  %v15006_v8 = vpop.f32.mrb[211].mxu0 }
0x1008   :  { %v20607_v31 = vpop.eup %20606  ;;  %19146 = vmatprep.mubr.msk.f32.mxu0 %vm314_vm0, %v15446_v18  ;;  %v14772_v63 = vpop.xlane.xlu0 %14771  ;;  %v15448_v14 = vmul.f32 %v20605_v25, %v15135_v23  ;;  %20235 = vmatpush3.bf16.msra.mxu0 %v25141_v30 }
0x1009   :  { %20620 = vrcp.f32 %v14772_v63  ;;  %v14769_v42 = vpop.xlane.xlu1 %14768  ;;  %v15447_v28 = vmul.f32 %v20607_v31, %v19072_v51 }
0x100a   :  { %20622 = vrcp.f32 %v14769_v42 }
0x100b   :  { %v20609_v53 = vpop.eup %20608  ;;  %20624 = vrcp.f32 %v25094_v15  ;;  %19147 = vmatmul.mubr.msk.f32.gmra.mrb[224].mxu0 %vm314_vm0, %v15447_v28 }
0x100c   :  { %v20611_v40 = vpop.eup %20610  ;;  %20626 = vrcp.f32 %v25092_v6  ;;  %19149 = vmatprep.mubr.msk.f32.mxu0 %vm314_vm0, %v15448_v14  ;;  %v14778_v61 = vpop.xlane.xlu0 %14777  ;;  %v15434_v58 = vmul.f32 %v20609_v53, %v25104_v59 }
0x100d   :  { %v20613_v13 = vpop.eup %20612  ;;  %20628 = vrcp.f32 %v14778_v61  ;;  %v14775_v10 = vpop.xlane.xlu1 %14774  ;;  %v15449_v24 = vmul.f32 %v20611_v40, %v25128_v19 }
0x100e   :  { %v20615_v11 = vpop.eup %20614  ;;  %20630 = vrcp.f32 %v14775_v10  ;;  %v19122_v51 = vpop.f32.mrb[212].mxu1 }
0x100f   :  { %v20617_v45 = vpop.eup %20616  ;;  %19150 = vmatmul.mubr.msk.f32.gmra.mrb[226].mxu0 %vm314_vm0, %v15449_v24  ;;  %v15363_v15 = vpop.f32.mrb[213].mxu1  ;;  %v15459_v48 = vmul.f32 %v20613_v13, %v19122_v51 }
0x1010   :  { %v20619_v57 = vpop.eup %20618  ;;  %v15458_v52 = vmul.f32 %v20615_v11, %v15363_v15  ;;  %19160 = vmatprep.mubr.msk.f32.mxu0 %vm314_vm0, %v15434_v58  ;;  %v15436_v6 = vmul.f32 %v20617_v45, %v25116_v38 }
0x1011   :  { %v15435_v59 = vmul.f32 %v20619_v57, %v25102_v26  ;;  %v14781_v23 = vpop.xlane.xlu1 %14780 }
0x1012   :  { %20632 = vrcp.f32 %v14781_v23  ;;  %19180 = vmatprep.mubr.msk.f32.mxu1 %vm314_vm0, %v15458_v52 }
0x1013   :  { %v20621_v19 = vpop.eup %20620  ;;  %19161 = vmatmul.mubr.msk.f32.vlgmr.msra.gmra.mrb[220].mxu0 %vm314_vm0, %v15435_v59  ;;  %19181 = vmatmul.mubr.msk.f32.vlgmr.msra.gmra.mrb[220].mxu1 %vm314_vm0, %v15459_v48  ;;  %20634 = vrcp.f32 %v25096_v9 }
0x1014   :  { %v20623_v3 = vpop.eup %20622  ;;  %19163 = vmatprep.mubr.msk.f32.mxu0 %vm314_vm0, %v15436_v6  ;;  %v15438_v12 = vmul.f32 %v20621_v19, %v25139_v54  ;;  %20247 = vmatpush3.bf16.msra.mxu1 %v25088_v16  ;;  %20636 = vrcp.f32 %v25098_v7 }
0x1015   :  { %v20625_v38 = vpop.eup %20624  ;;  %v15437_v26 = vmul.f32 %v20623_v3, %v25114_v50  ;;  %20249 = vmatprep.subr.bf16.mxu1 %v25141_v30  ;;  %20638 = vrcp.f32 %v25100_v1 }
0x1016   :  { %v20627_v55 = vpop.eup %20626  ;;  %v19125_v2 = vpop.f32.mrb[214].mxu1  ;;  %20640 = vrcp.f32 %v25108_v35 }
0x1017   :  { %v20629_v56 = vpop.eup %20628  ;;  %19164 = vmatmul.mubr.msk.f32.gmra.mrb[222].mxu0 %vm314_vm0, %v15437_v26  ;;  %v15373_v21 = vpop.f32.mrb[215].mxu1  ;;  %v15461_v9 = vmul.f32 %v20625_v38, %v19125_v2  ;;  %20642 = vrcp.f32 %v25106_v62 }
0x1018   :  { %v20631_v46 = vpop.eup %20630  ;;  %v15460_v20 = vmul.f32 %v20627_v55, %v15373_v21  ;;  %19166 = vmatprep.mubr.msk.f32.mxu0 %vm314_vm0, %v15438_v12  ;;  %v15440_v16 = vmul.f32 %v20629_v56, %v15006_v8  ;;  %20251 = vmatpush3.bf16.msra.mxu1 %v25141_v30  ;;  %20644 = vrcp.f32 %v25112_v4 }
0x1019   :  { %v15439_v50 = vmul.f32 %v20631_v46, %v25130_v33  ;;  %20646 = vrcp.f32 %v25110_v34 }
0x101a   :  { %19183 = vmatprep.mubr.msk.f32.mxu1 %vm314_vm0, %v15460_v20  ;;  %20648 = vrcp.f32 %v25120_v29 }
0x101b   :  { %19167 = vmatmul.mubr.msk.f32.gmra.mrb[224].mxu0 %vm314_vm0, %v15439_v50  ;;  %19184 = vmatmul.mubr.msk.f32.gmra.mrb[222].mxu1 %vm314_vm0, %v15461_v9  ;;  %20650 = vrcp.f32 %v25118_v60 }
0x101c   :  { %v20633_v7 = vpop.eup %20632  ;;  %19169 = vmatprep.mubr.msk.f32.mxu0 %vm314_vm0, %v15440_v16  ;;  %20652 = vrcp.f32 %v25124_v0 }
0x101d   :  { %v15441_v54 = vmul.f32 %v20633_v7, %v25147_v47  ;;  %v20635_v44 = vpop.eup %20634  ;;  %20654 = vrcp.f32 %v25122_v17 }
0x101e   :  { %v19128_v27 = vpop.f32.mrb[216].mxu1  ;;  %v20637_v37 = vpop.eup %20636  ;;  %20656 = vrcp.f32 %v25126_v39 }
0x101f   :  { %19170 = vmatmul.mubr.msk.f32.gmra.mrb[226].mxu0 %vm314_vm0, %v15441_v54  ;;  %v15383_v33 = vpop.f32.mrb[217].mxu1  ;;  %v15463_v22 = vmul.f32 %v20637_v37, %v19128_v27  ;;  %v20639_v35 = vpop.eup %20638 }
0x1020   :  { %v15462_v32 = vmul.f32 %v20635_v44, %v15383_v33  ;;  %v20641_v5 = vpop.eup %20640 }
0x1021   :  { %v20643_v49 = vpop.eup %20642 }
0x1022   :  { %19186 = vmatprep.mubr.msk.f32.mxu1 %vm314_vm0, %v15462_v32  ;;  %v20645_v34 = vpop.eup %20644 }
0x1023   :  { %19187 = vmatmul.mubr.msk.f32.gmra.mrb[224].mxu1 %vm314_vm0, %v15463_v22  ;;  %v20647_v60 = vpop.eup %20646 }
0x1024   :  { %v20649_v0 = vpop.eup %20648 }
0x1025   :  { %v19131_v1 = vpop.f32.mrb[218].mxu1  ;;  %v20651_v63 = vpop.eup %20650 }
0x1026   :  { %v15393_v30 = vpop.f32.mrb[219].mxu1  ;;  %v15465_v62 = vmul.f32 %v20641_v5, %v19131_v1  ;;  %v20653_v17 = vpop.eup %20652 }
0x1027   :  { %v15464_v36 = vmul.f32 %v20639_v35, %v15393_v30  ;;  %v20655_v53 = vpop.eup %20654 }
0x1028   :  { %v20657_v61 = vpop.eup %20656 }
0x1029   :  { %v19094_v4 = vpop.f32.mrb[212].mxu0  ;;  %19189 = vmatprep.mubr.msk.f32.mxu1 %vm314_vm0, %v15464_v36 }
0x102a   :  { %v15234_v18 = vpop.f32.mrb[213].mxu0  ;;  %19190 = vmatmul.mubr.msk.f32.gmra.mrb[226].mxu1 %vm314_vm0, %v15465_v62  ;;  %v15451_v29 = vmul.f32 %v20645_v34, %v19094_v4 }
0x102b   :  { %v15450_v43 = vmul.f32 %v20643_v49, %v15234_v18 }
0x102d   :  { %v19097_v41 = vpop.f32.mrb[214].mxu0  ;;  %19200 = vmatprep.mubr.msk.f32.mxu1 %vm314_vm0, %v15450_v43 }
0x102e   :  { %v15244_v47 = vpop.f32.mrb[215].mxu0  ;;  %19201 = vmatmul.mubr.msk.f32.vlgmr.msra.gmra.mrb[220].mxu1 %vm314_vm0, %v15451_v29  ;;  %v15453_v8 = vmul.f32 %v20649_v0, %v19097_v41 }
0x102f   :  { %v15452_v25 = vmul.f32 %v20647_v60, %v15244_v47 }
0x1031   :  { %v19100_v31 = vpop.f32.mrb[216].mxu0  ;;  %19203 = vmatprep.mubr.msk.f32.mxu1 %vm314_vm0, %v15452_v25 }
0x1032   :  { %v15254_v14 = vpop.f32.mrb[217].mxu0  ;;  %19204 = vmatmul.mubr.msk.f32.gmra.mrb[222].mxu1 %vm314_vm0, %v15453_v8  ;;  %v15455_v39 = vmul.f32 %v20653_v17, %v19100_v31 }
0x1033   :  { %v15454_v42 = vmul.f32 %v20651_v63, %v15254_v14 }
0x1035   :  { %v19103_v28 = vpop.f32.mrb[218].mxu0  ;;  %19206 = vmatprep.mubr.msk.f32.mxu1 %vm314_vm0, %v15454_v42 }
0x1036   :  { %v15264_v40 = vpop.f32.mrb[219].mxu0  ;;  %19207 = vmatmul.mubr.msk.f32.gmra.mrb[224].mxu1 %vm314_vm0, %v15455_v39  ;;  %v15457_v13 = vmul.f32 %v20657_v61, %v19103_v28 }
0x1037   :  { %v15456_v58 = vmul.f32 %v20655_v53, %v15264_v40 }
0x1039   :  { %19209 = vmatprep.mubr.msk.f32.mxu1 %vm314_vm0, %v15456_v58 }
0x103a   :  { %19210 = vmatmul.mubr.msk.f32.gmra.mrb[226].mxu1 %vm314_vm0, %v15457_v13 }
0x10e6   :  { %v19162_v10 = vpop.f32.mrb[220].mxu0 }
0x10e7   :  { %v15693_v24 = vpop.f32.mrb[221].mxu0 }
0x10ea   :  { %v19165_v11 = vpop.f32.mrb[222].mxu0 }
0x10eb   :  { %v15703_v51 = vpop.f32.mrb[223].mxu0 }
0x10ee   :  { %v19168_v45 = vpop.f32.mrb[224].mxu0 }
0x10ef   :  { %v15713_v15 = vpop.f32.mrb[225].mxu0 }
0x10f2   :  { %v19171_v57 = vpop.f32.mrb[226].mxu0 }
0x10f3   :  { %v15723_v52 = vpop.f32.mrb[227].mxu0 }
0x1101   :  { %v19202_v6 = vpop.f32.mrb[220].mxu1 }
0x1102   :  { %16000 = vrot.lane.b32.xlu1 %v19202_v6, %s20741_s6  ;;  %v15951_v59 = vpop.f32.mrb[221].mxu1 }
0x1103   :  { %15998 = vrot.lane.b32.xlu0 %v15951_v59, %s20741_s6 }
0x1105   :  { %v19205_v48 = vpop.f32.mrb[222].mxu1 }
0x1106   :  { %v15961_v23 = vpop.f32.mrb[223].mxu1 }
0x1107   :  { %16004 = vrot.lane.b32.xlu0 %v19205_v48, %s20741_s6  ;;  %16002 = vrot.lane.b32.xlu1 %v15961_v23, %s20741_s6 }
0x1109   :  { %v19208_v19 = vpop.f32.mrb[224].mxu1 }
0x110a   :  { %v15971_v3 = vpop.f32.mrb[225].mxu1 }
0x110b   :  { %16008 = vrot.lane.b32.xlu0 %v19208_v19, %s20741_s6  ;;  %16006 = vrot.lane.b32.xlu1 %v15971_v3, %s20741_s6 }
0x110d   :  { %v19211_v12 = vpop.f32.mrb[226].mxu1 }
0x110e   :  { %v15981_v38 = vpop.f32.mrb[227].mxu1 }
0x110f   :  { %16012 = vrot.lane.b32.xlu0 %v19211_v12, %s20741_s6  ;;  %16010 = vrot.lane.b32.xlu1 %v15981_v38, %s20741_s6 }
0x1174   :  { %v16001_v26 = vpop.permute.xlu1 %16000 }
0x1175   :  { %v16023_v55 = vsel %vm11905_vm6, %v19162_v10, %v16001_v26  ;;  %v15999_v2 = vpop.permute.xlu0 %15998 }
0x1176   :  { %16031 = vst [vmem:[%s25243_s7 + $0x8] sm:$0xff] %v16023_v55  ;;  %v16022_v56 = vsel %vm11905_vm6, %v15693_v24, %v15999_v2 }
0x1177   :  { %16030 = vst [vmem:[%s25243_s7] sm:$0xff] %v16022_v56 }
0x1179   :  { %v16005_v21 = vpop.permute.xlu0 %16004  ;;  %v16003_v46 = vpop.permute.xlu1 %16002 }
0x117a   :  { %v16025_v20 = vsel %vm11905_vm6, %v19165_v11, %v16005_v21  ;;  %v16024_v16 = vsel %vm11905_vm6, %v15703_v51, %v16003_v46 }
0x117b   :  { %16033 = vst [vmem:[%s25243_s7 + $0x18] sm:$0xff] %v16025_v20  ;;  %16032 = vst [vmem:[%s25243_s7 + $0x10] sm:$0xff] %v16024_v16 }
0x117d   :  { %v16009_v9 = vpop.permute.xlu0 %16008  ;;  %v16007_v50 = vpop.permute.xlu1 %16006 }
0x117e   :  { %v16027_v7 = vsel %vm11905_vm6, %v19168_v45, %v16009_v9  ;;  %v16026_v54 = vsel %vm11905_vm6, %v15713_v15, %v16007_v50 }
0x117f   :  { %16035 = vst [vmem:[%s25243_s7 + $0x28] sm:$0xff] %v16027_v7  ;;  %16034 = vst [vmem:[%s25243_s7 + $0x20] sm:$0xff] %v16026_v54 }
0x1181   :  { %v16013_v27 = vpop.permute.xlu0 %16012  ;;  %v16011_v44 = vpop.permute.xlu1 %16010 }
0x1182   :  { %v16029_v33 = vsel %vm11905_vm6, %v19171_v57, %v16013_v27  ;;  %v16028_v37 = vsel %vm11905_vm6, %v15723_v52, %v16011_v44 }
0x1183   :  { %16037 = vst [vmem:[%s25243_s7 + $0x38] sm:$0xff] %v16029_v33  ;;  %16036 = vst [vmem:[%s25243_s7 + $0x30] sm:$0xff] %v16028_v37 }

</bundles_post_ra>
